<compile_context>
chip_gen: v5e
topology: v5e:2x2
jax: 0.10.0
libtpu: 0.0.40
codegen_flags: <defaults>
</compile_context>

<pallas_src>
import functools

import jax
import jax.numpy as jnp
from jax.experimental import pallas as pl
from jax.experimental.pallas import tpu as pltpu


def _round_up(v, m):
    return (v + m - 1) // m * m


def _ddrsa_kernel(x_ref, w_ih_ref, w_hh_ref, w_head_ref, b_long_ref,
                  w_att_x_ref, b_att_ref, w_cs_ih_ref, w_cs_rec_ref,
                  w_cs_out_ref, b_cs_out_ref,
                  long_out_ref, out_ref,
                  h_all_ref,
                  *, T, D, H, K, HD, HDp, use_sigmoid):
    f32 = jnp.float32
    bf16 = jnp.bfloat16
    bt = x_ref.shape[-1]            # batch tile, sits on the 128-lane axis

    b_long = b_long_ref[...]        # (D, 1)  f32
    w_att_x = w_att_x_ref[...]      # (D, 1)  f32
    b_att = b_att_ref[...]          # (1, 1)  f32
    b_cs_out = b_cs_out_ref[...]    # (1, 1)  f32

    def lstm_gates(pre, c, n):
        # PyTorch gate order i, f, g, o; feature-major -> gate slices are
        # sublane slices at multiples of 8 (n is 32 or HDp=40). f32 math.
        gi = jax.nn.sigmoid(pre[0 * n:1 * n])
        gf = jax.nn.sigmoid(pre[1 * n:2 * n])
        gg = jnp.tanh(pre[2 * n:3 * n])
        go = jax.nn.sigmoid(pre[3 * n:4 * n])
        c_new = gf * c + gi * gg
        h_new = go * jnp.tanh(c_new)
        return h_new, c_new

    # ---------------- pass 1: embedding LSTM over time ----------------
    h = jnp.zeros((H, bt), f32)
    c = jnp.zeros((H, bt), f32)
    count = jnp.zeros((1, bt), jnp.int32)       # number of non-zero (observed) steps
    att_rows = []                               # attention logits (hidden part), registers
    for t in range(T):                          # T small & static -> unrolled
        xt = x_ref[t]                           # (D, bt) f32
        observed = jnp.sum(jnp.abs(xt), axis=0, keepdims=True) != 0.0
        count = count + observed.astype(jnp.int32)
        pre = (jnp.dot(w_ih_ref[...], xt.astype(bf16), preferred_element_type=f32) +
               jnp.dot(w_hh_ref[...], h.astype(bf16), preferred_element_type=f32))  # (4H, bt)
        h, c = lstm_gates(pre, c, H)
        h_all_ref[t] = h                        # (H, bt) dense store into scratch
        # fused longitudinal + attention head: ONE (D+1, H) @ (H, bt) matmul
        heads_t = jnp.dot(w_head_ref[...], h.astype(bf16), preferred_element_type=f32)
        long_out_ref[t] = heads_t[:D] + b_long  # lane-dense (D, bt) store
        att_rows.append(heads_t[D:D + 1])       # (1, bt), stays in registers

    last_obs = count - 1                        # (1, bt) index of last observation

    # x_last = x[b, last_obs[b]] (reference convention); tiles are already in VMEM.
    x_last = jnp.zeros((D, bt), f32)
    for t in range(T):
        x_last = x_last + jnp.where(last_obs == t, x_ref[t], 0.0)

    # ---------------- masked softmax attention over T ----------------
    att_x = jnp.sum(w_att_x * x_last, axis=0, keepdims=True) + b_att       # (1, bt)
    att = jnp.concatenate(att_rows, axis=0) + att_x                        # (T, bt)
    t_idx = jax.lax.broadcasted_iota(jnp.int32, (T, 1), 0)
    att = jnp.where(t_idx >= last_obs, -10000000000.0, att)                # mask t >= last_obs
    m = jnp.max(att, axis=0, keepdims=True)
    e = jnp.exp(att - m)
    wgt = e / jnp.sum(e, axis=0, keepdims=True)                            # (T, bt) softmax

    acc = jnp.zeros((H, bt), f32)
    for t in range(T):
        acc = acc + wgt[t:t + 1] * h_all_ref[t]
    # last_obs > 0 -> softmax-weighted sum; last_obs == 0 -> reference sets attention
    # to 0; last_obs < 0 (all-zero row) -> hidden states are exactly 0 anyway.
    hidden_att = jnp.where(last_obs >= 1, acc, 0.0)                        # (H, bt)

    # ---------------- cause-specific LSTMCell rollout (K steps) ----------------
    # state0 = concat([hidden_att, x_last]) padded to HDp rows, built in registers.
    pieces = [hidden_att, x_last]
    if HDp > HD:
        pieces.append(jnp.zeros((HDp - HD, bt), f32))
    state0 = jnp.concatenate(pieces, axis=0)                               # (HDp, bt)

    # loop-invariant input projection, hoisted out of the K loop
    inp_pre = jnp.dot(w_cs_ih_ref[...], state0.astype(bf16),
                      preferred_element_type=f32)                          # (4*HDp, bt)

    hcs = state0
    ccs = state0          # reference passes (hidden_attentive, hidden_attentive) as (h0, c0)
    logit_rows = []
    for k in range(K):
        # fused recurrence: rows [:4*HDp] = W_hh_cs contribution, last row = w_cs_out
        rec = jnp.dot(w_cs_rec_ref[...], hcs.astype(bf16),
                      preferred_element_type=f32)                          # (4*HDp + 1, bt)
        if k > 0:
            logit_rows.append(rec[4 * HDp:4 * HDp + 1])                    # logit of step k-1
        pre = inp_pre + rec[:4 * HDp]
        hcs, ccs = lstm_gates(pre, ccs, HDp)
    # last step's logit needs one extra tiny matmul
    logit_rows.append(jnp.dot(w_cs_out_ref[...], hcs.astype(bf16),
                              preferred_element_type=f32))                 # (1, bt)

    logits = jnp.concatenate(logit_rows, axis=0) + b_cs_out                # (K, bt)
    vals = jax.nn.sigmoid(logits) if use_sigmoid else logits

    # final softmax over the K concatenated outcomes (risks == 1), single dense store
    m2 = jnp.max(vals, axis=0, keepdims=True)
    e2 = jnp.exp(vals - m2)
    out_ref[...] = e2 / jnp.sum(e2, axis=0, keepdims=True)


def ddrsa_forward(x, params, *, output_dim, risks=1, use_sigmoid=True, block_b=128):
    """x: (B, T, input_dim) float32, batch-first like the PyTorch module."""
    assert risks == 1  # TODO(synk): risks > 1 needs per-risk cause-specific weights.
    B, T, D = x.shape
    H = params["w_hh"].shape[1]
    HD = H + D
    HDp = _round_up(HD, 8)          # pad cause-specific width so gate slices are tile-aligned
    K = output_dim
    f32 = jnp.float32
    bf16 = jnp.bfloat16

    # Batch tile on lanes: multiple of 128 so every vector op is lane-dense.
    bt = _round_up(min(block_b, max(B, 1)), 128)
    Bp = _round_up(B, bt)

    x_tdb = jnp.transpose(x.astype(f32), (1, 2, 0))          # (T, D, B) feature-major
    if Bp != B:
        x_tdb = jnp.pad(x_tdb, ((0, 0), (0, 0), (0, Bp - B)))  # zero columns are inert

    # ---- host-side weight prep: (out, in) layouts, bf16 matmul operands ----
    w_ih = params["w_ih"].astype(bf16)                        # (4H, D)
    w_hh = params["w_hh"].astype(bf16)                        # (4H, H)
    w_att = params["w_att"]                                   # (1, HD): [hidden | x] columns
    w_head = jnp.concatenate([params["w_long"], w_att[:, :H]], axis=0).astype(bf16)  # (D+1, H)
    w_att_x = w_att[:, H:].reshape(D, 1).astype(f32)          # (D, 1)
    b_long = params["b_long"].reshape(D, 1).astype(f32)
    b_att = params["b_att"].reshape(1, 1).astype(f32)
    b_cs_out = params["b_cs_out"].reshape(1, 1).astype(f32)

    def _pad_gates(w):    # (4*HD, HD) -> (4*HDp, HDp), each gate padded with zeros
        wp = jnp.zeros((4 * HDp, HDp), f32)
        for g in range(4):
            wp = wp.at[g * HDp:g * HDp + HD, :HD].set(w[g * HD:(g + 1) * HD, :])
        return wp

    w_cs_ih_p = _pad_gates(params["w_cs_ih"]).astype(bf16)                 # (4*HDp, HDp)
    w_cs_out_p = jnp.zeros((1, HDp), f32).at[:, :HD].set(params["w_cs_out"])
    # fused recurrence matrix: [W_hh_cs (padded) ; w_cs_out]  -> (4*HDp + 1, HDp)
    w_cs_rec = jnp.concatenate([_pad_gates(params["w_cs_hh"]), w_cs_out_p],
                               axis=0).astype(bf16)
    w_cs_out_b = w_cs_out_p.astype(bf16)                                   # (1, HDp)

    kernel = functools.partial(_ddrsa_kernel, T=T, D=D, H=H, K=K, HD=HD, HDp=HDp,
                               use_sigmoid=use_sigmoid)

    def _full(w):  # whole-array block, VMEM-resident across all batch tiles
        return pl.BlockSpec(w.shape, lambda i, _nd=w.ndim: (0,) * _nd)

    grid = (Bp // bt,)
    long_tdb, outcomes_kb = pl.pallas_call(
        kernel,
        out_shape=(jax.ShapeDtypeStruct((T, D, Bp), f32),
                   jax.ShapeDtypeStruct((K, Bp), f32)),
        grid=grid,
        in_specs=[pl.BlockSpec((T, D, bt), lambda i: (0, 0, i)),
                  _full(w_ih), _full(w_hh), _full(w_head), _full(b_long),
                  _full(w_att_x), _full(b_att), _full(w_cs_ih_p),
                  _full(w_cs_rec), _full(w_cs_out_b), _full(b_cs_out)],
        out_specs=(pl.BlockSpec((T, D, bt), lambda i: (0, 0, i)),
                   pl.BlockSpec((K, bt), lambda i: (0, i))),
        scratch_shapes=[pltpu.VMEM((T, H, bt), f32)],   # per-step hidden states
        compiler_params=pltpu.CompilerParams(
            dimension_semantics=("parallel",)),          # batch tiles split across TCs
    )(x_tdb, w_ih, w_hh, w_head, b_long, w_att_x, b_att,
      w_cs_ih_p, w_cs_rec, w_cs_out_b, b_cs_out)

    longitudinal_prediction = jnp.transpose(long_tdb, (2, 0, 1))[:B]   # (B, T, D)
    outcomes = jnp.transpose(outcomes_kb, (1, 0))[:B]                  # (B, K)
    return longitudinal_prediction, [outcomes[:, i * K:(i + 1) * K] for i in range(risks)]


def init_params(key, input_dim, hidden_rnn):
    # PyTorch-native layouts: LSTM weights (4*out, in) with gate order i,f,g,o,
    # Linear weights (out, in).
    D, H = input_dim, hidden_rnn
    HD = H + D
    ks = jax.random.split(key, 10)
    s = 0.1
    f32 = jnp.float32
    return dict(
        w_ih=jax.random.normal(ks[0], (4 * H, D), f32) * s,      # embedding LSTM (bias=False)
        w_hh=jax.random.normal(ks[1], (4 * H, H), f32) * s,
        w_long=jax.random.normal(ks[2], (D, H), f32) * s,        # longitudinal head
        b_long=jax.random.normal(ks[3], (D,), f32) * s,
        w_att=jax.random.normal(ks[4], (1, HD), f32) * s,        # attention head
        b_att=jax.random.normal(ks[5], (1,), f32) * s,
        w_cs_ih=jax.random.normal(ks[6], (4 * HD, HD), f32) * s,  # cause-specific LSTMCell
        w_cs_hh=jax.random.normal(ks[7], (4 * HD, HD), f32) * s,
        w_cs_out=jax.random.normal(ks[8], (1, HD), f32) * s,      # cause-specific head
        b_cs_out=jax.random.normal(ks[9], (1,), f32) * s,
    )


if __name__ == "__main__":
    key = jax.random.PRNGKey(0)
    B, T = 2, 8
    input_dim, hidden_rnn, output_dim = 4, 32, 8

    kx, kp = jax.random.split(key)
    x = jax.random.normal(kx, (B, T, input_dim), jnp.float32)
    # zero out the trailing step of batch 1 to exercise the input mask / last-obs logic
    x = x.at[1, T - 1, :].set(0.0)

    params = init_params(kp, input_dim, hidden_rnn)

    fwd = jax.jit(functools.partial(ddrsa_forward, output_dim=output_dim))
    long_pred, outcomes = fwd(x, params)
    jax.block_until_ready((long_pred, outcomes))

    assert long_pred.shape == (B, T, input_dim)
    assert len(outcomes) == 1 and outcomes[0].shape == (B, output_dim)
    assert bool(jnp.all(jnp.isfinite(long_pred)))
    assert bool(jnp.all(jnp.isfinite(outcomes[0])))
    # each row of the final outcomes is a softmax -> sums to 1
    assert bool(jnp.allclose(jnp.sum(outcomes[0], axis=-1), 1.0, atol=1e-5))

    print("KERNEL_OK")
</pallas_src>

<mosaic_0001>
module attributes {stable_mosaic.version = 11 : i64} {
  func.func @_ddrsa_kernel(%arg0: i32, %arg1: memref<8x4x128xf32, #tpu.memory_space<vmem>>, %arg2: memref<128x4xbf16, #tpu.memory_space<vmem>>, %arg3: memref<128x32xbf16, #tpu.memory_space<vmem>>, %arg4: memref<5x32xbf16, #tpu.memory_space<vmem>>, %arg5: memref<4x1xf32, #tpu.memory_space<vmem>>, %arg6: memref<4x1xf32, #tpu.memory_space<vmem>>, %arg7: memref<1x1xf32, #tpu.memory_space<vmem>>, %arg8: memref<160x40xbf16, #tpu.memory_space<vmem>>, %arg9: memref<161x40xbf16, #tpu.memory_space<vmem>>, %arg10: memref<1x40xbf16, #tpu.memory_space<vmem>>, %arg11: memref<1x1xf32, #tpu.memory_space<vmem>>, %arg12: memref<8x4x128xf32, #tpu.memory_space<vmem>>, %arg13: memref<8x128xf32, #tpu.memory_space<vmem>>, %arg14: memref<8x32x128xf32, #tpu.memory_space<vmem>>) attributes {dimension_semantics = [#tpu.dimension_semantics<parallel>], iteration_bounds = array<i64: 1>, scalar_prefetch = 0 : i64, scratch_operands = 1 : i64, tpu.core_type = #tpu.core_type<tc>, window_params = [{transform_indices = @transform_0, window_bounds = array<i64: 8, 4, 128>}, {pipeline_mode = #tpu.pipeline_mode<synchronous>, transform_indices = @transform_1, window_bounds = array<i64: 128, 4>}, {pipeline_mode = #tpu.pipeline_mode<synchronous>, transform_indices = @transform_2, window_bounds = array<i64: 128, 32>}, {pipeline_mode = #tpu.pipeline_mode<synchronous>, transform_indices = @transform_3, window_bounds = array<i64: 5, 32>}, {pipeline_mode = #tpu.pipeline_mode<synchronous>, transform_indices = @transform_4, window_bounds = array<i64: 4, 1>}, {pipeline_mode = #tpu.pipeline_mode<synchronous>, transform_indices = @transform_5, window_bounds = array<i64: 4, 1>}, {pipeline_mode = #tpu.pipeline_mode<synchronous>, transform_indices = @transform_6, window_bounds = array<i64: 1, 1>}, {pipeline_mode = #tpu.pipeline_mode<synchronous>, transform_indices = @transform_7, window_bounds = array<i64: 160, 40>}, {pipeline_mode = #tpu.pipeline_mode<synchronous>, transform_indices = @transform_8, window_bounds = array<i64: 161, 40>}, {pipeline_mode = #tpu.pipeline_mode<synchronous>, transform_indices = @transform_9, window_bounds = array<i64: 1, 40>}, {pipeline_mode = #tpu.pipeline_mode<synchronous>, transform_indices = @transform_10, window_bounds = array<i64: 1, 1>}, {transform_indices = @transform_11, window_bounds = array<i64: 8, 4, 128>}, {transform_indices = @transform_12, window_bounds = array<i64: 8, 128>}]} {
    %c0 = arith.constant 0 : index
    %c0_0 = arith.constant 0 : index
    %0 = vector.load %arg5[%c0, %c0_0] : memref<4x1xf32, #tpu.memory_space<vmem>>, vector<4x1xf32>
    %c0_1 = arith.constant 0 : index
    %c0_2 = arith.constant 0 : index
    %1 = vector.load %arg6[%c0_1, %c0_2] : memref<4x1xf32, #tpu.memory_space<vmem>>, vector<4x1xf32>
    %c0_3 = arith.constant 0 : index
    %c0_4 = arith.constant 0 : index
    %2 = vector.load %arg7[%c0_3, %c0_4] : memref<1x1xf32, #tpu.memory_space<vmem>>, vector<1x1xf32>
    %c0_5 = arith.constant 0 : index
    %c0_6 = arith.constant 0 : index
    %3 = vector.load %arg11[%c0_5, %c0_6] : memref<1x1xf32, #tpu.memory_space<vmem>>, vector<1x1xf32>
    %cst = arith.constant 0.000000e+00 : f32
    %4 = vector.broadcast %cst : f32 to vector<32x128xf32>
    %cst_7 = arith.constant 0.000000e+00 : f32
    %5 = vector.broadcast %cst_7 : f32 to vector<32x128xf32>
    %c0_i32 = arith.constant 0 : i32
    %6 = vector.broadcast %c0_i32 : i32 to vector<1x128xi32>
    %c0_8 = arith.constant 0 : index
    %c0_9 = arith.constant 0 : index
    %c0_10 = arith.constant 0 : index
    %7 = vector.load %arg1[%c0_8, %c0_9, %c0_10] : memref<8x4x128xf32, #tpu.memory_space<vmem>>, vector<1x4x128xf32>
    %8 = vector.shape_cast %7 : vector<1x4x128xf32> to vector<4x128xf32>
    %9 = math.absf %8 : vector<4x128xf32>
    %cst_11 = arith.constant dense<0.000000e+00> : vector<128xf32>
    %10 = vector.multi_reduction <add>, %9, %cst_11 [0] : vector<4x128xf32> to vector<128xf32>
    %11 = vector.shape_cast %10 : vector<128xf32> to vector<1x128xf32>
    %cst_12 = arith.constant 0.000000e+00 : f32
    %12 = vector.broadcast %cst_12 : f32 to vector<1x128xf32>
    %13 = arith.cmpf one, %11, %12 : vector<1x128xf32>
    %14 = arith.extui %13 : vector<1x128xi1> to vector<1x128xi32>
    %15 = arith.addi %6, %14 : vector<1x128xi32>
    %c0_13 = arith.constant 0 : index
    %c0_14 = arith.constant 0 : index
    %16 = vector.load %arg2[%c0_13, %c0_14] : memref<128x4xbf16, #tpu.memory_space<vmem>>, vector<128x4xbf16>
    %17 = arith.truncf %8 : vector<4x128xf32> to vector<4x128xbf16>
    %cst_15 = arith.constant dense<0.000000e+00> : vector<128x128xf32>
    %18 = tpu.matmul %16, %17, %cst_15 {dimension_numbers = #tpu.dot_dimension_numbers<[1], [0], [0], [1], [0, 0, 1, 1], [], []>} : vector<128x4xbf16>, vector<4x128xbf16>, vector<128x128xf32> -> vector<128x128xf32>
    %c0_16 = arith.constant 0 : index
    %c0_17 = arith.constant 0 : index
    %19 = vector.load %arg3[%c0_16, %c0_17] : memref<128x32xbf16, #tpu.memory_space<vmem>>, vector<128x32xbf16>
    %20 = arith.truncf %4 : vector<32x128xf32> to vector<32x128xbf16>
    %cst_18 = arith.constant dense<0.000000e+00> : vector<128x128xf32>
    %21 = tpu.matmul %19, %20, %cst_18 {dimension_numbers = #tpu.dot_dimension_numbers<[1], [0], [0], [1], [0, 0, 1, 1], [], []>} : vector<128x32xbf16>, vector<32x128xbf16>, vector<128x128xf32> -> vector<128x128xf32>
    %22 = arith.addf %18, %21 : vector<128x128xf32>
    %23 = vector.extract_strided_slice %22 {offsets = [0, 0], sizes = [32, 128], strides = [1, 1]} : vector<128x128xf32> to vector<32x128xf32>
    %24 = arith.negf %23 : vector<32x128xf32>
    %25 = math.exp %24 : vector<32x128xf32>
    %cst_19 = arith.constant 1.000000e+00 : f32
    %26 = vector.broadcast %cst_19 : f32 to vector<32x128xf32>
    %27 = arith.addf %26, %25 : vector<32x128xf32>
    %28 = arith.divf %26, %27 : vector<32x128xf32>
    %29 = vector.extract_strided_slice %22 {offsets = [32, 0], sizes = [32, 128], strides = [1, 1]} : vector<128x128xf32> to vector<32x128xf32>
    %30 = arith.negf %29 : vector<32x128xf32>
    %31 = math.exp %30 : vector<32x128xf32>
    %cst_20 = arith.constant 1.000000e+00 : f32
    %32 = vector.broadcast %cst_20 : f32 to vector<32x128xf32>
    %33 = arith.addf %32, %31 : vector<32x128xf32>
    %34 = arith.divf %32, %33 : vector<32x128xf32>
    %35 = vector.extract_strided_slice %22 {offsets = [64, 0], sizes = [32, 128], strides = [1, 1]} : vector<128x128xf32> to vector<32x128xf32>
    %36 = math.tanh %35 : vector<32x128xf32>
    %37 = vector.extract_strided_slice %22 {offsets = [96, 0], sizes = [32, 128], strides = [1, 1]} : vector<128x128xf32> to vector<32x128xf32>
    %38 = arith.negf %37 : vector<32x128xf32>
    %39 = math.exp %38 : vector<32x128xf32>
    %cst_21 = arith.constant 1.000000e+00 : f32
    %40 = vector.broadcast %cst_21 : f32 to vector<32x128xf32>
    %41 = arith.addf %40, %39 : vector<32x128xf32>
    %42 = arith.divf %40, %41 : vector<32x128xf32>
    %43 = arith.mulf %34, %5 : vector<32x128xf32>
    %44 = arith.mulf %28, %36 : vector<32x128xf32>
    %45 = arith.addf %43, %44 : vector<32x128xf32>
    %46 = math.tanh %45 : vector<32x128xf32>
    %47 = arith.mulf %42, %46 : vector<32x128xf32>
    %c0_22 = arith.constant 0 : index
    %c0_23 = arith.constant 0 : index
    %c0_24 = arith.constant 0 : index
    %48 = vector.load %arg14[%c0_22, %c0_23, %c0_24] : memref<8x32x128xf32, #tpu.memory_space<vmem>>, vector<1x32x128xf32>
    %49 = vector.shape_cast %48 : vector<1x32x128xf32> to vector<32x128xf32>
    %50 = vector.shape_cast %47 : vector<32x128xf32> to vector<1x32x128xf32>
    tpu.vector_store %arg14[%c0_22, %c0_23, %c0_24], %50 {strides = array<i32>} : memref<8x32x128xf32, #tpu.memory_space<vmem>>, vector<1x32x128xf32>,
    %c0_25 = arith.constant 0 : index
    %c0_26 = arith.constant 0 : index
    %51 = vector.load %arg4[%c0_25, %c0_26] : memref<5x32xbf16, #tpu.memory_space<vmem>>, vector<5x32xbf16>
    %52 = arith.truncf %47 : vector<32x128xf32> to vector<32x128xbf16>
    %cst_27 = arith.constant dense<0.000000e+00> : vector<5x128xf32>
    %53 = tpu.matmul %51, %52, %cst_27 {dimension_numbers = #tpu.dot_dimension_numbers<[1], [0], [0], [1], [0, 0, 1, 1], [], []>} : vector<5x32xbf16>, vector<32x128xbf16>, vector<5x128xf32> -> vector<5x128xf32>
    %54 = vector.extract_strided_slice %53 {offsets = [0, 0], sizes = [4, 128], strides = [1, 1]} : vector<5x128xf32> to vector<4x128xf32>
    %55 = vector.broadcast %0 : vector<4x1xf32> to vector<4x128xf32>
    %56 = arith.addf %54, %55 : vector<4x128xf32>
    %c0_28 = arith.constant 0 : index
    %c0_29 = arith.constant 0 : index
    %c0_30 = arith.constant 0 : index
    %57 = vector.load %arg12[%c0_28, %c0_29, %c0_30] : memref<8x4x128xf32, #tpu.memory_space<vmem>>, vector<1x4x128xf32>
    %58 = vector.shape_cast %57 : vector<1x4x128xf32> to vector<4x128xf32>
    %59 = vector.shape_cast %56 : vector<4x128xf32> to vector<1x4x128xf32>
    tpu.vector_store %arg12[%c0_28, %c0_29, %c0_30], %59 {strides = array<i32>} : memref<8x4x128xf32, #tpu.memory_space<vmem>>, vector<1x4x128xf32>,
    %60 = vector.extract_strided_slice %53 {offsets = [4, 0], sizes = [1, 128], strides = [1, 1]} : vector<5x128xf32> to vector<1x128xf32>
    %c1 = arith.constant 1 : index
    %c0_31 = arith.constant 0 : index
    %c0_32 = arith.constant 0 : index
    %61 = vector.load %arg1[%c1, %c0_31, %c0_32] : memref<8x4x128xf32, #tpu.memory_space<vmem>>, vector<1x4x128xf32>
    %62 = vector.shape_cast %61 : vector<1x4x128xf32> to vector<4x128xf32>
    %63 = math.absf %62 : vector<4x128xf32>
    %cst_33 = arith.constant dense<0.000000e+00> : vector<128xf32>
    %64 = vector.multi_reduction <add>, %63, %cst_33 [0] : vector<4x128xf32> to vector<128xf32>
    %65 = vector.shape_cast %64 : vector<128xf32> to vector<1x128xf32>
    %cst_34 = arith.constant 0.000000e+00 : f32
    %66 = vector.broadcast %cst_34 : f32 to vector<1x128xf32>
    %67 = arith.cmpf one, %65, %66 : vector<1x128xf32>
    %68 = arith.extui %67 : vector<1x128xi1> to vector<1x128xi32>
    %69 = arith.addi %15, %68 : vector<1x128xi32>
    %c0_35 = arith.constant 0 : index
    %c0_36 = arith.constant 0 : index
    %70 = vector.load %arg2[%c0_35, %c0_36] : memref<128x4xbf16, #tpu.memory_space<vmem>>, vector<128x4xbf16>
    %71 = arith.truncf %62 : vector<4x128xf32> to vector<4x128xbf16>
    %cst_37 = arith.constant dense<0.000000e+00> : vector<128x128xf32>
    %72 = tpu.matmul %70, %71, %cst_37 {dimension_numbers = #tpu.dot_dimension_numbers<[1], [0], [0], [1], [0, 0, 1, 1], [], []>} : vector<128x4xbf16>, vector<4x128xbf16>, vector<128x128xf32> -> vector<128x128xf32>
    %c0_38 = arith.constant 0 : index
    %c0_39 = arith.constant 0 : index
    %73 = vector.load %arg3[%c0_38, %c0_39] : memref<128x32xbf16, #tpu.memory_space<vmem>>, vector<128x32xbf16>
    %74 = arith.truncf %47 : vector<32x128xf32> to vector<32x128xbf16>
    %cst_40 = arith.constant dense<0.000000e+00> : vector<128x128xf32>
    %75 = tpu.matmul %73, %74, %cst_40 {dimension_numbers = #tpu.dot_dimension_numbers<[1], [0], [0], [1], [0, 0, 1, 1], [], []>} : vector<128x32xbf16>, vector<32x128xbf16>, vector<128x128xf32> -> vector<128x128xf32>
    %76 = arith.addf %72, %75 : vector<128x128xf32>
    %77 = vector.extract_strided_slice %76 {offsets = [0, 0], sizes = [32, 128], strides = [1, 1]} : vector<128x128xf32> to vector<32x128xf32>
    %78 = arith.negf %77 : vector<32x128xf32>
    %79 = math.exp %78 : vector<32x128xf32>
    %cst_41 = arith.constant 1.000000e+00 : f32
    %80 = vector.broadcast %cst_41 : f32 to vector<32x128xf32>
    %81 = arith.addf %80, %79 : vector<32x128xf32>
    %82 = arith.divf %80, %81 : vector<32x128xf32>
    %83 = vector.extract_strided_slice %76 {offsets = [32, 0], sizes = [32, 128], strides = [1, 1]} : vector<128x128xf32> to vector<32x128xf32>
    %84 = arith.negf %83 : vector<32x128xf32>
    %85 = math.exp %84 : vector<32x128xf32>
    %cst_42 = arith.constant 1.000000e+00 : f32
    %86 = vector.broadcast %cst_42 : f32 to vector<32x128xf32>
    %87 = arith.addf %86, %85 : vector<32x128xf32>
    %88 = arith.divf %86, %87 : vector<32x128xf32>
    %89 = vector.extract_strided_slice %76 {offsets = [64, 0], sizes = [32, 128], strides = [1, 1]} : vector<128x128xf32> to vector<32x128xf32>
    %90 = math.tanh %89 : vector<32x128xf32>
    %91 = vector.extract_strided_slice %76 {offsets = [96, 0], sizes = [32, 128], strides = [1, 1]} : vector<128x128xf32> to vector<32x128xf32>
    %92 = arith.negf %91 : vector<32x128xf32>
    %93 = math.exp %92 : vector<32x128xf32>
    %cst_43 = arith.constant 1.000000e+00 : f32
    %94 = vector.broadcast %cst_43 : f32 to vector<32x128xf32>
    %95 = arith.addf %94, %93 : vector<32x128xf32>
    %96 = arith.divf %94, %95 : vector<32x128xf32>
    %97 = arith.mulf %88, %45 : vector<32x128xf32>
    %98 = arith.mulf %82, %90 : vector<32x128xf32>
    %99 = arith.addf %97, %98 : vector<32x128xf32>
    %100 = math.tanh %99 : vector<32x128xf32>
    %101 = arith.mulf %96, %100 : vector<32x128xf32>
    %c1_44 = arith.constant 1 : index
    %c0_45 = arith.constant 0 : index
    %c0_46 = arith.constant 0 : index
    %102 = vector.load %arg14[%c1_44, %c0_45, %c0_46] : memref<8x32x128xf32, #tpu.memory_space<vmem>>, vector<1x32x128xf32>
    %103 = vector.shape_cast %102 : vector<1x32x128xf32> to vector<32x128xf32>
    %104 = vector.shape_cast %101 : vector<32x128xf32> to vector<1x32x128xf32>
    tpu.vector_store %arg14[%c1_44, %c0_45, %c0_46], %104 {strides = array<i32>} : memref<8x32x128xf32, #tpu.memory_space<vmem>>, vector<1x32x128xf32>,
    %c0_47 = arith.constant 0 : index
    %c0_48 = arith.constant 0 : index
    %105 = vector.load %arg4[%c0_47, %c0_48] : memref<5x32xbf16, #tpu.memory_space<vmem>>, vector<5x32xbf16>
    %106 = arith.truncf %101 : vector<32x128xf32> to vector<32x128xbf16>
    %cst_49 = arith.constant dense<0.000000e+00> : vector<5x128xf32>
    %107 = tpu.matmul %105, %106, %cst_49 {dimension_numbers = #tpu.dot_dimension_numbers<[1], [0], [0], [1], [0, 0, 1, 1], [], []>} : vector<5x32xbf16>, vector<32x128xbf16>, vector<5x128xf32> -> vector<5x128xf32>
    %108 = vector.extract_strided_slice %107 {offsets = [0, 0], sizes = [4, 128], strides = [1, 1]} : vector<5x128xf32> to vector<4x128xf32>
    %109 = vector.broadcast %0 : vector<4x1xf32> to vector<4x128xf32>
    %110 = arith.addf %108, %109 : vector<4x128xf32>
    %c1_50 = arith.constant 1 : index
    %c0_51 = arith.constant 0 : index
    %c0_52 = arith.constant 0 : index
    %111 = vector.load %arg12[%c1_50, %c0_51, %c0_52] : memref<8x4x128xf32, #tpu.memory_space<vmem>>, vector<1x4x128xf32>
    %112 = vector.shape_cast %111 : vector<1x4x128xf32> to vector<4x128xf32>
    %113 = vector.shape_cast %110 : vector<4x128xf32> to vector<1x4x128xf32>
    tpu.vector_store %arg12[%c1_50, %c0_51, %c0_52], %113 {strides = array<i32>} : memref<8x4x128xf32, #tpu.memory_space<vmem>>, vector<1x4x128xf32>,
    %114 = vector.extract_strided_slice %107 {offsets = [4, 0], sizes = [1, 128], strides = [1, 1]} : vector<5x128xf32> to vector<1x128xf32>
    %c2 = arith.constant 2 : index
    %c0_53 = arith.constant 0 : index
    %c0_54 = arith.constant 0 : index
    %115 = vector.load %arg1[%c2, %c0_53, %c0_54] : memref<8x4x128xf32, #tpu.memory_space<vmem>>, vector<1x4x128xf32>
    %116 = vector.shape_cast %115 : vector<1x4x128xf32> to vector<4x128xf32>
    %117 = math.absf %116 : vector<4x128xf32>
    %cst_55 = arith.constant dense<0.000000e+00> : vector<128xf32>
    %118 = vector.multi_reduction <add>, %117, %cst_55 [0] : vector<4x128xf32> to vector<128xf32>
    %119 = vector.shape_cast %118 : vector<128xf32> to vector<1x128xf32>
    %cst_56 = arith.constant 0.000000e+00 : f32
    %120 = vector.broadcast %cst_56 : f32 to vector<1x128xf32>
    %121 = arith.cmpf one, %119, %120 : vector<1x128xf32>
    %122 = arith.extui %121 : vector<1x128xi1> to vector<1x128xi32>
    %123 = arith.addi %69, %122 : vector<1x128xi32>
    %c0_57 = arith.constant 0 : index
    %c0_58 = arith.constant 0 : index
    %124 = vector.load %arg2[%c0_57, %c0_58] : memref<128x4xbf16, #tpu.memory_space<vmem>>, vector<128x4xbf16>
    %125 = arith.truncf %116 : vector<4x128xf32> to vector<4x128xbf16>
    %cst_59 = arith.constant dense<0.000000e+00> : vector<128x128xf32>
    %126 = tpu.matmul %124, %125, %cst_59 {dimension_numbers = #tpu.dot_dimension_numbers<[1], [0], [0], [1], [0, 0, 1, 1], [], []>} : vector<128x4xbf16>, vector<4x128xbf16>, vector<128x128xf32> -> vector<128x128xf32>
    %c0_60 = arith.constant 0 : index
    %c0_61 = arith.constant 0 : index
    %127 = vector.load %arg3[%c0_60, %c0_61] : memref<128x32xbf16, #tpu.memory_space<vmem>>, vector<128x32xbf16>
    %128 = arith.truncf %101 : vector<32x128xf32> to vector<32x128xbf16>
    %cst_62 = arith.constant dense<0.000000e+00> : vector<128x128xf32>
    %129 = tpu.matmul %127, %128, %cst_62 {dimension_numbers = #tpu.dot_dimension_numbers<[1], [0], [0], [1], [0, 0, 1, 1], [], []>} : vector<128x32xbf16>, vector<32x128xbf16>, vector<128x128xf32> -> vector<128x128xf32>
    %130 = arith.addf %126, %129 : vector<128x128xf32>
    %131 = vector.extract_strided_slice %130 {offsets = [0, 0], sizes = [32, 128], strides = [1, 1]} : vector<128x128xf32> to vector<32x128xf32>
    %132 = arith.negf %131 : vector<32x128xf32>
    %133 = math.exp %132 : vector<32x128xf32>
    %cst_63 = arith.constant 1.000000e+00 : f32
    %134 = vector.broadcast %cst_63 : f32 to vector<32x128xf32>
    %135 = arith.addf %134, %133 : vector<32x128xf32>
    %136 = arith.divf %134, %135 : vector<32x128xf32>
    %137 = vector.extract_strided_slice %130 {offsets = [32, 0], sizes = [32, 128], strides = [1, 1]} : vector<128x128xf32> to vector<32x128xf32>
    %138 = arith.negf %137 : vector<32x128xf32>
    %139 = math.exp %138 : vector<32x128xf32>
    %cst_64 = arith.constant 1.000000e+00 : f32
    %140 = vector.broadcast %cst_64 : f32 to vector<32x128xf32>
    %141 = arith.addf %140, %139 : vector<32x128xf32>
    %142 = arith.divf %140, %141 : vector<32x128xf32>
    %143 = vector.extract_strided_slice %130 {offsets = [64, 0], sizes = [32, 128], strides = [1, 1]} : vector<128x128xf32> to vector<32x128xf32>
    %144 = math.tanh %143 : vector<32x128xf32>
    %145 = vector.extract_strided_slice %130 {offsets = [96, 0], sizes = [32, 128], strides = [1, 1]} : vector<128x128xf32> to vector<32x128xf32>
    %146 = arith.negf %145 : vector<32x128xf32>
    %147 = math.exp %146 : vector<32x128xf32>
    %cst_65 = arith.constant 1.000000e+00 : f32
    %148 = vector.broadcast %cst_65 : f32 to vector<32x128xf32>
    %149 = arith.addf %148, %147 : vector<32x128xf32>
    %150 = arith.divf %148, %149 : vector<32x128xf32>
    %151 = arith.mulf %142, %99 : vector<32x128xf32>
    %152 = arith.mulf %136, %144 : vector<32x128xf32>
    %153 = arith.addf %151, %152 : vector<32x128xf32>
    %154 = math.tanh %153 : vector<32x128xf32>
    %155 = arith.mulf %150, %154 : vector<32x128xf32>
    %c2_66 = arith.constant 2 : index
    %c0_67 = arith.constant 0 : index
    %c0_68 = arith.constant 0 : index
    %156 = vector.load %arg14[%c2_66, %c0_67, %c0_68] : memref<8x32x128xf32, #tpu.memory_space<vmem>>, vector<1x32x128xf32>
    %157 = vector.shape_cast %156 : vector<1x32x128xf32> to vector<32x128xf32>
    %158 = vector.shape_cast %155 : vector<32x128xf32> to vector<1x32x128xf32>
    tpu.vector_store %arg14[%c2_66, %c0_67, %c0_68], %158 {strides = array<i32>} : memref<8x32x128xf32, #tpu.memory_space<vmem>>, vector<1x32x128xf32>,
    %c0_69 = arith.constant 0 : index
    %c0_70 = arith.constant 0 : index
    %159 = vector.load %arg4[%c0_69, %c0_70] : memref<5x32xbf16, #tpu.memory_space<vmem>>, vector<5x32xbf16>
    %160 = arith.truncf %155 : vector<32x128xf32> to vector<32x128xbf16>
    %cst_71 = arith.constant dense<0.000000e+00> : vector<5x128xf32>
    %161 = tpu.matmul %159, %160, %cst_71 {dimension_numbers = #tpu.dot_dimension_numbers<[1], [0], [0], [1], [0, 0, 1, 1], [], []>} : vector<5x32xbf16>, vector<32x128xbf16>, vector<5x128xf32> -> vector<5x128xf32>
    %162 = vector.extract_strided_slice %161 {offsets = [0, 0], sizes = [4, 128], strides = [1, 1]} : vector<5x128xf32> to vector<4x128xf32>
    %163 = vector.broadcast %0 : vector<4x1xf32> to vector<4x128xf32>
    %164 = arith.addf %162, %163 : vector<4x128xf32>
    %c2_72 = arith.constant 2 : index
    %c0_73 = arith.constant 0 : index
    %c0_74 = arith.constant 0 : index
    %165 = vector.load %arg12[%c2_72, %c0_73, %c0_74] : memref<8x4x128xf32, #tpu.memory_space<vmem>>, vector<1x4x128xf32>
    %166 = vector.shape_cast %165 : vector<1x4x128xf32> to vector<4x128xf32>
    %167 = vector.shape_cast %164 : vector<4x128xf32> to vector<1x4x128xf32>
    tpu.vector_store %arg12[%c2_72, %c0_73, %c0_74], %167 {strides = array<i32>} : memref<8x4x128xf32, #tpu.memory_space<vmem>>, vector<1x4x128xf32>,
    %168 = vector.extract_strided_slice %161 {offsets = [4, 0], sizes = [1, 128], strides = [1, 1]} : vector<5x128xf32> to vector<1x128xf32>
    %c3 = arith.constant 3 : index
    %c0_75 = arith.constant 0 : index
    %c0_76 = arith.constant 0 : index
    %169 = vector.load %arg1[%c3, %c0_75, %c0_76] : memref<8x4x128xf32, #tpu.memory_space<vmem>>, vector<1x4x128xf32>
    %170 = vector.shape_cast %169 : vector<1x4x128xf32> to vector<4x128xf32>
    %171 = math.absf %170 : vector<4x128xf32>
    %cst_77 = arith.constant dense<0.000000e+00> : vector<128xf32>
    %172 = vector.multi_reduction <add>, %171, %cst_77 [0] : vector<4x128xf32> to vector<128xf32>
    %173 = vector.shape_cast %172 : vector<128xf32> to vector<1x128xf32>
    %cst_78 = arith.constant 0.000000e+00 : f32
    %174 = vector.broadcast %cst_78 : f32 to vector<1x128xf32>
    %175 = arith.cmpf one, %173, %174 : vector<1x128xf32>
    %176 = arith.extui %175 : vector<1x128xi1> to vector<1x128xi32>
    %177 = arith.addi %123, %176 : vector<1x128xi32>
    %c0_79 = arith.constant 0 : index
    %c0_80 = arith.constant 0 : index
    %178 = vector.load %arg2[%c0_79, %c0_80] : memref<128x4xbf16, #tpu.memory_space<vmem>>, vector<128x4xbf16>
    %179 = arith.truncf %170 : vector<4x128xf32> to vector<4x128xbf16>
    %cst_81 = arith.constant dense<0.000000e+00> : vector<128x128xf32>
    %180 = tpu.matmul %178, %179, %cst_81 {dimension_numbers = #tpu.dot_dimension_numbers<[1], [0], [0], [1], [0, 0, 1, 1], [], []>} : vector<128x4xbf16>, vector<4x128xbf16>, vector<128x128xf32> -> vector<128x128xf32>
    %c0_82 = arith.constant 0 : index
    %c0_83 = arith.constant 0 : index
    %181 = vector.load %arg3[%c0_82, %c0_83] : memref<128x32xbf16, #tpu.memory_space<vmem>>, vector<128x32xbf16>
    %182 = arith.truncf %155 : vector<32x128xf32> to vector<32x128xbf16>
    %cst_84 = arith.constant dense<0.000000e+00> : vector<128x128xf32>
    %183 = tpu.matmul %181, %182, %cst_84 {dimension_numbers = #tpu.dot_dimension_numbers<[1], [0], [0], [1], [0, 0, 1, 1], [], []>} : vector<128x32xbf16>, vector<32x128xbf16>, vector<128x128xf32> -> vector<128x128xf32>
    %184 = arith.addf %180, %183 : vector<128x128xf32>
    %185 = vector.extract_strided_slice %184 {offsets = [0, 0], sizes = [32, 128], strides = [1, 1]} : vector<128x128xf32> to vector<32x128xf32>
    %186 = arith.negf %185 : vector<32x128xf32>
    %187 = math.exp %186 : vector<32x128xf32>
    %cst_85 = arith.constant 1.000000e+00 : f32
    %188 = vector.broadcast %cst_85 : f32 to vector<32x128xf32>
    %189 = arith.addf %188, %187 : vector<32x128xf32>
    %190 = arith.divf %188, %189 : vector<32x128xf32>
    %191 = vector.extract_strided_slice %184 {offsets = [32, 0], sizes = [32, 128], strides = [1, 1]} : vector<128x128xf32> to vector<32x128xf32>
    %192 = arith.negf %191 : vector<32x128xf32>
    %193 = math.exp %192 : vector<32x128xf32>
    %cst_86 = arith.constant 1.000000e+00 : f32
    %194 = vector.broadcast %cst_86 : f32 to vector<32x128xf32>
    %195 = arith.addf %194, %193 : vector<32x128xf32>
    %196 = arith.divf %194, %195 : vector<32x128xf32>
    %197 = vector.extract_strided_slice %184 {offsets = [64, 0], sizes = [32, 128], strides = [1, 1]} : vector<128x128xf32> to vector<32x128xf32>
    %198 = math.tanh %197 : vector<32x128xf32>
    %199 = vector.extract_strided_slice %184 {offsets = [96, 0], sizes = [32, 128], strides = [1, 1]} : vector<128x128xf32> to vector<32x128xf32>
    %200 = arith.negf %199 : vector<32x128xf32>
    %201 = math.exp %200 : vector<32x128xf32>
    %cst_87 = arith.constant 1.000000e+00 : f32
    %202 = vector.broadcast %cst_87 : f32 to vector<32x128xf32>
    %203 = arith.addf %202, %201 : vector<32x128xf32>
    %204 = arith.divf %202, %203 : vector<32x128xf32>
    %205 = arith.mulf %196, %153 : vector<32x128xf32>
    %206 = arith.mulf %190, %198 : vector<32x128xf32>
    %207 = arith.addf %205, %206 : vector<32x128xf32>
    %208 = math.tanh %207 : vector<32x128xf32>
    %209 = arith.mulf %204, %208 : vector<32x128xf32>
    %c3_88 = arith.constant 3 : index
    %c0_89 = arith.constant 0 : index
    %c0_90 = arith.constant 0 : index
    %210 = vector.load %arg14[%c3_88, %c0_89, %c0_90] : memref<8x32x128xf32, #tpu.memory_space<vmem>>, vector<1x32x128xf32>
    %211 = vector.shape_cast %210 : vector<1x32x128xf32> to vector<32x128xf32>
    %212 = vector.shape_cast %209 : vector<32x128xf32> to vector<1x32x128xf32>
    tpu.vector_store %arg14[%c3_88, %c0_89, %c0_90], %212 {strides = array<i32>} : memref<8x32x128xf32, #tpu.memory_space<vmem>>, vector<1x32x128xf32>,
    %c0_91 = arith.constant 0 : index
    %c0_92 = arith.constant 0 : index
    %213 = vector.load %arg4[%c0_91, %c0_92] : memref<5x32xbf16, #tpu.memory_space<vmem>>, vector<5x32xbf16>
    %214 = arith.truncf %209 : vector<32x128xf32> to vector<32x128xbf16>
    %cst_93 = arith.constant dense<0.000000e+00> : vector<5x128xf32>
    %215 = tpu.matmul %213, %214, %cst_93 {dimension_numbers = #tpu.dot_dimension_numbers<[1], [0], [0], [1], [0, 0, 1, 1], [], []>} : vector<5x32xbf16>, vector<32x128xbf16>, vector<5x128xf32> -> vector<5x128xf32>
    %216 = vector.extract_strided_slice %215 {offsets = [0, 0], sizes = [4, 128], strides = [1, 1]} : vector<5x128xf32> to vector<4x128xf32>
    %217 = vector.broadcast %0 : vector<4x1xf32> to vector<4x128xf32>
    %218 = arith.addf %216, %217 : vector<4x128xf32>
    %c3_94 = arith.constant 3 : index
    %c0_95 = arith.constant 0 : index
    %c0_96 = arith.constant 0 : index
    %219 = vector.load %arg12[%c3_94, %c0_95, %c0_96] : memref<8x4x128xf32, #tpu.memory_space<vmem>>, vector<1x4x128xf32>
    %220 = vector.shape_cast %219 : vector<1x4x128xf32> to vector<4x128xf32>
    %221 = vector.shape_cast %218 : vector<4x128xf32> to vector<1x4x128xf32>
    tpu.vector_store %arg12[%c3_94, %c0_95, %c0_96], %221 {strides = array<i32>} : memref<8x4x128xf32, #tpu.memory_space<vmem>>, vector<1x4x128xf32>,
    %222 = vector.extract_strided_slice %215 {offsets = [4, 0], sizes = [1, 128], strides = [1, 1]} : vector<5x128xf32> to vector<1x128xf32>
    %c4 = arith.constant 4 : index
    %c0_97 = arith.constant 0 : index
    %c0_98 = arith.constant 0 : index
    %223 = vector.load %arg1[%c4, %c0_97, %c0_98] : memref<8x4x128xf32, #tpu.memory_space<vmem>>, vector<1x4x128xf32>
    %224 = vector.shape_cast %223 : vector<1x4x128xf32> to vector<4x128xf32>
    %225 = math.absf %224 : vector<4x128xf32>
    %cst_99 = arith.constant dense<0.000000e+00> : vector<128xf32>
    %226 = vector.multi_reduction <add>, %225, %cst_99 [0] : vector<4x128xf32> to vector<128xf32>
    %227 = vector.shape_cast %226 : vector<128xf32> to vector<1x128xf32>
    %cst_100 = arith.constant 0.000000e+00 : f32
    %228 = vector.broadcast %cst_100 : f32 to vector<1x128xf32>
    %229 = arith.cmpf one, %227, %228 : vector<1x128xf32>
    %230 = arith.extui %229 : vector<1x128xi1> to vector<1x128xi32>
    %231 = arith.addi %177, %230 : vector<1x128xi32>
    %c0_101 = arith.constant 0 : index
    %c0_102 = arith.constant 0 : index
    %232 = vector.load %arg2[%c0_101, %c0_102] : memref<128x4xbf16, #tpu.memory_space<vmem>>, vector<128x4xbf16>
    %233 = arith.truncf %224 : vector<4x128xf32> to vector<4x128xbf16>
    %cst_103 = arith.constant dense<0.000000e+00> : vector<128x128xf32>
    %234 = tpu.matmul %232, %233, %cst_103 {dimension_numbers = #tpu.dot_dimension_numbers<[1], [0], [0], [1], [0, 0, 1, 1], [], []>} : vector<128x4xbf16>, vector<4x128xbf16>, vector<128x128xf32> -> vector<128x128xf32>
    %c0_104 = arith.constant 0 : index
    %c0_105 = arith.constant 0 : index
    %235 = vector.load %arg3[%c0_104, %c0_105] : memref<128x32xbf16, #tpu.memory_space<vmem>>, vector<128x32xbf16>
    %236 = arith.truncf %209 : vector<32x128xf32> to vector<32x128xbf16>
    %cst_106 = arith.constant dense<0.000000e+00> : vector<128x128xf32>
    %237 = tpu.matmul %235, %236, %cst_106 {dimension_numbers = #tpu.dot_dimension_numbers<[1], [0], [0], [1], [0, 0, 1, 1], [], []>} : vector<128x32xbf16>, vector<32x128xbf16>, vector<128x128xf32> -> vector<128x128xf32>
    %238 = arith.addf %234, %237 : vector<128x128xf32>
    %239 = vector.extract_strided_slice %238 {offsets = [0, 0], sizes = [32, 128], strides = [1, 1]} : vector<128x128xf32> to vector<32x128xf32>
    %240 = arith.negf %239 : vector<32x128xf32>
    %241 = math.exp %240 : vector<32x128xf32>
    %cst_107 = arith.constant 1.000000e+00 : f32
    %242 = vector.broadcast %cst_107 : f32 to vector<32x128xf32>
    %243 = arith.addf %242, %241 : vector<32x128xf32>
    %244 = arith.divf %242, %243 : vector<32x128xf32>
    %245 = vector.extract_strided_slice %238 {offsets = [32, 0], sizes = [32, 128], strides = [1, 1]} : vector<128x128xf32> to vector<32x128xf32>
    %246 = arith.negf %245 : vector<32x128xf32>
    %247 = math.exp %246 : vector<32x128xf32>
    %cst_108 = arith.constant 1.000000e+00 : f32
    %248 = vector.broadcast %cst_108 : f32 to vector<32x128xf32>
    %249 = arith.addf %248, %247 : vector<32x128xf32>
    %250 = arith.divf %248, %249 : vector<32x128xf32>
    %251 = vector.extract_strided_slice %238 {offsets = [64, 0], sizes = [32, 128], strides = [1, 1]} : vector<128x128xf32> to vector<32x128xf32>
    %252 = math.tanh %251 : vector<32x128xf32>
    %253 = vector.extract_strided_slice %238 {offsets = [96, 0], sizes = [32, 128], strides = [1, 1]} : vector<128x128xf32> to vector<32x128xf32>
    %254 = arith.negf %253 : vector<32x128xf32>
    %255 = math.exp %254 : vector<32x128xf32>
    %cst_109 = arith.constant 1.000000e+00 : f32
    %256 = vector.broadcast %cst_109 : f32 to vector<32x128xf32>
    %257 = arith.addf %256, %255 : vector<32x128xf32>
    %258 = arith.divf %256, %257 : vector<32x128xf32>
    %259 = arith.mulf %250, %207 : vector<32x128xf32>
    %260 = arith.mulf %244, %252 : vector<32x128xf32>
    %261 = arith.addf %259, %260 : vector<32x128xf32>
    %262 = math.tanh %261 : vector<32x128xf32>
    %263 = arith.mulf %258, %262 : vector<32x128xf32>
    %c4_110 = arith.constant 4 : index
    %c0_111 = arith.constant 0 : index
    %c0_112 = arith.constant 0 : index
    %264 = vector.load %arg14[%c4_110, %c0_111, %c0_112] : memref<8x32x128xf32, #tpu.memory_space<vmem>>, vector<1x32x128xf32>
    %265 = vector.shape_cast %264 : vector<1x32x128xf32> to vector<32x128xf32>
    %266 = vector.shape_cast %263 : vector<32x128xf32> to vector<1x32x128xf32>
    tpu.vector_store %arg14[%c4_110, %c0_111, %c0_112], %266 {strides = array<i32>} : memref<8x32x128xf32, #tpu.memory_space<vmem>>, vector<1x32x128xf32>,
    %c0_113 = arith.constant 0 : index
    %c0_114 = arith.constant 0 : index
    %267 = vector.load %arg4[%c0_113, %c0_114] : memref<5x32xbf16, #tpu.memory_space<vmem>>, vector<5x32xbf16>
    %268 = arith.truncf %263 : vector<32x128xf32> to vector<32x128xbf16>
    %cst_115 = arith.constant dense<0.000000e+00> : vector<5x128xf32>
    %269 = tpu.matmul %267, %268, %cst_115 {dimension_numbers = #tpu.dot_dimension_numbers<[1], [0], [0], [1], [0, 0, 1, 1], [], []>} : vector<5x32xbf16>, vector<32x128xbf16>, vector<5x128xf32> -> vector<5x128xf32>
    %270 = vector.extract_strided_slice %269 {offsets = [0, 0], sizes = [4, 128], strides = [1, 1]} : vector<5x128xf32> to vector<4x128xf32>
    %271 = vector.broadcast %0 : vector<4x1xf32> to vector<4x128xf32>
    %272 = arith.addf %270, %271 : vector<4x128xf32>
    %c4_116 = arith.constant 4 : index
    %c0_117 = arith.constant 0 : index
    %c0_118 = arith.constant 0 : index
    %273 = vector.load %arg12[%c4_116, %c0_117, %c0_118] : memref<8x4x128xf32, #tpu.memory_space<vmem>>, vector<1x4x128xf32>
    %274 = vector.shape_cast %273 : vector<1x4x128xf32> to vector<4x128xf32>
    %275 = vector.shape_cast %272 : vector<4x128xf32> to vector<1x4x128xf32>
    tpu.vector_store %arg12[%c4_116, %c0_117, %c0_118], %275 {strides = array<i32>} : memref<8x4x128xf32, #tpu.memory_space<vmem>>, vector<1x4x128xf32>,
    %276 = vector.extract_strided_slice %269 {offsets = [4, 0], sizes = [1, 128], strides = [1, 1]} : vector<5x128xf32> to vector<1x128xf32>
    %c5 = arith.constant 5 : index
    %c0_119 = arith.constant 0 : index
    %c0_120 = arith.constant 0 : index
    %277 = vector.load %arg1[%c5, %c0_119, %c0_120] : memref<8x4x128xf32, #tpu.memory_space<vmem>>, vector<1x4x128xf32>
    %278 = vector.shape_cast %277 : vector<1x4x128xf32> to vector<4x128xf32>
    %279 = math.absf %278 : vector<4x128xf32>
    %cst_121 = arith.constant dense<0.000000e+00> : vector<128xf32>
    %280 = vector.multi_reduction <add>, %279, %cst_121 [0] : vector<4x128xf32> to vector<128xf32>
    %281 = vector.shape_cast %280 : vector<128xf32> to vector<1x128xf32>
    %cst_122 = arith.constant 0.000000e+00 : f32
    %282 = vector.broadcast %cst_122 : f32 to vector<1x128xf32>
    %283 = arith.cmpf one, %281, %282 : vector<1x128xf32>
    %284 = arith.extui %283 : vector<1x128xi1> to vector<1x128xi32>
    %285 = arith.addi %231, %284 : vector<1x128xi32>
    %c0_123 = arith.constant 0 : index
    %c0_124 = arith.constant 0 : index
    %286 = vector.load %arg2[%c0_123, %c0_124] : memref<128x4xbf16, #tpu.memory_space<vmem>>, vector<128x4xbf16>
    %287 = arith.truncf %278 : vector<4x128xf32> to vector<4x128xbf16>
    %cst_125 = arith.constant dense<0.000000e+00> : vector<128x128xf32>
    %288 = tpu.matmul %286, %287, %cst_125 {dimension_numbers = #tpu.dot_dimension_numbers<[1], [0], [0], [1], [0, 0, 1, 1], [], []>} : vector<128x4xbf16>, vector<4x128xbf16>, vector<128x128xf32> -> vector<128x128xf32>
    %c0_126 = arith.constant 0 : index
    %c0_127 = arith.constant 0 : index
    %289 = vector.load %arg3[%c0_126, %c0_127] : memref<128x32xbf16, #tpu.memory_space<vmem>>, vector<128x32xbf16>
    %290 = arith.truncf %263 : vector<32x128xf32> to vector<32x128xbf16>
    %cst_128 = arith.constant dense<0.000000e+00> : vector<128x128xf32>
    %291 = tpu.matmul %289, %290, %cst_128 {dimension_numbers = #tpu.dot_dimension_numbers<[1], [0], [0], [1], [0, 0, 1, 1], [], []>} : vector<128x32xbf16>, vector<32x128xbf16>, vector<128x128xf32> -> vector<128x128xf32>
    %292 = arith.addf %288, %291 : vector<128x128xf32>
    %293 = vector.extract_strided_slice %292 {offsets = [0, 0], sizes = [32, 128], strides = [1, 1]} : vector<128x128xf32> to vector<32x128xf32>
    %294 = arith.negf %293 : vector<32x128xf32>
    %295 = math.exp %294 : vector<32x128xf32>
    %cst_129 = arith.constant 1.000000e+00 : f32
    %296 = vector.broadcast %cst_129 : f32 to vector<32x128xf32>
    %297 = arith.addf %296, %295 : vector<32x128xf32>
    %298 = arith.divf %296, %297 : vector<32x128xf32>
    %299 = vector.extract_strided_slice %292 {offsets = [32, 0], sizes = [32, 128], strides = [1, 1]} : vector<128x128xf32> to vector<32x128xf32>
    %300 = arith.negf %299 : vector<32x128xf32>
    %301 = math.exp %300 : vector<32x128xf32>
    %cst_130 = arith.constant 1.000000e+00 : f32
    %302 = vector.broadcast %cst_130 : f32 to vector<32x128xf32>
    %303 = arith.addf %302, %301 : vector<32x128xf32>
    %304 = arith.divf %302, %303 : vector<32x128xf32>
    %305 = vector.extract_strided_slice %292 {offsets = [64, 0], sizes = [32, 128], strides = [1, 1]} : vector<128x128xf32> to vector<32x128xf32>
    %306 = math.tanh %305 : vector<32x128xf32>
    %307 = vector.extract_strided_slice %292 {offsets = [96, 0], sizes = [32, 128], strides = [1, 1]} : vector<128x128xf32> to vector<32x128xf32>
    %308 = arith.negf %307 : vector<32x128xf32>
    %309 = math.exp %308 : vector<32x128xf32>
    %cst_131 = arith.constant 1.000000e+00 : f32
    %310 = vector.broadcast %cst_131 : f32 to vector<32x128xf32>
    %311 = arith.addf %310, %309 : vector<32x128xf32>
    %312 = arith.divf %310, %311 : vector<32x128xf32>
    %313 = arith.mulf %304, %261 : vector<32x128xf32>
    %314 = arith.mulf %298, %306 : vector<32x128xf32>
    %315 = arith.addf %313, %314 : vector<32x128xf32>
    %316 = math.tanh %315 : vector<32x128xf32>
    %317 = arith.mulf %312, %316 : vector<32x128xf32>
    %c5_132 = arith.constant 5 : index
    %c0_133 = arith.constant 0 : index
    %c0_134 = arith.constant 0 : index
    %318 = vector.load %arg14[%c5_132, %c0_133, %c0_134] : memref<8x32x128xf32, #tpu.memory_space<vmem>>, vector<1x32x128xf32>
    %319 = vector.shape_cast %318 : vector<1x32x128xf32> to vector<32x128xf32>
    %320 = vector.shape_cast %317 : vector<32x128xf32> to vector<1x32x128xf32>
    tpu.vector_store %arg14[%c5_132, %c0_133, %c0_134], %320 {strides = array<i32>} : memref<8x32x128xf32, #tpu.memory_space<vmem>>, vector<1x32x128xf32>,
    %c0_135 = arith.constant 0 : index
    %c0_136 = arith.constant 0 : index
    %321 = vector.load %arg4[%c0_135, %c0_136] : memref<5x32xbf16, #tpu.memory_space<vmem>>, vector<5x32xbf16>
    %322 = arith.truncf %317 : vector<32x128xf32> to vector<32x128xbf16>
    %cst_137 = arith.constant dense<0.000000e+00> : vector<5x128xf32>
    %323 = tpu.matmul %321, %322, %cst_137 {dimension_numbers = #tpu.dot_dimension_numbers<[1], [0], [0], [1], [0, 0, 1, 1], [], []>} : vector<5x32xbf16>, vector<32x128xbf16>, vector<5x128xf32> -> vector<5x128xf32>
    %324 = vector.extract_strided_slice %323 {offsets = [0, 0], sizes = [4, 128], strides = [1, 1]} : vector<5x128xf32> to vector<4x128xf32>
    %325 = vector.broadcast %0 : vector<4x1xf32> to vector<4x128xf32>
    %326 = arith.addf %324, %325 : vector<4x128xf32>
    %c5_138 = arith.constant 5 : index
    %c0_139 = arith.constant 0 : index
    %c0_140 = arith.constant 0 : index
    %327 = vector.load %arg12[%c5_138, %c0_139, %c0_140] : memref<8x4x128xf32, #tpu.memory_space<vmem>>, vector<1x4x128xf32>
    %328 = vector.shape_cast %327 : vector<1x4x128xf32> to vector<4x128xf32>
    %329 = vector.shape_cast %326 : vector<4x128xf32> to vector<1x4x128xf32>
    tpu.vector_store %arg12[%c5_138, %c0_139, %c0_140], %329 {strides = array<i32>} : memref<8x4x128xf32, #tpu.memory_space<vmem>>, vector<1x4x128xf32>,
    %330 = vector.extract_strided_slice %323 {offsets = [4, 0], sizes = [1, 128], strides = [1, 1]} : vector<5x128xf32> to vector<1x128xf32>
    %c6 = arith.constant 6 : index
    %c0_141 = arith.constant 0 : index
    %c0_142 = arith.constant 0 : index
    %331 = vector.load %arg1[%c6, %c0_141, %c0_142] : memref<8x4x128xf32, #tpu.memory_space<vmem>>, vector<1x4x128xf32>
    %332 = vector.shape_cast %331 : vector<1x4x128xf32> to vector<4x128xf32>
    %333 = math.absf %332 : vector<4x128xf32>
    %cst_143 = arith.constant dense<0.000000e+00> : vector<128xf32>
    %334 = vector.multi_reduction <add>, %333, %cst_143 [0] : vector<4x128xf32> to vector<128xf32>
    %335 = vector.shape_cast %334 : vector<128xf32> to vector<1x128xf32>
    %cst_144 = arith.constant 0.000000e+00 : f32
    %336 = vector.broadcast %cst_144 : f32 to vector<1x128xf32>
    %337 = arith.cmpf one, %335, %336 : vector<1x128xf32>
    %338 = arith.extui %337 : vector<1x128xi1> to vector<1x128xi32>
    %339 = arith.addi %285, %338 : vector<1x128xi32>
    %c0_145 = arith.constant 0 : index
    %c0_146 = arith.constant 0 : index
    %340 = vector.load %arg2[%c0_145, %c0_146] : memref<128x4xbf16, #tpu.memory_space<vmem>>, vector<128x4xbf16>
    %341 = arith.truncf %332 : vector<4x128xf32> to vector<4x128xbf16>
    %cst_147 = arith.constant dense<0.000000e+00> : vector<128x128xf32>
    %342 = tpu.matmul %340, %341, %cst_147 {dimension_numbers = #tpu.dot_dimension_numbers<[1], [0], [0], [1], [0, 0, 1, 1], [], []>} : vector<128x4xbf16>, vector<4x128xbf16>, vector<128x128xf32> -> vector<128x128xf32>
    %c0_148 = arith.constant 0 : index
    %c0_149 = arith.constant 0 : index
    %343 = vector.load %arg3[%c0_148, %c0_149] : memref<128x32xbf16, #tpu.memory_space<vmem>>, vector<128x32xbf16>
    %344 = arith.truncf %317 : vector<32x128xf32> to vector<32x128xbf16>
    %cst_150 = arith.constant dense<0.000000e+00> : vector<128x128xf32>
    %345 = tpu.matmul %343, %344, %cst_150 {dimension_numbers = #tpu.dot_dimension_numbers<[1], [0], [0], [1], [0, 0, 1, 1], [], []>} : vector<128x32xbf16>, vector<32x128xbf16>, vector<128x128xf32> -> vector<128x128xf32>
    %346 = arith.addf %342, %345 : vector<128x128xf32>
    %347 = vector.extract_strided_slice %346 {offsets = [0, 0], sizes = [32, 128], strides = [1, 1]} : vector<128x128xf32> to vector<32x128xf32>
    %348 = arith.negf %347 : vector<32x128xf32>
    %349 = math.exp %348 : vector<32x128xf32>
    %cst_151 = arith.constant 1.000000e+00 : f32
    %350 = vector.broadcast %cst_151 : f32 to vector<32x128xf32>
    %351 = arith.addf %350, %349 : vector<32x128xf32>
    %352 = arith.divf %350, %351 : vector<32x128xf32>
    %353 = vector.extract_strided_slice %346 {offsets = [32, 0], sizes = [32, 128], strides = [1, 1]} : vector<128x128xf32> to vector<32x128xf32>
    %354 = arith.negf %353 : vector<32x128xf32>
    %355 = math.exp %354 : vector<32x128xf32>
    %cst_152 = arith.constant 1.000000e+00 : f32
    %356 = vector.broadcast %cst_152 : f32 to vector<32x128xf32>
    %357 = arith.addf %356, %355 : vector<32x128xf32>
    %358 = arith.divf %356, %357 : vector<32x128xf32>
    %359 = vector.extract_strided_slice %346 {offsets = [64, 0], sizes = [32, 128], strides = [1, 1]} : vector<128x128xf32> to vector<32x128xf32>
    %360 = math.tanh %359 : vector<32x128xf32>
    %361 = vector.extract_strided_slice %346 {offsets = [96, 0], sizes = [32, 128], strides = [1, 1]} : vector<128x128xf32> to vector<32x128xf32>
    %362 = arith.negf %361 : vector<32x128xf32>
    %363 = math.exp %362 : vector<32x128xf32>
    %cst_153 = arith.constant 1.000000e+00 : f32
    %364 = vector.broadcast %cst_153 : f32 to vector<32x128xf32>
    %365 = arith.addf %364, %363 : vector<32x128xf32>
    %366 = arith.divf %364, %365 : vector<32x128xf32>
    %367 = arith.mulf %358, %315 : vector<32x128xf32>
    %368 = arith.mulf %352, %360 : vector<32x128xf32>
    %369 = arith.addf %367, %368 : vector<32x128xf32>
    %370 = math.tanh %369 : vector<32x128xf32>
    %371 = arith.mulf %366, %370 : vector<32x128xf32>
    %c6_154 = arith.constant 6 : index
    %c0_155 = arith.constant 0 : index
    %c0_156 = arith.constant 0 : index
    %372 = vector.load %arg14[%c6_154, %c0_155, %c0_156] : memref<8x32x128xf32, #tpu.memory_space<vmem>>, vector<1x32x128xf32>
    %373 = vector.shape_cast %372 : vector<1x32x128xf32> to vector<32x128xf32>
    %374 = vector.shape_cast %371 : vector<32x128xf32> to vector<1x32x128xf32>
    tpu.vector_store %arg14[%c6_154, %c0_155, %c0_156], %374 {strides = array<i32>} : memref<8x32x128xf32, #tpu.memory_space<vmem>>, vector<1x32x128xf32>,
    %c0_157 = arith.constant 0 : index
    %c0_158 = arith.constant 0 : index
    %375 = vector.load %arg4[%c0_157, %c0_158] : memref<5x32xbf16, #tpu.memory_space<vmem>>, vector<5x32xbf16>
    %376 = arith.truncf %371 : vector<32x128xf32> to vector<32x128xbf16>
    %cst_159 = arith.constant dense<0.000000e+00> : vector<5x128xf32>
    %377 = tpu.matmul %375, %376, %cst_159 {dimension_numbers = #tpu.dot_dimension_numbers<[1], [0], [0], [1], [0, 0, 1, 1], [], []>} : vector<5x32xbf16>, vector<32x128xbf16>, vector<5x128xf32> -> vector<5x128xf32>
    %378 = vector.extract_strided_slice %377 {offsets = [0, 0], sizes = [4, 128], strides = [1, 1]} : vector<5x128xf32> to vector<4x128xf32>
    %379 = vector.broadcast %0 : vector<4x1xf32> to vector<4x128xf32>
    %380 = arith.addf %378, %379 : vector<4x128xf32>
    %c6_160 = arith.constant 6 : index
    %c0_161 = arith.constant 0 : index
    %c0_162 = arith.constant 0 : index
    %381 = vector.load %arg12[%c6_160, %c0_161, %c0_162] : memref<8x4x128xf32, #tpu.memory_space<vmem>>, vector<1x4x128xf32>
    %382 = vector.shape_cast %381 : vector<1x4x128xf32> to vector<4x128xf32>
    %383 = vector.shape_cast %380 : vector<4x128xf32> to vector<1x4x128xf32>
    tpu.vector_store %arg12[%c6_160, %c0_161, %c0_162], %383 {strides = array<i32>} : memref<8x4x128xf32, #tpu.memory_space<vmem>>, vector<1x4x128xf32>,
    %384 = vector.extract_strided_slice %377 {offsets = [4, 0], sizes = [1, 128], strides = [1, 1]} : vector<5x128xf32> to vector<1x128xf32>
    %c7 = arith.constant 7 : index
    %c0_163 = arith.constant 0 : index
    %c0_164 = arith.constant 0 : index
    %385 = vector.load %arg1[%c7, %c0_163, %c0_164] : memref<8x4x128xf32, #tpu.memory_space<vmem>>, vector<1x4x128xf32>
    %386 = vector.shape_cast %385 : vector<1x4x128xf32> to vector<4x128xf32>
    %387 = math.absf %386 : vector<4x128xf32>
    %cst_165 = arith.constant dense<0.000000e+00> : vector<128xf32>
    %388 = vector.multi_reduction <add>, %387, %cst_165 [0] : vector<4x128xf32> to vector<128xf32>
    %389 = vector.shape_cast %388 : vector<128xf32> to vector<1x128xf32>
    %cst_166 = arith.constant 0.000000e+00 : f32
    %390 = vector.broadcast %cst_166 : f32 to vector<1x128xf32>
    %391 = arith.cmpf one, %389, %390 : vector<1x128xf32>
    %392 = arith.extui %391 : vector<1x128xi1> to vector<1x128xi32>
    %393 = arith.addi %339, %392 : vector<1x128xi32>
    %c0_167 = arith.constant 0 : index
    %c0_168 = arith.constant 0 : index
    %394 = vector.load %arg2[%c0_167, %c0_168] : memref<128x4xbf16, #tpu.memory_space<vmem>>, vector<128x4xbf16>
    %395 = arith.truncf %386 : vector<4x128xf32> to vector<4x128xbf16>
    %cst_169 = arith.constant dense<0.000000e+00> : vector<128x128xf32>
    %396 = tpu.matmul %394, %395, %cst_169 {dimension_numbers = #tpu.dot_dimension_numbers<[1], [0], [0], [1], [0, 0, 1, 1], [], []>} : vector<128x4xbf16>, vector<4x128xbf16>, vector<128x128xf32> -> vector<128x128xf32>
    %c0_170 = arith.constant 0 : index
    %c0_171 = arith.constant 0 : index
    %397 = vector.load %arg3[%c0_170, %c0_171] : memref<128x32xbf16, #tpu.memory_space<vmem>>, vector<128x32xbf16>
    %398 = arith.truncf %371 : vector<32x128xf32> to vector<32x128xbf16>
    %cst_172 = arith.constant dense<0.000000e+00> : vector<128x128xf32>
    %399 = tpu.matmul %397, %398, %cst_172 {dimension_numbers = #tpu.dot_dimension_numbers<[1], [0], [0], [1], [0, 0, 1, 1], [], []>} : vector<128x32xbf16>, vector<32x128xbf16>, vector<128x128xf32> -> vector<128x128xf32>
    %400 = arith.addf %396, %399 : vector<128x128xf32>
    %401 = vector.extract_strided_slice %400 {offsets = [0, 0], sizes = [32, 128], strides = [1, 1]} : vector<128x128xf32> to vector<32x128xf32>
    %402 = arith.negf %401 : vector<32x128xf32>
    %403 = math.exp %402 : vector<32x128xf32>
    %cst_173 = arith.constant 1.000000e+00 : f32
    %404 = vector.broadcast %cst_173 : f32 to vector<32x128xf32>
    %405 = arith.addf %404, %403 : vector<32x128xf32>
    %406 = arith.divf %404, %405 : vector<32x128xf32>
    %407 = vector.extract_strided_slice %400 {offsets = [32, 0], sizes = [32, 128], strides = [1, 1]} : vector<128x128xf32> to vector<32x128xf32>
    %408 = arith.negf %407 : vector<32x128xf32>
    %409 = math.exp %408 : vector<32x128xf32>
    %cst_174 = arith.constant 1.000000e+00 : f32
    %410 = vector.broadcast %cst_174 : f32 to vector<32x128xf32>
    %411 = arith.addf %410, %409 : vector<32x128xf32>
    %412 = arith.divf %410, %411 : vector<32x128xf32>
    %413 = vector.extract_strided_slice %400 {offsets = [64, 0], sizes = [32, 128], strides = [1, 1]} : vector<128x128xf32> to vector<32x128xf32>
    %414 = math.tanh %413 : vector<32x128xf32>
    %415 = vector.extract_strided_slice %400 {offsets = [96, 0], sizes = [32, 128], strides = [1, 1]} : vector<128x128xf32> to vector<32x128xf32>
    %416 = arith.negf %415 : vector<32x128xf32>
    %417 = math.exp %416 : vector<32x128xf32>
    %cst_175 = arith.constant 1.000000e+00 : f32
    %418 = vector.broadcast %cst_175 : f32 to vector<32x128xf32>
    %419 = arith.addf %418, %417 : vector<32x128xf32>
    %420 = arith.divf %418, %419 : vector<32x128xf32>
    %421 = arith.mulf %412, %369 : vector<32x128xf32>
    %422 = arith.mulf %406, %414 : vector<32x128xf32>
    %423 = arith.addf %421, %422 : vector<32x128xf32>
    %424 = math.tanh %423 : vector<32x128xf32>
    %425 = arith.mulf %420, %424 : vector<32x128xf32>
    %c7_176 = arith.constant 7 : index
    %c0_177 = arith.constant 0 : index
    %c0_178 = arith.constant 0 : index
    %426 = vector.load %arg14[%c7_176, %c0_177, %c0_178] : memref<8x32x128xf32, #tpu.memory_space<vmem>>, vector<1x32x128xf32>
    %427 = vector.shape_cast %426 : vector<1x32x128xf32> to vector<32x128xf32>
    %428 = vector.shape_cast %425 : vector<32x128xf32> to vector<1x32x128xf32>
    tpu.vector_store %arg14[%c7_176, %c0_177, %c0_178], %428 {strides = array<i32>} : memref<8x32x128xf32, #tpu.memory_space<vmem>>, vector<1x32x128xf32>,
    %c0_179 = arith.constant 0 : index
    %c0_180 = arith.constant 0 : index
    %429 = vector.load %arg4[%c0_179, %c0_180] : memref<5x32xbf16, #tpu.memory_space<vmem>>, vector<5x32xbf16>
    %430 = arith.truncf %425 : vector<32x128xf32> to vector<32x128xbf16>
    %cst_181 = arith.constant dense<0.000000e+00> : vector<5x128xf32>
    %431 = tpu.matmul %429, %430, %cst_181 {dimension_numbers = #tpu.dot_dimension_numbers<[1], [0], [0], [1], [0, 0, 1, 1], [], []>} : vector<5x32xbf16>, vector<32x128xbf16>, vector<5x128xf32> -> vector<5x128xf32>
    %432 = vector.extract_strided_slice %431 {offsets = [0, 0], sizes = [4, 128], strides = [1, 1]} : vector<5x128xf32> to vector<4x128xf32>
    %433 = vector.broadcast %0 : vector<4x1xf32> to vector<4x128xf32>
    %434 = arith.addf %432, %433 : vector<4x128xf32>
    %c7_182 = arith.constant 7 : index
    %c0_183 = arith.constant 0 : index
    %c0_184 = arith.constant 0 : index
    %435 = vector.load %arg12[%c7_182, %c0_183, %c0_184] : memref<8x4x128xf32, #tpu.memory_space<vmem>>, vector<1x4x128xf32>
    %436 = vector.shape_cast %435 : vector<1x4x128xf32> to vector<4x128xf32>
    %437 = vector.shape_cast %434 : vector<4x128xf32> to vector<1x4x128xf32>
    tpu.vector_store %arg12[%c7_182, %c0_183, %c0_184], %437 {strides = array<i32>} : memref<8x4x128xf32, #tpu.memory_space<vmem>>, vector<1x4x128xf32>,
    %438 = vector.extract_strided_slice %431 {offsets = [4, 0], sizes = [1, 128], strides = [1, 1]} : vector<5x128xf32> to vector<1x128xf32>
    %c1_i32 = arith.constant 1 : i32
    %439 = vector.broadcast %c1_i32 : i32 to vector<1x128xi32>
    %440 = arith.subi %393, %439 : vector<1x128xi32>
    %cst_185 = arith.constant 0.000000e+00 : f32
    %441 = vector.broadcast %cst_185 : f32 to vector<4x128xf32>
    %c0_i32_186 = arith.constant 0 : i32
    %442 = vector.broadcast %c0_i32_186 : i32 to vector<1x128xi32>
    %443 = arith.cmpi eq, %440, %442 : vector<1x128xi32>
    %c0_187 = arith.constant 0 : index
    %c0_188 = arith.constant 0 : index
    %c0_189 = arith.constant 0 : index
    %444 = vector.load %arg1[%c0_187, %c0_188, %c0_189] : memref<8x4x128xf32, #tpu.memory_space<vmem>>, vector<1x4x128xf32>
    %445 = vector.shape_cast %444 : vector<1x4x128xf32> to vector<4x128xf32>
    %cst_190 = arith.constant 0.000000e+00 : f32
    %446 = vector.shape_cast %443 : vector<1x128xi1> to vector<1x128xi1>
    %447 = vector.broadcast %446 : vector<1x128xi1> to vector<4x128xi1>
    %448 = vector.broadcast %cst_190 : f32 to vector<4x128xf32>
    %449 = arith.select %447, %445, %448 : vector<4x128xi1>, vector<4x128xf32>
    %450 = arith.addf %441, %449 : vector<4x128xf32>
    %c1_i32_191 = arith.constant 1 : i32
    %451 = vector.broadcast %c1_i32_191 : i32 to vector<1x128xi32>
    %452 = arith.cmpi eq, %440, %451 : vector<1x128xi32>
    %c1_192 = arith.constant 1 : index
    %c0_193 = arith.constant 0 : index
    %c0_194 = arith.constant 0 : index
    %453 = vector.load %arg1[%c1_192, %c0_193, %c0_194] : memref<8x4x128xf32, #tpu.memory_space<vmem>>, vector<1x4x128xf32>
    %454 = vector.shape_cast %453 : vector<1x4x128xf32> to vector<4x128xf32>
    %cst_195 = arith.constant 0.000000e+00 : f32
    %455 = vector.shape_cast %452 : vector<1x128xi1> to vector<1x128xi1>
    %456 = vector.broadcast %455 : vector<1x128xi1> to vector<4x128xi1>
    %457 = vector.broadcast %cst_195 : f32 to vector<4x128xf32>
    %458 = arith.select %456, %454, %457 : vector<4x128xi1>, vector<4x128xf32>
    %459 = arith.addf %450, %458 : vector<4x128xf32>
    %c2_i32 = arith.constant 2 : i32
    %460 = vector.broadcast %c2_i32 : i32 to vector<1x128xi32>
    %461 = arith.cmpi eq, %440, %460 : vector<1x128xi32>
    %c2_196 = arith.constant 2 : index
    %c0_197 = arith.constant 0 : index
    %c0_198 = arith.constant 0 : index
    %462 = vector.load %arg1[%c2_196, %c0_197, %c0_198] : memref<8x4x128xf32, #tpu.memory_space<vmem>>, vector<1x4x128xf32>
    %463 = vector.shape_cast %462 : vector<1x4x128xf32> to vector<4x128xf32>
    %cst_199 = arith.constant 0.000000e+00 : f32
    %464 = vector.shape_cast %461 : vector<1x128xi1> to vector<1x128xi1>
    %465 = vector.broadcast %464 : vector<1x128xi1> to vector<4x128xi1>
    %466 = vector.broadcast %cst_199 : f32 to vector<4x128xf32>
    %467 = arith.select %465, %463, %466 : vector<4x128xi1>, vector<4x128xf32>
    %468 = arith.addf %459, %467 : vector<4x128xf32>
    %c3_i32 = arith.constant 3 : i32
    %469 = vector.broadcast %c3_i32 : i32 to vector<1x128xi32>
    %470 = arith.cmpi eq, %440, %469 : vector<1x128xi32>
    %c3_200 = arith.constant 3 : index
    %c0_201 = arith.constant 0 : index
    %c0_202 = arith.constant 0 : index
    %471 = vector.load %arg1[%c3_200, %c0_201, %c0_202] : memref<8x4x128xf32, #tpu.memory_space<vmem>>, vector<1x4x128xf32>
    %472 = vector.shape_cast %471 : vector<1x4x128xf32> to vector<4x128xf32>
    %cst_203 = arith.constant 0.000000e+00 : f32
    %473 = vector.shape_cast %470 : vector<1x128xi1> to vector<1x128xi1>
    %474 = vector.broadcast %473 : vector<1x128xi1> to vector<4x128xi1>
    %475 = vector.broadcast %cst_203 : f32 to vector<4x128xf32>
    %476 = arith.select %474, %472, %475 : vector<4x128xi1>, vector<4x128xf32>
    %477 = arith.addf %468, %476 : vector<4x128xf32>
    %c4_i32 = arith.constant 4 : i32
    %478 = vector.broadcast %c4_i32 : i32 to vector<1x128xi32>
    %479 = arith.cmpi eq, %440, %478 : vector<1x128xi32>
    %c4_204 = arith.constant 4 : index
    %c0_205 = arith.constant 0 : index
    %c0_206 = arith.constant 0 : index
    %480 = vector.load %arg1[%c4_204, %c0_205, %c0_206] : memref<8x4x128xf32, #tpu.memory_space<vmem>>, vector<1x4x128xf32>
    %481 = vector.shape_cast %480 : vector<1x4x128xf32> to vector<4x128xf32>
    %cst_207 = arith.constant 0.000000e+00 : f32
    %482 = vector.shape_cast %479 : vector<1x128xi1> to vector<1x128xi1>
    %483 = vector.broadcast %482 : vector<1x128xi1> to vector<4x128xi1>
    %484 = vector.broadcast %cst_207 : f32 to vector<4x128xf32>
    %485 = arith.select %483, %481, %484 : vector<4x128xi1>, vector<4x128xf32>
    %486 = arith.addf %477, %485 : vector<4x128xf32>
    %c5_i32 = arith.constant 5 : i32
    %487 = vector.broadcast %c5_i32 : i32 to vector<1x128xi32>
    %488 = arith.cmpi eq, %440, %487 : vector<1x128xi32>
    %c5_208 = arith.constant 5 : index
    %c0_209 = arith.constant 0 : index
    %c0_210 = arith.constant 0 : index
    %489 = vector.load %arg1[%c5_208, %c0_209, %c0_210] : memref<8x4x128xf32, #tpu.memory_space<vmem>>, vector<1x4x128xf32>
    %490 = vector.shape_cast %489 : vector<1x4x128xf32> to vector<4x128xf32>
    %cst_211 = arith.constant 0.000000e+00 : f32
    %491 = vector.shape_cast %488 : vector<1x128xi1> to vector<1x128xi1>
    %492 = vector.broadcast %491 : vector<1x128xi1> to vector<4x128xi1>
    %493 = vector.broadcast %cst_211 : f32 to vector<4x128xf32>
    %494 = arith.select %492, %490, %493 : vector<4x128xi1>, vector<4x128xf32>
    %495 = arith.addf %486, %494 : vector<4x128xf32>
    %c6_i32 = arith.constant 6 : i32
    %496 = vector.broadcast %c6_i32 : i32 to vector<1x128xi32>
    %497 = arith.cmpi eq, %440, %496 : vector<1x128xi32>
    %c6_212 = arith.constant 6 : index
    %c0_213 = arith.constant 0 : index
    %c0_214 = arith.constant 0 : index
    %498 = vector.load %arg1[%c6_212, %c0_213, %c0_214] : memref<8x4x128xf32, #tpu.memory_space<vmem>>, vector<1x4x128xf32>
    %499 = vector.shape_cast %498 : vector<1x4x128xf32> to vector<4x128xf32>
    %cst_215 = arith.constant 0.000000e+00 : f32
    %500 = vector.shape_cast %497 : vector<1x128xi1> to vector<1x128xi1>
    %501 = vector.broadcast %500 : vector<1x128xi1> to vector<4x128xi1>
    %502 = vector.broadcast %cst_215 : f32 to vector<4x128xf32>
    %503 = arith.select %501, %499, %502 : vector<4x128xi1>, vector<4x128xf32>
    %504 = arith.addf %495, %503 : vector<4x128xf32>
    %c7_i32 = arith.constant 7 : i32
    %505 = vector.broadcast %c7_i32 : i32 to vector<1x128xi32>
    %506 = arith.cmpi eq, %440, %505 : vector<1x128xi32>
    %c7_216 = arith.constant 7 : index
    %c0_217 = arith.constant 0 : index
    %c0_218 = arith.constant 0 : index
    %507 = vector.load %arg1[%c7_216, %c0_217, %c0_218] : memref<8x4x128xf32, #tpu.memory_space<vmem>>, vector<1x4x128xf32>
    %508 = vector.shape_cast %507 : vector<1x4x128xf32> to vector<4x128xf32>
    %cst_219 = arith.constant 0.000000e+00 : f32
    %509 = vector.shape_cast %506 : vector<1x128xi1> to vector<1x128xi1>
    %510 = vector.broadcast %509 : vector<1x128xi1> to vector<4x128xi1>
    %511 = vector.broadcast %cst_219 : f32 to vector<4x128xf32>
    %512 = arith.select %510, %508, %511 : vector<4x128xi1>, vector<4x128xf32>
    %513 = arith.addf %504, %512 : vector<4x128xf32>
    %514 = vector.broadcast %1 : vector<4x1xf32> to vector<4x128xf32>
    %515 = arith.mulf %514, %513 : vector<4x128xf32>
    %cst_220 = arith.constant dense<0.000000e+00> : vector<128xf32>
    %516 = vector.multi_reduction <add>, %515, %cst_220 [0] : vector<4x128xf32> to vector<128xf32>
    %517 = vector.shape_cast %516 : vector<128xf32> to vector<1x128xf32>
    %518 = vector.broadcast %2 : vector<1x1xf32> to vector<1x128xf32>
    %519 = arith.addf %517, %518 : vector<1x128xf32>
    %520 = tpu.concatenate %60, %114, %168, %222, %276, %330, %384, %438 in 0 : vector<1x128xf32>, vector<1x128xf32>, vector<1x128xf32>, vector<1x128xf32>, vector<1x128xf32>, vector<1x128xf32>, vector<1x128xf32>, vector<1x128xf32> -> vector<8x128xf32>
    %521 = vector.broadcast %519 : vector<1x128xf32> to vector<8x128xf32>
    %522 = arith.addf %520, %521 : vector<8x128xf32>
    %523 = tpu.iota {dimensions = array<i32: 0>} : vector<8x1xi32>
    %524 = vector.broadcast %523 : vector<8x1xi32> to vector<8x128xi32>
    %525 = vector.broadcast %440 : vector<1x128xi32> to vector<8x128xi32>
    %526 = arith.cmpi sge, %524, %525 : vector<8x128xi32>
    %cst_221 = arith.constant -1.000000e+10 : f32
    %527 = vector.broadcast %cst_221 : f32 to vector<8x128xf32>
    %528 = arith.select %526, %527, %522 : vector<8x128xi1>, vector<8x128xf32>
    %cst_222 = arith.constant dense<0xFF800000> : vector<128xf32>
    %529 = vector.multi_reduction <maximumf>, %528, %cst_222 [0] : vector<8x128xf32> to vector<128xf32>
    %530 = vector.shape_cast %529 : vector<128xf32> to vector<1x128xf32>
    %531 = vector.broadcast %530 : vector<1x128xf32> to vector<8x128xf32>
    %532 = arith.subf %528, %531 : vector<8x128xf32>
    %533 = math.exp %532 : vector<8x128xf32>
    %cst_223 = arith.constant dense<0.000000e+00> : vector<128xf32>
    %534 = vector.multi_reduction <add>, %533, %cst_223 [0] : vector<8x128xf32> to vector<128xf32>
    %535 = vector.shape_cast %534 : vector<128xf32> to vector<1x128xf32>
    %536 = vector.broadcast %535 : vector<1x128xf32> to vector<8x128xf32>
    %537 = arith.divf %533, %536 : vector<8x128xf32>
    %cst_224 = arith.constant 0.000000e+00 : f32
    %538 = vector.broadcast %cst_224 : f32 to vector<32x128xf32>
    %539 = vector.extract_strided_slice %537 {offsets = [0, 0], sizes = [1, 128], strides = [1, 1]} : vector<8x128xf32> to vector<1x128xf32>
    %c0_225 = arith.constant 0 : index
    %c0_226 = arith.constant 0 : index
    %c0_227 = arith.constant 0 : index
    %540 = vector.load %arg14[%c0_225, %c0_226, %c0_227] : memref<8x32x128xf32, #tpu.memory_space<vmem>>, vector<1x32x128xf32>
    %541 = vector.shape_cast %540 : vector<1x32x128xf32> to vector<32x128xf32>
    %542 = vector.broadcast %539 : vector<1x128xf32> to vector<32x128xf32>
    %543 = arith.mulf %542, %541 : vector<32x128xf32>
    %544 = arith.addf %538, %543 : vector<32x128xf32>
    %545 = vector.extract_strided_slice %537 {offsets = [1, 0], sizes = [1, 128], strides = [1, 1]} : vector<8x128xf32> to vector<1x128xf32>
    %c1_228 = arith.constant 1 : index
    %c0_229 = arith.constant 0 : index
    %c0_230 = arith.constant 0 : index
    %546 = vector.load %arg14[%c1_228, %c0_229, %c0_230] : memref<8x32x128xf32, #tpu.memory_space<vmem>>, vector<1x32x128xf32>
    %547 = vector.shape_cast %546 : vector<1x32x128xf32> to vector<32x128xf32>
    %548 = vector.broadcast %545 : vector<1x128xf32> to vector<32x128xf32>
    %549 = arith.mulf %548, %547 : vector<32x128xf32>
    %550 = arith.addf %544, %549 : vector<32x128xf32>
    %551 = vector.extract_strided_slice %537 {offsets = [2, 0], sizes = [1, 128], strides = [1, 1]} : vector<8x128xf32> to vector<1x128xf32>
    %c2_231 = arith.constant 2 : index
    %c0_232 = arith.constant 0 : index
    %c0_233 = arith.constant 0 : index
    %552 = vector.load %arg14[%c2_231, %c0_232, %c0_233] : memref<8x32x128xf32, #tpu.memory_space<vmem>>, vector<1x32x128xf32>
    %553 = vector.shape_cast %552 : vector<1x32x128xf32> to vector<32x128xf32>
    %554 = vector.broadcast %551 : vector<1x128xf32> to vector<32x128xf32>
    %555 = arith.mulf %554, %553 : vector<32x128xf32>
    %556 = arith.addf %550, %555 : vector<32x128xf32>
    %557 = vector.extract_strided_slice %537 {offsets = [3, 0], sizes = [1, 128], strides = [1, 1]} : vector<8x128xf32> to vector<1x128xf32>
    %c3_234 = arith.constant 3 : index
    %c0_235 = arith.constant 0 : index
    %c0_236 = arith.constant 0 : index
    %558 = vector.load %arg14[%c3_234, %c0_235, %c0_236] : memref<8x32x128xf32, #tpu.memory_space<vmem>>, vector<1x32x128xf32>
    %559 = vector.shape_cast %558 : vector<1x32x128xf32> to vector<32x128xf32>
    %560 = vector.broadcast %557 : vector<1x128xf32> to vector<32x128xf32>
    %561 = arith.mulf %560, %559 : vector<32x128xf32>
    %562 = arith.addf %556, %561 : vector<32x128xf32>
    %563 = vector.extract_strided_slice %537 {offsets = [4, 0], sizes = [1, 128], strides = [1, 1]} : vector<8x128xf32> to vector<1x128xf32>
    %c4_237 = arith.constant 4 : index
    %c0_238 = arith.constant 0 : index
    %c0_239 = arith.constant 0 : index
    %564 = vector.load %arg14[%c4_237, %c0_238, %c0_239] : memref<8x32x128xf32, #tpu.memory_space<vmem>>, vector<1x32x128xf32>
    %565 = vector.shape_cast %564 : vector<1x32x128xf32> to vector<32x128xf32>
    %566 = vector.broadcast %563 : vector<1x128xf32> to vector<32x128xf32>
    %567 = arith.mulf %566, %565 : vector<32x128xf32>
    %568 = arith.addf %562, %567 : vector<32x128xf32>
    %569 = vector.extract_strided_slice %537 {offsets = [5, 0], sizes = [1, 128], strides = [1, 1]} : vector<8x128xf32> to vector<1x128xf32>
    %c5_240 = arith.constant 5 : index
    %c0_241 = arith.constant 0 : index
    %c0_242 = arith.constant 0 : index
    %570 = vector.load %arg14[%c5_240, %c0_241, %c0_242] : memref<8x32x128xf32, #tpu.memory_space<vmem>>, vector<1x32x128xf32>
    %571 = vector.shape_cast %570 : vector<1x32x128xf32> to vector<32x128xf32>
    %572 = vector.broadcast %569 : vector<1x128xf32> to vector<32x128xf32>
    %573 = arith.mulf %572, %571 : vector<32x128xf32>
    %574 = arith.addf %568, %573 : vector<32x128xf32>
    %575 = vector.extract_strided_slice %537 {offsets = [6, 0], sizes = [1, 128], strides = [1, 1]} : vector<8x128xf32> to vector<1x128xf32>
    %c6_243 = arith.constant 6 : index
    %c0_244 = arith.constant 0 : index
    %c0_245 = arith.constant 0 : index
    %576 = vector.load %arg14[%c6_243, %c0_244, %c0_245] : memref<8x32x128xf32, #tpu.memory_space<vmem>>, vector<1x32x128xf32>
    %577 = vector.shape_cast %576 : vector<1x32x128xf32> to vector<32x128xf32>
    %578 = vector.broadcast %575 : vector<1x128xf32> to vector<32x128xf32>
    %579 = arith.mulf %578, %577 : vector<32x128xf32>
    %580 = arith.addf %574, %579 : vector<32x128xf32>
    %581 = vector.extract_strided_slice %537 {offsets = [7, 0], sizes = [1, 128], strides = [1, 1]} : vector<8x128xf32> to vector<1x128xf32>
    %c7_246 = arith.constant 7 : index
    %c0_247 = arith.constant 0 : index
    %c0_248 = arith.constant 0 : index
    %582 = vector.load %arg14[%c7_246, %c0_247, %c0_248] : memref<8x32x128xf32, #tpu.memory_space<vmem>>, vector<1x32x128xf32>
    %583 = vector.shape_cast %582 : vector<1x32x128xf32> to vector<32x128xf32>
    %584 = vector.broadcast %581 : vector<1x128xf32> to vector<32x128xf32>
    %585 = arith.mulf %584, %583 : vector<32x128xf32>
    %586 = arith.addf %580, %585 : vector<32x128xf32>
    %c1_i32_249 = arith.constant 1 : i32
    %587 = vector.broadcast %c1_i32_249 : i32 to vector<1x128xi32>
    %588 = arith.cmpi sge, %440, %587 : vector<1x128xi32>
    %cst_250 = arith.constant 0.000000e+00 : f32
    %589 = vector.shape_cast %588 : vector<1x128xi1> to vector<1x128xi1>
    %590 = vector.broadcast %589 : vector<1x128xi1> to vector<32x128xi1>
    %591 = vector.broadcast %cst_250 : f32 to vector<32x128xf32>
    %592 = arith.select %590, %586, %591 : vector<32x128xi1>, vector<32x128xf32>
    %cst_251 = arith.constant 0.000000e+00 : f32
    %593 = vector.broadcast %cst_251 : f32 to vector<4x128xf32>
    %594 = tpu.concatenate %592, %513, %593 in 0 : vector<32x128xf32>, vector<4x128xf32>, vector<4x128xf32> -> vector<40x128xf32>
    %c0_252 = arith.constant 0 : index
    %c0_253 = arith.constant 0 : index
    %595 = vector.load %arg8[%c0_252, %c0_253] : memref<160x40xbf16, #tpu.memory_space<vmem>>, vector<160x40xbf16>
    %596 = arith.truncf %594 : vector<40x128xf32> to vector<40x128xbf16>
    %cst_254 = arith.constant dense<0.000000e+00> : vector<160x128xf32>
    %597 = tpu.matmul %595, %596, %cst_254 {dimension_numbers = #tpu.dot_dimension_numbers<[1], [0], [0], [1], [0, 0, 1, 1], [], []>} : vector<160x40xbf16>, vector<40x128xbf16>, vector<160x128xf32> -> vector<160x128xf32>
    %c0_255 = arith.constant 0 : index
    %c0_256 = arith.constant 0 : index
    %598 = vector.load %arg9[%c0_255, %c0_256] : memref<161x40xbf16, #tpu.memory_space<vmem>>, vector<161x40xbf16>
    %599 = arith.truncf %594 : vector<40x128xf32> to vector<40x128xbf16>
    %cst_257 = arith.constant dense<0.000000e+00> : vector<161x128xf32>
    %600 = tpu.matmul %598, %599, %cst_257 {dimension_numbers = #tpu.dot_dimension_numbers<[1], [0], [0], [1], [0, 0, 1, 1], [], []>} : vector<161x40xbf16>, vector<40x128xbf16>, vector<161x128xf32> -> vector<161x128xf32>
    %601 = vector.extract_strided_slice %600 {offsets = [0, 0], sizes = [160, 128], strides = [1, 1]} : vector<161x128xf32> to vector<160x128xf32>
    %602 = arith.addf %597, %601 : vector<160x128xf32>
    %603 = vector.extract_strided_slice %602 {offsets = [0, 0], sizes = [40, 128], strides = [1, 1]} : vector<160x128xf32> to vector<40x128xf32>
    %604 = arith.negf %603 : vector<40x128xf32>
    %605 = math.exp %604 : vector<40x128xf32>
    %cst_258 = arith.constant 1.000000e+00 : f32
    %606 = vector.broadcast %cst_258 : f32 to vector<40x128xf32>
    %607 = arith.addf %606, %605 : vector<40x128xf32>
    %608 = arith.divf %606, %607 : vector<40x128xf32>
    %609 = vector.extract_strided_slice %602 {offsets = [40, 0], sizes = [40, 128], strides = [1, 1]} : vector<160x128xf32> to vector<40x128xf32>
    %610 = arith.negf %609 : vector<40x128xf32>
    %611 = math.exp %610 : vector<40x128xf32>
    %cst_259 = arith.constant 1.000000e+00 : f32
    %612 = vector.broadcast %cst_259 : f32 to vector<40x128xf32>
    %613 = arith.addf %612, %611 : vector<40x128xf32>
    %614 = arith.divf %612, %613 : vector<40x128xf32>
    %615 = vector.extract_strided_slice %602 {offsets = [80, 0], sizes = [40, 128], strides = [1, 1]} : vector<160x128xf32> to vector<40x128xf32>
    %616 = math.tanh %615 : vector<40x128xf32>
    %617 = vector.extract_strided_slice %602 {offsets = [120, 0], sizes = [40, 128], strides = [1, 1]} : vector<160x128xf32> to vector<40x128xf32>
    %618 = arith.negf %617 : vector<40x128xf32>
    %619 = math.exp %618 : vector<40x128xf32>
    %cst_260 = arith.constant 1.000000e+00 : f32
    %620 = vector.broadcast %cst_260 : f32 to vector<40x128xf32>
    %621 = arith.addf %620, %619 : vector<40x128xf32>
    %622 = arith.divf %620, %621 : vector<40x128xf32>
    %623 = arith.mulf %614, %594 : vector<40x128xf32>
    %624 = arith.mulf %608, %616 : vector<40x128xf32>
    %625 = arith.addf %623, %624 : vector<40x128xf32>
    %626 = math.tanh %625 : vector<40x128xf32>
    %627 = arith.mulf %622, %626 : vector<40x128xf32>
    %c0_261 = arith.constant 0 : index
    %c0_262 = arith.constant 0 : index
    %628 = vector.load %arg9[%c0_261, %c0_262] : memref<161x40xbf16, #tpu.memory_space<vmem>>, vector<161x40xbf16>
    %629 = arith.truncf %627 : vector<40x128xf32> to vector<40x128xbf16>
    %cst_263 = arith.constant dense<0.000000e+00> : vector<161x128xf32>
    %630 = tpu.matmul %628, %629, %cst_263 {dimension_numbers = #tpu.dot_dimension_numbers<[1], [0], [0], [1], [0, 0, 1, 1], [], []>} : vector<161x40xbf16>, vector<40x128xbf16>, vector<161x128xf32> -> vector<161x128xf32>
    %631 = vector.extract_strided_slice %630 {offsets = [160, 0], sizes = [1, 128], strides = [1, 1]} : vector<161x128xf32> to vector<1x128xf32>
    %632 = vector.extract_strided_slice %630 {offsets = [0, 0], sizes = [160, 128], strides = [1, 1]} : vector<161x128xf32> to vector<160x128xf32>
    %633 = arith.addf %597, %632 : vector<160x128xf32>
    %634 = vector.extract_strided_slice %633 {offsets = [0, 0], sizes = [40, 128], strides = [1, 1]} : vector<160x128xf32> to vector<40x128xf32>
    %635 = arith.negf %634 : vector<40x128xf32>
    %636 = math.exp %635 : vector<40x128xf32>
    %cst_264 = arith.constant 1.000000e+00 : f32
    %637 = vector.broadcast %cst_264 : f32 to vector<40x128xf32>
    %638 = arith.addf %637, %636 : vector<40x128xf32>
    %639 = arith.divf %637, %638 : vector<40x128xf32>
    %640 = vector.extract_strided_slice %633 {offsets = [40, 0], sizes = [40, 128], strides = [1, 1]} : vector<160x128xf32> to vector<40x128xf32>
    %641 = arith.negf %640 : vector<40x128xf32>
    %642 = math.exp %641 : vector<40x128xf32>
    %cst_265 = arith.constant 1.000000e+00 : f32
    %643 = vector.broadcast %cst_265 : f32 to vector<40x128xf32>
    %644 = arith.addf %643, %642 : vector<40x128xf32>
    %645 = arith.divf %643, %644 : vector<40x128xf32>
    %646 = vector.extract_strided_slice %633 {offsets = [80, 0], sizes = [40, 128], strides = [1, 1]} : vector<160x128xf32> to vector<40x128xf32>
    %647 = math.tanh %646 : vector<40x128xf32>
    %648 = vector.extract_strided_slice %633 {offsets = [120, 0], sizes = [40, 128], strides = [1, 1]} : vector<160x128xf32> to vector<40x128xf32>
    %649 = arith.negf %648 : vector<40x128xf32>
    %650 = math.exp %649 : vector<40x128xf32>
    %cst_266 = arith.constant 1.000000e+00 : f32
    %651 = vector.broadcast %cst_266 : f32 to vector<40x128xf32>
    %652 = arith.addf %651, %650 : vector<40x128xf32>
    %653 = arith.divf %651, %652 : vector<40x128xf32>
    %654 = arith.mulf %645, %625 : vector<40x128xf32>
    %655 = arith.mulf %639, %647 : vector<40x128xf32>
    %656 = arith.addf %654, %655 : vector<40x128xf32>
    %657 = math.tanh %656 : vector<40x128xf32>
    %658 = arith.mulf %653, %657 : vector<40x128xf32>
    %c0_267 = arith.constant 0 : index
    %c0_268 = arith.constant 0 : index
    %659 = vector.load %arg9[%c0_267, %c0_268] : memref<161x40xbf16, #tpu.memory_space<vmem>>, vector<161x40xbf16>
    %660 = arith.truncf %658 : vector<40x128xf32> to vector<40x128xbf16>
    %cst_269 = arith.constant dense<0.000000e+00> : vector<161x128xf32>
    %661 = tpu.matmul %659, %660, %cst_269 {dimension_numbers = #tpu.dot_dimension_numbers<[1], [0], [0], [1], [0, 0, 1, 1], [], []>} : vector<161x40xbf16>, vector<40x128xbf16>, vector<161x128xf32> -> vector<161x128xf32>
    %662 = vector.extract_strided_slice %661 {offsets = [160, 0], sizes = [1, 128], strides = [1, 1]} : vector<161x128xf32> to vector<1x128xf32>
    %663 = vector.extract_strided_slice %661 {offsets = [0, 0], sizes = [160, 128], strides = [1, 1]} : vector<161x128xf32> to vector<160x128xf32>
    %664 = arith.addf %597, %663 : vector<160x128xf32>
    %665 = vector.extract_strided_slice %664 {offsets = [0, 0], sizes = [40, 128], strides = [1, 1]} : vector<160x128xf32> to vector<40x128xf32>
    %666 = arith.negf %665 : vector<40x128xf32>
    %667 = math.exp %666 : vector<40x128xf32>
    %cst_270 = arith.constant 1.000000e+00 : f32
    %668 = vector.broadcast %cst_270 : f32 to vector<40x128xf32>
    %669 = arith.addf %668, %667 : vector<40x128xf32>
    %670 = arith.divf %668, %669 : vector<40x128xf32>
    %671 = vector.extract_strided_slice %664 {offsets = [40, 0], sizes = [40, 128], strides = [1, 1]} : vector<160x128xf32> to vector<40x128xf32>
    %672 = arith.negf %671 : vector<40x128xf32>
    %673 = math.exp %672 : vector<40x128xf32>
    %cst_271 = arith.constant 1.000000e+00 : f32
    %674 = vector.broadcast %cst_271 : f32 to vector<40x128xf32>
    %675 = arith.addf %674, %673 : vector<40x128xf32>
    %676 = arith.divf %674, %675 : vector<40x128xf32>
    %677 = vector.extract_strided_slice %664 {offsets = [80, 0], sizes = [40, 128], strides = [1, 1]} : vector<160x128xf32> to vector<40x128xf32>
    %678 = math.tanh %677 : vector<40x128xf32>
    %679 = vector.extract_strided_slice %664 {offsets = [120, 0], sizes = [40, 128], strides = [1, 1]} : vector<160x128xf32> to vector<40x128xf32>
    %680 = arith.negf %679 : vector<40x128xf32>
    %681 = math.exp %680 : vector<40x128xf32>
    %cst_272 = arith.constant 1.000000e+00 : f32
    %682 = vector.broadcast %cst_272 : f32 to vector<40x128xf32>
    %683 = arith.addf %682, %681 : vector<40x128xf32>
    %684 = arith.divf %682, %683 : vector<40x128xf32>
    %685 = arith.mulf %676, %656 : vector<40x128xf32>
    %686 = arith.mulf %670, %678 : vector<40x128xf32>
    %687 = arith.addf %685, %686 : vector<40x128xf32>
    %688 = math.tanh %687 : vector<40x128xf32>
    %689 = arith.mulf %684, %688 : vector<40x128xf32>
    %c0_273 = arith.constant 0 : index
    %c0_274 = arith.constant 0 : index
    %690 = vector.load %arg9[%c0_273, %c0_274] : memref<161x40xbf16, #tpu.memory_space<vmem>>, vector<161x40xbf16>
    %691 = arith.truncf %689 : vector<40x128xf32> to vector<40x128xbf16>
    %cst_275 = arith.constant dense<0.000000e+00> : vector<161x128xf32>
    %692 = tpu.matmul %690, %691, %cst_275 {dimension_numbers = #tpu.dot_dimension_numbers<[1], [0], [0], [1], [0, 0, 1, 1], [], []>} : vector<161x40xbf16>, vector<40x128xbf16>, vector<161x128xf32> -> vector<161x128xf32>
    %693 = vector.extract_strided_slice %692 {offsets = [160, 0], sizes = [1, 128], strides = [1, 1]} : vector<161x128xf32> to vector<1x128xf32>
    %694 = vector.extract_strided_slice %692 {offsets = [0, 0], sizes = [160, 128], strides = [1, 1]} : vector<161x128xf32> to vector<160x128xf32>
    %695 = arith.addf %597, %694 : vector<160x128xf32>
    %696 = vector.extract_strided_slice %695 {offsets = [0, 0], sizes = [40, 128], strides = [1, 1]} : vector<160x128xf32> to vector<40x128xf32>
    %697 = arith.negf %696 : vector<40x128xf32>
    %698 = math.exp %697 : vector<40x128xf32>
    %cst_276 = arith.constant 1.000000e+00 : f32
    %699 = vector.broadcast %cst_276 : f32 to vector<40x128xf32>
    %700 = arith.addf %699, %698 : vector<40x128xf32>
    %701 = arith.divf %699, %700 : vector<40x128xf32>
    %702 = vector.extract_strided_slice %695 {offsets = [40, 0], sizes = [40, 128], strides = [1, 1]} : vector<160x128xf32> to vector<40x128xf32>
    %703 = arith.negf %702 : vector<40x128xf32>
    %704 = math.exp %703 : vector<40x128xf32>
    %cst_277 = arith.constant 1.000000e+00 : f32
    %705 = vector.broadcast %cst_277 : f32 to vector<40x128xf32>
    %706 = arith.addf %705, %704 : vector<40x128xf32>
    %707 = arith.divf %705, %706 : vector<40x128xf32>
    %708 = vector.extract_strided_slice %695 {offsets = [80, 0], sizes = [40, 128], strides = [1, 1]} : vector<160x128xf32> to vector<40x128xf32>
    %709 = math.tanh %708 : vector<40x128xf32>
    %710 = vector.extract_strided_slice %695 {offsets = [120, 0], sizes = [40, 128], strides = [1, 1]} : vector<160x128xf32> to vector<40x128xf32>
    %711 = arith.negf %710 : vector<40x128xf32>
    %712 = math.exp %711 : vector<40x128xf32>
    %cst_278 = arith.constant 1.000000e+00 : f32
    %713 = vector.broadcast %cst_278 : f32 to vector<40x128xf32>
    %714 = arith.addf %713, %712 : vector<40x128xf32>
    %715 = arith.divf %713, %714 : vector<40x128xf32>
    %716 = arith.mulf %707, %687 : vector<40x128xf32>
    %717 = arith.mulf %701, %709 : vector<40x128xf32>
    %718 = arith.addf %716, %717 : vector<40x128xf32>
    %719 = math.tanh %718 : vector<40x128xf32>
    %720 = arith.mulf %715, %719 : vector<40x128xf32>
    %c0_279 = arith.constant 0 : index
    %c0_280 = arith.constant 0 : index
    %721 = vector.load %arg9[%c0_279, %c0_280] : memref<161x40xbf16, #tpu.memory_space<vmem>>, vector<161x40xbf16>
    %722 = arith.truncf %720 : vector<40x128xf32> to vector<40x128xbf16>
    %cst_281 = arith.constant dense<0.000000e+00> : vector<161x128xf32>
    %723 = tpu.matmul %721, %722, %cst_281 {dimension_numbers = #tpu.dot_dimension_numbers<[1], [0], [0], [1], [0, 0, 1, 1], [], []>} : vector<161x40xbf16>, vector<40x128xbf16>, vector<161x128xf32> -> vector<161x128xf32>
    %724 = vector.extract_strided_slice %723 {offsets = [160, 0], sizes = [1, 128], strides = [1, 1]} : vector<161x128xf32> to vector<1x128xf32>
    %725 = vector.extract_strided_slice %723 {offsets = [0, 0], sizes = [160, 128], strides = [1, 1]} : vector<161x128xf32> to vector<160x128xf32>
    %726 = arith.addf %597, %725 : vector<160x128xf32>
    %727 = vector.extract_strided_slice %726 {offsets = [0, 0], sizes = [40, 128], strides = [1, 1]} : vector<160x128xf32> to vector<40x128xf32>
    %728 = arith.negf %727 : vector<40x128xf32>
    %729 = math.exp %728 : vector<40x128xf32>
    %cst_282 = arith.constant 1.000000e+00 : f32
    %730 = vector.broadcast %cst_282 : f32 to vector<40x128xf32>
    %731 = arith.addf %730, %729 : vector<40x128xf32>
    %732 = arith.divf %730, %731 : vector<40x128xf32>
    %733 = vector.extract_strided_slice %726 {offsets = [40, 0], sizes = [40, 128], strides = [1, 1]} : vector<160x128xf32> to vector<40x128xf32>
    %734 = arith.negf %733 : vector<40x128xf32>
    %735 = math.exp %734 : vector<40x128xf32>
    %cst_283 = arith.constant 1.000000e+00 : f32
    %736 = vector.broadcast %cst_283 : f32 to vector<40x128xf32>
    %737 = arith.addf %736, %735 : vector<40x128xf32>
    %738 = arith.divf %736, %737 : vector<40x128xf32>
    %739 = vector.extract_strided_slice %726 {offsets = [80, 0], sizes = [40, 128], strides = [1, 1]} : vector<160x128xf32> to vector<40x128xf32>
    %740 = math.tanh %739 : vector<40x128xf32>
    %741 = vector.extract_strided_slice %726 {offsets = [120, 0], sizes = [40, 128], strides = [1, 1]} : vector<160x128xf32> to vector<40x128xf32>
    %742 = arith.negf %741 : vector<40x128xf32>
    %743 = math.exp %742 : vector<40x128xf32>
    %cst_284 = arith.constant 1.000000e+00 : f32
    %744 = vector.broadcast %cst_284 : f32 to vector<40x128xf32>
    %745 = arith.addf %744, %743 : vector<40x128xf32>
    %746 = arith.divf %744, %745 : vector<40x128xf32>
    %747 = arith.mulf %738, %718 : vector<40x128xf32>
    %748 = arith.mulf %732, %740 : vector<40x128xf32>
    %749 = arith.addf %747, %748 : vector<40x128xf32>
    %750 = math.tanh %749 : vector<40x128xf32>
    %751 = arith.mulf %746, %750 : vector<40x128xf32>
    %c0_285 = arith.constant 0 : index
    %c0_286 = arith.constant 0 : index
    %752 = vector.load %arg9[%c0_285, %c0_286] : memref<161x40xbf16, #tpu.memory_space<vmem>>, vector<161x40xbf16>
    %753 = arith.truncf %751 : vector<40x128xf32> to vector<40x128xbf16>
    %cst_287 = arith.constant dense<0.000000e+00> : vector<161x128xf32>
    %754 = tpu.matmul %752, %753, %cst_287 {dimension_numbers = #tpu.dot_dimension_numbers<[1], [0], [0], [1], [0, 0, 1, 1], [], []>} : vector<161x40xbf16>, vector<40x128xbf16>, vector<161x128xf32> -> vector<161x128xf32>
    %755 = vector.extract_strided_slice %754 {offsets = [160, 0], sizes = [1, 128], strides = [1, 1]} : vector<161x128xf32> to vector<1x128xf32>
    %756 = vector.extract_strided_slice %754 {offsets = [0, 0], sizes = [160, 128], strides = [1, 1]} : vector<161x128xf32> to vector<160x128xf32>
    %757 = arith.addf %597, %756 : vector<160x128xf32>
    %758 = vector.extract_strided_slice %757 {offsets = [0, 0], sizes = [40, 128], strides = [1, 1]} : vector<160x128xf32> to vector<40x128xf32>
    %759 = arith.negf %758 : vector<40x128xf32>
    %760 = math.exp %759 : vector<40x128xf32>
    %cst_288 = arith.constant 1.000000e+00 : f32
    %761 = vector.broadcast %cst_288 : f32 to vector<40x128xf32>
    %762 = arith.addf %761, %760 : vector<40x128xf32>
    %763 = arith.divf %761, %762 : vector<40x128xf32>
    %764 = vector.extract_strided_slice %757 {offsets = [40, 0], sizes = [40, 128], strides = [1, 1]} : vector<160x128xf32> to vector<40x128xf32>
    %765 = arith.negf %764 : vector<40x128xf32>
    %766 = math.exp %765 : vector<40x128xf32>
    %cst_289 = arith.constant 1.000000e+00 : f32
    %767 = vector.broadcast %cst_289 : f32 to vector<40x128xf32>
    %768 = arith.addf %767, %766 : vector<40x128xf32>
    %769 = arith.divf %767, %768 : vector<40x128xf32>
    %770 = vector.extract_strided_slice %757 {offsets = [80, 0], sizes = [40, 128], strides = [1, 1]} : vector<160x128xf32> to vector<40x128xf32>
    %771 = math.tanh %770 : vector<40x128xf32>
    %772 = vector.extract_strided_slice %757 {offsets = [120, 0], sizes = [40, 128], strides = [1, 1]} : vector<160x128xf32> to vector<40x128xf32>
    %773 = arith.negf %772 : vector<40x128xf32>
    %774 = math.exp %773 : vector<40x128xf32>
    %cst_290 = arith.constant 1.000000e+00 : f32
    %775 = vector.broadcast %cst_290 : f32 to vector<40x128xf32>
    %776 = arith.addf %775, %774 : vector<40x128xf32>
    %777 = arith.divf %775, %776 : vector<40x128xf32>
    %778 = arith.mulf %769, %749 : vector<40x128xf32>
    %779 = arith.mulf %763, %771 : vector<40x128xf32>
    %780 = arith.addf %778, %779 : vector<40x128xf32>
    %781 = math.tanh %780 : vector<40x128xf32>
    %782 = arith.mulf %777, %781 : vector<40x128xf32>
    %c0_291 = arith.constant 0 : index
    %c0_292 = arith.constant 0 : index
    %783 = vector.load %arg9[%c0_291, %c0_292] : memref<161x40xbf16, #tpu.memory_space<vmem>>, vector<161x40xbf16>
    %784 = arith.truncf %782 : vector<40x128xf32> to vector<40x128xbf16>
    %cst_293 = arith.constant dense<0.000000e+00> : vector<161x128xf32>
    %785 = tpu.matmul %783, %784, %cst_293 {dimension_numbers = #tpu.dot_dimension_numbers<[1], [0], [0], [1], [0, 0, 1, 1], [], []>} : vector<161x40xbf16>, vector<40x128xbf16>, vector<161x128xf32> -> vector<161x128xf32>
    %786 = vector.extract_strided_slice %785 {offsets = [160, 0], sizes = [1, 128], strides = [1, 1]} : vector<161x128xf32> to vector<1x128xf32>
    %787 = vector.extract_strided_slice %785 {offsets = [0, 0], sizes = [160, 128], strides = [1, 1]} : vector<161x128xf32> to vector<160x128xf32>
    %788 = arith.addf %597, %787 : vector<160x128xf32>
    %789 = vector.extract_strided_slice %788 {offsets = [0, 0], sizes = [40, 128], strides = [1, 1]} : vector<160x128xf32> to vector<40x128xf32>
    %790 = arith.negf %789 : vector<40x128xf32>
    %791 = math.exp %790 : vector<40x128xf32>
    %cst_294 = arith.constant 1.000000e+00 : f32
    %792 = vector.broadcast %cst_294 : f32 to vector<40x128xf32>
    %793 = arith.addf %792, %791 : vector<40x128xf32>
    %794 = arith.divf %792, %793 : vector<40x128xf32>
    %795 = vector.extract_strided_slice %788 {offsets = [40, 0], sizes = [40, 128], strides = [1, 1]} : vector<160x128xf32> to vector<40x128xf32>
    %796 = arith.negf %795 : vector<40x128xf32>
    %797 = math.exp %796 : vector<40x128xf32>
    %cst_295 = arith.constant 1.000000e+00 : f32
    %798 = vector.broadcast %cst_295 : f32 to vector<40x128xf32>
    %799 = arith.addf %798, %797 : vector<40x128xf32>
    %800 = arith.divf %798, %799 : vector<40x128xf32>
    %801 = vector.extract_strided_slice %788 {offsets = [80, 0], sizes = [40, 128], strides = [1, 1]} : vector<160x128xf32> to vector<40x128xf32>
    %802 = math.tanh %801 : vector<40x128xf32>
    %803 = vector.extract_strided_slice %788 {offsets = [120, 0], sizes = [40, 128], strides = [1, 1]} : vector<160x128xf32> to vector<40x128xf32>
    %804 = arith.negf %803 : vector<40x128xf32>
    %805 = math.exp %804 : vector<40x128xf32>
    %cst_296 = arith.constant 1.000000e+00 : f32
    %806 = vector.broadcast %cst_296 : f32 to vector<40x128xf32>
    %807 = arith.addf %806, %805 : vector<40x128xf32>
    %808 = arith.divf %806, %807 : vector<40x128xf32>
    %809 = arith.mulf %800, %780 : vector<40x128xf32>
    %810 = arith.mulf %794, %802 : vector<40x128xf32>
    %811 = arith.addf %809, %810 : vector<40x128xf32>
    %812 = math.tanh %811 : vector<40x128xf32>
    %813 = arith.mulf %808, %812 : vector<40x128xf32>
    %c0_297 = arith.constant 0 : index
    %c0_298 = arith.constant 0 : index
    %814 = vector.load %arg9[%c0_297, %c0_298] : memref<161x40xbf16, #tpu.memory_space<vmem>>, vector<161x40xbf16>
    %815 = arith.truncf %813 : vector<40x128xf32> to vector<40x128xbf16>
    %cst_299 = arith.constant dense<0.000000e+00> : vector<161x128xf32>
    %816 = tpu.matmul %814, %815, %cst_299 {dimension_numbers = #tpu.dot_dimension_numbers<[1], [0], [0], [1], [0, 0, 1, 1], [], []>} : vector<161x40xbf16>, vector<40x128xbf16>, vector<161x128xf32> -> vector<161x128xf32>
    %817 = vector.extract_strided_slice %816 {offsets = [160, 0], sizes = [1, 128], strides = [1, 1]} : vector<161x128xf32> to vector<1x128xf32>
    %818 = vector.extract_strided_slice %816 {offsets = [0, 0], sizes = [160, 128], strides = [1, 1]} : vector<161x128xf32> to vector<160x128xf32>
    %819 = arith.addf %597, %818 : vector<160x128xf32>
    %820 = vector.extract_strided_slice %819 {offsets = [0, 0], sizes = [40, 128], strides = [1, 1]} : vector<160x128xf32> to vector<40x128xf32>
    %821 = arith.negf %820 : vector<40x128xf32>
    %822 = math.exp %821 : vector<40x128xf32>
    %cst_300 = arith.constant 1.000000e+00 : f32
    %823 = vector.broadcast %cst_300 : f32 to vector<40x128xf32>
    %824 = arith.addf %823, %822 : vector<40x128xf32>
    %825 = arith.divf %823, %824 : vector<40x128xf32>
    %826 = vector.extract_strided_slice %819 {offsets = [40, 0], sizes = [40, 128], strides = [1, 1]} : vector<160x128xf32> to vector<40x128xf32>
    %827 = arith.negf %826 : vector<40x128xf32>
    %828 = math.exp %827 : vector<40x128xf32>
    %cst_301 = arith.constant 1.000000e+00 : f32
    %829 = vector.broadcast %cst_301 : f32 to vector<40x128xf32>
    %830 = arith.addf %829, %828 : vector<40x128xf32>
    %831 = arith.divf %829, %830 : vector<40x128xf32>
    %832 = vector.extract_strided_slice %819 {offsets = [80, 0], sizes = [40, 128], strides = [1, 1]} : vector<160x128xf32> to vector<40x128xf32>
    %833 = math.tanh %832 : vector<40x128xf32>
    %834 = vector.extract_strided_slice %819 {offsets = [120, 0], sizes = [40, 128], strides = [1, 1]} : vector<160x128xf32> to vector<40x128xf32>
    %835 = arith.negf %834 : vector<40x128xf32>
    %836 = math.exp %835 : vector<40x128xf32>
    %cst_302 = arith.constant 1.000000e+00 : f32
    %837 = vector.broadcast %cst_302 : f32 to vector<40x128xf32>
    %838 = arith.addf %837, %836 : vector<40x128xf32>
    %839 = arith.divf %837, %838 : vector<40x128xf32>
    %840 = arith.mulf %831, %811 : vector<40x128xf32>
    %841 = arith.mulf %825, %833 : vector<40x128xf32>
    %842 = arith.addf %840, %841 : vector<40x128xf32>
    %843 = math.tanh %842 : vector<40x128xf32>
    %844 = arith.mulf %839, %843 : vector<40x128xf32>
    %c0_303 = arith.constant 0 : index
    %c0_304 = arith.constant 0 : index
    %845 = vector.load %arg10[%c0_303, %c0_304] : memref<1x40xbf16, #tpu.memory_space<vmem>>, vector<1x40xbf16>
    %846 = arith.truncf %844 : vector<40x128xf32> to vector<40x128xbf16>
    %cst_305 = arith.constant dense<0.000000e+00> : vector<1x128xf32>
    %847 = tpu.matmul %845, %846, %cst_305 {dimension_numbers = #tpu.dot_dimension_numbers<[1], [0], [0], [1], [0, 0, 1, 1], [], []>} : vector<1x40xbf16>, vector<40x128xbf16>, vector<1x128xf32> -> vector<1x128xf32>
    %848 = tpu.concatenate %631, %662, %693, %724, %755, %786, %817, %847 in 0 : vector<1x128xf32>, vector<1x128xf32>, vector<1x128xf32>, vector<1x128xf32>, vector<1x128xf32>, vector<1x128xf32>, vector<1x128xf32>, vector<1x128xf32> -> vector<8x128xf32>
    %849 = vector.broadcast %3 : vector<1x1xf32> to vector<8x128xf32>
    %850 = arith.addf %848, %849 : vector<8x128xf32>
    %851 = arith.negf %850 : vector<8x128xf32>
    %852 = math.exp %851 : vector<8x128xf32>
    %cst_306 = arith.constant 1.000000e+00 : f32
    %853 = vector.broadcast %cst_306 : f32 to vector<8x128xf32>
    %854 = arith.addf %853, %852 : vector<8x128xf32>
    %855 = arith.divf %853, %854 : vector<8x128xf32>
    %cst_307 = arith.constant dense<0xFF800000> : vector<128xf32>
    %856 = vector.multi_reduction <maximumf>, %855, %cst_307 [0] : vector<8x128xf32> to vector<128xf32>
    %857 = vector.shape_cast %856 : vector<128xf32> to vector<1x128xf32>
    %858 = vector.broadcast %857 : vector<1x128xf32> to vector<8x128xf32>
    %859 = arith.subf %855, %858 : vector<8x128xf32>
    %860 = math.exp %859 : vector<8x128xf32>
    %cst_308 = arith.constant dense<0.000000e+00> : vector<128xf32>
    %861 = vector.multi_reduction <add>, %860, %cst_308 [0] : vector<8x128xf32> to vector<128xf32>
    %862 = vector.shape_cast %861 : vector<128xf32> to vector<1x128xf32>
    %863 = vector.broadcast %862 : vector<1x128xf32> to vector<8x128xf32>
    %864 = arith.divf %860, %863 : vector<8x128xf32>
    %c0_309 = arith.constant 0 : index
    %c0_310 = arith.constant 0 : index
    %865 = vector.load %arg13[%c0_309, %c0_310] : memref<8x128xf32, #tpu.memory_space<vmem>>, vector<8x128xf32>
    tpu.vector_store %arg13[%c0_309, %c0_310], %864 {strides = array<i32>} : memref<8x128xf32, #tpu.memory_space<vmem>>, vector<8x128xf32>,
    return
  }
  func.func @transform_0(%arg0: i32) -> (i32, i32, i32) {
    %c0_i32 = arith.constant 0 : i32
    %c0_i32_0 = arith.constant 0 : i32
    %c0_i32_1 = arith.constant 0 : i32
    return %c0_i32, %c0_i32_0, %arg0 : i32, i32, i32
  }
  func.func @transform_1(%arg0: i32) -> (i32, i32) {
    %c0_i32 = arith.constant 0 : i32
    %c0_i32_0 = arith.constant 0 : i32
    %c0_i32_1 = arith.constant 0 : i32
    return %c0_i32, %c0_i32_0 : i32, i32
  }
  func.func @transform_2(%arg0: i32) -> (i32, i32) {
    %c0_i32 = arith.constant 0 : i32
    %c0_i32_0 = arith.constant 0 : i32
    %c0_i32_1 = arith.constant 0 : i32
    return %c0_i32, %c0_i32_0 : i32, i32
  }
  func.func @transform_3(%arg0: i32) -> (i32, i32) {
    %c0_i32 = arith.constant 0 : i32
    %c0_i32_0 = arith.constant 0 : i32
    %c0_i32_1 = arith.constant 0 : i32
    return %c0_i32, %c0_i32_0 : i32, i32
  }
  func.func @transform_4(%arg0: i32) -> (i32, i32) {
    %c0_i32 = arith.constant 0 : i32
    %c0_i32_0 = arith.constant 0 : i32
    %c0_i32_1 = arith.constant 0 : i32
    return %c0_i32, %c0_i32_0 : i32, i32
  }
  func.func @transform_5(%arg0: i32) -> (i32, i32) {
    %c0_i32 = arith.constant 0 : i32
    %c0_i32_0 = arith.constant 0 : i32
    %c0_i32_1 = arith.constant 0 : i32
    return %c0_i32, %c0_i32_0 : i32, i32
  }
  func.func @transform_6(%arg0: i32) -> (i32, i32) {
    %c0_i32 = arith.constant 0 : i32
    %c0_i32_0 = arith.constant 0 : i32
    %c0_i32_1 = arith.constant 0 : i32
    return %c0_i32, %c0_i32_0 : i32, i32
  }
  func.func @transform_7(%arg0: i32) -> (i32, i32) {
    %c0_i32 = arith.constant 0 : i32
    %c0_i32_0 = arith.constant 0 : i32
    %c0_i32_1 = arith.constant 0 : i32
    return %c0_i32, %c0_i32_0 : i32, i32
  }
  func.func @transform_8(%arg0: i32) -> (i32, i32) {
    %c0_i32 = arith.constant 0 : i32
    %c0_i32_0 = arith.constant 0 : i32
    %c0_i32_1 = arith.constant 0 : i32
    return %c0_i32, %c0_i32_0 : i32, i32
  }
  func.func @transform_9(%arg0: i32) -> (i32, i32) {
    %c0_i32 = arith.constant 0 : i32
    %c0_i32_0 = arith.constant 0 : i32
    %c0_i32_1 = arith.constant 0 : i32
    return %c0_i32, %c0_i32_0 : i32, i32
  }
  func.func @transform_10(%arg0: i32) -> (i32, i32) {
    %c0_i32 = arith.constant 0 : i32
    %c0_i32_0 = arith.constant 0 : i32
    %c0_i32_1 = arith.constant 0 : i32
    return %c0_i32, %c0_i32_0 : i32, i32
  }
  func.func @transform_11(%arg0: i32) -> (i32, i32, i32) {
    %c0_i32 = arith.constant 0 : i32
    %c0_i32_0 = arith.constant 0 : i32
    %c0_i32_1 = arith.constant 0 : i32
    return %c0_i32, %c0_i32_0, %arg0 : i32, i32, i32
  }
  func.func @transform_12(%arg0: i32) -> (i32, i32) {
    %c0_i32 = arith.constant 0 : i32
    %c0_i32_0 = arith.constant 0 : i32
    return %c0_i32, %arg0 : i32, i32
  }
}

</mosaic_0001>

<bundles_post_ra>
// kernel: ddrsa_forward.1
= control target key start
LH: loop header
LB: loop body
LE: loop exit
PB: predicated region body
PF: predicated region fallthrough
CT: control target
= control target key end

     0   :  { %v17011_v0 = vmov 0   ;;  %vm134_vm0 = vcmask 261120   ;;  %vm273_vm1 = vcmask 1041408   ;;  %vm248_vm2 = vcmask 31744   ;;  %s16996_s2 = inlined_call_operand.vmem [shape: bf16[128,32], index: 2, kind: input, shape index: {}]   ;;  %s16997_s0 = inlined_call_operand.vmem [shape: f32[8,4,128], index: 0, kind: input, shape index: {}]   ;;  %s16998_s1 = inlined_call_operand.vmem [shape: bf16[128,4], index: 1, kind: input, shape index: {}]   ;;  %s16999_s3 = inlined_call_operand.vmem [shape: bf16[5,32], index: 3, kind: input, shape index: {}]   ;;  %s17000_s10 = inlined_call_operand.<no memory space> [shape: f32[1,1], index: 10, kind: input, shape index: {}]   ;;  %s17001_s4 = inlined_call_operand.vmem [shape: f32[4,1], index: 4, kind: input, shape index: {}]   ;;  %s17002_s11 = inlined_call_operand.vmem [shape: f32[8,4,128], index: 11, kind: output, shape index: {0}]   ;;  %s17003_s5 = inlined_call_operand.vmem [shape: f32[4,1], index: 5, kind: input, shape index: {}]   ;;  %s17004_s6 = inlined_call_operand.<no memory space> [shape: f32[1,1], index: 6, kind: input, shape index: {}]   ;;  %s17005_s7 = inlined_call_operand.vmem [shape: bf16[160,40], index: 7, kind: input, shape index: {}]   ;;  %s17006_s8 = inlined_call_operand.vmem [shape: bf16[161,40], index: 8, kind: input, shape index: {}]   ;;  %s17007_s9 = inlined_call_operand.vmem [shape: bf16[1,40], index: 9, kind: input, shape index: {}]   ;;  %s17008_s12 = inlined_call_operand.vmem [shape: f32[8,128], index: 12, kind: output, shape index: {1}]  }
   0x1   :  { %9575 = vmatpush.bf16.msra.mxu1 %v17011_v0  ;;  %v9442_v1 = vld [vmem:[%s16996_s2 + $0x38] sm:$0xff]  ;;  %166 = vmatpush.bf16.msra.mxu0 %v17011_v0  ;;  %v10852_v2 = vld [vmem:[%s16997_s0] sm:$0xf]  ;;  %v9436_v7 = vld [vmem:[%s16996_s2 + $0x8] sm:$0xff] }
   0x2   :  { %v9435_v3 = vld [vmem:[%s16996_s2] sm:$0xff]  ;;  %v77_v4 = vpack.c.bf16 %v10852_v2, %v10852_v2  ;;  %9582 = vset.pattern.permute.xlu1 %v17011_v0  ;;  %9581 = vset.pattern.permute.xlu0 %v17011_v0  ;;  %v9428_v8 = vld [vmem:[%s16998_s1 + $0x8] sm:$0xff]  ;;  %v9437_v9 = vld [vmem:[%s16996_s2 + $0x10] sm:$0xff] }
   0x3   :  { %v9427_v6 = vld [vmem:[%s16998_s1] sm:$0xff]  ;;  %v9429_v10 = vld [vmem:[%s16998_s1 + $0x10] sm:$0xff]  ;;  %v9438_v11 = vld [vmem:[%s16996_s2 + $0x18] sm:$0xff] }
   0x4   :  { %8388 = vmatmul.msk.bf16.vlgmr.msra.gmra.mxu1 %vm134_vm0, %v9442_v1  ;;  %v275_v5 = vsel %vm273_vm1, %v77_v4, 0  ;;  %8381 = vmatmul.msk.bf16.vlgmr.msra.gmra.mxu0 %vm134_vm0, %v9435_v3  ;;  %v9430_v12 = vld [vmem:[%s16998_s1 + $0x18] sm:$0xff]  ;;  %v9439_v13 = vld [vmem:[%s16996_s2 + $0x20] sm:$0xff]  ;;  %v9440_v15 = vld [vmem:[%s16996_s2 + $0x28] sm:$0xff] }
   0x5   :  { %284 = vmatpush.bf16.msrb.mxu1 %v275_v5  ;;  %v9431_v14 = vld [vmem:[%s16998_s1 + $0x20] sm:$0xff]  ;;  %v9432_v16 = vld [vmem:[%s16998_s1 + $0x28] sm:$0xff]  ;;  %v9441_v17 = vld [vmem:[%s16996_s2 + $0x30] sm:$0xff] }
   0x6   :  { %v9433_v18 = vld [vmem:[%s16998_s1 + $0x30] sm:$0xff]  ;;  %v9434_v19 = vld [vmem:[%s16998_s1 + $0x38] sm:$0xff] }
  0x14   :  { %8421 = vmatmul.msk.bf16.vlgmr.msrb.gmra.mxu1 %vm248_vm2, %v9427_v6  ;;  %8382 = vmatmul.msk.bf16.gmra.mxu0 %vm134_vm0, %v9436_v7 }
  0x24   :  { %8422 = vmatmul.msk.bf16.gmra.mxu1 %vm248_vm2, %v9428_v8  ;;  %8383 = vmatmul.msk.bf16.gmra.mxu0 %vm134_vm0, %v9437_v9 }
  0x34   :  { %8423 = vmatmul.msk.bf16.gmra.mxu1 %vm248_vm2, %v9429_v10  ;;  %8384 = vmatmul.msk.bf16.gmra.mxu0 %vm134_vm0, %v9438_v11 }
  0x44   :  { %8424 = vmatmul.msk.bf16.gmra.mxu1 %vm248_vm2, %v9430_v12  ;;  %8385 = vmatmul.msk.bf16.gmra.mxu0 %vm134_vm0, %v9439_v13 }
  0x54   :  { %8425 = vmatmul.msk.bf16.gmra.mxu1 %vm248_vm2, %v9431_v14  ;;  %8386 = vmatmul.msk.bf16.gmra.mxu0 %vm134_vm0, %v9440_v15 }
  0x64   :  { %8426 = vmatmul.msk.bf16.gmra.mxu1 %vm248_vm2, %v9432_v16  ;;  %8387 = vmatmul.msk.bf16.gmra.mxu0 %vm134_vm0, %v9441_v17 }
  0x74   :  { %8427 = vmatmul.msk.bf16.gmra.mxu1 %vm248_vm2, %v9433_v18 }
  0x81   :  { %v10919_v20 = vpop.f32.mrf.mxu1  ;;  %v168_v21 = vpop.f32.mrf.mxu0 }
  0x84   :  { %8428 = vmatmul.msk.bf16.gmra.mxu1 %vm248_vm2, %v9434_v19 }
  0x89   :  { %v10922_v22 = vpop.f32.mrf.mxu1  ;;  %v170_v23 = vpop.f32.mrf.mxu0 }
  0x91   :  { %v286_v24 = vpop.f32.mrf.mxu1  ;;  %v173_v25 = vpop.f32.mrf.mxu0 }
  0x92   :  { %v287_v26 = vadd.f32 %v286_v24, %v168_v21 }
  0x94   :  { %v8429_v34 = vmul.f32 -1.442695, %v287_v26 }
  0x96   :  { %9584 = vpow2.f32 %v8429_v34 }
  0x99   :  { %v288_v27 = vpop.f32.mrf.mxu1  ;;  %v10924_v28 = vpop.f32.mrf.mxu0 }
  0x9a   :  { %v289_v63 = vadd.f32 %v288_v27, %v170_v23 }
  0x9c   :  { %v9585_v39 = vpop.eup %9584  ;;  %v8430_v7 = vmul.f32 -1.442695, %v289_v63 }
  0x9d   :  { %v338_v41 = vadd.f32 1.0, %v9585_v39 }
  0x9f   :  { %v353_v1 = vand.u32 2147483648, %v338_v41  ;;  %vm347_vm7 = vweird.f32 %v338_v41  ;;  %v351_v3 = vand.u32 2147483647, %v338_v41 }
  0xa1   :  { %v291_v29 = vpop.f32.mrf.mxu1  ;;  %v178_v30 = vpop.f32.mrf.mxu0  ;;  %v354_v8 = vor.u32 1.1754944e-38, %v353_v1  ;;  %vm352_vm10 = vcmp.eq.f32.partialorder %v351_v3, 8.507059e+37 }
  0xa2   :  { %v292_v31 = vadd.f32 %v291_v29, %v173_v25 }
  0xa4   :  { %v8431_v17 = vmul.f32 -1.442695, %v292_v31 }
  0xa9   :  { %v293_v32 = vpop.f32.mrf.mxu1  ;;  %v10926_v33 = vpop.f32.mrf.mxu0 }
  0xaa   :  { %v294_v18 = vadd.f32 %v293_v32, %v10924_v28 }
  0xac   :  { %v8432_v26 = vmul.f32 -1.442695, %v294_v18 }
  0xb1   :  { %v296_v35 = vpop.f32.mrf.mxu1  ;;  %v183_v36 = vpop.f32.mrf.mxu0 }
  0xb2   :  { %v297_v37 = vadd.f32 %v296_v35, %v178_v30 }
  0xb4   :  { %v8433_v38 = vmul.f32 -1.442695, %v297_v37 }
  0xb6   :  { %9586 = vpow2.f32 %v8433_v38 }
  0xb7   :  { %9588 = vrcp.f32 %v338_v41 }
  0xb9   :  { %v298_v40 = vpop.f32.mrf.mxu1  ;;  %v185_v42 = vpop.f32.mrf.mxu0 }
  0xba   :  { %v299_v23 = vadd.f32 %v298_v40, %v10926_v33 }
  0xbc   :  { %v9587_v43 = vpop.eup %9586  ;;  %v8434_v30 = vmul.f32 -1.442695, %v299_v23 }
  0xbd   :  { %v414_v44 = vadd.f32 1.0, %v9587_v43  ;;  %v9589_v46 = vpop.eup %9588 }
  0xbe   :  { %v343_v50 = vmul.f32 %v9589_v46, %v338_v41  ;;  %vm348_vm5 = vweird.f32 %v9589_v46 }
  0xbf   :  { %9590 = vrcp.f32 %v414_v44  ;;  %v429_v59 = vand.u32 2147483648, %v414_v44  ;;  %vm423_vm4 = vweird.f32 %v414_v44  ;;  %v427_v62 = vand.u32 2147483647, %v414_v44  ;;  %vm349_vm8 = vmor %vm347_vm7, %vm348_vm5 }
  0xc0   :  { %v344_v53 = vsub.f32 1.0, %v343_v50 }
  0xc1   :  { %v301_v45 = vpop.f32.mrf.mxu1  ;;  %v188_v48 = vpop.f32.mrf.mxu0  ;;  %v430_v5 = vor.u32 1.1754944e-38, %v429_v59  ;;  %vm428_vm9 = vcmp.eq.f32.partialorder %v427_v62, 8.507059e+37 }
  0xc2   :  { %v345_v55 = vmul.f32 %v9589_v46, %v344_v53  ;;  %v302_v24 = vadd.f32 %v301_v45, %v183_v36 }
  0xc4   :  { %v346_v61 = vadd.f32 %v9589_v46, %v345_v55  ;;  %v8435_v34 = vmul.f32 -1.442695, %v302_v24 }
  0xc5   :  { %v9591_v47 = vpop.eup %9590 }
  0xc6   :  { %v419_v49 = vmul.f32 %v9591_v47, %v414_v44  ;;  %vm424_vm3 = vweird.f32 %v9591_v47  ;;  %v350_v6 = vsel %vm349_vm8, %v9589_v46, %v346_v61 }
  0xc7   :  { %vm425_vm6 = vmor %vm423_vm4, %vm424_vm3  ;;  %v355_v13 = vsel %vm352_vm10, %v354_v8, %v350_v6 }
  0xc8   :  { %v420_v51 = vsub.f32 1.0, %v419_v49 }
  0xc9   :  { %v303_v52 = vpop.f32.mrf.mxu1  ;;  %v10928_v56 = vpop.f32.mrf.mxu0 }
  0xca   :  { %v421_v54 = vmul.f32 %v9591_v47, %v420_v51  ;;  %v304_v27 = vadd.f32 %v303_v52, %v185_v42 }
  0xcc   :  { %v422_v58 = vadd.f32 %v9591_v47, %v421_v54  ;;  %v8436_v31 = vmul.f32 -1.442695, %v304_v27 }
  0xce   :  { %v426_v4 = vsel %vm425_vm6, %v9591_v47, %v422_v58 }
  0xcf   :  { %v431_v9 = vsel %vm428_vm9, %v430_v5, %v426_v4 }
  0xd0   :  { %v558_v14 = vmul.f32 0.0, %v431_v9 }
  0xd1   :  { %v306_v57 = vpop.f32.mrf.mxu1  ;;  %v10932_v11 = vpop.f32.mrf.mxu0 }
  0xd2   :  { %v307_v60 = vadd.f32 %v306_v57, %v188_v48 }
  0xd4   :  { %9592 = vtanh.f32 %v307_v60 }
  0xd5   :  { %9594 = vpow2.f32 %v8430_v7 }
  0xd6   :  { %9596 = vpow2.f32 %v8431_v17 }
  0xd7   :  { %9598 = vpow2.f32 %v8432_v26 }
  0xd9   :  { %v10930_v10 = vpop.f32.mrf.mxu1  ;;  %v10940_v25 = vpop.f32.mrf.mxu0 }
  0xda   :  { %v9593_v12 = vpop.eup %9592 }
  0xdb   :  { %v562_v15 = vmul.f32 %v9593_v12, %v355_v13  ;;  %v9595_v21 = vpop.eup %9594 }
  0xdc   :  { %v10942_v29 = vadd.f32 1.0, %v9595_v21  ;;  %v9597_v35 = vpop.eup %9596 }
  0xdd   :  { %v10934_v16 = vadd.f32 %v562_v15, %v558_v14  ;;  %v10947_v32 = vadd.f32 1.0, %v9597_v35  ;;  %v9599_v36 = vpop.eup %9598 }
  0xde   :  { %9600 = vrcp.f32 %v10942_v29  ;;  %v10952_v40 = vadd.f32 1.0, %v9599_v36  ;;  %v366_v63 = vand.u32 2147483647, %v10942_v29  ;;  %v368_v4 = vand.u32 2147483648, %v10942_v29 }
  0xdf   :  { %9602 = vpow2.f32 %v8434_v30  ;;  %vm362_vm12 = vweird.f32 %v10942_v29  ;;  %v383_v8 = vand.u32 2147483648, %v10947_v32  ;;  %vm377_vm15 = vweird.f32 %v10947_v32 }
  0xe0   :  { %9604 = vpow2.f32 %v8435_v34  ;;  %vm11002_vm14 = vcmp.eq.f32.partialorder %v366_v63, 8.507059e+37  ;;  %v369_v21 = vor.u32 1.1754944e-38, %v368_v4  ;;  %v309_v30 = vadd.f32 %v10930_v10, %v10928_v56 }
  0xe1   :  { %v10937_v19 = vpop.f32.mrf.mxu1  ;;  %9606 = vpow2.f32 %v8436_v31  ;;  %v198_v33 = vpop.f32.mrf.mxu0  ;;  %v381_v34 = vand.u32 2147483647, %v10947_v32  ;;  %v11014_v35 = vor.u32 1.1754944e-38, %v383_v8  ;;  %vm392_vm5 = vweird.f32 %v10952_v40 }
  0xe2   :  { %9608 = vrcp.f32 %v10947_v32  ;;  %v396_v56 = vand.u32 2147483647, %v10952_v40 }
  0xe3   :  { %9610 = vrcp.f32 %v10952_v40  ;;  %vm11042_vm6 = vcmp.eq.f32.partialorder %v381_v34, 8.507059e+37 }
  0xe4   :  { %v10949_v37 = vpop.eup %9600 }
  0xe5   :  { %v9603_v38 = vpop.eup %9602  ;;  %v358_v43 = vmul.f32 %v10949_v37, %v10942_v29  ;;  %vm363_vm11 = vweird.f32 %v10949_v37 }
  0xe6   :  { %v9605_v39 = vpop.eup %9604  ;;  %v10956_v44 = vadd.f32 1.0, %v9603_v38  ;;  %vm10994_vm13 = vmor %vm362_vm12, %vm363_vm11 }
  0xe7   :  { %v9607_v42 = vpop.eup %9606  ;;  %v10958_v45 = vadd.f32 1.0, %v9605_v39  ;;  %v359_v48 = vsub.f32 1.0, %v358_v43  ;;  %v398_v39 = vand.u32 2147483648, %v10952_v40 }
  0xe8   :  { %v10960_v46 = vpop.eup %9608  ;;  %v10963_v47 = vadd.f32 1.0, %v9607_v42  ;;  %9612 = vrcp.f32 %v10956_v44  ;;  %vm438_vm8 = vweird.f32 %v10956_v44 }
  0xe9   :  { %v10945_v28 = vpop.f32.mrf.mxu1  ;;  %v200_v50 = vpop.f32.mrf.mxu0  ;;  %v373_v51 = vmul.f32 %v10960_v46, %v10947_v32  ;;  %9614 = vrcp.f32 %v10958_v45  ;;  %v360_v55 = vmul.f32 %v10949_v37, %v359_v48  ;;  %vm378_vm3 = vweird.f32 %v10960_v46 }
  0xea   :  { %9616 = vrcp.f32 %v10963_v47  ;;  %v10970_v54 = vpop.eup %9610  ;;  %vm11025_vm4 = vmor %vm377_vm15, %vm378_vm3  ;;  %v314_v43 = vadd.f32 %v10945_v28, %v10940_v25  ;;  %v474_v63 = vand.u32 2147483648, %v10963_v47  ;;  %vm468_vm15 = vweird.f32 %v10963_v47 }
  0xeb   :  { %v374_v58 = vsub.f32 1.0, %v373_v51  ;;  %v388_v62 = vmul.f32 %v10970_v54, %v10952_v40  ;;  %v361_v3 = vadd.f32 %v10949_v37, %v360_v55  ;;  %vm393_vm7 = vweird.f32 %v10970_v54 }
  0xec   :  { %v444_v51 = vand.u32 2147483648, %v10956_v44  ;;  %vm11068_vm11 = vmor %vm392_vm5, %vm393_vm7 }
  0xed   :  { %v375_v6 = vmul.f32 %v10960_v46, %v374_v58  ;;  %v389_v12 = vsub.f32 1.0, %v388_v62  ;;  %v365_v17 = vsel %vm10994_vm13, %v10949_v37, %v361_v3  ;;  %vm453_vm13 = vweird.f32 %v10958_v45 }
  0xee   :  { %v10973_v60 = vpop.eup %9612  ;;  %v11021_v37 = vsel %vm11002_vm14, %v369_v21, %v365_v17  ;;  %v457_v3 = vand.u32 2147483647, %v10958_v45  ;;  %v445_v8 = vor.u32 1.1754944e-38, %v444_v51 }
  0xef   :  { %v10975_v61 = vpop.eup %9614  ;;  %v434_v5 = vmul.f32 %v10973_v60, %v10956_v44  ;;  %v11008_v26 = vadd.f32 %v10960_v46, %v375_v6  ;;  %v390_v36 = vmul.f32 %v10970_v54, %v389_v12  ;;  %vm439_vm9 = vweird.f32 %v10973_v60 }
  0xf0   :  { %v10980_v1 = vpop.eup %9616  ;;  %v449_v7 = vmul.f32 %v10975_v61, %v10958_v45  ;;  %vm454_vm10 = vweird.f32 %v10975_v61  ;;  %vm11080_vm14 = vmor %vm438_vm8, %vm439_vm9  ;;  %vm458_vm8 = vcmp.eq.f32.partialorder %v457_v3, 8.507059e+37 }
  0xf1   :  { %v316_v41 = vpop.f32.mrf.mxu1  ;;  %v464_v13 = vmul.f32 %v10980_v1, %v10963_v47  ;;  %v435_v24 = vsub.f32 1.0, %v434_v5  ;;  %vm469_vm12 = vweird.f32 %v10980_v1  ;;  %vm11092_vm3 = vmor %vm453_vm13, %vm454_vm10 }
  0xf2   :  { %v317_v49 = vadd.f32 %v316_v41, %v198_v33  ;;  %v450_v29 = vsub.f32 1.0, %v449_v7  ;;  %v312_v33 = vadd.f32 %v10937_v19, %v10932_v11  ;;  %v380_v19 = vsel %vm11025_vm4, %v10960_v46, %v11008_v26  ;;  %vm11107_vm5 = vmor %vm468_vm15, %vm469_vm12 }
  0xf3   :  { %v465_v31 = vsub.f32 1.0, %v464_v13  ;;  %v436_v11 = vmul.f32 %v10973_v60, %v435_v24  ;;  %v391_v46 = vadd.f32 %v10970_v54, %v390_v36  ;;  %vm397_vm4 = vcmp.eq.f32.partialorder %v396_v56, 8.507059e+37 }
  0xf4   :  { %v8437_v57 = vmul.f32 -1.442695, %v317_v49  ;;  %v451_v41 = vmul.f32 %v10975_v61, %v450_v29 }
  0xf5   :  { %v466_v49 = vmul.f32 %v10980_v1, %v465_v31  ;;  %v437_v25 = vadd.f32 %v10973_v60, %v436_v11  ;;  %v50_v11 = vand.u32 2147483647, %v10852_v2 }
  0xf6   :  { %v452_v55 = vadd.f32 %v10975_v61, %v451_v41 }
  0xf7   :  { %v441_v5 = vsel %vm11080_vm14, %v10973_v60, %v437_v25  ;;  %v399_v60 = vor.u32 1.1754944e-38, %v398_v39 }
  0xf9   :  { %v318_v52 = vpop.f32.mrf.mxu1 }
  0xfa   :  { %v319_v53 = vadd.f32 %v318_v52, %v200_v50  ;;  %v442_v52 = vand.u32 2147483647, %v10956_v44  ;;  %v395_v44 = vsel %vm11068_vm11, %v10970_v54, %v391_v46 }
  0xfb   :  { %v400_v18 = vsel %vm397_vm4, %v399_v60, %v395_v44 }
  0xfc   :  { %v8438_v59 = vmul.f32 -1.442695, %v319_v53  ;;  %vm443_vm7 = vcmp.eq.f32.partialorder %v442_v52, 8.507059e+37 }
  0xfd   :  { %v446_v17 = vsel %vm443_vm7, %v445_v8, %v441_v5 }
  0xfe   :  { %9618 = vpow2.f32 %v8438_v59  ;;  %v467_v59 = vadd.f32 %v10980_v1, %v466_v49  ;;  %v559_v34 = vmul.f32 0.0, %v446_v17 }
  0xff   :  { %9620 = vpow2.f32 %v8437_v57  ;;  %v459_v57 = vand.u32 2147483648, %v10958_v45  ;;  %v472_v45 = vand.u32 2147483647, %v10963_v47  ;;  %v385_v47 = vsel %vm11042_vm6, %v11014_v35, %v380_v19 }
 0x100   :  { %vm51_vm6 = vcmask 1043456  }
 0x101   :  { %v321_v9 = vpop.f32.mrf.mxu1  ;;  %v460_v54 = vor.u32 1.1754944e-38, %v459_v57  ;;  %vm473_vm9 = vcmp.eq.f32.partialorder %v472_v45, 8.507059e+37  ;;  %v52_v49 = vsel %vm51_vm6, %v50_v11, 0.0 }
 0x102   :  { %v322_v15 = vadd.f32 %v321_v9, %v10919_v20  ;;  %v456_v9 = vsel %vm11092_vm3, %v10975_v61, %v452_v55  ;;  %v471_v61 = vsel %vm11107_vm5, %v10980_v1, %v467_v59  ;;  %v53_v17 = vrot.slane %v52_v49, 4 }
 0x103   :  { %v461_v24 = vsel %vm458_vm8, %v460_v54, %v456_v9 }
 0x104   :  { %v9619_v23 = vpop.eup %9618  ;;  %v8439_v27 = vmul.f32 -1.442695, %v322_v15  ;;  %v475_v15 = vor.u32 1.1754944e-38, %v474_v63 }
 0x105   :  { %v9621_v20 = vpop.eup %9620  ;;  %v11031_v10 = vadd.f32 1.0, %v9619_v23 }
 0x106   :  { %9622 = vpow2.f32 %v8439_v27  ;;  %v11039_v32 = vadd.f32 1.0, %v9621_v20  ;;  %v476_v29 = vsel %vm473_vm9, %v475_v15, %v471_v61 }
 0x107   :  { %9624 = vtanh.f32 %v309_v30  ;;  %vm518_vm12 = vweird.f32 %v11031_v10  ;;  %v522_v58 = vand.u32 2147483647, %v11031_v10  ;;  %v524_v59 = vand.u32 2147483648, %v11031_v10 }
 0x108   :  { %9626 = vtanh.f32 %v312_v33  ;;  %v560_v33 = vmul.f32 0.0, %v461_v24  ;;  %vm503_vm4 = vweird.f32 %v11039_v32  ;;  %v507_v5 = vand.u32 2147483647, %v11039_v32 }
 0x109   :  { %v323_v48 = vpop.f32.mrf.mxu1  ;;  %9628 = vrcp.f32 %v11031_v10  ;;  %v509_v6 = vand.u32 2147483648, %v11039_v32  ;;  %v525_v12 = vor.u32 1.1754944e-38, %v524_v59  ;;  %v9446_v59 = vld [vmem:[%s16998_s1 + $0x18] sm:$0xff] }
 0x10a   :  { %v324_v50 = vadd.f32 %v323_v48, %v10922_v22  ;;  %9630 = vrcp.f32 %v11039_v32 }
 0x10b   :  { %9632 = vtanh.f32 %v314_v43 }
 0x10c   :  { %v9623_v53 = vpop.eup %9622  ;;  %v8440_v28 = vmul.f32 -1.442695, %v324_v50 }
 0x10d   :  { %v11061_v22 = vadd.f32 1.0, %v9623_v53  ;;  %v9625_v62 = vpop.eup %9624 }
 0x10e   :  { %9634 = vpow2.f32 %v8440_v28  ;;  %v9627_v4 = vpop.eup %9626  ;;  %v563_v23 = vmul.f32 %v9625_v62, %v11021_v37  ;;  %v561_v37 = vmul.f32 0.0, %v476_v29  ;;  %v9443_v28 = vld [vmem:[%s16998_s1] sm:$0xff] }
 0x10f   :  { %9636 = vrcp.f32 %v11061_v22  ;;  %v11100_v7 = vpop.eup %9628  ;;  %v564_v20 = vmul.f32 %v9627_v4, %v385_v47  ;;  %v539_v51 = vand.u32 2147483648, %v11061_v22  ;;  %vm533_vm14 = vweird.f32 %v11061_v22 }
 0x110   :  { %v11111_v13 = vpop.eup %9630  ;;  %v514_v26 = vmul.f32 %v11100_v7, %v11031_v10  ;;  %v11131_v36 = vadd.f32 %v563_v23, %v559_v34  ;;  %vm519_vm13 = vweird.f32 %v11100_v7  ;;  %v537_v53 = vand.u32 2147483647, %v11061_v22  ;;  %v8442_v34 = vld [vmem:[%s16997_s0 + $0x4] sm:$0xf] }
 0x111   :  { %v9633_v14 = vpop.eup %9632  ;;  %v499_v1 = vmul.f32 %v11111_v13, %v11039_v32  ;;  %v11134_v19 = vadd.f32 %v564_v20, %v560_v33  ;;  %vm504_vm11 = vweird.f32 %v11111_v13  ;;  %v540_v4 = vor.u32 1.1754944e-38, %v539_v51  ;;  %vm11174_vm5 = vmor %vm518_vm12, %vm519_vm13 }
 0x112   :  { %v565_v35 = vmul.f32 %v9633_v14, %v400_v18  ;;  %v515_v38 = vsub.f32 1.0, %v514_v26  ;;  %vm538_vm7 = vcmp.eq.f32.partialorder %v537_v53, 8.507059e+37  ;;  %vm11181_vm9 = vmor %vm503_vm4, %vm504_vm11  ;;  %vm523_vm11 = vcmp.eq.f32.partialorder %v522_v58, 8.507059e+37  ;;  %v9456_v53 = vld [vmem:[%s16996_s2 + $0x28] sm:$0xff]  ;;  %v9445_v58 = vld [vmem:[%s16998_s1 + $0x10] sm:$0xff] }
 0x113   :  { %v500_v39 = vsub.f32 1.0, %v499_v1  ;;  %v510_v14 = vor.u32 1.1754944e-38, %v509_v6  ;;  %vm508_vm13 = vcmp.eq.f32.partialorder %v507_v5, 8.507059e+37  ;;  %v9454_v1 = vld [vmem:[%s16996_s2 + $0x18] sm:$0xff]  ;;  %v9449_v5 = vld [vmem:[%s16998_s1 + $0x30] sm:$0xff] }
 0x114   :  { %v9635_v21 = vpop.eup %9634  ;;  %v11136_v41 = vadd.f32 %v565_v35, %v561_v37  ;;  %v516_v43 = vmul.f32 %v11100_v7, %v515_v38  ;;  %v610_v35 = vand.u32 2147483647, %v8442_v34 }
 0x115   :  { %v11122_v27 = vpop.eup %9636  ;;  %v11126_v30 = vadd.f32 1.0, %v9635_v21  ;;  %v501_v46 = vmul.f32 %v11111_v13, %v500_v39 }
 0x116   :  { %v529_v31 = vmul.f32 %v11122_v27, %v11061_v22  ;;  %vm534_vm10 = vweird.f32 %v11122_v27  ;;  %v517_v25 = vadd.f32 %v11100_v7, %v516_v43  ;;  %v611_v33 = vsel %vm51_vm6, %v610_v35, 0.0 }
 0x117   :  { %9638 = vrcp.f32 %v11126_v30  ;;  %vm11155_vm15 = vmor %vm533_vm14, %vm534_vm10  ;;  %v554_v55 = vand.u32 2147483648, %v11126_v30  ;;  %v502_v57 = vadd.f32 %v11111_v13, %v501_v46  ;;  %v552_v40 = vand.u32 2147483647, %v11126_v30 }
 0x118   :  { %v530_v56 = vsub.f32 1.0, %v529_v31  ;;  %9640 = vtanh.f32 %v11131_v36  ;;  %vm548_vm8 = vweird.f32 %v11126_v30  ;;  %v521_v32 = vsel %vm11174_vm5, %v11100_v7, %v517_v25  ;;  %v9452_v25 = vld [vmem:[%s16996_s2 + $0x8] sm:$0xff] }
 0x119   :  { %9642 = vtanh.f32 %v11134_v19  ;;  %v555_v60 = vor.u32 1.1754944e-38, %v554_v55  ;;  %vm553_vm12 = vcmp.eq.f32.partialorder %v552_v40, 8.507059e+37  ;;  %v506_v47 = vsel %vm11181_vm9, %v11111_v13, %v502_v57  ;;  %v9453_v55 = vld [vmem:[%s16996_s2 + $0x10] sm:$0xff]  ;;  %v9444_v57 = vld [vmem:[%s16998_s1 + $0x8] sm:$0xff] }
 0x11a   :  { %v531_v42 = vmul.f32 %v11122_v27, %v530_v56  ;;  %9644 = vtanh.f32 %v11136_v41  ;;  %v526_v15 = vsel %vm523_vm11, %v525_v12, %v521_v32  ;;  %v511_v21 = vsel %vm508_vm13, %v510_v14, %v506_v47  ;;  %v9448_v40 = vld [vmem:[%s16998_s1 + $0x28] sm:$0xff] }
 0x11b   :  { %9646 = vtanh.f32 %v10934_v16  ;;  %v637_v31 = vpack.c.bf16 %v8442_v34, %v8442_v34  ;;  %v612_v56 = vrot.slane %v611_v33, 4 }
 0x11c   :  { %v532_v50 = vadd.f32 %v11122_v27, %v531_v42 }
 0x11d   :  { %v9639_v48 = vpop.eup %9638  ;;  %v832_v37 = vsel %vm273_vm1, %v637_v31, 0  ;;  %v613_v11 = vadd.f32 %v612_v56, %v611_v33 }
 0x11e   :  { %v544_v2 = vmul.f32 %v9639_v48, %v11126_v30  ;;  %v9641_v62 = vpop.eup %9640  ;;  %v536_v63 = vsel %vm11155_vm15, %v11122_v27, %v532_v50  ;;  %vm549_vm3 = vweird.f32 %v9639_v48  ;;  %v54_v27 = vadd.f32 %v53_v17, %v52_v49  ;;  %v9451_v50 = vld [vmem:[%s16996_s2] sm:$0xff] }
 0x11f   :  { %v9643_v3 = vpop.eup %9642  ;;  %v541_v10 = vsel %vm538_vm7, %v540_v4, %v536_v63  ;;  %vm550_vm10 = vmor %vm548_vm8, %vm549_vm3  ;;  %v11199_v24 = vmul.f32 %v9641_v62, %v526_v15  ;;  %v614_v42 = vrot.slane %v613_v11, 2  ;;  %v9457_v62 = vld [vmem:[%s16996_s2 + $0x30] sm:$0xff]  ;;  %v9447_v63 = vld [vmem:[%s16998_s1 + $0x20] sm:$0xff] }
 0x120   :  { %v545_v52 = vsub.f32 1.0, %v544_v2  ;;  %v9645_v45 = vpop.eup %9644  ;;  %v11193_v18 = vmul.f32 %v9643_v3, %v541_v10  ;;  %v55_v29 = vrot.slane %v54_v27, 2 }
 0x121   :  { %v9647_v26 = vpop.eup %9646  ;;  %v615_v43 = vadd.f32 %v614_v42, %v613_v11 }
 0x122   :  { %v546_v22 = vmul.f32 %v9639_v48, %v545_v52  ;;  %v11201_v13 = vmul.f32 %v9647_v26, %v511_v21  ;;  %v56_v30 = vadd.f32 %v55_v29, %v54_v27 }
 0x123   :  { %v616_v49 = vrot.slane %v615_v43, 1 }
 0x124   :  { %v547_v8 = vadd.f32 %v9639_v48, %v546_v22  ;;  %v583_v20 = vpack.c.bf16 %v11199_v24, %v11201_v13  ;;  %v57_v38 = vrot.slane %v56_v30, 1  ;;  %v9458_v22 = vld [vmem:[%s16996_s2 + $0x38] sm:$0xff] }
 0x125   :  { %v617_v46 = vadd.f32 %v616_v49, %v615_v43 }
 0x126   :  { %v551_v54 = vsel %vm550_vm10, %v9639_v48, %v547_v8  ;;  %v58_v39 = vadd.f32 %v57_v38, %v56_v30  ;;  %v9455_v48 = vld [vmem:[%s16996_s2 + $0x20] sm:$0xff] }
 0x127   :  { %v556_v61 = vsel %vm553_vm12, %v555_v60, %v551_v54  ;;  %vm618_vm15 = vcmp.ne.f32.partialorder %v617_v46, 0.0 }
 0x128   :  { %v11195_v7 = vmul.f32 %v9645_v45, %v556_v61  ;;  %vm59_vm14 = vcmp.ne.f32.partialorder %v58_v39, 0.0  ;;  %v619_v51 = vsel %vm618_vm15, 1, %v17011_v0  ;;  %v9450_v45 = vld [vmem:[%s16998_s1 + $0x38] sm:$0xff] }
 0x129   :  { %v60_v2 = vsel %vm59_vm14, 1, %v17011_v0 }
 0x12a   :  { %v584_v23 = vpack.c.bf16 %v11195_v7, %v11193_v18  ;;  %v11223_v52 = vadd.s32 %v619_v51, %v60_v2 }
 0x12c   :  { %594 = vmatpush.bf16.msra.mxu1 %v584_v23  ;;  %724 = vmatpush.bf16.msrb.mxu0 %v584_v23 }
 0x12d   :  { %9576 = vmatpush.bf16.msra.mxu2 %v584_v23  ;;  %9577 = vmatpush.bf16.msra.mxu3 %v584_v23 }
 0x130   :  { %595 = vmatpush.bf16.msra.mxu1 %v583_v20  ;;  %725 = vmatpush.bf16.msrb.mxu0 %v583_v20 }
 0x131   :  { %9578 = vmatpush.bf16.msra.mxu2 %v583_v20  ;;  %9579 = vmatpush.bf16.msra.mxu3 %v583_v20 }
 0x133   :  { %8475 = vmatmul.msk.bf16.vlgmr.msrb.gmra.mxu0 %vm134_vm0, %v9451_v50 }
 0x134   :  { %8478 = vmatmul.msk.bf16.vlgmr.msra.gmra.mxu2 %vm134_vm0, %v9454_v1  ;;  %8481 = vmatmul.msk.bf16.vlgmr.msra.gmra.mxu3 %vm134_vm0, %v9457_v62 }
 0x135   :  { %841 = vmatpush.bf16.msrb.mxu2 %v832_v37 }
 0x143   :  { %8476 = vmatmul.msk.bf16.gmra.mxu0 %vm134_vm0, %v9452_v25 }
 0x144   :  { %8479 = vmatmul.msk.bf16.gmra.mxu2 %vm134_vm0, %v9455_v48  ;;  %8482 = vmatmul.msk.bf16.gmra.mxu3 %vm134_vm0, %v9458_v22 }
 0x153   :  { %8477 = vmatmul.msk.bf16.gmra.mxu0 %vm134_vm0, %v9453_v55 }
 0x154   :  { %8480 = vmatmul.msk.bf16.gmra.mxu2 %vm134_vm0, %v9456_v53 }
 0x164   :  { %8515 = vmatmul.msk.bf16.vlgmr.msrb.gmra.mxu2 %vm248_vm2, %v9443_v28 }
 0x174   :  { %8516 = vmatmul.msk.bf16.gmra.mxu2 %vm248_vm2, %v9444_v57 }
 0x184   :  { %8517 = vmatmul.msk.bf16.gmra.mxu2 %vm248_vm2, %v9445_v58 }
 0x194   :  { %8518 = vmatmul.msk.bf16.gmra.mxu2 %vm248_vm2, %v9446_v59 }
 0x1a4   :  { %8519 = vmatmul.msk.bf16.gmra.mxu2 %vm248_vm2, %v9447_v63 }
 0x1b0   :  { %v727_v9 = vpop.f32.mrf.mxu0 }
 0x1b4   :  { %8520 = vmatmul.msk.bf16.gmra.mxu2 %vm248_vm2, %v9448_v40 }
 0x1b7   :  { %v11270_v3 = vpop.f32.mrf.mxu2 }
 0x1b8   :  { %v729_v60 = vpop.f32.mrf.mxu0 }
 0x1bf   :  { %v11272_v4 = vpop.f32.mrf.mxu2 }
 0x1c0   :  { %v732_v54 = vpop.f32.mrf.mxu0 }
 0x1c4   :  { %8521 = vmatmul.msk.bf16.gmra.mxu2 %vm248_vm2, %v9449_v5 }
 0x1c7   :  { %v747_v6 = vpop.f32.mrf.mxu2 }
 0x1c8   :  { %v734_v61 = vpop.f32.mrf.mxu0 }
 0x1cf   :  { %v11278_v44 = vpop.f32.mrf.mxu2 }
 0x1d0   :  { %v737_v21 = vpop.f32.mrf.mxu0 }
 0x1d4   :  { %8522 = vmatmul.msk.bf16.gmra.mxu2 %vm248_vm2, %v9450_v45 }
 0x1d7   :  { %v11284_v8 = vpop.f32.mrf.mxu2 }
 0x1df   :  { %v11286_v32 = vpop.f32.mrf.mxu2 }
 0x1e7   :  { %v843_v10 = vpop.f32.mrf.mxu2 }
 0x1e8   :  { %v844_v14 = vadd.f32 %v843_v10, %v727_v9 }
 0x1ea   :  { %v8523_v17 = vmul.f32 -1.442695, %v844_v14 }
 0x1ec   :  { %9648 = vpow2.f32 %v8523_v17  ;;  %v739_v17 = vpop.f32.mrf.mxu0 }
 0x1ef   :  { %v845_v12 = vpop.f32.mrf.mxu2 }
 0x1f0   :  { %v846_v46 = vadd.f32 %v845_v12, %v729_v60 }
 0x1f2   :  { %v9649_v20 = vpop.eup %9648  ;;  %v8524_v58 = vmul.f32 -1.442695, %v846_v46 }
 0x1f3   :  { %v895_v1 = vadd.f32 1.0, %v9649_v20 }
 0x1f5   :  { %v910_v25 = vand.u32 2147483648, %v895_v1  ;;  %vm904_vm8 = vweird.f32 %v895_v1  ;;  %v908_v28 = vand.u32 2147483647, %v895_v1 }
 0x1f7   :  { %v848_v47 = vpop.f32.mrf.mxu2  ;;  %v911_v63 = vor.u32 1.1754944e-38, %v910_v25  ;;  %vm909_vm12 = vcmp.eq.f32.partialorder %v908_v28, 8.507059e+37 }
 0x1f8   :  { %v849_v62 = vadd.f32 %v848_v47, %v732_v54 }
 0x1fa   :  { %v8525_v60 = vmul.f32 -1.442695, %v849_v62  ;;  %v582_v62 = vld [vmem:[%s16999_s3] sm:$0x7] }
 0x1fb   :  { %8441 = vmatmul.msk.bf16.vlgmr.msra.gmra.mxu1 %vm134_vm0, %v582_v62 }
 0x1ff   :  { %v850_v15 = vpop.f32.mrf.mxu2 }
 0x200   :  { %v851_v40 = vadd.f32 %v850_v15, %v734_v61 }
 0x202   :  { %v8526_v12 = vmul.f32 -1.442695, %v851_v40 }
 0x207   :  { %v853_v23 = vpop.f32.mrf.mxu2 }
 0x208   :  { %v854_v26 = vadd.f32 %v853_v23, %v737_v21 }
 0x20a   :  { %v8527_v27 = vmul.f32 -1.442695, %v854_v26 }
 0x20c   :  { %9650 = vpow2.f32 %v8527_v27 }
 0x20d   :  { %9652 = vrcp.f32 %v895_v1 }
 0x20f   :  { %v855_v29 = vpop.f32.mrf.mxu2 }
 0x210   :  { %v856_v47 = vadd.f32 %v855_v29, %v739_v17 }
 0x212   :  { %v9651_v30 = vpop.eup %9650 }
 0x213   :  { %v971_v34 = vadd.f32 1.0, %v9651_v30  ;;  %v9653_v31 = vpop.eup %9652 }
 0x214   :  { %v900_v38 = vmul.f32 %v9653_v31, %v895_v1  ;;  %vm905_vm5 = vweird.f32 %v9653_v31 }
 0x215   :  { %9654 = vrcp.f32 %v971_v34  ;;  %v986_v2 = vand.u32 2147483648, %v971_v34  ;;  %vm980_vm4 = vweird.f32 %v971_v34  ;;  %v984_v53 = vand.u32 2147483647, %v971_v34  ;;  %vm906_vm9 = vmor %vm904_vm8, %vm905_vm5 }
 0x216   :  { %v901_v39 = vsub.f32 1.0, %v900_v38 }
 0x217   :  { %v858_v35 = vpop.f32.mrf.mxu2  ;;  %v987_v57 = vor.u32 1.1754944e-38, %v986_v2  ;;  %vm985_vm10 = vcmp.eq.f32.partialorder %v984_v53, 8.507059e+37 }
 0x218   :  { %v902_v43 = vmul.f32 %v9653_v31, %v901_v39  ;;  %v859_v61 = vadd.f32 %v858_v35, %v11270_v3  ;;  %v757_v3 = vpop.f32.mrf.mxu3 }
 0x21a   :  { %v903_v51 = vadd.f32 %v9653_v31, %v902_v43  ;;  %v8529_v20 = vmul.f32 -1.442695, %v859_v61  ;;  %v8537_v61 = vld [vmem:[%s16997_s0 + $0x8] sm:$0xf] }
 0x21b   :  { %v9655_v33 = vpop.eup %9654 }
 0x21c   :  { %v976_v37 = vmul.f32 %v9655_v33, %v971_v34  ;;  %vm981_vm3 = vweird.f32 %v9655_v33  ;;  %v907_v59 = vsel %vm906_vm9, %v9653_v31, %v903_v51 }
 0x21d   :  { %vm982_vm7 = vmor %vm980_vm4, %vm981_vm3  ;;  %v912_v45 = vsel %vm909_vm12, %v911_v63, %v907_v59 }
 0x21e   :  { %v977_v56 = vsub.f32 1.0, %v976_v37 }
 0x21f   :  { %v860_v11 = vpop.f32.mrf.mxu2 }
 0x220   :  { %v978_v42 = vmul.f32 %v9655_v33, %v977_v56  ;;  %v861_v23 = vadd.f32 %v860_v11, %v11272_v4 }
 0x222   :  { %v979_v49 = vadd.f32 %v9655_v33, %v978_v42  ;;  %v8530_v1 = vmul.f32 -1.442695, %v861_v23 }
 0x224   :  { %v983_v55 = vsel %vm982_vm7, %v9655_v33, %v979_v49  ;;  %v759_v49 = vpop.f32.mrf.mxu3 }
 0x225   :  { %v988_v22 = vsel %vm985_vm10, %v987_v57, %v983_v55 }
 0x226   :  { %v1115_v9 = vmul.f32 %v988_v22, %v10934_v16  ;;  %v8528_v16 = vmul.f32 -1.442695, %v856_v47 }
 0x227   :  { %v863_v48 = vpop.f32.mrf.mxu2 }
 0x228   :  { %v864_v50 = vadd.f32 %v863_v48, %v747_v6 }
 0x22a   :  { %9656 = vtanh.f32 %v864_v50 }
 0x22b   :  { %9658 = vpow2.f32 %v8524_v58 }
 0x22c   :  { %9660 = vpow2.f32 %v8525_v60  ;;  %v762_v47 = vpop.f32.mrf.mxu3 }
 0x22d   :  { %9662 = vpow2.f32 %v8526_v12 }
 0x22f   :  { %v11288_v5 = vpop.f32.mrf.mxu2 }
 0x230   :  { %v9657_v6 = vpop.eup %9656 }
 0x231   :  { %v1119_v10 = vmul.f32 %v9657_v6, %v912_v45  ;;  %v9659_v21 = vpop.eup %9658  ;;  %v20_v45 = vstv %s17000_s10 }
 0x232   :  { %v11296_v15 = vadd.f32 1.0, %v9659_v21  ;;  %v9661_v26 = vpop.eup %9660  ;;  %21 = vst [vmem:[#allocation4] sm:$0x1] %v20_v45 }
 0x233   :  { %v11291_v14 = vadd.f32 %v1119_v10, %v1115_v9  ;;  %v9663_v27 = vpop.eup %9662  ;;  %v11300_v30 = vadd.f32 1.0, %v9661_v26 }
 0x234   :  { %9664 = vrcp.f32 %v11296_v15  ;;  %v11304_v31 = vadd.f32 1.0, %v9663_v27  ;;  %v923_v25 = vand.u32 2147483647, %v11296_v15  ;;  %v925_v28 = vand.u32 2147483648, %v11296_v15 }
 0x235   :  { %9666 = vpow2.f32 %v8528_v16  ;;  %v940_v6 = vand.u32 2147483648, %v11300_v30  ;;  %vm919_vm13 = vweird.f32 %v11296_v15  ;;  %vm934_vm15 = vweird.f32 %v11300_v30 }
 0x236   :  { %9668 = vpow2.f32 %v8529_v20  ;;  %vm11347_vm14 = vcmp.eq.f32.partialorder %v923_v25, 8.507059e+37  ;;  %v926_v60 = vor.u32 1.1754944e-38, %v925_v28  ;;  %v938_v26 = vand.u32 2147483647, %v11300_v30 }
 0x237   :  { %v11293_v54 = vpop.f32.mrf.mxu2  ;;  %9670 = vpow2.f32 %v8530_v1  ;;  %v1164_v16 = vand.u32 2147483647, %v8537_v61  ;;  %v1191_v27 = vpack.c.bf16 %v8537_v61, %v8537_v61  ;;  %vm949_vm8 = vweird.f32 %v11304_v31 }
 0x238   :  { %9672 = vrcp.f32 %v11300_v30  ;;  %vm11432_vm12 = vcmp.eq.f32.partialorder %v938_v26, 8.507059e+37 }
 0x239   :  { %9674 = vrcp.f32 %v11304_v31  ;;  %v9583_v62 = vld [vmem:[#allocation4] ss:$0 sm:$0xff] }
 0x23a   :  { %v11307_v4 = vpop.eup %9664  ;;  %8287 = vperm.xlu1 %9582, %v9583_v62  }
 0x23b   :  { %v9667_v29 = vpop.eup %9666  ;;  %v915_v33 = vmul.f32 %v11307_v4, %v11296_v15  ;;  %vm920_vm11 = vweird.f32 %v11307_v4 }
 0x23c   :  { %v9669_v35 = vpop.eup %9668  ;;  %v11314_v11 = vadd.f32 1.0, %v9667_v29  ;;  %vm11363_vm3 = vmor %vm919_vm13, %vm920_vm11 }
 0x23d   :  { %v9671_v38 = vpop.eup %9670  ;;  %v11318_v42 = vadd.f32 1.0, %v9669_v35  ;;  %v916_v43 = vsub.f32 1.0, %v915_v33 }
 0x23e   :  { %v11312_v56 = vpop.eup %9672  ;;  %v11320_v48 = vadd.f32 1.0, %v9671_v38  ;;  %9676 = vrcp.f32 %v11314_v11  ;;  %v1386_v38 = vsel %vm273_vm1, %v1191_v27, 0  ;;  %vm995_vm10 = vweird.f32 %v11314_v11 }
 0x23f   :  { %v11302_v34 = vpop.f32.mrf.mxu2  ;;  %v11316_v39 = vpop.eup %9674  ;;  %v930_v46 = vmul.f32 %v11312_v56, %v11300_v30  ;;  %9678 = vrcp.f32 %v11318_v42  ;;  %v917_v51 = vmul.f32 %v11307_v4, %v916_v43  ;;  %vm935_vm4 = vweird.f32 %v11312_v56  ;;  %v9459_v43 = vld [vmem:[%s16998_s1] sm:$0xff]  ;;  %1395 = vmatpush.bf16.msrb.mxu3 %v1386_v38 }
 0x240   :  { %v945_v2 = vmul.f32 %v11316_v39, %v11304_v31  ;;  %9680 = vrcp.f32 %v11320_v48  ;;  %vm950_vm5 = vweird.f32 %v11316_v39  ;;  %vm11401_vm7 = vmor %vm934_vm15, %vm935_vm4  ;;  %v1016_v38 = vand.u32 2147483648, %v11318_v42 }
 0x241   :  { %v931_v57 = vsub.f32 1.0, %v930_v46  ;;  %v918_v40 = vadd.f32 %v11307_v4, %v917_v51  ;;  %vm11410_vm9 = vmor %vm949_vm8, %vm950_vm5 }
 0x242   :  { %v946_v58 = vsub.f32 1.0, %v945_v2  ;;  %8610 = vmatmul.msk.bf16.vlgmr.msrb.gmra.mxu3 %vm248_vm2, %v9459_v43 }
 0x243   :  { %v932_v17 = vmul.f32 %v11312_v56, %v931_v57  ;;  %v922_v1 = vsel %vm11363_vm3, %v11307_v4, %v918_v40  ;;  %v866_v57 = vadd.f32 %v11288_v5, %v11278_v44  ;;  %v869_v40 = vadd.f32 %v11293_v54, %v11284_v8 }
 0x244   :  { %v11336_v22 = vpop.eup %9676  ;;  %v947_v21 = vmul.f32 %v11316_v39, %v946_v58  ;;  %v11392_v51 = vsel %vm11347_vm14, %v926_v60, %v922_v1  ;;  %v955_v5 = vand.u32 2147483648, %v11304_v31  ;;  %vm1010_vm14 = vweird.f32 %v11318_v42 }
 0x245   :  { %v11344_v9 = vpop.eup %9678  ;;  %v991_v15 = vmul.f32 %v11336_v22, %v11314_v11  ;;  %vm996_vm13 = vweird.f32 %v11336_v22 }
 0x246   :  { %v11351_v12 = vpop.eup %9680  ;;  %v1006_v20 = vmul.f32 %v11344_v9, %v11318_v42  ;;  %v11387_v4 = vadd.f32 %v11316_v39, %v947_v21  ;;  %v871_v21 = vadd.f32 %v11302_v34, %v11286_v32  ;;  %vm1011_vm15 = vweird.f32 %v11344_v9  ;;  %vm11463_vm4 = vmor %vm995_vm10, %vm996_vm13 }
 0x247   :  { %v873_v37 = vpop.f32.mrf.mxu2  ;;  %v1021_v35 = vmul.f32 %v11351_v12, %v11320_v48  ;;  %vm1026_vm3 = vweird.f32 %v11351_v12  ;;  %vm11474_vm8 = vmor %vm1010_vm14, %vm1011_vm15  ;;  %vm1025_vm10 = vweird.f32 %v11320_v48 }
 0x248   :  { %v874_v50 = vadd.f32 %v873_v37, %v757_v3  ;;  %v11374_v3 = vor.u32 1.1754944e-38, %v940_v6  ;;  %v1165_v37 = vsel %vm51_vm6, %v1164_v16, 0.0  ;;  %v952_v8 = vsel %vm11410_vm9, %v11316_v39, %v11387_v4  ;;  %vm11488_vm13 = vmor %vm1025_vm10, %vm1026_vm3 }
 0x249   :  { %v1166_v46 = vrot.slane %v1165_v37, 4  ;;  %v999_v16 = vand.u32 2147483647, %v11314_v11 }
 0x24a   :  { %v8531_v59 = vmul.f32 -1.442695, %v874_v50  ;;  %v992_v50 = vsub.f32 1.0, %v991_v15 }
 0x24b   :  { %vm1000_vm14 = vcmp.eq.f32.partialorder %v999_v16, 8.507059e+37 }
 0x24c   :  { %v993_v45 = vmul.f32 %v11336_v22, %v992_v50  ;;  %v1031_v50 = vand.u32 2147483648, %v11320_v48 }
 0x24e   :  { %v994_v26 = vadd.f32 %v11336_v22, %v993_v45 }
 0x24f   :  { %v875_v53 = vpop.f32.mrf.mxu2 }
 0x250   :  { %v876_v55 = vadd.f32 %v875_v53, %v759_v49  ;;  %v11384_v49 = vadd.f32 %v11312_v56, %v932_v17  ;;  %v953_v53 = vand.u32 2147483647, %v11304_v31  ;;  %v1001_v31 = vand.u32 2147483648, %v11314_v11 }
 0x251   :  { %v998_v11 = vsel %vm11463_vm4, %v11336_v22, %v994_v26 }
 0x252   :  { %v8532_v63 = vmul.f32 -1.442695, %v876_v55  ;;  %v1007_v55 = vsub.f32 1.0, %v1006_v20  ;;  %v937_v30 = vsel %vm11401_vm7, %v11312_v56, %v11384_v49  ;;  %vm11440_vm11 = vcmp.eq.f32.partialorder %v953_v53, 8.507059e+37 }
 0x253   :  { %v1014_v53 = vand.u32 2147483647, %v11318_v42  ;;  %v1002_v62 = vor.u32 1.1754944e-38, %v1001_v31  ;;  %v942_v45 = vsel %vm11432_vm12, %v11374_v3, %v937_v30  ;;  %v9460_v3 = vld [vmem:[%s16998_s1 + $0x8] sm:$0xff] }
 0x254   :  { %9682 = vpow2.f32 %v8532_v63  ;;  %v1022_v63 = vsub.f32 1.0, %v1021_v35  ;;  %v1008_v60 = vmul.f32 %v11344_v9, %v1007_v55  ;;  %v1029_v55 = vand.u32 2147483647, %v11320_v48  ;;  %8611 = vmatmul.msk.bf16.gmra.mxu3 %vm248_vm2, %v9460_v3 }
 0x255   :  { %9684 = vpow2.f32 %v8531_v59  ;;  %v1167_v59 = vadd.f32 %v1166_v46, %v1165_v37  ;;  %v1003_v31 = vsel %vm1000_vm14, %v1002_v62, %v998_v11  ;;  %vm1015_vm15 = vcmp.eq.f32.partialorder %v1014_v53, 8.507059e+37 }
 0x256   :  { %v1023_v23 = vmul.f32 %v11351_v12, %v1022_v63  ;;  %v1009_v35 = vadd.f32 %v11344_v9, %v1008_v60  ;;  %vm1030_vm7 = vcmp.eq.f32.partialorder %v1029_v55, 8.507059e+37 }
 0x257   :  { %v878_v29 = vpop.f32.mrf.mxu2  ;;  %v1168_v6 = vrot.slane %v1167_v59, 2 }
 0x258   :  { %v879_v33 = vadd.f32 %v878_v29, %v762_v47  ;;  %v764_v47 = vpop.f32.mrf.mxu3  ;;  %v45_v29 = vld [vmem:[%s17001_s4] sm:$0xf]  ;;  %v1024_v43 = vadd.f32 %v11351_v12, %v1023_v23  ;;  %v1013_v63 = vsel %vm11474_vm8, %v11344_v9, %v1009_v35 }
 0x259   :  { %v1169_v15 = vadd.f32 %v1168_v6, %v1167_v59  ;;  %603 = vperm.xlu1 %9582, %v45_v29   ;;  %v1017_v6 = vor.u32 1.1754944e-38, %v1016_v38 }
 0x25a   :  { %v9683_v2 = vpop.eup %9682  ;;  %v8533_v25 = vmul.f32 -1.442695, %v879_v33  ;;  %v1028_v9 = vsel %vm11488_vm13, %v11351_v12, %v1024_v43 }
 0x25b   :  { %v9685_v28 = vpop.eup %9684  ;;  %v11424_v54 = vadd.f32 1.0, %v9683_v2  ;;  %v1170_v32 = vrot.slane %v1169_v15, 1  ;;  %v1018_v12 = vsel %vm1015_vm15, %v1017_v6, %v1013_v63 }
 0x25c   :  { %9686 = vpow2.f32 %v8533_v25  ;;  %v11429_v10 = vadd.f32 1.0, %v9685_v28 }
 0x25d   :  { %9688 = vtanh.f32 %v866_v57  ;;  %v1171_v37 = vadd.f32 %v1170_v32, %v1169_v15  ;;  %v1081_v53 = vand.u32 2147483648, %v11424_v54 }
 0x25e   :  { %9690 = vtanh.f32 %v869_v40  ;;  %v956_v40 = vor.u32 1.1754944e-38, %v955_v5  ;;  %vm1060_vm10 = vweird.f32 %v11429_v10  ;;  %v1064_v62 = vand.u32 2147483647, %v11429_v10 }
 0x25f   :  { %v880_v61 = vpop.f32.mrf.mxu2  ;;  %9692 = vrcp.f32 %v11424_v54  ;;  %vm1172_vm5 = vcmp.ne.f32.partialorder %v1171_v37, 0.0  ;;  %v1066_v42 = vand.u32 2147483648, %v11429_v10 }
 0x260   :  { %v881_v20 = vadd.f32 %v880_v61, %v764_v47  ;;  %9694 = vrcp.f32 %v11429_v10  ;;  %v1173_v57 = vsel %vm1172_vm5, 1, %v17011_v0  ;;  %v957_v56 = vsel %vm11440_vm11, %v956_v40, %v952_v8  ;;  %v9461_v40 = vld [vmem:[%s16998_s1 + $0x10] sm:$0xff] }
 0x261   :  { %9696 = vtanh.f32 %v871_v21  ;;  %v11496_v22 = vadd.s32 %v1173_v57, %v11223_v52  ;;  %v1032_v52 = vor.u32 1.1754944e-38, %v1031_v50  ;;  %v1116_v8 = vmul.f32 %v1003_v31, %v11131_v36 }
 0x262   :  { %v9687_v34 = vpop.eup %9686  ;;  %v8534_v1 = vmul.f32 -1.442695, %v881_v20  ;;  %vm1075_vm11 = vweird.f32 %v11424_v54  ;;  %v1079_v50 = vand.u32 2147483647, %v11424_v54 }
 0x263   :  { %v11454_v33 = vadd.f32 1.0, %v9687_v34  ;;  %v9689_v46 = vpop.eup %9688  ;;  %v1033_v17 = vsel %vm1030_vm7, %v1032_v52, %v1028_v9  ;;  %v1082_v52 = vor.u32 1.1754944e-38, %v1081_v53 }
 0x264   :  { %9698 = vpow2.f32 %v8534_v1  ;;  %v9691_v25 = vpop.eup %9690  ;;  %v1120_v58 = vmul.f32 %v9689_v46, %v11392_v51  ;;  %v1117_v51 = vmul.f32 %v1018_v12, %v11134_v19  ;;  %v1118_v15 = vmul.f32 %v1033_v17, %v11136_v41  ;;  %8612 = vmatmul.msk.bf16.gmra.mxu3 %vm248_vm2, %v9461_v40 }
 0x265   :  { %9700 = vrcp.f32 %v11454_v33  ;;  %v11484_v59 = vpop.eup %9692  ;;  %v1121_v44 = vmul.f32 %v9691_v25, %v942_v45  ;;  %v1096_v29 = vand.u32 2147483648, %v11454_v33  ;;  %vm1090_vm4 = vweird.f32 %v11454_v33 }
 0x266   :  { %v11498_v48 = vpop.eup %9694  ;;  %v1071_v30 = vmul.f32 %v11484_v59, %v11424_v54  ;;  %v11530_v61 = vadd.f32 %v1120_v58, %v1116_v8  ;;  %vm1076_vm3 = vweird.f32 %v11484_v59  ;;  %v1094_v37 = vand.u32 2147483647, %v11454_v33  ;;  %v1140_v8 = vld [vmem:[%s16999_s3] sm:$0x7] }
 0x267   :  { %v9697_v5 = vpop.eup %9696  ;;  %v1056_v39 = vmul.f32 %v11498_v48, %v11429_v10  ;;  %v11533_v27 = vadd.f32 %v1121_v44, %v1117_v51  ;;  %vm1061_vm12 = vweird.f32 %v11498_v48  ;;  %v1097_v57 = vor.u32 1.1754944e-38, %v1096_v29  ;;  %vm11565_vm13 = vmor %vm1075_vm11, %vm1076_vm3  ;;  %v9463_v51 = vld [vmem:[%s16998_s1 + $0x20] sm:$0xff] }
 0x268   :  { %v1122_v21 = vmul.f32 %v9697_v5, %v957_v56  ;;  %v1072_v23 = vsub.f32 1.0, %v1071_v30  ;;  %vm1095_vm14 = vcmp.eq.f32.partialorder %v1094_v37, 8.507059e+37  ;;  %vm11574_vm7 = vmor %vm1060_vm10, %vm1061_vm12  ;;  %vm1080_vm12 = vcmp.eq.f32.partialorder %v1079_v50, 8.507059e+37  ;;  %v9473_v37 = vld [vmem:[%s16996_s2 + $0x30] sm:$0xff] }
 0x269   :  { %v1057_v20 = vsub.f32 1.0, %v1056_v39  ;;  %vm1065_vm3 = vcmp.eq.f32.partialorder %v1064_v62, 8.507059e+37 }
 0x26a   :  { %v9699_v49 = vpop.eup %9698  ;;  %v11535_v32 = vadd.f32 %v1122_v21, %v1118_v15  ;;  %v1073_v34 = vmul.f32 %v11484_v59, %v1072_v23  ;;  %v9462_v21 = vld [vmem:[%s16998_s1 + $0x18] sm:$0xff]  ;;  %v9469_v15 = vld [vmem:[%s16996_s2 + $0x10] sm:$0xff]  ;;  %v9464_v23 = vld [vmem:[%s16998_s1 + $0x28] sm:$0xff] }
 0x26b   :  { %v9701_v60 = vpop.eup %9700  ;;  %v1054_v4 = vadd.f32 1.0, %v9699_v49  ;;  %v1058_v19 = vmul.f32 %v11498_v48, %v1057_v20  ;;  %v1067_v49 = vor.u32 1.1754944e-38, %v1066_v42  ;;  %v9465_v20 = vld [vmem:[%s16998_s1 + $0x30] sm:$0xff] }
 0x26c   :  { %v1086_v47 = vmul.f32 %v9701_v60, %v11454_v33  ;;  %vm1091_vm9 = vweird.f32 %v9701_v60  ;;  %v1074_v38 = vadd.f32 %v11484_v59, %v1073_v34  ;;  %v9466_v34 = vld [vmem:[%s16998_s1 + $0x38] sm:$0xff] }
 0x26d   :  { %9702 = vrcp.f32 %v1054_v4  ;;  %vm11549_vm5 = vmor %vm1090_vm4, %vm1091_vm9  ;;  %v1111_v46 = vand.u32 2147483648, %v1054_v4  ;;  %v1059_v2 = vadd.f32 %v11498_v48, %v1058_v19  ;;  %v1109_v33 = vand.u32 2147483647, %v1054_v4 }
 0x26e   :  { %v1087_v16 = vsub.f32 1.0, %v1086_v47  ;;  %9704 = vtanh.f32 %v11530_v61  ;;  %vm1105_vm15 = vweird.f32 %v1054_v4  ;;  %v1078_v54 = vsel %vm11565_vm13, %v11484_v59, %v1074_v38  ;;  %v9468_v47 = vld [vmem:[%s16996_s2 + $0x8] sm:$0xff] }
 0x26f   :  { %9706 = vtanh.f32 %v11533_v27  ;;  %v1112_v5 = vor.u32 1.1754944e-38, %v1111_v46  ;;  %vm1110_vm11 = vcmp.eq.f32.partialorder %v1109_v33, 8.507059e+37  ;;  %v1063_v56 = vsel %vm11574_vm7, %v11498_v48, %v1059_v2  ;;  %v9474_v46 = vld [vmem:[%s16996_s2 + $0x38] sm:$0xff] }
 0x270   :  { %v1088_v36 = vmul.f32 %v9701_v60, %v1087_v16  ;;  %9708 = vtanh.f32 %v11535_v32  ;;  %v1083_v58 = vsel %vm1080_vm12, %v1082_v52, %v1078_v54  ;;  %v1068_v30 = vsel %vm1065_vm3, %v1067_v49, %v1063_v56  ;;  %v9470_v16 = vld [vmem:[%s16996_s2 + $0x18] sm:$0xff] }
 0x271   :  { %9710 = vtanh.f32 %v11291_v14  ;;  %vm17009_vm4 = vcmask 1040384  }
 0x272   :  { %v1089_v1 = vadd.f32 %v9701_v60, %v1088_v36  ;;  %v9471_v36 = vld [vmem:[%s16996_s2 + $0x20] sm:$0xff] }
 0x273   :  { %v9703_v26 = vpop.eup %9702 }
 0x274   :  { %v1101_v41 = vmul.f32 %v9703_v26, %v1054_v4  ;;  %v9705_v25 = vpop.eup %9704  ;;  %v1093_v28 = vsel %vm11549_vm5, %v9701_v60, %v1089_v1  ;;  %vm1106_vm8 = vweird.f32 %v9703_v26  ;;  %v9467_v4 = vld [vmem:[%s16996_s2] sm:$0xff]  ;;  %8613 = vmatmul.msk.bf16.gmra.mxu3 %vm248_vm2, %v9462_v21 }
 0x275   :  { %v9707_v55 = vpop.eup %9706  ;;  %v1098_v9 = vsel %vm1095_vm14, %v1097_v57, %v1093_v28  ;;  %vm1107_vm9 = vmor %vm1105_vm15, %vm1106_vm8  ;;  %v11593_v44 = vmul.f32 %v9705_v25, %v1083_v58 }
 0x276   :  { %v1102_v35 = vsub.f32 1.0, %v1101_v41  ;;  %v9709_v6 = vpop.eup %9708  ;;  %v11587_v59 = vmul.f32 %v9707_v55, %v1098_v9  ;;  %v9472_v41 = vld [vmem:[%s16996_s2 + $0x28] sm:$0xff] }
 0x277   :  { %v9711_v17 = vpop.eup %9710 }
 0x278   :  { %v1103_v11 = vmul.f32 %v9703_v26, %v1102_v35  ;;  %v11595_v48 = vmul.f32 %v9711_v17, %v1068_v30  ;;  %v597_v19 = vpop.f32.mrf.mxu1 }
 0x279   :  { %v4556_v28 = vrot.slane %v597_v19, 4 }
 0x27a   :  { %v1104_v45 = vadd.f32 %v9703_v26, %v1103_v11  ;;  %v1141_v39 = vpack.c.bf16 %v11593_v44, %v11595_v48 }
 0x27c   :  { %v1108_v31 = vsel %vm1107_vm9, %v9703_v26, %v1104_v45 }
 0x27d   :  { %v1113_v3 = vsel %vm1110_vm11, %v1112_v5, %v1108_v31 }
 0x27e   :  { %v11589_v12 = vmul.f32 %v9709_v6, %v1113_v3 }
 0x280   :  { %v1142_v60 = vpack.c.bf16 %v11589_v12, %v11587_v59  ;;  %v599_v29 = vpop.f32.mrf.mxu1 }
 0x282   :  { %1152 = vmatpush.bf16.msra.mxu0 %v1142_v60  ;;  %1278 = vmatpush.bf16.msrb.mxu1 %v1142_v60 }
 0x284   :  { %8614 = vmatmul.msk.bf16.gmra.mxu3 %vm248_vm2, %v9463_v51 }
 0x286   :  { %1153 = vmatpush.bf16.msra.mxu0 %v1141_v39  ;;  %1279 = vmatpush.bf16.msrb.mxu1 %v1141_v39 }
 0x289   :  { %8535 = vmatmul.msk.bf16.vlgmr.msra.gmra.mxu0 %vm134_vm0, %v1140_v8  ;;  %8570 = vmatmul.msk.bf16.vlgmr.msrb.gmra.mxu1 %vm134_vm0, %v9467_v4 }
 0x294   :  { %8615 = vmatmul.msk.bf16.gmra.mxu3 %vm248_vm2, %v9464_v23 }
 0x299   :  { %8571 = vmatmul.msk.bf16.gmra.mxu1 %vm134_vm0, %v9468_v47 }
 0x2a4   :  { %8616 = vmatmul.msk.bf16.gmra.mxu3 %vm248_vm2, %v9465_v20 }
 0x2a9   :  { %8572 = vmatmul.msk.bf16.gmra.mxu1 %vm134_vm0, %v9469_v15 }
 0x2ac   :  { %v11643_v26 = vpop.permute.xlu1 %8287 }
 0x2ad   :  { %17113 = vst [vmem:[#allocation5_spill] sm:$0xff] %v11643_v26 }
 0x2b4   :  { %8617 = vmatmul.msk.bf16.gmra.mxu3 %vm248_vm2, %v9466_v34 }
 0x2b9   :  { %8573 = vmatmul.msk.bf16.gmra.mxu1 %vm134_vm0, %v9470_v16 }
 0x2c5   :  { %v1397_v38 = vpop.f32.mrf.mxu3 }
 0x2c9   :  { %8574 = vmatmul.msk.bf16.gmra.mxu1 %vm134_vm0, %v9471_v36 }
 0x2cb   :  { %v11648_v1 = vpop.permute.xlu1 %603 }
 0x2cc   :  { %v606_v35 = vadd.f32 %v11648_v1, %v597_v19 }
 0x2cd   :  { %v1399_v43 = vpop.f32.mrf.mxu3 }
 0x2ce   :  { %607 = vst [vmem:[%s17002_s11] sm:$0xf] %v606_v35 }
 0x2d7   :  { %v1402_v2 = vpop.f32.mrf.mxu3 }
 0x2d9   :  { %8575 = vmatmul.msk.bf16.gmra.mxu1 %vm134_vm0, %v9472_v41 }
 0x2df   :  { %v11663_v50 = vpop.f32.mrf.mxu3 }
 0x2e7   :  { %v1407_v63 = vpop.f32.mrf.mxu3 }
 0x2e9   :  { %8576 = vmatmul.msk.bf16.gmra.mxu1 %vm134_vm0, %v9473_v37 }
 0x2ef   :  { %v11674_v45 = vpop.f32.mrf.mxu3 }
 0x2f7   :  { %v1412_v9 = vpop.f32.mrf.mxu3 }
 0x2f9   :  { %8577 = vmatmul.msk.bf16.gmra.mxu1 %vm134_vm0, %v9474_v46 }
 0x2ff   :  { %v1414_v49 = vpop.f32.mrf.mxu3 }
 0x306   :  { %v1155_v53 = vpop.f32.mrf.mxu0  ;;  %v1281_v25 = vpop.f32.mrf.mxu1 }
 0x307   :  { %v1159_v11 = vadd.f32 %v1155_v53, %v11648_v1  ;;  %v4559_v33 = vrot.slane %v1155_v53, 3  ;;  %v1398_v55 = vadd.f32 %v1397_v38, %v1281_v25  ;;  %v1417_v39 = vpop.f32.mrf.mxu3 }
 0x309   :  { %8536 = vst [vmem:[%s17002_s11 + $0x4] sm:$0xf] %v1159_v11  ;;  %v11670_v57 = vsel %vm17009_vm4, %v4556_v28, %v4559_v33  ;;  %v8618_v54 = vmul.f32 -1.442695, %v1398_v55 }
 0x30b   :  { %9712 = vpow2.f32 %v8618_v54 }
 0x30e   :  { %v1283_v62 = vpop.f32.mrf.mxu1  ;;  %v1157_v42 = vpop.f32.mrf.mxu0 }
 0x30f   :  { %v11676_v20 = vpop.f32.mrf.mxu3  ;;  %v1400_v41 = vadd.f32 %v1399_v43, %v1283_v62 }
 0x311   :  { %v9713_v56 = vpop.eup %9712  ;;  %v8619_v25 = vmul.f32 -1.442695, %v1400_v41 }
 0x312   :  { %v1449_v58 = vadd.f32 1.0, %v9713_v56 }
 0x314   :  { %v1464_v46 = vand.u32 2147483648, %v1449_v58  ;;  %vm1458_vm14 = vweird.f32 %v1449_v58 }
 0x316   :  { %v1286_v40 = vpop.f32.mrf.mxu1  ;;  %v1465_v43 = vor.u32 1.1754944e-38, %v1464_v46 }
 0x317   :  { %v11672_v6 = vadd.f32 %v1402_v2, %v1286_v40  ;;  %v1462_v2 = vand.u32 2147483647, %v1449_v58  ;;  %v11678_v33 = vpop.f32.mrf.mxu3 }
 0x319   :  { %vm1463_vm9 = vcmp.eq.f32.partialorder %v1462_v2, 8.507059e+37 }
 0x31e   :  { %v1288_v10 = vpop.f32.mrf.mxu1 }
 0x326   :  { %v1291_v5 = vpop.f32.mrf.mxu1 }
 0x327   :  { %v1408_v52 = vadd.f32 %v1407_v63, %v1291_v5 }
 0x329   :  { %v8622_v31 = vmul.f32 -1.442695, %v1408_v52  ;;  %v1405_v52 = vadd.f32 %v11663_v50, %v1288_v10 }
 0x32b   :  { %9714 = vpow2.f32 %v8622_v31 }
 0x32c   :  { %9716 = vrcp.f32 %v1449_v58 }
 0x32e   :  { %v1293_v3 = vpop.f32.mrf.mxu1 }
 0x32f   :  { %v1410_v56 = vadd.f32 %v11674_v45, %v1293_v3 }
 0x331   :  { %v9715_v30 = vpop.eup %9714 }
 0x332   :  { %v1525_v60 = vadd.f32 1.0, %v9715_v30  ;;  %v9717_v4 = vpop.eup %9716 }
 0x333   :  { %v1454_v47 = vmul.f32 %v9717_v4, %v1449_v58  ;;  %vm1459_vm10 = vweird.f32 %v9717_v4  ;;  %v8620_v58 = vmul.f32 -1.442695, %v11672_v6 }
 0x334   :  { %9718 = vrcp.f32 %v1525_v60  ;;  %v1540_v29 = vand.u32 2147483648, %v1525_v60  ;;  %vm1534_vm8 = vweird.f32 %v1525_v60  ;;  %v1538_v38 = vand.u32 2147483647, %v1525_v60  ;;  %vm1460_vm15 = vmor %vm1458_vm14, %vm1459_vm10 }
 0x335   :  { %v1455_v23 = vsub.f32 1.0, %v1454_v47  ;;  %v8623_v47 = vmul.f32 -1.442695, %v1410_v56 }
 0x336   :  { %v1296_v17 = vpop.f32.mrf.mxu1  ;;  %v1541_v28 = vor.u32 1.1754944e-38, %v1540_v29  ;;  %vm1539_vm7 = vcmp.eq.f32.partialorder %v1538_v38, 8.507059e+37 }
 0x337   :  { %v1456_v36 = vmul.f32 %v9717_v4, %v1455_v23  ;;  %v1413_v30 = vadd.f32 %v1412_v9, %v1296_v17 }
 0x339   :  { %v1457_v37 = vadd.f32 %v9717_v4, %v1456_v36 }
 0x33a   :  { %v9719_v8 = vpop.eup %9718 }
 0x33b   :  { %v1530_v21 = vmul.f32 %v9719_v8, %v1525_v60  ;;  %vm1535_vm5 = vweird.f32 %v9719_v8  ;;  %v1461_v11 = vsel %vm1460_vm15, %v9717_v4, %v1457_v37  ;;  %v8621_v4 = vmul.f32 -1.442695, %v1405_v52 }
 0x33c   :  { %vm1536_vm13 = vmor %vm1534_vm8, %vm1535_vm5  ;;  %v1466_v63 = vsel %vm1463_vm9, %v1465_v43, %v1461_v11 }
 0x33d   :  { %v1531_v51 = vsub.f32 1.0, %v1530_v21 }
 0x33e   :  { %v1298_v15 = vpop.f32.mrf.mxu1 }
 0x33f   :  { %v1532_v16 = vmul.f32 %v9719_v8, %v1531_v51 }
 0x341   :  { %v1533_v19 = vadd.f32 %v9719_v8, %v1532_v16 }
 0x343   :  { %v1537_v53 = vsel %vm1536_vm13, %v9719_v8, %v1533_v19  ;;  %v1415_v8 = vadd.f32 %v1414_v49, %v1298_v15 }
 0x344   :  { %v1542_v55 = vsel %vm1539_vm7, %v1541_v28, %v1537_v53 }
 0x345   :  { %v1669_v40 = vmul.f32 %v1542_v55, %v11291_v14  ;;  %v8624_v14 = vmul.f32 -1.442695, %v1413_v30  ;;  %v8625_v51 = vmul.f32 -1.442695, %v1415_v8 }
 0x346   :  { %v1301_v34 = vpop.f32.mrf.mxu1 }
 0x347   :  { %v1418_v35 = vadd.f32 %v1417_v39, %v1301_v34  ;;  %v11690_v39 = vpop.f32.mrf.mxu3 }
 0x349   :  { %9720 = vtanh.f32 %v1418_v35 }
 0x34a   :  { %9722 = vpow2.f32 %v8619_v25 }
 0x34b   :  { %9724 = vpow2.f32 %v8620_v58 }
 0x34c   :  { %9726 = vpow2.f32 %v8621_v4 }
 0x34e   :  { %v11680_v62 = vpop.f32.mrf.mxu1 }
 0x34f   :  { %v9721_v42 = vpop.eup %9720  ;;  %v1427_v45 = vpop.f32.mrf.mxu3 }
 0x350   :  { %v1673_v54 = vmul.f32 %v9721_v42, %v1466_v63  ;;  %v9723_v31 = vpop.eup %9722 }
 0x351   :  { %v1450_v21 = vadd.f32 1.0, %v9723_v31  ;;  %v9725_v6 = vpop.eup %9724 }
 0x352   :  { %v11683_v5 = vadd.f32 %v1673_v54, %v1669_v40  ;;  %v9727_v10 = vpop.eup %9726  ;;  %v11696_v17 = vadd.f32 1.0, %v9725_v6 }
 0x353   :  { %9728 = vrcp.f32 %v1450_v21  ;;  %v11698_v15 = vadd.f32 1.0, %v9727_v10  ;;  %v1477_v54 = vand.u32 2147483647, %v1450_v21  ;;  %v1479_v52 = vand.u32 2147483648, %v1450_v21 }
 0x354   :  { %9730 = vpow2.f32 %v8623_v47  ;;  %v1494_v4 = vand.u32 2147483648, %v11696_v17  ;;  %vm1473_vm12 = vweird.f32 %v1450_v21  ;;  %vm1488_vm8 = vweird.f32 %v11696_v17 }
 0x355   :  { %9732 = vpow2.f32 %v8624_v14  ;;  %vm11740_vm5 = vcmp.eq.f32.partialorder %v1477_v54, 8.507059e+37  ;;  %vm1503_vm13 = vweird.f32 %v11698_v15 }
 0x356   :  { %v11688_v60 = vpop.f32.mrf.mxu1  ;;  %9734 = vpow2.f32 %v8625_v51 }
 0x357   :  { %9736 = vrcp.f32 %v11696_v17  ;;  %v1429_v29 = vpop.f32.mrf.mxu3 }
 0x358   :  { %9738 = vrcp.f32 %v11698_v15 }
 0x359   :  { %v11694_v9 = vpop.eup %9728 }
 0x35a   :  { %v9731_v3 = vpop.eup %9730  ;;  %v1469_v34 = vmul.f32 %v11694_v9, %v1450_v21  ;;  %vm1474_vm11 = vweird.f32 %v11694_v9 }
 0x35b   :  { %v9733_v49 = vpop.eup %9732  ;;  %v11700_v16 = vadd.f32 1.0, %v9731_v3  ;;  %vm11736_vm3 = vmor %vm1473_vm12, %vm1474_vm11 }
 0x35c   :  { %v9735_v23 = vpop.eup %9734  ;;  %v11704_v19 = vadd.f32 1.0, %v9733_v49  ;;  %v1470_v35 = vsub.f32 1.0, %v1469_v34 }
 0x35d   :  { %v11707_v41 = vadd.f32 1.0, %v9735_v23  ;;  %9740 = vrcp.f32 %v11700_v16  ;;  %v11712_v38 = vpop.eup %9736  ;;  %v1492_v23 = vand.u32 2147483647, %v11696_v17  ;;  %vm1549_vm15 = vweird.f32 %v11700_v16 }
 0x35e   :  { %v11692_v50 = vpop.f32.mrf.mxu1  ;;  %9742 = vrcp.f32 %v11704_v19  ;;  %v11714_v46 = vpop.eup %9738  ;;  %v1471_v53 = vmul.f32 %v11694_v9, %v1470_v35  ;;  %v1484_v11 = vmul.f32 %v11712_v38, %v11696_v17  ;;  %vm1489_vm10 = vweird.f32 %v11712_v38 }
 0x35f   :  { %9744 = vrcp.f32 %v11707_v41  ;;  %v1499_v42 = vmul.f32 %v11714_v46, %v11698_v15  ;;  %v1432_v8 = vpop.f32.mrf.mxu3  ;;  %vm1504_vm14 = vweird.f32 %v11714_v46  ;;  %vm11780_vm7 = vcmp.eq.f32.partialorder %v1492_v23, 8.507059e+37 }
 0x360   :  { %v1472_v56 = vadd.f32 %v11694_v9, %v1471_v53  ;;  %v1485_v58 = vsub.f32 1.0, %v1484_v11  ;;  %v1570_v51 = vand.u32 2147483648, %v11704_v19  ;;  %vm11807_vm4 = vmor %vm1503_vm13, %vm1504_vm14  ;;  %vm1579_vm14 = vweird.f32 %v11707_v41 }
 0x361   :  { %v1500_v47 = vsub.f32 1.0, %v1499_v42  ;;  %v1507_v42 = vand.u32 2147483647, %v11698_v15 }
 0x362   :  { %v1476_v49 = vsel %vm11736_vm3, %v11694_v9, %v1472_v56  ;;  %v1486_v34 = vmul.f32 %v11712_v38, %v1485_v58  ;;  %vm11796_vm3 = vmor %vm1488_vm8, %vm1489_vm10  ;;  %vm1564_vm10 = vweird.f32 %v11704_v19 }
 0x363   :  { %v11717_v28 = vpop.eup %9740  ;;  %v1501_v53 = vmul.f32 %v11714_v46, %v1500_v47  ;;  %vm11786_vm11 = vcmp.eq.f32.partialorder %v1507_v42, 8.507059e+37 }
 0x364   :  { %v11721_v55 = vpop.eup %9742  ;;  %v1545_v31 = vmul.f32 %v11717_v28, %v11700_v16  ;;  %vm1550_vm9 = vweird.f32 %v11717_v28 }
 0x365   :  { %v11725_v40 = vpop.eup %9744  ;;  %v1560_v30 = vmul.f32 %v11721_v55, %v11704_v19  ;;  %vm1565_vm12 = vweird.f32 %v11721_v55  ;;  %vm11817_vm8 = vmor %vm1549_vm15, %vm1550_vm9 }
 0x366   :  { %v1311_v36 = vpop.f32.mrf.mxu1  ;;  %v1575_v14 = vmul.f32 %v11725_v40, %v11707_v41  ;;  %v1546_v3 = vsub.f32 1.0, %v1545_v31  ;;  %vm11828_vm13 = vmor %vm1564_vm10, %vm1565_vm12 }
 0x367   :  { %v1428_v37 = vadd.f32 %v1427_v45, %v1311_v36  ;;  %v1480_v45 = vor.u32 1.1754944e-38, %v1479_v52  ;;  %v1561_v36 = vsub.f32 1.0, %v1560_v30  ;;  %v1487_v52 = vadd.f32 %v11712_v38, %v1486_v34  ;;  %v1434_v30 = vpop.f32.mrf.mxu3 }
 0x369   :  { %v8626_v43 = vmul.f32 -1.442695, %v1428_v37  ;;  %v1576_v37 = vsub.f32 1.0, %v1575_v14  ;;  %v11758_v11 = vsel %vm11740_vm5, %v1480_v45, %v1476_v49  ;;  %v1562_v54 = vmul.f32 %v11721_v55, %v1561_v36 }
 0x36a   :  { %vm1580_vm5 = vweird.f32 %v11725_v40 }
 0x36b   :  { %v1563_v45 = vadd.f32 %v11721_v55, %v1562_v54  ;;  %vm11839_vm15 = vmor %vm1579_vm14, %vm1580_vm5 }
 0x36e   :  { %v1313_v2 = vpop.f32.mrf.mxu1 }
 0x36f   :  { %v1430_v25 = vadd.f32 %v1429_v29, %v1313_v2  ;;  %v11751_v29 = vor.u32 1.1754944e-38, %v1494_v4  ;;  %v1420_v2 = vadd.f32 %v11676_v20, %v11680_v62  ;;  %v1425_v20 = vadd.f32 %v11690_v39, %v11692_v50 }
 0x370   :  { %v1509_v62 = vand.u32 2147483648, %v11698_v15  ;;  %v1555_v39 = vand.u32 2147483648, %v11700_v16  ;;  %v1553_v50 = vand.u32 2147483647, %v11700_v16  ;;  %v1585_v15 = vand.u32 2147483648, %v11707_v41 }
 0x371   :  { %v8627_v63 = vmul.f32 -1.442695, %v1430_v25 }
 0x372   :  { %vm1554_vm9 = vcmp.eq.f32.partialorder %v1553_v50, 8.507059e+37  ;;  %v1510_v54 = vor.u32 1.1754944e-38, %v1509_v62  ;;  %v11869_v50 = vld [vmem:[%s16997_s0 + $0xc] sm:$0xf] }
 0x373   :  { %9746 = vpow2.f32 %v8627_v63  ;;  %v1547_v63 = vmul.f32 %v11717_v28, %v1546_v3 }
 0x374   :  { %9748 = vpow2.f32 %v8626_v43  ;;  %v1423_v43 = vadd.f32 %v11678_v33, %v11688_v60  ;;  %v1577_v33 = vmul.f32 %v11725_v40, %v1576_v37  ;;  %v1502_v60 = vadd.f32 %v11714_v46, %v1501_v53 }
 0x375   :  { %v1583_v37 = vand.u32 2147483647, %v11707_v41 }
 0x376   :  { %v1316_v10 = vpop.f32.mrf.mxu1  ;;  %v1578_v17 = vadd.f32 %v11725_v40, %v1577_v33 }
 0x377   :  { %v1433_v21 = vadd.f32 %v1432_v8, %v1316_v10  ;;  %v1548_v8 = vadd.f32 %v11717_v28, %v1547_v63 }
 0x378   :  { %v1582_v42 = vsel %vm11839_vm15, %v11725_v40, %v1578_v17 }
 0x379   :  { %v9747_v35 = vpop.eup %9746  ;;  %v8628_v9 = vmul.f32 -1.442695, %v1433_v21  ;;  %v1568_v21 = vand.u32 2147483647, %v11704_v19  ;;  %v1552_v16 = vsel %vm11817_vm8, %v11717_v28, %v1548_v8  ;;  %v1556_v19 = vor.u32 1.1754944e-38, %v1555_v39 }
 0x37a   :  { %v9749_v25 = vpop.eup %9748  ;;  %v11771_v31 = vadd.f32 1.0, %v9747_v35  ;;  %v1571_v28 = vor.u32 1.1754944e-38, %v1570_v51 }
 0x37b   :  { %9750 = vpow2.f32 %v8628_v9  ;;  %v11775_v56 = vadd.f32 1.0, %v9749_v25  ;;  %v1491_v9 = vsel %vm11796_vm3, %v11712_v38, %v1487_v52  ;;  %v1567_v25 = vsel %vm11828_vm13, %v11721_v55, %v1563_v45 }
 0x37c   :  { %9752 = vtanh.f32 %v1420_v2  ;;  %v1586_v38 = vor.u32 1.1754944e-38, %v1585_v15  ;;  %vm1569_vm12 = vcmp.eq.f32.partialorder %v1568_v21, 8.507059e+37  ;;  %v1496_v33 = vsel %vm11780_vm7, %v11751_v29, %v1491_v9 }
 0x37d   :  { %9754 = vtanh.f32 %v1423_v43  ;;  %v1506_v43 = vsel %vm11807_vm4, %v11714_v46, %v1502_v60  ;;  %v1572_v39 = vsel %vm1569_vm12, %v1571_v28, %v1567_v25  ;;  %vm1584_vm4 = vcmp.eq.f32.partialorder %v1583_v37, 8.507059e+37 }
 0x37e   :  { %v1318_v4 = vpop.f32.mrf.mxu1  ;;  %9756 = vtanh.f32 %v1425_v20  ;;  %v1557_v20 = vsel %vm1554_vm9, %v1556_v19, %v1552_v16  ;;  %v1511_v40 = vsel %vm11786_vm11, %v1510_v54, %v1506_v43  ;;  %v1587_v60 = vsel %vm1584_vm4, %v1586_v38, %v1582_v42 }
 0x37f   :  { %v1435_v14 = vadd.f32 %v1434_v30, %v1318_v4  ;;  %9758 = vrcp.f32 %v11771_v31  ;;  %v1670_v30 = vmul.f32 %v1557_v20, %v11530_v61  ;;  %v1718_v29 = vand.u32 2147483647, %v11869_v50 }
 0x380   :  { %9760 = vrcp.f32 %v11775_v56  ;;  %v1671_v8 = vmul.f32 %v1572_v39, %v11533_v27  ;;  %v1672_v6 = vmul.f32 %v1587_v60, %v11535_v32  ;;  %vm1614_vm7 = vweird.f32 %v11775_v56 }
 0x381   :  { %v9751_v10 = vpop.eup %9750  ;;  %v8629_v49 = vmul.f32 -1.442695, %v1435_v14  ;;  %v1719_v45 = vsel %vm51_vm6, %v1718_v29, 0.0  ;;  %v1618_v37 = vand.u32 2147483647, %v11775_v56  ;;  %vm1629_vm3 = vweird.f32 %v11771_v31 }
 0x382   :  { %v11824_v36 = vadd.f32 1.0, %v9751_v10  ;;  %v9753_v34 = vpop.eup %9752  ;;  %v1633_v28 = vand.u32 2147483647, %v11771_v31 }
 0x383   :  { %9762 = vpow2.f32 %v8629_v49  ;;  %v9755_v2 = vpop.eup %9754  ;;  %v1674_v52 = vmul.f32 %v9753_v34, %v11758_v11  ;;  %v1720_v49 = vrot.slane %v1719_v45, 4 }
 0x384   :  { %9764 = vrcp.f32 %v11824_v36  ;;  %v9757_v41 = vpop.eup %9756  ;;  %v1675_v46 = vmul.f32 %v9755_v2, %v1496_v33  ;;  %v1648_v25 = vand.u32 2147483647, %v11824_v36  ;;  %vm1644_vm10 = vweird.f32 %v11824_v36 }
 0x385   :  { %v11856_v63 = vpop.eup %9758  ;;  %v1676_v11 = vmul.f32 %v9757_v41, %v1511_v40  ;;  %v11882_v51 = vadd.f32 %v1674_v52, %v1670_v30  ;;  %v1721_v32 = vadd.f32 %v1720_v49, %v1719_v45  ;;  %v1650_v41 = vand.u32 2147483648, %v11824_v36  ;;  %v9489_v52 = vld [vmem:[%s16996_s2 + $0x30] sm:$0xff] }
 0x386   :  { %v11858_v55 = vpop.eup %9760  ;;  %v1625_v58 = vmul.f32 %v11856_v63, %v11771_v31  ;;  %v11888_v10 = vadd.f32 %v1675_v46, %v1671_v8  ;;  %vm1630_vm8 = vweird.f32 %v11856_v63  ;;  %v1635_v40 = vand.u32 2147483648, %v11771_v31 }
 0x387   :  { %v1610_v47 = vmul.f32 %v11858_v55, %v11775_v56  ;;  %v11891_v3 = vadd.f32 %v1676_v11, %v1672_v6  ;;  %v1722_v34 = vrot.slane %v1721_v32, 2  ;;  %vm1615_vm11 = vweird.f32 %v11858_v55  ;;  %vm11929_vm9 = vmor %vm1629_vm3, %vm1630_vm8 }
 0x388   :  { %v1626_v27 = vsub.f32 1.0, %v1625_v58  ;;  %vm1649_vm15 = vcmp.eq.f32.partialorder %v1648_v25, 8.507059e+37  ;;  %v1651_v11 = vor.u32 1.1754944e-38, %v1650_v41  ;;  %v1620_v58 = vand.u32 2147483648, %v11775_v56  ;;  %v9485_v25 = vld [vmem:[%s16996_s2 + $0x10] sm:$0xff] }
 0x389   :  { %v9763_v62 = vpop.eup %9762  ;;  %v1611_v23 = vsub.f32 1.0, %v1610_v47  ;;  %v1723_v53 = vadd.f32 %v1722_v34, %v1721_v32  ;;  %vm11933_vm12 = vcmp.eq.f32.partialorder %v1633_v28, 8.507059e+37  ;;  %v1636_v45 = vor.u32 1.1754944e-38, %v1635_v40  ;;  %v9477_v41 = vld [vmem:[%s16998_s1 + $0x10] sm:$0xff]  ;;  %v9486_v28 = vld [vmem:[%s16996_s2 + $0x18] sm:$0xff] }
 0x38a   :  { %v11875_v4 = vpop.eup %9764  ;;  %v11880_v14 = vadd.f32 1.0, %v9763_v62  ;;  %v1627_v21 = vmul.f32 %v11856_v63, %v1626_v27 }
 0x38b   :  { %v1640_v61 = vmul.f32 %v11875_v4, %v11824_v36  ;;  %v1612_v16 = vmul.f32 %v11858_v55, %v1611_v23  ;;  %vm1645_vm5 = vweird.f32 %v11875_v4  ;;  %v1724_v20 = vrot.slane %v1723_v53, 1 }
 0x38c   :  { %9766 = vrcp.f32 %v11880_v14  ;;  %v1628_v38 = vadd.f32 %v11856_v63, %v1627_v21  ;;  %vm11913_vm13 = vmor %vm1644_vm10, %vm1645_vm5  ;;  %v1663_v33 = vand.u32 2147483647, %v11880_v14  ;;  %v1665_v39 = vand.u32 2147483648, %v11880_v14 }
 0x38d   :  { %v1641_v17 = vsub.f32 1.0, %v1640_v61  ;;  %9768 = vtanh.f32 %v11683_v5  ;;  %v1613_v46 = vadd.f32 %v11858_v55, %v1612_v16  ;;  %v1725_v30 = vadd.f32 %v1724_v20, %v1723_v53  ;;  %vm11942_vm5 = vmor %vm1614_vm7, %vm1615_vm11  ;;  %v9484_v53 = vld [vmem:[%s16996_s2 + $0x8] sm:$0xff] }
 0x38e   :  { %9770 = vtanh.f32 %v11882_v51  ;;  %vm1659_vm4 = vweird.f32 %v11880_v14  ;;  %v1632_v31 = vsel %vm11929_vm9, %v11856_v63, %v1628_v38  ;;  %v1666_v61 = vor.u32 1.1754944e-38, %v1665_v39  ;;  %v9479_v38 = vld [vmem:[%s16998_s1 + $0x20] sm:$0xff]  ;;  %v9488_v20 = vld [vmem:[%s16996_s2 + $0x28] sm:$0xff]  ;;  %v9490_v39 = vld [vmem:[%s16996_s2 + $0x38] sm:$0xff] }
 0x38f   :  { %v1642_v15 = vmul.f32 %v11875_v4, %v1641_v17  ;;  %9772 = vtanh.f32 %v11888_v10  ;;  %vm1726_vm3 = vcmp.ne.f32.partialorder %v1725_v30, 0.0  ;;  %vm1664_vm10 = vcmp.eq.f32.partialorder %v1663_v33, 8.507059e+37  ;;  %v9481_v33 = vld [vmem:[%s16998_s1 + $0x30] sm:$0xff] }
 0x390   :  { %9774 = vtanh.f32 %v11891_v3  ;;  %v1727_v27 = vsel %vm1726_vm3, 1, %v17011_v0  ;;  %v1617_v56 = vsel %vm11942_vm5, %v11858_v55, %v1613_v46  ;;  %v1621_v23 = vor.u32 1.1754944e-38, %v1620_v58  ;;  %v9482_v46 = vld [vmem:[%s16998_s1 + $0x38] sm:$0xff] }
 0x391   :  { %v1643_v19 = vadd.f32 %v11875_v4, %v1642_v15  ;;  %v11954_v17 = vadd.s32 %v1727_v27, %v11496_v22  ;;  %v1637_v63 = vsel %vm11933_vm12, %v1636_v45, %v1632_v31  ;;  %vm1619_vm7 = vcmp.eq.f32.partialorder %v1618_v37, 8.507059e+37  ;;  %v9483_v37 = vld [vmem:[%s16996_s2] sm:$0xff] }
 0x392   :  { %v9767_v35 = vpop.eup %9766  ;;  %v1622_v21 = vsel %vm1619_vm7, %v1621_v23, %v1617_v56  ;;  %v1745_v22 = vpack.c.bf16 %v11869_v50, %v11869_v50  ;;  %v9475_v50 = vld [vmem:[%s16998_s1] sm:$0xff] }
 0x393   :  { %v1655_v2 = vmul.f32 %v9767_v35, %v11880_v14  ;;  %v9769_v9 = vpop.eup %9768  ;;  %v1647_v36 = vsel %vm11913_vm13, %v11875_v4, %v1643_v19  ;;  %vm1660_vm14 = vweird.f32 %v9767_v35  ;;  %v1694_v19 = vld [vmem:[%s16999_s3] sm:$0x7] }
 0x394   :  { %v9771_v43 = vpop.eup %9770  ;;  %v1652_v6 = vsel %vm1649_vm15, %v1651_v11, %v1647_v36  ;;  %vm1661_vm8 = vmor %vm1659_vm4, %vm1660_vm14  ;;  %v11968_v55 = vmul.f32 %v9769_v9, %v1622_v21  ;;  %v9476_v9 = vld [vmem:[%s16998_s1 + $0x8] sm:$0xff] }
 0x395   :  { %v1656_v42 = vsub.f32 1.0, %v1655_v2  ;;  %v9773_v54 = vpop.eup %9772  ;;  %v1940_v2 = vsel %vm273_vm1, %v1745_v22, 0 }
 0x396   :  { %v9775_v60 = vpop.eup %9774  ;;  %v11958_v15 = vmul.f32 %v9773_v54, %v1652_v6  ;;  %v9480_v54 = vld [vmem:[%s16998_s1 + $0x28] sm:$0xff] }
 0x397   :  { %v1657_v62 = vmul.f32 %v9767_v35, %v1656_v42  ;;  %v9487_v42 = vld [vmem:[%s16996_s2 + $0x20] sm:$0xff] }
 0x399   :  { %v1658_v4 = vadd.f32 %v9767_v35, %v1657_v62 }
 0x39b   :  { %v1662_v14 = vsel %vm1661_vm8, %v9767_v35, %v1658_v4  ;;  %v11964_v35 = vmul.f32 %v9771_v43, %v1637_v63  ;;  %v9478_v43 = vld [vmem:[%s16998_s1 + $0x18] sm:$0xff] }
 0x39c   :  { %v1667_v49 = vsel %vm1664_vm10, %v1666_v61, %v1662_v14 }
 0x39d   :  { %v11960_v32 = vmul.f32 %v9775_v60, %v1667_v49  ;;  %v1695_v16 = vpack.c.bf16 %v11964_v35, %v11968_v55 }
 0x39f   :  { %v1696_v34 = vpack.c.bf16 %v11960_v32, %v11958_v15 }
 0x3a1   :  { %1706 = vmatpush.bf16.msrb.mxu0 %v1696_v34  ;;  %1832 = vmatpush.bf16.msra.mxu2 %v1696_v34 }
 0x3a5   :  { %1707 = vmatpush.bf16.msrb.mxu0 %v1695_v16  ;;  %1833 = vmatpush.bf16.msra.mxu2 %v1695_v16 }
 0x3a8   :  { %8630 = vmatmul.msk.bf16.vlgmr.msrb.gmra.mxu0 %vm134_vm0, %v1694_v19  ;;  %8665 = vmatmul.msk.bf16.vlgmr.msra.gmra.mxu2 %vm134_vm0, %v9483_v37 }
 0x3a9   :  { %1949 = vmatpush.bf16.msra.mxu0 %v1940_v2 }
 0x3b8   :  { %8705 = vmatmul.msk.bf16.vlgmr.msra.gmra.mxu0 %vm248_vm2, %v9475_v50  ;;  %8666 = vmatmul.msk.bf16.gmra.mxu2 %vm134_vm0, %v9484_v53 }
 0x3c8   :  { %8706 = vmatmul.msk.bf16.gmra.mxu0 %vm248_vm2, %v9476_v9  ;;  %8667 = vmatmul.msk.bf16.gmra.mxu2 %vm134_vm0, %v9485_v25 }
 0x3d8   :  { %8707 = vmatmul.msk.bf16.gmra.mxu0 %vm248_vm2, %v9477_v41  ;;  %8668 = vmatmul.msk.bf16.gmra.mxu2 %vm134_vm0, %v9486_v28 }
 0x3e8   :  { %8708 = vmatmul.msk.bf16.gmra.mxu0 %vm248_vm2, %v9478_v43  ;;  %8669 = vmatmul.msk.bf16.gmra.mxu2 %vm134_vm0, %v9487_v42 }
 0x3f8   :  { %8709 = vmatmul.msk.bf16.gmra.mxu0 %vm248_vm2, %v9479_v38  ;;  %8670 = vmatmul.msk.bf16.gmra.mxu2 %vm134_vm0, %v9488_v20 }
 0x408   :  { %8710 = vmatmul.msk.bf16.gmra.mxu0 %vm248_vm2, %v9480_v54  ;;  %8671 = vmatmul.msk.bf16.gmra.mxu2 %vm134_vm0, %v9489_v52 }
 0x418   :  { %8711 = vmatmul.msk.bf16.gmra.mxu0 %vm248_vm2, %v9481_v33  ;;  %8672 = vmatmul.msk.bf16.gmra.mxu2 %vm134_vm0, %v9490_v39 }
 0x425   :  { %v1709_v40 = vpop.f32.mrf.mxu0 }
 0x426   :  { %v1713_v60 = vadd.f32 %v1709_v40, %v11648_v1  ;;  %v4562_v36 = vrot.slane %v1709_v40, 2 }
 0x428   :  { %8631 = vst [vmem:[%s17002_s11 + $0x8] sm:$0xf] %v1713_v60  ;;  %8712 = vmatmul.msk.bf16.gmra.mxu0 %vm248_vm2, %v9482_v46  ;;  %v12047_v62 = vsel %vm273_vm1, %v11670_v57, %v4562_v36 }
 0x42b   :  { %v1835_v30 = vpop.f32.mrf.mxu2 }
 0x42d   :  { %v1711_v11 = vpop.f32.mrf.mxu0 }
 0x433   :  { %v1837_v58 = vpop.f32.mrf.mxu2 }
 0x435   :  { %v1951_v29 = vpop.f32.mrf.mxu0 }
 0x436   :  { %v1952_v8 = vadd.f32 %v1951_v29, %v1835_v30 }
 0x438   :  { %v8713_v14 = vmul.f32 -1.442695, %v1952_v8 }
 0x43a   :  { %9776 = vpow2.f32 %v8713_v14 }
 0x43b   :  { %v1840_v4 = vpop.f32.mrf.mxu2 }
 0x43d   :  { %v1953_v47 = vpop.f32.mrf.mxu0 }
 0x43e   :  { %v1954_v39 = vadd.f32 %v1953_v47, %v1837_v58 }
 0x440   :  { %v9777_v63 = vpop.eup %9776  ;;  %v8714_v8 = vmul.f32 -1.442695, %v1954_v39 }
 0x441   :  { %v2003_v22 = vadd.f32 1.0, %v9777_v63 }
 0x443   :  { %v12049_v31 = vpop.f32.mrf.mxu2  ;;  %v2018_v30 = vand.u32 2147483648, %v2003_v22  ;;  %vm2012_vm9 = vweird.f32 %v2003_v22  ;;  %v2016_v11 = vand.u32 2147483647, %v2003_v22 }
 0x445   :  { %v1956_v6 = vpop.f32.mrf.mxu0  ;;  %v2019_v58 = vor.u32 1.1754944e-38, %v2018_v30  ;;  %vm2017_vm5 = vcmp.eq.f32.partialorder %v2016_v11, 8.507059e+37 }
 0x446   :  { %v12051_v61 = vadd.f32 %v1956_v6, %v1840_v4 }
 0x44b   :  { %v1845_v45 = vpop.f32.mrf.mxu2 }
 0x44d   :  { %v1958_v27 = vpop.f32.mrf.mxu0 }
 0x453   :  { %v1847_v56 = vpop.f32.mrf.mxu2 }
 0x455   :  { %v1961_v49 = vpop.f32.mrf.mxu0 }
 0x456   :  { %v1962_v57 = vadd.f32 %v1961_v49, %v1845_v45 }
 0x458   :  { %v8717_v23 = vmul.f32 -1.442695, %v1962_v57 }
 0x45a   :  { %9778 = vpow2.f32 %v8717_v23 }
 0x45b   :  { %v1850_v21 = vpop.f32.mrf.mxu2  ;;  %9780 = vrcp.f32 %v2003_v22 }
 0x45d   :  { %v1963_v34 = vpop.f32.mrf.mxu0 }
 0x460   :  { %v9779_v16 = vpop.eup %9778 }
 0x461   :  { %v2079_v2 = vadd.f32 1.0, %v9779_v16  ;;  %v9781_v50 = vpop.eup %9780  ;;  %v1959_v16 = vadd.f32 %v1958_v27, %v12049_v31 }
 0x462   :  { %v2008_v25 = vmul.f32 %v9781_v50, %v2003_v22  ;;  %vm2013_vm14 = vweird.f32 %v9781_v50 }
 0x463   :  { %9782 = vrcp.f32 %v2079_v2  ;;  %v1852_v37 = vpop.f32.mrf.mxu2  ;;  %v2094_v46 = vand.u32 2147483648, %v2079_v2  ;;  %vm2088_vm13 = vweird.f32 %v2079_v2  ;;  %v2092_v36 = vand.u32 2147483647, %v2079_v2  ;;  %vm2014_vm12 = vmor %vm2012_vm9, %vm2013_vm14 }
 0x464   :  { %v2009_v42 = vsub.f32 1.0, %v2008_v25 }
 0x465   :  { %v1966_v19 = vpop.f32.mrf.mxu0  ;;  %v2095_v4 = vor.u32 1.1754944e-38, %v2094_v46  ;;  %vm2093_vm4 = vcmp.eq.f32.partialorder %v2092_v36, 8.507059e+37 }
 0x466   :  { %v2010_v54 = vmul.f32 %v9781_v50, %v2009_v42 }
 0x468   :  { %v2011_v60 = vadd.f32 %v9781_v50, %v2010_v54 }
 0x469   :  { %v9783_v53 = vpop.eup %9782 }
 0x46a   :  { %v2084_v9 = vmul.f32 %v9783_v53, %v2079_v2  ;;  %vm2089_vm11 = vweird.f32 %v9783_v53  ;;  %v2015_v6 = vsel %vm2014_vm12, %v9781_v50, %v2011_v60  ;;  %v1964_v50 = vadd.f32 %v1963_v34, %v1847_v56 }
 0x46b   :  { %v1855_v41 = vpop.f32.mrf.mxu2  ;;  %vm2090_vm15 = vmor %vm2088_vm13, %vm2089_vm11  ;;  %v2020_v57 = vsel %vm2017_vm5, %v2019_v58, %v2015_v6 }
 0x46c   :  { %v2085_v28 = vsub.f32 1.0, %v2084_v9  ;;  %v1967_v9 = vadd.f32 %v1966_v19, %v1850_v21  ;;  %v8718_v54 = vmul.f32 -1.442695, %v1964_v50 }
 0x46d   :  { %v1968_v43 = vpop.f32.mrf.mxu0 }
 0x46e   :  { %v2086_v38 = vmul.f32 %v9783_v53, %v2085_v28  ;;  %v8716_v28 = vmul.f32 -1.442695, %v1959_v16  ;;  %v1969_v42 = vadd.f32 %v1968_v43, %v1852_v37 }
 0x470   :  { %v2087_v33 = vadd.f32 %v9783_v53, %v2086_v38 }
 0x472   :  { %v2091_v29 = vsel %vm2090_vm15, %v9783_v53, %v2087_v33  ;;  %v8715_v53 = vmul.f32 -1.442695, %v12051_v61 }
 0x473   :  { %v12053_v20 = vpop.f32.mrf.mxu2  ;;  %v2096_v47 = vsel %vm2093_vm4, %v2095_v4, %v2091_v29 }
 0x474   :  { %v2223_v23 = vmul.f32 %v2096_v47, %v11683_v5  ;;  %v8719_v5 = vmul.f32 -1.442695, %v1967_v9 }
 0x475   :  { %v1971_v52 = vpop.f32.mrf.mxu0 }
 0x476   :  { %v1972_v40 = vadd.f32 %v1971_v52, %v1855_v41  ;;  %v8720_v52 = vmul.f32 -1.442695, %v1969_v42 }
 0x478   :  { %9784 = vtanh.f32 %v1972_v40 }
 0x479   :  { %9786 = vpow2.f32 %v8714_v8 }
 0x47a   :  { %9788 = vpow2.f32 %v8715_v53 }
 0x47b   :  { %v12055_v45 = vpop.f32.mrf.mxu2  ;;  %9790 = vpow2.f32 %v8716_v28 }
 0x47d   :  { %v12057_v14 = vpop.f32.mrf.mxu0 }
 0x47e   :  { %v9785_v49 = vpop.eup %9784 }
 0x47f   :  { %v2227_v63 = vmul.f32 %v9785_v49, %v2020_v57  ;;  %v9787_v2 = vpop.eup %9786 }
 0x480   :  { %v2004_v38 = vadd.f32 1.0, %v9787_v2  ;;  %v9789_v61 = vpop.eup %9788 }
 0x481   :  { %v12060_v22 = vadd.f32 %v2227_v63, %v2223_v23  ;;  %v9791_v56 = vpop.eup %9790  ;;  %v12072_v19 = vadd.f32 1.0, %v9789_v61 }
 0x482   :  { %9792 = vrcp.f32 %v2004_v38  ;;  %v12074_v43 = vadd.f32 1.0, %v9791_v56  ;;  %v2031_v53 = vand.u32 2147483647, %v2004_v38  ;;  %v2033_v9 = vand.u32 2147483648, %v2004_v38 }
 0x483   :  { %v12064_v25 = vpop.f32.mrf.mxu2  ;;  %9794 = vpow2.f32 %v8718_v54  ;;  %vm2027_vm8 = vweird.f32 %v2004_v38  ;;  %vm2042_vm11 = vweird.f32 %v12072_v19 }
 0x484   :  { %9796 = vpow2.f32 %v8719_v5  ;;  %vm12116_vm7 = vcmp.eq.f32.partialorder %v2031_v53, 8.507059e+37  ;;  %vm2057_vm14 = vweird.f32 %v12074_v43 }
 0x485   :  { %v12066_v41 = vpop.f32.mrf.mxu0  ;;  %9798 = vpow2.f32 %v8720_v52  ;;  %v2048_v52 = vand.u32 2147483648, %v12072_v19 }
 0x486   :  { %9800 = vrcp.f32 %v12072_v19 }
 0x487   :  { %9802 = vrcp.f32 %v12074_v43 }
 0x488   :  { %v12070_v21 = vpop.eup %9792 }
 0x489   :  { %v9795_v34 = vpop.eup %9794  ;;  %v2023_v40 = vmul.f32 %v12070_v21, %v2004_v38  ;;  %vm2028_vm3 = vweird.f32 %v12070_v21 }
 0x48a   :  { %v9797_v37 = vpop.eup %9796  ;;  %v12076_v39 = vadd.f32 1.0, %v9795_v34  ;;  %vm12112_vm10 = vmor %vm2027_vm8, %vm2028_vm3 }
 0x48b   :  { %v1865_v27 = vpop.f32.mrf.mxu2  ;;  %v9799_v33 = vpop.eup %9798  ;;  %v12080_v60 = vadd.f32 1.0, %v9797_v37  ;;  %v2024_v11 = vsub.f32 1.0, %v2023_v40 }
 0x48c   :  { %v12083_v36 = vadd.f32 1.0, %v9799_v33  ;;  %9804 = vrcp.f32 %v12076_v39  ;;  %v12088_v8 = vpop.eup %9800  ;;  %v2034_v33 = vor.u32 1.1754944e-38, %v2033_v9  ;;  %v1977_v9 = vadd.f32 %v12066_v41, %v12055_v45 }
 0x48d   :  { %v12068_v31 = vpop.f32.mrf.mxu0  ;;  %9806 = vrcp.f32 %v12080_v60  ;;  %v12090_v4 = vpop.eup %9802  ;;  %v2025_v58 = vmul.f32 %v12070_v21, %v2024_v11  ;;  %v2038_v57 = vmul.f32 %v12088_v8, %v12072_v19  ;;  %v2046_v11 = vand.u32 2147483647, %v12072_v19 }
 0x48e   :  { %9808 = vrcp.f32 %v12083_v36  ;;  %v2053_v16 = vmul.f32 %v12090_v4, %v12074_v43  ;;  %vm2043_vm13 = vweird.f32 %v12088_v8  ;;  %vm2058_vm15 = vweird.f32 %v12090_v4 }
 0x48f   :  { %v2026_v42 = vadd.f32 %v12070_v21, %v2025_v58  ;;  %v2039_v54 = vsub.f32 1.0, %v2038_v57  ;;  %v12127_v58 = vor.u32 1.1754944e-38, %v2048_v52  ;;  %vm2103_vm9 = vweird.f32 %v12076_v39  ;;  %vm12172_vm8 = vmor %vm2042_vm11, %vm2043_vm13 }
 0x490   :  { %vm12156_vm12 = vcmp.eq.f32.partialorder %v2046_v11, 8.507059e+37  ;;  %vm2118_vm13 = vweird.f32 %v12080_v60 }
 0x492   :  { %v12093_v49 = vpop.eup %9804 }
 0x493   :  { %v1867_v30 = vpop.f32.mrf.mxu2  ;;  %v12097_v63 = vpop.eup %9806  ;;  %v2099_v28 = vmul.f32 %v12093_v49, %v12076_v39  ;;  %vm2104_vm4 = vweird.f32 %v12093_v49 }
 0x494   :  { %v12101_v50 = vpop.eup %9808  ;;  %v2114_v5 = vmul.f32 %v12097_v63, %v12080_v60  ;;  %vm2119_vm3 = vweird.f32 %v12097_v63  ;;  %vm12193_vm11 = vmor %vm2103_vm9, %vm2104_vm4 }
 0x495   :  { %v1981_v46 = vpop.f32.mrf.mxu0  ;;  %v2129_v56 = vmul.f32 %v12101_v50, %v12083_v36  ;;  %v2100_v40 = vsub.f32 1.0, %v2099_v28  ;;  %v2061_v28 = vand.u32 2147483647, %v12074_v43 }
 0x496   :  { %v1982_v29 = vadd.f32 %v1981_v46, %v1865_v27  ;;  %v2054_v27 = vsub.f32 1.0, %v2053_v16 }
 0x497   :  { %v2130_v57 = vsub.f32 1.0, %v2129_v56  ;;  %vm12162_vm5 = vcmp.eq.f32.partialorder %v2061_v28, 8.507059e+37 }
 0x498   :  { %v8721_v23 = vmul.f32 -1.442695, %v1982_v29  ;;  %v2115_v29 = vsub.f32 1.0, %v2114_v5  ;;  %v2055_v16 = vmul.f32 %v12090_v4, %v2054_v27 }
 0x499   :  { %v2131_v45 = vmul.f32 %v12101_v50, %v2130_v57  ;;  %v2122_v57 = vand.u32 2147483647, %v12080_v60 }
 0x49a   :  { %v2056_v41 = vadd.f32 %v12090_v4, %v2055_v16 }
 0x49b   :  { %v1870_v61 = vpop.f32.mrf.mxu2  ;;  %v2132_v19 = vadd.f32 %v12101_v50, %v2131_v45 }
 0x49d   :  { %v1983_v6 = vpop.f32.mrf.mxu0 }
 0x49e   :  { %v1984_v47 = vadd.f32 %v1983_v6, %v1867_v30  ;;  %v2030_v30 = vsel %vm12112_vm10, %v12070_v21, %v2026_v42  ;;  %v2040_v6 = vmul.f32 %v12088_v8, %v2039_v54  ;;  %v2101_v42 = vmul.f32 %v12093_v49, %v2100_v40 }
 0x49f   :  { %v12134_v53 = vsel %vm12116_vm7, %v2034_v33, %v2030_v30  ;;  %v2116_v54 = vmul.f32 %v12097_v63, %v2115_v29  ;;  %v2124_v40 = vand.u32 2147483648, %v12080_v60  ;;  %vm2134_vm10 = vweird.f32 %v12101_v50  ;;  %vm12183_vm7 = vmor %vm2057_vm14, %vm2058_vm15 }
 0x4a0   :  { %v8722_v2 = vmul.f32 -1.442695, %v1984_v47  ;;  %v2041_v5 = vadd.f32 %v12088_v8, %v2040_v6  ;;  %v2102_v37 = vadd.f32 %v12093_v49, %v2101_v42  ;;  %vm12204_vm14 = vmor %vm2118_vm13, %vm2119_vm3  ;;  %vm2133_vm15 = vweird.f32 %v12083_v36 }
 0x4a1   :  { %v2117_v11 = vadd.f32 %v12097_v63, %v2116_v54  ;;  %vm12215_vm9 = vmor %vm2133_vm15, %vm2134_vm10  ;;  %v2060_v54 = vsel %vm12183_vm7, %v12090_v4, %v2056_v41  ;;  %vm2123_vm3 = vcmp.eq.f32.partialorder %v2122_v57, 8.507059e+37 }
 0x4a2   :  { %9810 = vpow2.f32 %v8722_v2  ;;  %v2045_v42 = vsel %vm12172_vm8, %v12088_v8, %v2041_v5  ;;  %v2136_v45 = vsel %vm12215_vm9, %v12101_v50, %v2132_v19 }
 0x4a3   :  { %9812 = vpow2.f32 %v8721_v23  ;;  %v1974_v23 = vadd.f32 %v12057_v14, %v12053_v20  ;;  %v1979_v20 = vadd.f32 %v12068_v31, %v12064_v25  ;;  %v2063_v14 = vand.u32 2147483648, %v12074_v43  ;;  %v1872_v56 = vpop.f32.mrf.mxu2 }
 0x4a4   :  { %v2109_v25 = vand.u32 2147483648, %v12076_v39  ;;  %v2107_v31 = vand.u32 2147483647, %v12076_v39  ;;  %v2139_v43 = vand.u32 2147483648, %v12083_v36  ;;  %v2106_v39 = vsel %vm12193_vm11, %v12093_v49, %v2102_v37 }
 0x4a5   :  { %v1986_v46 = vpop.f32.mrf.mxu0  ;;  %v2125_v49 = vor.u32 1.1754944e-38, %v2124_v40 }
 0x4a6   :  { %v1987_v38 = vadd.f32 %v1986_v46, %v1870_v61  ;;  %v2110_v60 = vor.u32 1.1754944e-38, %v2109_v25  ;;  %vm2108_vm4 = vcmp.eq.f32.partialorder %v2107_v31, 8.507059e+37  ;;  %v2140_v8 = vor.u32 1.1754944e-38, %v2139_v43 }
 0x4a7   :  { %v2050_v31 = vsel %vm12156_vm12, %v12127_v58, %v2045_v42 }
 0x4a8   :  { %v9811_v47 = vpop.eup %9810  ;;  %v8723_v21 = vmul.f32 -1.442695, %v1987_v38  ;;  %v2111_v5 = vsel %vm2108_vm4, %v2110_v60, %v2106_v39 }
 0x4a9   :  { %v9813_v2 = vpop.eup %9812  ;;  %v12147_v52 = vadd.f32 1.0, %v9811_v47  ;;  %v2224_v40 = vmul.f32 %v2111_v5, %v11882_v51 }
 0x4aa   :  { %9814 = vpow2.f32 %v8723_v21  ;;  %v12151_v61 = vadd.f32 1.0, %v9813_v2  ;;  %v2137_v2 = vand.u32 2147483647, %v12083_v36 }
 0x4ab   :  { %9816 = vtanh.f32 %v1974_v23  ;;  %vm2183_vm10 = vweird.f32 %v12147_v52  ;;  %v2187_v5 = vand.u32 2147483647, %v12147_v52 }
 0x4ac   :  { %9818 = vtanh.f32 %v1977_v9  ;;  %vm2138_vm8 = vcmp.eq.f32.partialorder %v2137_v2, 8.507059e+37  ;;  %vm2168_vm12 = vweird.f32 %v12151_v61  ;;  %v2172_v42 = vand.u32 2147483647, %v12151_v61 }
 0x4ad   :  { %v1988_v34 = vpop.f32.mrf.mxu0  ;;  %9820 = vtanh.f32 %v1979_v20  ;;  %v2121_v20 = vsel %vm12204_vm14, %v12097_v63, %v2117_v11  ;;  %v2141_v41 = vsel %vm2138_vm8, %v2140_v8, %v2136_v45 }
 0x4ae   :  { %v1989_v46 = vadd.f32 %v1988_v34, %v1872_v56  ;;  %9822 = vrcp.f32 %v12147_v52  ;;  %v2064_v56 = vor.u32 1.1754944e-38, %v2063_v14  ;;  %v2126_v37 = vsel %vm2123_vm3, %v2125_v49, %v2121_v20 }
 0x4af   :  { %9824 = vrcp.f32 %v12151_v61  ;;  %v2225_v33 = vmul.f32 %v2126_v37, %v11888_v10  ;;  %v2226_v19 = vmul.f32 %v2141_v41, %v11891_v3  ;;  %vm12309_vm3 = vcmp.eq.f32.partialorder %v2187_v5, 8.507059e+37  ;;  %v2248_v5 = vld [vmem:[%s16999_s3] sm:$0x7] }
 0x4b0   :  { %v9815_v38 = vpop.eup %9814  ;;  %v8724_v6 = vmul.f32 -1.442695, %v1989_v46  ;;  %v2065_v50 = vsel %vm12162_vm5, %v2064_v56, %v2060_v54  ;;  %v12245_v46 = vld [vmem:[%s16997_s0 + $0x10] sm:$0xf] }
 0x4b1   :  { %v12200_v23 = vadd.f32 1.0, %v9815_v38  ;;  %v9817_v16 = vpop.eup %9816  ;;  %v2272_v58 = vand.u32 2147483647, %v12245_v46 }
 0x4b2   :  { %9826 = vpow2.f32 %v8724_v6  ;;  %v9819_v9 = vpop.eup %9818  ;;  %v2228_v34 = vmul.f32 %v9817_v16, %v12134_v53 }
 0x4b3   :  { %9828 = vrcp.f32 %v12200_v23  ;;  %v9821_v36 = vpop.eup %9820  ;;  %v2229_v4 = vmul.f32 %v9819_v9, %v2050_v31  ;;  %v2273_v6 = vsel %vm51_vm6, %v2272_v58, 0.0  ;;  %v2202_v45 = vand.u32 2147483647, %v12200_v23 }
 0x4b4   :  { %v12232_v25 = vpop.eup %9822  ;;  %v2230_v53 = vmul.f32 %v9821_v36, %v2065_v50  ;;  %v12258_v29 = vadd.f32 %v2228_v34, %v2224_v40  ;;  %v2274_v16 = vrot.slane %v2273_v6, 4  ;;  %v2204_v8 = vand.u32 2147483648, %v12200_v23  ;;  %v9503_v50 = vld [vmem:[%s16996_s2 + $0x20] sm:$0xff] }
 0x4b5   :  { %v12234_v63 = vpop.eup %9824  ;;  %v2179_v27 = vmul.f32 %v12232_v25, %v12147_v52  ;;  %v12264_v47 = vadd.f32 %v2229_v4, %v2225_v33  ;;  %vm2184_vm11 = vweird.f32 %v12232_v25  ;;  %vm2198_vm13 = vweird.f32 %v12200_v23 }
 0x4b6   :  { %v2164_v11 = vmul.f32 %v12234_v63, %v12151_v61  ;;  %v12267_v43 = vadd.f32 %v2230_v53, %v2226_v19  ;;  %v2275_v3 = vadd.f32 %v2274_v16, %v2273_v6  ;;  %vm2169_vm5 = vweird.f32 %v12234_v63  ;;  %vm12305_vm4 = vmor %vm2183_vm10, %vm2184_vm11 }
 0x4b7   :  { %v2180_v10 = vsub.f32 1.0, %v2179_v27  ;;  %v2189_v53 = vand.u32 2147483648, %v12147_v52  ;;  %vm2203_vm9 = vcmp.eq.f32.partialorder %v2202_v45, 8.507059e+37  ;;  %v2174_v19 = vand.u32 2147483648, %v12151_v61 }
 0x4b8   :  { %v9827_v14 = vpop.eup %9826  ;;  %v2165_v21 = vsub.f32 1.0, %v2164_v11  ;;  %v2276_v9 = vrot.slane %v2275_v3, 2  ;;  %v2205_v11 = vor.u32 1.1754944e-38, %v2204_v8 }
 0x4b9   :  { %v12251_v30 = vpop.eup %9828  ;;  %v12256_v38 = vadd.f32 1.0, %v9827_v14  ;;  %v2181_v2 = vmul.f32 %v12232_v25, %v2180_v10 }
 0x4ba   :  { %v2194_v51 = vmul.f32 %v12251_v30, %v12200_v23  ;;  %v2166_v28 = vmul.f32 %v12234_v63, %v2165_v21  ;;  %vm2199_vm7 = vweird.f32 %v12251_v30  ;;  %v2277_v49 = vadd.f32 %v2276_v9, %v2275_v3 }
 0x4bb   :  { %9830 = vrcp.f32 %v12256_v38  ;;  %v2182_v31 = vadd.f32 %v12232_v25, %v2181_v2  ;;  %vm12289_vm14 = vmor %vm2198_vm13, %vm2199_vm7  ;;  %v2217_v41 = vand.u32 2147483647, %v12256_v38  ;;  %v2219_v14 = vand.u32 2147483648, %v12256_v38 }
 0x4bc   :  { %v2195_v57 = vsub.f32 1.0, %v2194_v51  ;;  %9832 = vtanh.f32 %v12060_v22  ;;  %v2278_v37 = vrot.slane %v2277_v49, 1  ;;  %v2167_v40 = vadd.f32 %v12234_v63, %v2166_v28  ;;  %vm12318_vm7 = vmor %vm2168_vm12, %vm2169_vm5 }
 0x4bd   :  { %9834 = vtanh.f32 %v12258_v29  ;;  %vm2213_vm8 = vweird.f32 %v12256_v38  ;;  %v2186_v52 = vsel %vm12305_vm4, %v12232_v25, %v2182_v31  ;;  %v2220_v16 = vor.u32 1.1754944e-38, %v2219_v14  ;;  %v9493_v31 = vld [vmem:[%s16998_s1 + $0x10] sm:$0xff]  ;;  %v9504_v14 = vld [vmem:[%s16996_s2 + $0x28] sm:$0xff] }
 0x4be   :  { %v2196_v39 = vmul.f32 %v12251_v30, %v2195_v57  ;;  %9836 = vtanh.f32 %v12264_v47  ;;  %v2279_v33 = vadd.f32 %v2278_v37, %v2277_v49  ;;  %v2190_v21 = vor.u32 1.1754944e-38, %v2189_v53  ;;  %v9502_v37 = vld [vmem:[%s16996_s2 + $0x18] sm:$0xff]  ;;  %v9505_v53 = vld [vmem:[%s16996_s2 + $0x30] sm:$0xff] }
 0x4bf   :  { %9838 = vtanh.f32 %v12267_v43  ;;  %vm2218_vm13 = vcmp.eq.f32.partialorder %v2217_v41, 8.507059e+37  ;;  %v2171_v61 = vsel %vm12318_vm7, %v12234_v63, %v2167_v40  ;;  %v2175_v9 = vor.u32 1.1754944e-38, %v2174_v19  ;;  %v9495_v41 = vld [vmem:[%s16998_s1 + $0x20] sm:$0xff]  ;;  %v9496_v40 = vld [vmem:[%s16998_s1 + $0x28] sm:$0xff] }
 0x4c0   :  { %v2197_v36 = vadd.f32 %v12251_v30, %v2196_v39  ;;  %vm2280_vm10 = vcmp.ne.f32.partialorder %v2279_v33, 0.0  ;;  %v2191_v25 = vsel %vm12309_vm3, %v2190_v21, %v2186_v52  ;;  %vm2173_vm12 = vcmp.eq.f32.partialorder %v2172_v42, 8.507059e+37  ;;  %v9499_v42 = vld [vmem:[%s16996_s2] sm:$0xff] }
 0x4c1   :  { %v9831_v60 = vpop.eup %9830  ;;  %v2281_v39 = vsel %vm2280_vm10, 1, %v17011_v0  ;;  %vm17010_vm5 = vcmask 1042432  }
 0x4c2   :  { %v2209_v20 = vmul.f32 %v9831_v60, %v12256_v38  ;;  %v9833_v54 = vpop.eup %9832  ;;  %v2201_v23 = vsel %vm12289_vm14, %v12251_v30, %v2197_v36  ;;  %vm2214_vm15 = vweird.f32 %v9831_v60  ;;  %v12330_v3 = vadd.s32 %v2281_v39, %v11954_v17 }
 0x4c3   :  { %v9835_v56 = vpop.eup %9834  ;;  %v2206_v57 = vsel %vm2203_vm9, %v2205_v11, %v2201_v23  ;;  %vm2215_vm11 = vmor %vm2213_vm8, %vm2214_vm15  ;;  %v2176_v36 = vsel %vm2173_vm12, %v2175_v9, %v2171_v61  ;;  %v2299_v17 = vpack.c.bf16 %v12245_v46, %v12245_v46  ;;  %v9491_v46 = vld [vmem:[%s16998_s1] sm:$0xff]  ;;  %v9506_v23 = vld [vmem:[%s16996_s2 + $0x38] sm:$0xff] }
 0x4c4   :  { %v2210_v34 = vsub.f32 1.0, %v2209_v20  ;;  %v9837_v4 = vpop.eup %9836  ;;  %v12340_v49 = vmul.f32 %v9835_v56, %v2191_v25  ;;  %v12344_v63 = vmul.f32 %v9833_v54, %v2176_v36  ;;  %v9500_v54 = vld [vmem:[%s16996_s2 + $0x8] sm:$0xff] }
 0x4c5   :  { %v9839_v27 = vpop.eup %9838  ;;  %v12334_v28 = vmul.f32 %v9837_v4, %v2206_v57  ;;  %v2494_v8 = vsel %vm273_vm1, %v2299_v17, 0  ;;  %v9492_v56 = vld [vmem:[%s16998_s1 + $0x8] sm:$0xff]  ;;  %v9494_v4 = vld [vmem:[%s16998_s1 + $0x18] sm:$0xff] }
 0x4c6   :  { %v2211_v58 = vmul.f32 %v9831_v60, %v2210_v34  ;;  %17166 = vst [vmem:[#allocation6_spill] sm:$0xff] %v12340_v49  ;;  %v2249_v45 = vpack.c.bf16 %v12340_v49, %v12344_v63  ;;  %v9501_v34 = vld [vmem:[%s16996_s2 + $0x10] sm:$0xff] }
 0x4c7   :  { %17167 = vst [vmem:[#allocation7_spill] sm:$0xff] %v12344_v63 }
 0x4c8   :  { %v2212_v30 = vadd.f32 %v9831_v60, %v2211_v58  ;;  %v9498_v58 = vld [vmem:[%s16998_s1 + $0x38] sm:$0xff] }
 0x4ca   :  { %v2216_v38 = vsel %vm2215_vm11, %v9831_v60, %v2212_v30 }
 0x4cb   :  { %v2221_v2 = vsel %vm2218_vm13, %v2220_v16, %v2216_v38 }
 0x4cc   :  { %v12336_v20 = vmul.f32 %v9839_v27, %v2221_v2  ;;  %v9497_v27 = vld [vmem:[%s16998_s1 + $0x30] sm:$0xff] }
 0x4ce   :  { %v2250_v60 = vpack.c.bf16 %v12336_v20, %v12334_v28 }
 0x4d0   :  { %2260 = vmatpush.bf16.msra.mxu1 %v2250_v60  ;;  %2386 = vmatpush.bf16.msra.mxu3 %v2250_v60 }
 0x4d4   :  { %2261 = vmatpush.bf16.msra.mxu1 %v2249_v45  ;;  %2387 = vmatpush.bf16.msra.mxu3 %v2249_v45 }
 0x4d7   :  { %8725 = vmatmul.msk.bf16.vlgmr.msra.gmra.mxu1 %vm134_vm0, %v2248_v5  ;;  %8760 = vmatmul.msk.bf16.vlgmr.msra.gmra.mxu3 %vm134_vm0, %v9499_v42 }
 0x4d8   :  { %2503 = vmatpush.bf16.msrb.mxu1 %v2494_v8 }
 0x4e7   :  { %8800 = vmatmul.msk.bf16.vlgmr.msrb.gmra.mxu1 %vm248_vm2, %v9491_v46  ;;  %8761 = vmatmul.msk.bf16.gmra.mxu3 %vm134_vm0, %v9500_v54 }
 0x4f7   :  { %8801 = vmatmul.msk.bf16.gmra.mxu1 %vm248_vm2, %v9492_v56  ;;  %8762 = vmatmul.msk.bf16.gmra.mxu3 %vm134_vm0, %v9501_v34 }
 0x507   :  { %8802 = vmatmul.msk.bf16.gmra.mxu1 %vm248_vm2, %v9493_v31  ;;  %8763 = vmatmul.msk.bf16.gmra.mxu3 %vm134_vm0, %v9502_v37 }
 0x517   :  { %8803 = vmatmul.msk.bf16.gmra.mxu1 %vm248_vm2, %v9494_v4  ;;  %8764 = vmatmul.msk.bf16.gmra.mxu3 %vm134_vm0, %v9503_v50 }
 0x527   :  { %8804 = vmatmul.msk.bf16.gmra.mxu1 %vm248_vm2, %v9495_v41  ;;  %8765 = vmatmul.msk.bf16.gmra.mxu3 %vm134_vm0, %v9504_v14 }
 0x537   :  { %8805 = vmatmul.msk.bf16.gmra.mxu1 %vm248_vm2, %v9496_v40  ;;  %8766 = vmatmul.msk.bf16.gmra.mxu3 %vm134_vm0, %v9505_v53 }
 0x547   :  { %8806 = vmatmul.msk.bf16.gmra.mxu1 %vm248_vm2, %v9497_v27  ;;  %8767 = vmatmul.msk.bf16.gmra.mxu3 %vm134_vm0, %v9506_v23 }
 0x554   :  { %v2263_v33 = vpop.f32.mrf.mxu1 }
 0x555   :  { %v2267_v11 = vadd.f32 %v2263_v33, %v11648_v1  ;;  %v4565_v19 = vrot.slane %v2263_v33, 1 }
 0x557   :  { %8726 = vst [vmem:[%s17002_s11 + $0xc] sm:$0xf] %v2267_v11  ;;  %8807 = vmatmul.msk.bf16.gmra.mxu1 %vm248_vm2, %v9498_v58  ;;  %v12423_v51 = vsel %vm17010_vm5, %v12047_v62, %v4565_v19 }
 0x55a   :  { %v2389_v6 = vpop.f32.mrf.mxu3 }
 0x55c   :  { %v2265_v30 = vpop.f32.mrf.mxu1 }
 0x562   :  { %v2391_v10 = vpop.f32.mrf.mxu3 }
 0x564   :  { %v2505_v52 = vpop.f32.mrf.mxu1 }
 0x565   :  { %v2506_v57 = vadd.f32 %v2505_v52, %v2389_v6 }
 0x567   :  { %v8808_v25 = vmul.f32 -1.442695, %v2506_v57 }
 0x569   :  { %9840 = vpow2.f32 %v8808_v25 }
 0x56a   :  { %v2394_v16 = vpop.f32.mrf.mxu3 }
 0x56c   :  { %v2507_v21 = vpop.f32.mrf.mxu1 }
 0x56d   :  { %v2508_v19 = vadd.f32 %v2507_v21, %v2391_v10 }
 0x56f   :  { %v9841_v45 = vpop.eup %9840  ;;  %v8809_v25 = vmul.f32 -1.442695, %v2508_v19 }
 0x570   :  { %v2557_v5 = vadd.f32 1.0, %v9841_v45 }
 0x572   :  { %v12425_v39 = vpop.f32.mrf.mxu3  ;;  %vm2566_vm3 = vweird.f32 %v2557_v5 }
 0x574   :  { %v2510_v38 = vpop.f32.mrf.mxu1 }
 0x575   :  { %v12427_v61 = vadd.f32 %v2510_v38, %v2394_v16  ;;  %v2572_v16 = vand.u32 2147483648, %v2557_v5  ;;  %v2570_v38 = vand.u32 2147483647, %v2557_v5 }
 0x577   :  { %v2573_v10 = vor.u32 1.1754944e-38, %v2572_v16  ;;  %vm2571_vm10 = vcmp.eq.f32.partialorder %v2570_v38, 8.507059e+37 }
 0x57a   :  { %v2399_v2 = vpop.f32.mrf.mxu3 }
 0x57c   :  { %v2512_v9 = vpop.f32.mrf.mxu1 }
 0x582   :  { %v2401_v36 = vpop.f32.mrf.mxu3 }
 0x584   :  { %v2515_v60 = vpop.f32.mrf.mxu1 }
 0x585   :  { %v2516_v62 = vadd.f32 %v2515_v60, %v2399_v2 }
 0x587   :  { %v8812_v17 = vmul.f32 -1.442695, %v2516_v62 }
 0x589   :  { %9842 = vpow2.f32 %v8812_v17 }
 0x58a   :  { %v2404_v8 = vpop.f32.mrf.mxu3  ;;  %9844 = vrcp.f32 %v2557_v5 }
 0x58c   :  { %v2517_v42 = vpop.f32.mrf.mxu1 }
 0x58f   :  { %v9843_v46 = vpop.eup %9842 }
 0x590   :  { %v2633_v54 = vadd.f32 1.0, %v9843_v46  ;;  %v9845_v31 = vpop.eup %9844 }
 0x591   :  { %v2562_v50 = vmul.f32 %v9845_v31, %v2557_v5  ;;  %vm2567_vm9 = vweird.f32 %v9845_v31 }
 0x592   :  { %9846 = vrcp.f32 %v2633_v54  ;;  %v2406_v56 = vpop.f32.mrf.mxu3  ;;  %v2648_v6 = vand.u32 2147483648, %v2633_v54  ;;  %vm2642_vm15 = vweird.f32 %v2633_v54  ;;  %v2646_v57 = vand.u32 2147483647, %v2633_v54  ;;  %vm2568_vm8 = vmor %vm2566_vm3, %vm2567_vm9 }
 0x593   :  { %v2563_v53 = vsub.f32 1.0, %v2562_v50 }
 0x594   :  { %v2520_v34 = vpop.f32.mrf.mxu1  ;;  %v2649_v60 = vor.u32 1.1754944e-38, %v2648_v6  ;;  %vm2647_vm7 = vcmp.eq.f32.partialorder %v2646_v57, 8.507059e+37 }
 0x595   :  { %v2564_v58 = vmul.f32 %v9845_v31, %v2563_v53  ;;  %v2521_v53 = vadd.f32 %v2520_v34, %v2404_v8 }
 0x597   :  { %v2565_v52 = vadd.f32 %v9845_v31, %v2564_v58 }
 0x598   :  { %v9847_v37 = vpop.eup %9846 }
 0x599   :  { %v2638_v4 = vmul.f32 %v9847_v37, %v2633_v54  ;;  %vm2643_vm14 = vweird.f32 %v9847_v37  ;;  %v2569_v62 = vsel %vm2568_vm8, %v9845_v31, %v2565_v52  ;;  %v2518_v31 = vadd.f32 %v2517_v42, %v2401_v36 }
 0x59a   :  { %v2409_v41 = vpop.f32.mrf.mxu3  ;;  %vm2644_vm4 = vmor %vm2642_vm15, %vm2643_vm14  ;;  %v2574_v54 = vsel %vm2571_vm10, %v2573_v10, %v2569_v62 }
 0x59b   :  { %v2639_v14 = vsub.f32 1.0, %v2638_v4  ;;  %v8813_v6 = vmul.f32 -1.442695, %v2518_v31 }
 0x59c   :  { %v2522_v40 = vpop.f32.mrf.mxu1 }
 0x59d   :  { %v2640_v27 = vmul.f32 %v9847_v37, %v2639_v14  ;;  %v8810_v14 = vmul.f32 -1.442695, %v12427_v61 }
 0x59f   :  { %v2641_v11 = vadd.f32 %v9847_v37, %v2640_v27 }
 0x5a1   :  { %v2645_v2 = vsel %vm2644_vm4, %v9847_v37, %v2641_v11  ;;  %v2513_v37 = vadd.f32 %v2512_v9, %v12425_v39  ;;  %v2523_v11 = vadd.f32 %v2522_v40, %v2406_v56 }
 0x5a2   :  { %v12429_v23 = vpop.f32.mrf.mxu3  ;;  %v2650_v21 = vsel %vm2647_vm7, %v2649_v60, %v2645_v2 }
 0x5a3   :  { %v2777_v4 = vmul.f32 %v2650_v21, %v12060_v22  ;;  %v8814_v22 = vmul.f32 -1.442695, %v2521_v53 }
 0x5a4   :  { %v2525_v33 = vpop.f32.mrf.mxu1 }
 0x5a5   :  { %v2526_v30 = vadd.f32 %v2525_v33, %v2409_v41  ;;  %v8811_v33 = vmul.f32 -1.442695, %v2513_v37 }
 0x5a7   :  { %9848 = vtanh.f32 %v2526_v30  ;;  %v8815_v30 = vmul.f32 -1.442695, %v2523_v11 }
 0x5a8   :  { %9850 = vpow2.f32 %v8809_v25 }
 0x5a9   :  { %9852 = vpow2.f32 %v8810_v14 }
 0x5aa   :  { %v12431_v17 = vpop.f32.mrf.mxu3  ;;  %9854 = vpow2.f32 %v8811_v33 }
 0x5ac   :  { %v12433_v45 = vpop.f32.mrf.mxu1 }
 0x5ad   :  { %v9849_v46 = vpop.eup %9848 }
 0x5ae   :  { %v2781_v50 = vmul.f32 %v9849_v46, %v2574_v54  ;;  %v9851_v41 = vpop.eup %9850 }
 0x5af   :  { %v2558_v19 = vadd.f32 1.0, %v9851_v41  ;;  %v9853_v61 = vpop.eup %9852 }
 0x5b0   :  { %v12436_v5 = vadd.f32 %v2781_v50, %v2777_v4  ;;  %v9855_v36 = vpop.eup %9854  ;;  %v12448_v34 = vadd.f32 1.0, %v9853_v61 }
 0x5b1   :  { %9856 = vrcp.f32 %v2558_v19  ;;  %v12450_v40 = vadd.f32 1.0, %v9855_v36  ;;  %vm2581_vm13 = vweird.f32 %v2558_v19 }
 0x5b2   :  { %v12440_v27 = vpop.f32.mrf.mxu3  ;;  %9858 = vpow2.f32 %v8813_v6  ;;  %v2585_v6 = vand.u32 2147483647, %v2558_v19  ;;  %vm2596_vm15 = vweird.f32 %v12448_v34 }
 0x5b3   :  { %9860 = vpow2.f32 %v8814_v22  ;;  %v2587_v22 = vand.u32 2147483648, %v2558_v19  ;;  %vm2611_vm4 = vweird.f32 %v12450_v40 }
 0x5b4   :  { %v12442_v58 = vpop.f32.mrf.mxu1  ;;  %9862 = vpow2.f32 %v8815_v30  ;;  %vm12492_vm14 = vcmp.eq.f32.partialorder %v2585_v6, 8.507059e+37 }
 0x5b5   :  { %9864 = vrcp.f32 %v12448_v34 }
 0x5b6   :  { %9866 = vrcp.f32 %v12450_v40 }
 0x5b7   :  { %v12446_v8 = vpop.eup %9856 }
 0x5b8   :  { %v9859_v42 = vpop.eup %9858  ;;  %v2577_v38 = vmul.f32 %v12446_v8, %v2558_v19  ;;  %vm2582_vm11 = vweird.f32 %v12446_v8 }
 0x5b9   :  { %v9861_v56 = vpop.eup %9860  ;;  %v12452_v57 = vadd.f32 1.0, %v9859_v42  ;;  %v2602_v42 = vand.u32 2147483648, %v12448_v34  ;;  %vm12488_vm12 = vmor %vm2581_vm13, %vm2582_vm11 }
 0x5ba   :  { %v2419_v9 = vpop.f32.mrf.mxu3  ;;  %v9863_v52 = vpop.eup %9862  ;;  %v12456_v2 = vadd.f32 1.0, %v9861_v56  ;;  %v2578_v62 = vsub.f32 1.0, %v2577_v38 }
 0x5bb   :  { %v12459_v25 = vadd.f32 1.0, %v9863_v52  ;;  %9868 = vrcp.f32 %v12452_v57  ;;  %v12464_v21 = vpop.eup %9864  ;;  %vm2657_vm8 = vweird.f32 %v12452_v57 }
 0x5bc   :  { %v12444_v39 = vpop.f32.mrf.mxu1  ;;  %9870 = vrcp.f32 %v12456_v2  ;;  %v12466_v46 = vpop.eup %9866  ;;  %v2579_v4 = vmul.f32 %v12446_v8, %v2578_v62  ;;  %v2592_v41 = vmul.f32 %v12464_v21, %v12448_v34  ;;  %v2588_v62 = vor.u32 1.1754944e-38, %v2587_v22 }
 0x5bd   :  { %9872 = vrcp.f32 %v12459_v25  ;;  %v2607_v53 = vmul.f32 %v12466_v46, %v12450_v40  ;;  %vm2597_vm9 = vweird.f32 %v12464_v21  ;;  %v2528_v22 = vadd.f32 %v12433_v45, %v12429_v23 }
 0x5be   :  { %v2580_v61 = vadd.f32 %v12446_v8, %v2579_v4  ;;  %v2533_v23 = vadd.f32 %v12444_v39, %v12440_v27  ;;  %v2617_v45 = vand.u32 2147483648, %v12450_v40  ;;  %vm2612_vm3 = vweird.f32 %v12466_v46 }
 0x5bf   :  { %v2608_v52 = vsub.f32 1.0, %v2607_v53  ;;  %v12503_v53 = vor.u32 1.1754944e-38, %v2602_v42  ;;  %v2663_v27 = vand.u32 2147483648, %v12452_v57  ;;  %v2661_v39 = vand.u32 2147483647, %v12452_v57  ;;  %vm12559_vm5 = vmor %vm2611_vm4, %vm2612_vm3 }
 0x5c0   :  { %v2584_v4 = vsel %vm12488_vm12, %v12446_v8, %v2580_v61  ;;  %vm12548_vm12 = vmor %vm2596_vm15, %vm2597_vm9  ;;  %vm2672_vm9 = vweird.f32 %v12456_v2  ;;  %vm2687_vm3 = vweird.f32 %v12459_v25 }
 0x5c1   :  { %v12469_v37 = vpop.eup %9868  ;;  %v12510_v38 = vsel %vm12492_vm14, %v2588_v62, %v2584_v4 }
 0x5c2   :  { %v2421_v60 = vpop.f32.mrf.mxu3  ;;  %v12473_v14 = vpop.eup %9870  ;;  %v2653_v30 = vmul.f32 %v12469_v37, %v12452_v57  ;;  %vm2658_vm10 = vweird.f32 %v12469_v37 }
 0x5c3   :  { %v12477_v11 = vpop.eup %9872  ;;  %v2668_v36 = vmul.f32 %v12473_v14, %v12456_v2  ;;  %vm2673_vm13 = vweird.f32 %v12473_v14  ;;  %vm12569_vm15 = vmor %vm2657_vm8, %vm2658_vm10  ;;  %vm2662_vm10 = vcmp.eq.f32.partialorder %v2661_v39, 8.507059e+37 }
 0x5c4   :  { %v2535_v16 = vpop.f32.mrf.mxu1  ;;  %vm2688_vm14 = vweird.f32 %v12477_v11  ;;  %vm12580_vm4 = vmor %vm2672_vm9, %vm2673_vm13 }
 0x5c5   :  { %v2536_v10 = vadd.f32 %v2535_v16, %v2419_v9  ;;  %v2593_v9 = vsub.f32 1.0, %v2592_v41  ;;  %v2683_v16 = vmul.f32 %v12477_v11, %v12459_v25  ;;  %v2669_v41 = vsub.f32 1.0, %v2668_v36  ;;  %vm12591_vm8 = vmor %vm2687_vm3, %vm2688_vm14 }
 0x5c6   :  { %v2615_v36 = vand.u32 2147483647, %v12450_v40  ;;  %v2693_v40 = vand.u32 2147483648, %v12459_v25 }
 0x5c7   :  { %v8816_v31 = vmul.f32 -1.442695, %v2536_v10  ;;  %v2684_v6 = vsub.f32 1.0, %v2683_v16 }
 0x5c8   :  { %vm12538_vm11 = vcmp.eq.f32.partialorder %v2615_v36, 8.507059e+37 }
 0x5ca   :  { %v2424_v56 = vpop.f32.mrf.mxu3 }
 0x5cc   :  { %v2537_v54 = vpop.f32.mrf.mxu1 }
 0x5cd   :  { %v2538_v50 = vadd.f32 %v2537_v54, %v2421_v60  ;;  %v2654_v54 = vsub.f32 1.0, %v2653_v30  ;;  %v2609_v30 = vmul.f32 %v12466_v46, %v2608_v52 }
 0x5cf   :  { %v8817_v33 = vmul.f32 -1.442695, %v2538_v50  ;;  %v2600_v50 = vand.u32 2147483647, %v12448_v34  ;;  %v2655_v42 = vmul.f32 %v12469_v37, %v2654_v54 }
 0x5d1   :  { %9874 = vpow2.f32 %v8817_v33  ;;  %vm12532_vm7 = vcmp.eq.f32.partialorder %v2600_v50, 8.507059e+37  ;;  %v2656_v4 = vadd.f32 %v12469_v37, %v2655_v42  ;;  %v2678_v50 = vand.u32 2147483648, %v12456_v2 }
 0x5d2   :  { %9876 = vpow2.f32 %v8816_v31  ;;  %v2594_v31 = vmul.f32 %v12464_v21, %v2593_v9  ;;  %v2531_v9 = vadd.f32 %v12442_v58, %v12431_v17  ;;  %v2685_v17 = vmul.f32 %v12477_v11, %v2684_v6 }
 0x5d3   :  { %v2610_v58 = vadd.f32 %v12466_v46, %v2609_v30  ;;  %v2660_v57 = vsel %vm12569_vm15, %v12469_v37, %v2656_v4  ;;  %v2679_v37 = vor.u32 1.1754944e-38, %v2678_v50 }
 0x5d4   :  { %v2540_v10 = vpop.f32.mrf.mxu1  ;;  %v2595_v52 = vadd.f32 %v12464_v21, %v2594_v31  ;;  %v2686_v34 = vadd.f32 %v12477_v11, %v2685_v17  ;;  %v2618_v31 = vor.u32 1.1754944e-38, %v2617_v45 }
 0x5d5   :  { %v2541_v19 = vadd.f32 %v2540_v10, %v2424_v56  ;;  %v2670_v56 = vmul.f32 %v12473_v14, %v2669_v41  ;;  %v2426_v10 = vpop.f32.mrf.mxu3 }
 0x5d6   :  { %v2690_v4 = vsel %vm12591_vm8, %v12477_v11, %v2686_v34 }
 0x5d7   :  { %v9875_v33 = vpop.eup %9874  ;;  %v8818_v8 = vmul.f32 -1.442695, %v2541_v19 }
 0x5d8   :  { %v9877_v61 = vpop.eup %9876  ;;  %v12523_v16 = vadd.f32 1.0, %v9875_v33  ;;  %v2671_v33 = vadd.f32 %v12473_v14, %v2670_v56 }
 0x5d9   :  { %9878 = vpow2.f32 %v8818_v8  ;;  %v12527_v60 = vadd.f32 1.0, %v9877_v61  ;;  %v2676_v61 = vand.u32 2147483647, %v12456_v2  ;;  %v2664_v2 = vor.u32 1.1754944e-38, %v2663_v27 }
 0x5da   :  { %9880 = vtanh.f32 %v2528_v22  ;;  %v2614_v27 = vsel %vm12559_vm5, %v12466_v46, %v2610_v58 }
 0x5db   :  { %9882 = vtanh.f32 %v2531_v9  ;;  %vm2677_vm13 = vcmp.eq.f32.partialorder %v2676_v61, 8.507059e+37  ;;  %v2619_v11 = vsel %vm12538_vm11, %v2618_v31, %v2614_v27  ;;  %v2726_v27 = vand.u32 2147483647, %v12527_v60 }
 0x5dc   :  { %v2542_v54 = vpop.f32.mrf.mxu1  ;;  %9884 = vtanh.f32 %v2533_v23  ;;  %v2691_v23 = vand.u32 2147483647, %v12459_v25 }
 0x5dd   :  { %v2543_v41 = vadd.f32 %v2542_v54, %v2426_v10  ;;  %9886 = vrcp.f32 %v12523_v16  ;;  %v2599_v10 = vsel %vm12548_vm12, %v12464_v21, %v2595_v52  ;;  %v2675_v54 = vsel %vm12580_vm4, %v12473_v14, %v2671_v33 }
 0x5de   :  { %9888 = vrcp.f32 %v12527_v60  ;;  %v2694_v21 = vor.u32 1.1754944e-38, %v2693_v40  ;;  %v2665_v52 = vsel %vm2662_vm10, %v2664_v2, %v2660_v57  ;;  %v2604_v39 = vsel %vm12532_vm7, %v12503_v53, %v2599_v10 }
 0x5df   :  { %v9879_v6 = vpop.eup %9878  ;;  %v8819_v30 = vmul.f32 -1.442695, %v2543_v41  ;;  %v2680_v50 = vsel %vm2677_vm13, %v2679_v37, %v2675_v54  ;;  %vm2692_vm5 = vcmp.eq.f32.partialorder %v2691_v23, 8.507059e+37  ;;  %v2778_v22 = vmul.f32 %v2665_v52, %v12258_v29 }
 0x5e0   :  { %v12576_v9 = vadd.f32 1.0, %v9879_v6  ;;  %v9881_v36 = vpop.eup %9880  ;;  %v2695_v58 = vsel %vm2692_vm5, %v2694_v21, %v2690_v4  ;;  %v12621_v6 = vld [vmem:[%s16997_s0 + $0x14] sm:$0xf]  ;;  %v2779_v19 = vmul.f32 %v2680_v50, %v12264_v47  ;;  %vm2722_vm7 = vweird.f32 %v12527_v60 }
 0x5e1   :  { %9890 = vpow2.f32 %v8819_v30  ;;  %v9883_v56 = vpop.eup %9882  ;;  %v2782_v33 = vmul.f32 %v9881_v36, %v12510_v38  ;;  %v2826_v53 = vand.u32 2147483647, %v12621_v6  ;;  %v2780_v61 = vmul.f32 %v2695_v58, %v12267_v43 }
 0x5e2   :  { %9892 = vrcp.f32 %v12576_v9  ;;  %v9885_v25 = vpop.eup %9884  ;;  %v2783_v46 = vmul.f32 %v9883_v56, %v2604_v39  ;;  %vm2737_vm12 = vweird.f32 %v12523_v16  ;;  %v2758_v39 = vand.u32 2147483648, %v12576_v9 }
 0x5e3   :  { %v12608_v41 = vpop.eup %9886  ;;  %v2784_v38 = vmul.f32 %v9885_v25, %v2619_v11  ;;  %v12634_v40 = vadd.f32 %v2782_v33, %v2778_v22  ;;  %v2827_v36 = vsel %vm51_vm6, %v2826_v53, 0.0  ;;  %v2756_v33 = vand.u32 2147483647, %v12576_v9 }
 0x5e4   :  { %v12610_v14 = vpop.eup %9888  ;;  %v2733_v62 = vmul.f32 %v12608_v41, %v12523_v16  ;;  %v12640_v42 = vadd.f32 %v2783_v46, %v2779_v19  ;;  %v2828_v56 = vrot.slane %v2827_v36, 4  ;;  %vm2738_vm15 = vweird.f32 %v12608_v41 }
 0x5e5   :  { %v2718_v30 = vmul.f32 %v12610_v14, %v12527_v60  ;;  %v12643_v57 = vadd.f32 %v2784_v38, %v2780_v61  ;;  %vm2723_vm11 = vweird.f32 %v12610_v14  ;;  %v2741_v50 = vand.u32 2147483647, %v12523_v16  ;;  %vm12681_vm10 = vmor %vm2737_vm12, %vm2738_vm15  ;;  %v9517_v38 = vld [vmem:[%s16996_s2 + $0x10] sm:$0xff] }
 0x5e6   :  { %v2734_v47 = vsub.f32 1.0, %v2733_v62  ;;  %v2829_v43 = vadd.f32 %v2828_v56, %v2827_v36  ;;  %vm2752_vm9 = vweird.f32 %v12576_v9  ;;  %vm2757_vm8 = vcmp.eq.f32.partialorder %v2756_v33, 8.507059e+37  ;;  %v9514_v56 = vld [vmem:[%s16998_s1 + $0x38] sm:$0xff] }
 0x5e7   :  { %v9891_v45 = vpop.eup %9890  ;;  %v2719_v2 = vsub.f32 1.0, %v2718_v30  ;;  %v2743_v30 = vand.u32 2147483648, %v12523_v16  ;;  %vm12685_vm13 = vcmp.eq.f32.partialorder %v2741_v50, 8.507059e+37 }
 0x5e8   :  { %v12627_v34 = vpop.eup %9892  ;;  %v12632_v8 = vadd.f32 1.0, %v9891_v45  ;;  %v2735_v10 = vmul.f32 %v12608_v41, %v2734_v47  ;;  %v2830_v54 = vrot.slane %v2829_v43, 2  ;;  %v2759_v47 = vor.u32 1.1754944e-38, %v2758_v39 }
 0x5e9   :  { %v2748_v29 = vmul.f32 %v12627_v34, %v12576_v9  ;;  %v2720_v37 = vmul.f32 %v12610_v14, %v2719_v2  ;;  %vm2753_vm14 = vweird.f32 %v12627_v34 }
 0x5ea   :  { %9894 = vrcp.f32 %v12632_v8  ;;  %v2831_v52 = vadd.f32 %v2830_v54, %v2829_v43  ;;  %v2736_v58 = vadd.f32 %v12608_v41, %v2735_v10  ;;  %vm12665_vm4 = vmor %vm2752_vm9, %vm2753_vm14  ;;  %v2771_v62 = vand.u32 2147483647, %v12632_v8 }
 0x5eb   :  { %v2749_v23 = vsub.f32 1.0, %v2748_v29  ;;  %9896 = vtanh.f32 %v12436_v5  ;;  %v2773_v53 = vand.u32 2147483648, %v12632_v8  ;;  %v2721_v19 = vadd.f32 %v12610_v14, %v2720_v37  ;;  %vm12694_vm14 = vmor %vm2722_vm7, %vm2723_vm11 }
 0x5ec   :  { %9898 = vtanh.f32 %v12634_v40  ;;  %v2832_v45 = vrot.slane %v2831_v52, 1  ;;  %vm2767_vm5 = vweird.f32 %v12632_v8  ;;  %v2740_v16 = vsel %vm12681_vm10, %v12608_v41, %v2736_v58 }
 0x5ed   :  { %v2750_v17 = vmul.f32 %v12627_v34, %v2749_v23  ;;  %9900 = vtanh.f32 %v12640_v42  ;;  %v2728_v23 = vand.u32 2147483648, %v12527_v60  ;;  %v2774_v10 = vor.u32 1.1754944e-38, %v2773_v53  ;;  %v9518_v53 = vld [vmem:[%s16996_s2 + $0x18] sm:$0xff] }
 0x5ee   :  { %9902 = vtanh.f32 %v12643_v57  ;;  %v2833_v36 = vadd.f32 %v2832_v45, %v2831_v52  ;;  %v2744_v54 = vor.u32 1.1754944e-38, %v2743_v30  ;;  %vm2772_vm9 = vcmp.eq.f32.partialorder %v2771_v62, 8.507059e+37  ;;  %v9509_v62 = vld [vmem:[%s16998_s1 + $0x10] sm:$0xff]  ;;  %v9519_v30 = vld [vmem:[%s16996_s2 + $0x20] sm:$0xff] }
 0x5ef   :  { %v2751_v21 = vadd.f32 %v12627_v34, %v2750_v17  ;;  %v2725_v60 = vsel %vm12694_vm14, %v12610_v14, %v2721_v19  ;;  %v2729_v52 = vor.u32 1.1754944e-38, %v2728_v23  ;;  %vm2727_vm7 = vcmp.eq.f32.partialorder %v2726_v27, 8.507059e+37  ;;  %v9515_v27 = vld [vmem:[%s16996_s2] sm:$0xff]  ;;  %v9510_v19 = vld [vmem:[%s16998_s1 + $0x18] sm:$0xff] }
 0x5f0   :  { %v9895_v25 = vpop.eup %9894  ;;  %vm2834_vm12 = vcmp.ne.f32.partialorder %v2833_v36, 0.0  ;;  %v2745_v41 = vsel %vm12685_vm13, %v2744_v54, %v2740_v16  ;;  %v9521_v36 = vld [vmem:[%s16996_s2 + $0x30] sm:$0xff]  ;;  %v9522_v23 = vld [vmem:[%s16996_s2 + $0x38] sm:$0xff] }
 0x5f1   :  { %v2763_v4 = vmul.f32 %v9895_v25, %v12632_v8  ;;  %v9897_v31 = vpop.eup %9896  ;;  %v2755_v9 = vsel %vm12665_vm4, %v12627_v34, %v2751_v21  ;;  %vm2768_vm3 = vweird.f32 %v9895_v25  ;;  %v2835_v37 = vsel %vm2834_vm12, 1, %v17011_v0 }
 0x5f2   :  { %v9899_v46 = vpop.eup %9898  ;;  %v2760_v43 = vsel %vm2757_vm8, %v2759_v47, %v2755_v9  ;;  %vm2769_vm15 = vmor %vm2767_vm5, %vm2768_vm3  ;;  %v2730_v50 = vsel %vm2727_vm7, %v2729_v52, %v2725_v60  ;;  %v9520_v9 = vld [vmem:[%s16996_s2 + $0x28] sm:$0xff]  ;;  %v9513_v47 = vld [vmem:[%s16998_s1 + $0x30] sm:$0xff] }
 0x5f3   :  { %v2764_v11 = vsub.f32 1.0, %v2763_v4  ;;  %v9901_v22 = vpop.eup %9900  ;;  %v12706_v4 = vadd.s32 %v2835_v37, %v12330_v3  ;;  %v2853_v3 = vpack.c.bf16 %v12621_v6, %v12621_v6  ;;  %v12720_v14 = vmul.f32 %v9897_v31, %v2730_v50  ;;  %v9507_v6 = vld [vmem:[%s16998_s1] sm:$0xff]  ;;  %v9516_v31 = vld [vmem:[%s16996_s2 + $0x8] sm:$0xff] }
 0x5f4   :  { %v9903_v61 = vpop.eup %9902  ;;  %v12710_v33 = vmul.f32 %v9901_v22, %v2760_v43  ;;  %v9508_v22 = vld [vmem:[%s16998_s1 + $0x8] sm:$0xff] }
 0x5f5   :  { %v2765_v29 = vmul.f32 %v9895_v25, %v2764_v11  ;;  %v12716_v11 = vmul.f32 %v9899_v46, %v2745_v41  ;;  %17195 = vst [vmem:[#allocation9_spill] sm:$0xff] %v12720_v14  ;;  %v3048_v45 = vsel %vm273_vm1, %v2853_v3, 0  ;;  %v2802_v46 = vld [vmem:[%s16999_s3] sm:$0x7] }
 0x5f7   :  { %v2766_v34 = vadd.f32 %v9895_v25, %v2765_v29  ;;  %17194 = vst [vmem:[#allocation8_spill] sm:$0xff] %v12716_v11  ;;  %v2803_v58 = vpack.c.bf16 %v12716_v11, %v12720_v14  ;;  %v9512_v29 = vld [vmem:[%s16998_s1 + $0x28] sm:$0xff] }
 0x5f9   :  { %v2770_v8 = vsel %vm2769_vm15, %v9895_v25, %v2766_v34 }
 0x5fa   :  { %v2775_v21 = vsel %vm2772_vm9, %v2774_v10, %v2770_v8 }
 0x5fb   :  { %v12712_v39 = vmul.f32 %v9903_v61, %v2775_v21  ;;  %v9511_v61 = vld [vmem:[%s16998_s1 + $0x20] sm:$0xff] }
 0x5fd   :  { %v2804_v25 = vpack.c.bf16 %v12712_v39, %v12710_v33 }
 0x5ff   :  { %2814 = vmatpush.bf16.msrb.mxu2 %v2804_v25  ;;  %2940 = vmatpush.bf16.msrb.mxu0 %v2804_v25 }
 0x603   :  { %2815 = vmatpush.bf16.msrb.mxu2 %v2803_v58  ;;  %2941 = vmatpush.bf16.msrb.mxu0 %v2803_v58 }
 0x606   :  { %8820 = vmatmul.msk.bf16.vlgmr.msrb.gmra.mxu2 %vm134_vm0, %v2802_v46  ;;  %8855 = vmatmul.msk.bf16.vlgmr.msrb.gmra.mxu0 %vm134_vm0, %v9515_v27 }
 0x607   :  { %3057 = vmatpush.bf16.msra.mxu2 %v3048_v45 }
 0x616   :  { %8895 = vmatmul.msk.bf16.vlgmr.msra.gmra.mxu2 %vm248_vm2, %v9507_v6  ;;  %8856 = vmatmul.msk.bf16.gmra.mxu0 %vm134_vm0, %v9516_v31 }
 0x626   :  { %8896 = vmatmul.msk.bf16.gmra.mxu2 %vm248_vm2, %v9508_v22  ;;  %8857 = vmatmul.msk.bf16.gmra.mxu0 %vm134_vm0, %v9517_v38 }
 0x636   :  { %8897 = vmatmul.msk.bf16.gmra.mxu2 %vm248_vm2, %v9509_v62  ;;  %8858 = vmatmul.msk.bf16.gmra.mxu0 %vm134_vm0, %v9518_v53 }
 0x646   :  { %8898 = vmatmul.msk.bf16.gmra.mxu2 %vm248_vm2, %v9510_v19  ;;  %8859 = vmatmul.msk.bf16.gmra.mxu0 %vm134_vm0, %v9519_v30 }
 0x656   :  { %8899 = vmatmul.msk.bf16.gmra.mxu2 %vm248_vm2, %v9511_v61  ;;  %8860 = vmatmul.msk.bf16.gmra.mxu0 %vm134_vm0, %v9520_v9 }
 0x666   :  { %8900 = vmatmul.msk.bf16.gmra.mxu2 %vm248_vm2, %v9512_v29  ;;  %8861 = vmatmul.msk.bf16.gmra.mxu0 %vm134_vm0, %v9521_v36 }
 0x676   :  { %8901 = vmatmul.msk.bf16.gmra.mxu2 %vm248_vm2, %v9513_v47  ;;  %8862 = vmatmul.msk.bf16.gmra.mxu0 %vm134_vm0, %v9522_v23 }
 0x683   :  { %v2943_v2 = vpop.f32.mrf.mxu0 }
 0x686   :  { %8902 = vmatmul.msk.bf16.gmra.mxu2 %vm248_vm2, %v9514_v56 }
 0x689   :  { %v2817_v34 = vpop.f32.mrf.mxu2 }
 0x68a   :  { %v2821_v17 = vadd.f32 %v2817_v34, %v11648_v1  ;;  %v12796_v16 = vsel %vm51_vm6, %v12423_v51, %v2817_v34 }
 0x68b   :  { %v2945_v43 = vpop.f32.mrf.mxu0 }
 0x68c   :  { %8821 = vst [vmem:[%s17002_s11 + $0x10] sm:$0xf] %v2821_v17 }
 0x691   :  { %v2819_v10 = vpop.f32.mrf.mxu2 }
 0x693   :  { %v2948_v54 = vpop.f32.mrf.mxu0 }
 0x699   :  { %v3059_v37 = vpop.f32.mrf.mxu2 }
 0x69a   :  { %v3060_v8 = vadd.f32 %v3059_v37, %v2943_v2 }
 0x69b   :  { %v12801_v60 = vpop.f32.mrf.mxu0 }
 0x69c   :  { %v8903_v3 = vmul.f32 -1.442695, %v3060_v8 }
 0x69e   :  { %9904 = vpow2.f32 %v8903_v3 }
 0x6a1   :  { %v3061_v21 = vpop.f32.mrf.mxu2 }
 0x6a2   :  { %v3062_v37 = vadd.f32 %v3061_v21, %v2945_v43 }
 0x6a3   :  { %v2953_v52 = vpop.f32.mrf.mxu0 }
 0x6a4   :  { %v9905_v6 = vpop.eup %9904 }
 0x6a5   :  { %v3111_v38 = vadd.f32 1.0, %v9905_v6  ;;  %v8904_v6 = vmul.f32 -1.442695, %v3062_v37 }
 0x6a7   :  { %vm3120_vm10 = vweird.f32 %v3111_v38 }
 0x6a9   :  { %v3064_v41 = vpop.f32.mrf.mxu2 }
 0x6aa   :  { %v12803_v50 = vadd.f32 %v3064_v41, %v2948_v54 }
 0x6ab   :  { %v12805_v25 = vpop.f32.mrf.mxu0 }
 0x6b1   :  { %v3066_v51 = vpop.f32.mrf.mxu2 }
 0x6b3   :  { %v2958_v58 = vpop.f32.mrf.mxu0 }
 0x6b9   :  { %v3069_v45 = vpop.f32.mrf.mxu2 }
 0x6ba   :  { %v3070_v27 = vadd.f32 %v3069_v45, %v2953_v52  ;;  %v3126_v45 = vand.u32 2147483648, %v3111_v38 }
 0x6bb   :  { %v2960_v22 = vpop.f32.mrf.mxu0 }
 0x6bc   :  { %v8907_v46 = vmul.f32 -1.442695, %v3070_v27  ;;  %v3124_v27 = vand.u32 2147483647, %v3111_v38  ;;  %v3127_v43 = vor.u32 1.1754944e-38, %v3126_v45 }
 0x6be   :  { %9906 = vpow2.f32 %v8907_v46  ;;  %vm3125_vm14 = vcmp.eq.f32.partialorder %v3124_v27, 8.507059e+37 }
 0x6bf   :  { %9908 = vrcp.f32 %v3111_v38 }
 0x6c1   :  { %v3071_v31 = vpop.f32.mrf.mxu2 }
 0x6c3   :  { %v2963_v30 = vpop.f32.mrf.mxu0 }
 0x6c4   :  { %v9907_v62 = vpop.eup %9906 }
 0x6c5   :  { %v3187_v53 = vadd.f32 1.0, %v9907_v62  ;;  %v9909_v61 = vpop.eup %9908 }
 0x6c6   :  { %v3116_v36 = vmul.f32 %v9909_v61, %v3111_v38  ;;  %vm3121_vm3 = vweird.f32 %v9909_v61 }
 0x6c7   :  { %9910 = vrcp.f32 %v3187_v53  ;;  %v3202_v8 = vand.u32 2147483648, %v3187_v53  ;;  %vm3196_vm4 = vweird.f32 %v3187_v53  ;;  %v3200_v3 = vand.u32 2147483647, %v3187_v53  ;;  %vm3122_vm13 = vmor %vm3120_vm10, %vm3121_vm3 }
 0x6c8   :  { %v3117_v56 = vsub.f32 1.0, %v3116_v36 }
 0x6c9   :  { %v3074_v19 = vpop.f32.mrf.mxu2  ;;  %v3203_v62 = vor.u32 1.1754944e-38, %v3202_v8  ;;  %vm3201_vm5 = vcmp.eq.f32.partialorder %v3200_v3, 8.507059e+37 }
 0x6ca   :  { %v3118_v17 = vmul.f32 %v9909_v61, %v3117_v56 }
 0x6cb   :  { %v12807_v34 = vpop.f32.mrf.mxu0 }
 0x6cc   :  { %v3119_v41 = vadd.f32 %v9909_v61, %v3118_v17 }
 0x6cd   :  { %v9911_v9 = vpop.eup %9910 }
 0x6ce   :  { %v3192_v29 = vmul.f32 %v9911_v9, %v3187_v53  ;;  %vm3197_vm11 = vweird.f32 %v9911_v9 }
 0x6cf   :  { %vm3198_vm8 = vmor %vm3196_vm4, %vm3197_vm11 }
 0x6d0   :  { %v3193_v47 = vsub.f32 1.0, %v3192_v29  ;;  %v3123_v29 = vsel %vm3122_vm13, %v9909_v61, %v3119_v41  ;;  %v3072_v61 = vadd.f32 %v3071_v31, %v12805_v25 }
 0x6d1   :  { %v3076_v23 = vpop.f32.mrf.mxu2  ;;  %v3128_v53 = vsel %vm3125_vm14, %v3127_v43, %v3123_v29 }
 0x6d2   :  { %v3194_v2 = vmul.f32 %v9911_v9, %v3193_v47  ;;  %v3077_v41 = vadd.f32 %v3076_v23, %v2960_v22  ;;  %v8908_v45 = vmul.f32 -1.442695, %v3072_v61 }
 0x6d3   :  { %v12809_v36 = vpop.f32.mrf.mxu0 }
 0x6d4   :  { %v3195_v54 = vadd.f32 %v9911_v9, %v3194_v2  ;;  %v8910_v27 = vmul.f32 -1.442695, %v3077_v41 }
 0x6d6   :  { %v3199_v46 = vsel %vm3198_vm8, %v9911_v9, %v3195_v54  ;;  %v3067_v9 = vadd.f32 %v3066_v51, %v12801_v60  ;;  %v3075_v54 = vadd.f32 %v3074_v19, %v2958_v58 }
 0x6d7   :  { %v3204_v21 = vsel %vm3201_vm5, %v3203_v62, %v3199_v46 }
 0x6d8   :  { %v3331_v56 = vmul.f32 %v3204_v21, %v12436_v5  ;;  %v8909_v5 = vmul.f32 -1.442695, %v3075_v54 }
 0x6d9   :  { %v3079_v10 = vpop.f32.mrf.mxu2 }
 0x6da   :  { %v3080_v52 = vadd.f32 %v3079_v10, %v2963_v30  ;;  %v8905_v10 = vmul.f32 -1.442695, %v12803_v50 }
 0x6db   :  { %v12819_v37 = vpop.f32.mrf.mxu0 }
 0x6dc   :  { %9912 = vtanh.f32 %v3080_v52  ;;  %v8906_v52 = vmul.f32 -1.442695, %v3067_v9 }
 0x6dd   :  { %9914 = vpow2.f32 %v8904_v6 }
 0x6de   :  { %9916 = vpow2.f32 %v8905_v10 }
 0x6df   :  { %9918 = vpow2.f32 %v8906_v52 }
 0x6e1   :  { %v12811_v30 = vpop.f32.mrf.mxu2 }
 0x6e2   :  { %v9913_v47 = vpop.eup %9912 }
 0x6e3   :  { %v3335_v2 = vmul.f32 %v9913_v47, %v3128_v53  ;;  %v9915_v17 = vpop.eup %9914  ;;  %v2973_v25 = vpop.f32.mrf.mxu0 }
 0x6e4   :  { %v3112_v3 = vadd.f32 1.0, %v9915_v17  ;;  %v9917_v50 = vpop.eup %9916 }
 0x6e5   :  { %v12814_v38 = vadd.f32 %v3335_v2, %v3331_v56  ;;  %v9919_v51 = vpop.eup %9918  ;;  %v12827_v19 = vadd.f32 1.0, %v9917_v50 }
 0x6e6   :  { %9920 = vrcp.f32 %v3112_v3  ;;  %v12829_v23 = vadd.f32 1.0, %v9919_v51  ;;  %v3141_v51 = vand.u32 2147483648, %v3112_v3  ;;  %vm3135_vm15 = vweird.f32 %v3112_v3 }
 0x6e7   :  { %9922 = vpow2.f32 %v8908_v45  ;;  %vm3150_vm11 = vweird.f32 %v12827_v19 }
 0x6e8   :  { %9924 = vpow2.f32 %v8909_v5  ;;  %vm3165_vm3 = vweird.f32 %v12829_v23 }
 0x6e9   :  { %v12821_v8 = vpop.f32.mrf.mxu2  ;;  %9926 = vpow2.f32 %v8910_v27 }
 0x6ea   :  { %9928 = vrcp.f32 %v12827_v19 }
 0x6eb   :  { %9930 = vrcp.f32 %v12829_v23  ;;  %v2975_v47 = vpop.f32.mrf.mxu0 }
 0x6ec   :  { %v12825_v58 = vpop.eup %9920 }
 0x6ed   :  { %v9923_v31 = vpop.eup %9922  ;;  %v3131_v29 = vmul.f32 %v12825_v58, %v3112_v3  ;;  %vm3136_vm12 = vweird.f32 %v12825_v58 }
 0x6ee   :  { %v9925_v22 = vpop.eup %9924  ;;  %v12831_v6 = vadd.f32 1.0, %v9923_v31  ;;  %vm12867_vm9 = vmor %vm3135_vm15, %vm3136_vm12 }
 0x6ef   :  { %v9927_v46 = vpop.eup %9926  ;;  %v12835_v43 = vadd.f32 1.0, %v9925_v22  ;;  %v3132_v53 = vsub.f32 1.0, %v3131_v29  ;;  %v3156_v29 = vand.u32 2147483648, %v12827_v19 }
 0x6f0   :  { %v12838_v21 = vadd.f32 1.0, %v9927_v46  ;;  %9932 = vrcp.f32 %v12831_v6  ;;  %v12843_v2 = vpop.eup %9928  ;;  %vm3211_vm10 = vweird.f32 %v12831_v6 }
 0x6f1   :  { %v12823_v60 = vpop.f32.mrf.mxu2  ;;  %9934 = vrcp.f32 %v12835_v43  ;;  %v12845_v9 = vpop.eup %9930  ;;  %v3133_v61 = vmul.f32 %v12825_v58, %v3132_v53  ;;  %v3146_v52 = vmul.f32 %v12843_v2, %v12827_v19  ;;  %vm3151_vm4 = vweird.f32 %v12843_v2 }
 0x6f2   :  { %9936 = vrcp.f32 %v12838_v21  ;;  %v3161_v5 = vmul.f32 %v12845_v9, %v12829_v23  ;;  %vm3166_vm8 = vweird.f32 %v12845_v9  ;;  %vm12927_vm15 = vmor %vm3150_vm11, %vm3151_vm4  ;;  %vm3226_vm4 = vweird.f32 %v12835_v43 }
 0x6f3   :  { %v3134_v22 = vadd.f32 %v12825_v58, %v3133_v61  ;;  %v3147_v46 = vsub.f32 1.0, %v3146_v52 }
 0x6f4   :  { %v3162_v53 = vsub.f32 1.0, %v3161_v5  ;;  %v3154_v5 = vand.u32 2147483647, %v12827_v19 }
 0x6f5   :  { %v3148_v26 = vmul.f32 %v12843_v2, %v3147_v46  ;;  %v3085_v46 = vadd.f32 %v12821_v8, %v12809_v36 }
 0x6f6   :  { %v12848_v54 = vpop.eup %9932  ;;  %vm12911_vm13 = vcmp.eq.f32.partialorder %v3154_v5, 8.507059e+37 }
 0x6f7   :  { %v12852_v45 = vpop.eup %9934  ;;  %v3207_v31 = vmul.f32 %v12848_v54, %v12831_v6  ;;  %vm3212_vm5 = vweird.f32 %v12848_v54 }
 0x6f8   :  { %v12856_v50 = vpop.eup %9936  ;;  %vm3227_vm12 = vweird.f32 %v12852_v45  ;;  %vm12948_vm11 = vmor %vm3211_vm10, %vm3212_vm5 }
 0x6f9   :  { %v3089_v62 = vpop.f32.mrf.mxu2 }
 0x6fa   :  { %v3090_v56 = vadd.f32 %v3089_v62, %v2973_v25  ;;  %v3139_v25 = vand.u32 2147483647, %v3112_v3  ;;  %v3222_v62 = vmul.f32 %v12852_v45, %v12835_v43 }
 0x6fc   :  { %v8911_v41 = vmul.f32 -1.442695, %v3090_v56  ;;  %v3237_v56 = vmul.f32 %v12856_v50, %v12838_v21  ;;  %vm12871_vm7 = vcmp.eq.f32.partialorder %v3139_v25, 8.507059e+37  ;;  %v3223_v0 = vsub.f32 1.0, %v3222_v62 }
 0x6fd   :  { %v12882_v25 = vor.u32 1.1754944e-38, %v3156_v29  ;;  %v3169_v62 = vand.u32 2147483647, %v12829_v23 }
 0x6ff   :  { %vm12917_vm14 = vcmp.eq.f32.partialorder %v3169_v62, 8.507059e+37 }
 0x701   :  { %v3091_v17 = vpop.f32.mrf.mxu2 }
 0x702   :  { %v3092_v10 = vadd.f32 %v3091_v17, %v2975_v47  ;;  %v2978_v47 = vpop.f32.mrf.mxu0  ;;  %v3163_v17 = vmul.f32 %v12845_v9, %v3162_v53  ;;  %v3149_v53 = vadd.f32 %v12843_v2, %v3148_v26 }
 0x704   :  { %v8912_v27 = vmul.f32 -1.442695, %v3092_v10  ;;  %v3142_v10 = vor.u32 1.1754944e-38, %v3141_v51  ;;  %v3238_v51 = vsub.f32 1.0, %v3237_v56  ;;  %v3164_v8 = vadd.f32 %v12845_v9, %v3163_v17 }
 0x706   :  { %9938 = vpow2.f32 %v8912_v27  ;;  %v3208_v27 = vsub.f32 1.0, %v3207_v31  ;;  %v3082_v31 = vadd.f32 %v12811_v30, %v12807_v34  ;;  %v3087_v34 = vadd.f32 %v12823_v60, %v12819_v37 }
 0x707   :  { %9940 = vpow2.f32 %v8911_v41  ;;  %v3138_v41 = vsel %vm12867_vm9, %v12825_v58, %v3134_v22  ;;  %v3171_v30 = vand.u32 2147483648, %v12829_v23  ;;  %v3239_v36 = vmul.f32 %v12856_v50, %v3238_v51 }
 0x708   :  { %v12889_v14 = vsel %vm12871_vm7, %v3142_v10, %v3138_v41  ;;  %v3209_v29 = vmul.f32 %v12848_v54, %v3208_v27  ;;  %v3217_v37 = vand.u32 2147483648, %v12831_v6  ;;  %v3215_v60 = vand.u32 2147483647, %v12831_v6  ;;  %vm12938_vm7 = vmor %vm3165_vm3, %vm3166_vm8 }
 0x709   :  { %v3094_v52 = vpop.f32.mrf.mxu2  ;;  %v3232_v41 = vand.u32 2147483648, %v12835_v43  ;;  %vm3242_vm9 = vweird.f32 %v12856_v50  ;;  %v3240_v19 = vadd.f32 %v12856_v50, %v3239_v36  ;;  %v3247_v23 = vand.u32 2147483648, %v12838_v21  ;;  %vm12959_vm3 = vmor %vm3226_vm4, %vm3227_vm12 }
 0x70a   :  { %v3095_v3 = vadd.f32 %v3094_v52, %v2978_v47  ;;  %v3224_v47 = vmul.f32 %v12852_v45, %v3223_v0  ;;  %v2980_v26 = vpop.f32.mrf.mxu0  ;;  %v3210_v10 = vadd.f32 %v12848_v54, %v3209_v29  ;;  %vm3241_vm8 = vweird.f32 %v12838_v21 }
 0x70b   :  { %vm12970_vm10 = vmor %vm3241_vm8, %vm3242_vm9  ;;  %vm3216_vm5 = vcmp.eq.f32.partialorder %v3215_v60, 8.507059e+37  ;;  %v3172_v5 = vor.u32 1.1754944e-38, %v3171_v30 }
 0x70c   :  { %v9939_v11 = vpop.eup %9938  ;;  %v8913_v58 = vmul.f32 -1.442695, %v3095_v3  ;;  %v3225_v3 = vadd.f32 %v12852_v45, %v3224_v47  ;;  %v3214_v6 = vsel %vm12948_vm11, %v12848_v54, %v3210_v10  ;;  %v3233_v54 = vor.u32 1.1754944e-38, %v3232_v41 }
 0x70d   :  { %v9941_v22 = vpop.eup %9940  ;;  %v12902_v56 = vadd.f32 1.0, %v9939_v11  ;;  %v3244_v10 = vsel %vm12970_vm10, %v12856_v50, %v3240_v19 }
 0x70e   :  { %9942 = vpow2.f32 %v8913_v58  ;;  %v12906_v61 = vadd.f32 1.0, %v9941_v22  ;;  %v3230_v22 = vand.u32 2147483647, %v12835_v43  ;;  %v3218_v43 = vor.u32 1.1754944e-38, %v3217_v37 }
 0x70f   :  { %9944 = vtanh.f32 %v3082_v31  ;;  %v3168_v37 = vsel %vm12938_vm7, %v12845_v9, %v3164_v8  ;;  %vm3291_vm9 = vweird.f32 %v12902_v56 }
 0x710   :  { %9946 = vtanh.f32 %v3085_v46  ;;  %vm3231_vm12 = vcmp.eq.f32.partialorder %v3230_v22, 8.507059e+37  ;;  %v3173_v50 = vsel %vm12917_vm14, %v3172_v5, %v3168_v37  ;;  %v3280_v37 = vand.u32 2147483647, %v12906_v61 }
 0x711   :  { %v3096_v11 = vpop.f32.mrf.mxu2  ;;  %9948 = vtanh.f32 %v3087_v34  ;;  %v3245_v34 = vand.u32 2147483647, %v12838_v21 }
 0x712   :  { %v3097_v27 = vadd.f32 %v3096_v11, %v2980_v26  ;;  %9950 = vrcp.f32 %v12902_v56  ;;  %v3153_v26 = vsel %vm12927_vm15, %v12843_v2, %v3149_v53  ;;  %v3229_v11 = vsel %vm12959_vm3, %v12852_v45, %v3225_v3 }
 0x713   :  { %9952 = vrcp.f32 %v12906_v61  ;;  %v3248_v2 = vor.u32 1.1754944e-38, %v3247_v23  ;;  %v3219_v53 = vsel %vm3216_vm5, %v3218_v43, %v3214_v6  ;;  %v3158_v60 = vsel %vm12911_vm13, %v12882_v25, %v3153_v26 }
 0x714   :  { %v9943_v51 = vpop.eup %9942  ;;  %v8914_v17 = vmul.f32 -1.442695, %v3097_v27  ;;  %v3234_v41 = vsel %vm3231_vm12, %v3233_v54, %v3229_v11  ;;  %vm3246_vm15 = vcmp.eq.f32.partialorder %v3245_v34, 8.507059e+37  ;;  %v3332_v31 = vmul.f32 %v3219_v53, %v12634_v40 }
 0x715   :  { %v12955_v46 = vadd.f32 1.0, %v9943_v51  ;;  %v9945_v62 = vpop.eup %9944  ;;  %v3249_v8 = vsel %vm3246_vm15, %v3248_v2, %v3244_v10  ;;  %v13000_v51 = vld [vmem:[%s16997_s0 + $0x18] sm:$0xf]  ;;  %v3333_v52 = vmul.f32 %v3234_v41, %v12640_v42  ;;  %vm3276_vm13 = vweird.f32 %v12906_v61 }
 0x716   :  { %9954 = vpow2.f32 %v8914_v17  ;;  %v9947_v47 = vpop.eup %9946  ;;  %v3336_v3 = vmul.f32 %v9945_v62, %v12889_v14  ;;  %v3380_v25 = vand.u32 2147483647, %v13000_v51  ;;  %v3334_v22 = vmul.f32 %v3249_v8, %v12643_v57 }
 0x717   :  { %9956 = vrcp.f32 %v12955_v46  ;;  %v9949_v21 = vpop.eup %9948  ;;  %v3337_v9 = vmul.f32 %v9947_v47, %v3158_v60  ;;  %v3312_v60 = vand.u32 2147483648, %v12955_v46  ;;  %v3295_v41 = vand.u32 2147483647, %v12902_v56 }
 0x718   :  { %v12987_v27 = vpop.eup %9950  ;;  %v3338_v14 = vmul.f32 %v9949_v21, %v3173_v50  ;;  %v13013_v23 = vadd.f32 %v3336_v3, %v3332_v31  ;;  %v3381_v62 = vsel %vm51_vm6, %v3380_v25, 0.0  ;;  %v3310_v3 = vand.u32 2147483647, %v12955_v46 }
 0x719   :  { %v12989_v45 = vpop.eup %9952  ;;  %v3287_v0 = vmul.f32 %v12987_v27, %v12902_v56  ;;  %v13019_v29 = vadd.f32 %v3337_v9, %v3333_v52  ;;  %v3382_v47 = vrot.slane %v3381_v62, 4  ;;  %vm3292_vm11 = vweird.f32 %v12987_v27 }
 0x71a   :  { %v3272_v17 = vmul.f32 %v12989_v45, %v12906_v61  ;;  %v13022_v6 = vadd.f32 %v3338_v14, %v3334_v22  ;;  %vm3277_vm14 = vweird.f32 %v12989_v45  ;;  %vm3306_vm4 = vweird.f32 %v12955_v46  ;;  %vm13060_vm5 = vmor %vm3291_vm9, %vm3292_vm11  ;;  %v9524_v14 = vld [vmem:[%s16998_s1 + $0x8] sm:$0xff] }
 0x71b   :  { %v3288_v42 = vsub.f32 1.0, %v3287_v0  ;;  %v3383_v57 = vadd.f32 %v3382_v47, %v3381_v62  ;;  %vm3311_vm10 = vcmp.eq.f32.partialorder %v3310_v3, 8.507059e+37  ;;  %vm13064_vm12 = vcmp.eq.f32.partialorder %v3295_v41, 8.507059e+37  ;;  %v9538_v47 = vld [vmem:[%s16996_s2 + $0x38] sm:$0xff] }
 0x71c   :  { %v9955_v30 = vpop.eup %9954  ;;  %v3273_v43 = vsub.f32 1.0, %v3272_v17  ;;  %v3297_v17 = vand.u32 2147483648, %v12902_v56 }
 0x71d   :  { %v13006_v19 = vpop.eup %9956  ;;  %v13011_v58 = vadd.f32 1.0, %v9955_v30  ;;  %v3289_v26 = vmul.f32 %v12987_v27, %v3288_v42  ;;  %v3384_v11 = vrot.slane %v3383_v57, 2  ;;  %v3313_v42 = vor.u32 1.1754944e-38, %v3312_v60 }
 0x71e   :  { %v3302_v40 = vmul.f32 %v13006_v19, %v12955_v46  ;;  %v3274_v54 = vmul.f32 %v12989_v45, %v3273_v43  ;;  %vm3307_vm7 = vweird.f32 %v13006_v19  ;;  %v9530_v43 = vld [vmem:[%s16998_s1 + $0x38] sm:$0xff] }
 0x71f   :  { %9958 = vrcp.f32 %v13011_v58  ;;  %v3385_v53 = vadd.f32 %v3384_v11, %v3383_v57  ;;  %v3290_v8 = vadd.f32 %v12987_v27, %v3289_v26  ;;  %vm13044_vm3 = vmor %vm3306_vm4, %vm3307_vm7  ;;  %v3325_v0 = vand.u32 2147483647, %v13011_v58 }
 0x720   :  { %v3303_v34 = vsub.f32 1.0, %v3302_v40  ;;  %9960 = vtanh.f32 %v12814_v38  ;;  %v3327_v25 = vand.u32 2147483648, %v13011_v58  ;;  %v3275_v52 = vadd.f32 %v12989_v45, %v3274_v54  ;;  %vm13073_vm7 = vmor %vm3276_vm13, %vm3277_vm14 }
 0x721   :  { %9962 = vtanh.f32 %v13013_v23  ;;  %v3386_v30 = vrot.slane %v3385_v53, 1  ;;  %vm3321_vm15 = vweird.f32 %v13011_v58  ;;  %v3294_v56 = vsel %vm13060_vm5, %v12987_v27, %v3290_v8 }
 0x722   :  { %v3304_v36 = vmul.f32 %v13006_v19, %v3303_v34  ;;  %9964 = vtanh.f32 %v13019_v29  ;;  %v3282_v34 = vand.u32 2147483648, %v12906_v61  ;;  %v3328_v26 = vor.u32 1.1754944e-38, %v3327_v25  ;;  %v9525_v25 = vld [vmem:[%s16998_s1 + $0x10] sm:$0xff] }
 0x723   :  { %9966 = vtanh.f32 %v13022_v6  ;;  %v3387_v62 = vadd.f32 %v3386_v30, %v3385_v53  ;;  %v3298_v11 = vor.u32 1.1754944e-38, %v3297_v17  ;;  %v17222_v54 = vmov 0   ;;  %v9526_v17 = vld [vmem:[%s16998_s1 + $0x18] sm:$0xff] }
 0x724   :  { %v3305_v2 = vadd.f32 %v13006_v19, %v3304_v36  ;;  %vm3326_vm4 = vcmp.eq.f32.partialorder %v3325_v0, 8.507059e+37  ;;  %v3279_v61 = vsel %vm13073_vm7, %v12989_v45, %v3275_v52  ;;  %v3283_v3 = vor.u32 1.1754944e-38, %v3282_v34  ;;  %v9533_v0 = vld [vmem:[%s16996_s2 + $0x10] sm:$0xff]  ;;  %v9534_v52 = vld [vmem:[%s16996_s2 + $0x18] sm:$0xff] }
 0x725   :  { %v9959_v21 = vpop.eup %9958  ;;  %vm3388_vm9 = vcmp.ne.f32.partialorder %v3387_v62, 0.0  ;;  %v3299_v27 = vsel %vm13064_vm12, %v3298_v11, %v3294_v56  ;;  %vm3281_vm13 = vcmp.eq.f32.partialorder %v3280_v37, 8.507059e+37  ;;  %v9531_v37 = vld [vmem:[%s16996_s2] sm:$0xff]  ;;  %v9528_v62 = vld [vmem:[%s16998_s1 + $0x28] sm:$0xff]  ;;  %v9529_v34 = vld [vmem:[%s16998_s1 + $0x30] sm:$0xff]  ;;  %vm17020_vm14 = vcmask 1044480  }
 0x726   :  { %v3317_v10 = vmul.f32 %v9959_v21, %v13011_v58  ;;  %v9961_v5 = vpop.eup %9960  ;;  %v3309_v46 = vsel %vm13044_vm3, %v13006_v19, %v3305_v2  ;;  %vm3322_vm8 = vweird.f32 %v9959_v21 }
 0x727   :  { %v9963_v9 = vpop.eup %9962  ;;  %v3314_v57 = vsel %vm3311_vm10, %v3313_v42, %v3309_v46  ;;  %vm3323_vm11 = vmor %vm3321_vm15, %vm3322_vm8  ;;  %v9527_v46 = vld [vmem:[%s16998_s1 + $0x20] sm:$0xff]  ;;  %v9537_v42 = vld [vmem:[%s16996_s2 + $0x30] sm:$0xff] }
 0x728   :  { %v3318_v50 = vsub.f32 1.0, %v3317_v10  ;;  %v9965_v31 = vpop.eup %9964  ;;  %v3389_v10 = vsel %vm3388_vm9, 1, %v17222_v54  ;;  %v13095_v8 = vmul.f32 %v9963_v9, %v3299_v27  ;;  %v3356_v9 = vld [vmem:[%s16999_s3] sm:$0x7] }
 0x729   :  { %v9967_v22 = vpop.eup %9966  ;;  %v13085_v2 = vadd.s32 %v3389_v10, %v12706_v4  ;;  %v13089_v60 = vmul.f32 %v9965_v31, %v3314_v57  ;;  %v3407_v4 = vpack.c.bf16 %v13000_v51, %v13000_v51  ;;  %v9523_v51 = vld [vmem:[%s16998_s1] sm:$0xff] }
 0x72a   :  { %v3319_v40 = vmul.f32 %v9959_v21, %v3318_v50  ;;  %v3284_v50 = vsel %vm3281_vm13, %v3283_v3, %v3279_v61  ;;  %17224 = vst [vmem:[#allocation11_spill] sm:$0xff] %v13095_v8 }
 0x72b   :  { %v13099_v45 = vmul.f32 %v9961_v5, %v3284_v50  ;;  %v3602_v31 = vsel %vm273_vm1, %v3407_v4, 0  ;;  %v9532_v5 = vld [vmem:[%s16996_s2 + $0x8] sm:$0xff] }
 0x72c   :  { %v3320_v19 = vadd.f32 %v9959_v21, %v3319_v40  ;;  %v9536_v40 = vld [vmem:[%s16996_s2 + $0x28] sm:$0xff] }
 0x72d   :  { %17225 = vst [vmem:[#allocation12_spill] sm:$0xff] %v13099_v45  ;;  %v3357_v30 = vpack.c.bf16 %v13095_v8, %v13099_v45 }
 0x72e   :  { %v3324_v58 = vsel %vm3323_vm11, %v9959_v21, %v3320_v19 }
 0x72f   :  { %v3329_v53 = vsel %vm3326_vm4, %v3328_v26, %v3324_v58 }
 0x730   :  { %v13091_v41 = vmul.f32 %v9967_v22, %v3329_v53  ;;  %v9535_v22 = vld [vmem:[%s16996_s2 + $0x20] sm:$0xff] }
 0x732   :  { %17223 = vst [vmem:[#allocation10_spill] sm:$0xff] %v13091_v41  ;;  %v3358_v21 = vpack.c.bf16 %v13091_v41, %v13089_v60 }
 0x734   :  { %3368 = vmatpush.bf16.msrb.mxu3 %v3358_v21  ;;  %3494 = vmatpush.bf16.msra.mxu1 %v3358_v21 }
 0x738   :  { %3369 = vmatpush.bf16.msrb.mxu3 %v3357_v30  ;;  %3495 = vmatpush.bf16.msra.mxu1 %v3357_v30 }
 0x73b   :  { %8915 = vmatmul.msk.bf16.vlgmr.msrb.gmra.mxu3 %vm134_vm0, %v3356_v9  ;;  %8950 = vmatmul.msk.bf16.vlgmr.msra.gmra.mxu1 %vm134_vm0, %v9531_v37 }
 0x73c   :  { %3611 = vmatpush.bf16.msra.mxu3 %v3602_v31 }
 0x74b   :  { %8990 = vmatmul.msk.bf16.vlgmr.msra.gmra.mxu3 %vm248_vm2, %v9523_v51  ;;  %8951 = vmatmul.msk.bf16.gmra.mxu1 %vm134_vm0, %v9532_v5 }
 0x75b   :  { %8991 = vmatmul.msk.bf16.gmra.mxu3 %vm248_vm2, %v9524_v14  ;;  %8952 = vmatmul.msk.bf16.gmra.mxu1 %vm134_vm0, %v9533_v0 }
 0x76b   :  { %8992 = vmatmul.msk.bf16.gmra.mxu3 %vm248_vm2, %v9525_v25  ;;  %8953 = vmatmul.msk.bf16.gmra.mxu1 %vm134_vm0, %v9534_v52 }
 0x77b   :  { %8993 = vmatmul.msk.bf16.gmra.mxu3 %vm248_vm2, %v9526_v17  ;;  %8954 = vmatmul.msk.bf16.gmra.mxu1 %vm134_vm0, %v9535_v22 }
 0x78b   :  { %8994 = vmatmul.msk.bf16.gmra.mxu3 %vm248_vm2, %v9527_v46  ;;  %8955 = vmatmul.msk.bf16.gmra.mxu1 %vm134_vm0, %v9536_v40 }
 0x79b   :  { %8995 = vmatmul.msk.bf16.gmra.mxu3 %vm248_vm2, %v9528_v62  ;;  %8956 = vmatmul.msk.bf16.gmra.mxu1 %vm134_vm0, %v9537_v42 }
 0x7ab   :  { %8996 = vmatmul.msk.bf16.gmra.mxu3 %vm248_vm2, %v9529_v34  ;;  %8957 = vmatmul.msk.bf16.gmra.mxu1 %vm134_vm0, %v9538_v47 }
 0x7b8   :  { %v3497_v19 = vpop.f32.mrf.mxu1 }
 0x7bb   :  { %8997 = vmatmul.msk.bf16.gmra.mxu3 %vm248_vm2, %v9530_v43 }
 0x7be   :  { %v3371_v36 = vpop.f32.mrf.mxu3 }
 0x7bf   :  { %v3375_v56 = vadd.f32 %v3371_v36, %v11648_v1  ;;  %v4568_v57 = vrot.slane %v3371_v36, 7 }
 0x7c0   :  { %v3499_v26 = vpop.f32.mrf.mxu1 }
 0x7c1   :  { %8916 = vst [vmem:[%s17002_s11 + $0x14] sm:$0xf] %v3375_v56  ;;  %v13178_v11 = vsel %vm17020_vm14, %v12796_v16, %v4568_v57 }
 0x7c6   :  { %v3373_v10 = vpop.f32.mrf.mxu3 }
 0x7c8   :  { %v3502_v58 = vpop.f32.mrf.mxu1 }
 0x7ce   :  { %v3613_v61 = vpop.f32.mrf.mxu3 }
 0x7cf   :  { %v3614_v53 = vadd.f32 %v3613_v61, %v3497_v19 }
 0x7d0   :  { %v13180_v3 = vpop.f32.mrf.mxu1 }
 0x7d1   :  { %v8998_v37 = vmul.f32 -1.442695, %v3614_v53 }
 0x7d3   :  { %9968 = vpow2.f32 %v8998_v37 }
 0x7d6   :  { %v3615_v27 = vpop.f32.mrf.mxu3 }
 0x7d7   :  { %v3616_v53 = vadd.f32 %v3615_v27, %v3499_v26 }
 0x7d8   :  { %v3507_v50 = vpop.f32.mrf.mxu1 }
 0x7d9   :  { %v9969_v14 = vpop.eup %9968 }
 0x7da   :  { %v3665_v52 = vadd.f32 1.0, %v9969_v14 }
 0x7dc   :  { %vm3674_vm12 = vweird.f32 %v3665_v52 }
 0x7de   :  { %v3618_v21 = vpop.f32.mrf.mxu3 }
 0x7df   :  { %v13182_v4 = vadd.f32 %v3618_v21, %v3502_v58 }
 0x7e0   :  { %v13184_v30 = vpop.f32.mrf.mxu1 }
 0x7e6   :  { %v3620_v31 = vpop.f32.mrf.mxu3 }
 0x7e8   :  { %v3512_v9 = vpop.f32.mrf.mxu1 }
 0x7ee   :  { %v3623_v51 = vpop.f32.mrf.mxu3 }
 0x7ef   :  { %v3624_v16 = vadd.f32 %v3623_v51, %v3507_v50 }
 0x7f0   :  { %v3514_v25 = vpop.f32.mrf.mxu1 }
 0x7f1   :  { %v9002_v5 = vmul.f32 -1.442695, %v3624_v16  ;;  %v3680_v16 = vand.u32 2147483648, %v3665_v52 }
 0x7f3   :  { %9970 = vpow2.f32 %v9002_v5  ;;  %v3678_v5 = vand.u32 2147483647, %v3665_v52  ;;  %v3681_v26 = vor.u32 1.1754944e-38, %v3680_v16 }
 0x7f4   :  { %9972 = vrcp.f32 %v3665_v52 }
 0x7f5   :  { %vm3679_vm9 = vcmp.eq.f32.partialorder %v3678_v5, 8.507059e+37 }
 0x7f6   :  { %v3625_v0 = vpop.f32.mrf.mxu3 }
 0x7f8   :  { %v3517_v40 = vpop.f32.mrf.mxu1 }
 0x7f9   :  { %v9971_v17 = vpop.eup %9970 }
 0x7fa   :  { %v3741_v22 = vadd.f32 1.0, %v9971_v17  ;;  %v9973_v62 = vpop.eup %9972  ;;  %v8999_v17 = vmul.f32 -1.442695, %v3616_v53 }
 0x7fb   :  { %v3670_v47 = vmul.f32 %v9973_v62, %v3665_v52  ;;  %vm3675_vm10 = vweird.f32 %v9973_v62 }
 0x7fc   :  { %9974 = vrcp.f32 %v3741_v22  ;;  %v3756_v50 = vand.u32 2147483648, %v3741_v22  ;;  %vm3750_vm8 = vweird.f32 %v3741_v22  ;;  %v3754_v51 = vand.u32 2147483647, %v3741_v22  ;;  %vm3676_vm15 = vmor %vm3674_vm12, %vm3675_vm10 }
 0x7fd   :  { %v3671_v36 = vsub.f32 1.0, %v3670_v47 }
 0x7fe   :  { %v3628_v46 = vpop.f32.mrf.mxu3  ;;  %vm3755_vm7 = vcmp.eq.f32.partialorder %v3754_v51, 8.507059e+37 }
 0x7ff   :  { %v3672_v10 = vmul.f32 %v9973_v62, %v3671_v36  ;;  %v3629_v53 = vadd.f32 %v3628_v46, %v3512_v9 }
 0x800   :  { %v13186_v57 = vpop.f32.mrf.mxu1 }
 0x801   :  { %v3673_v37 = vadd.f32 %v9973_v62, %v3672_v10 }
 0x802   :  { %v9975_v42 = vpop.eup %9974 }
 0x803   :  { %v3746_v34 = vmul.f32 %v9975_v42, %v3741_v22  ;;  %vm3751_vm3 = vweird.f32 %v9975_v42  ;;  %v3677_v47 = vsel %vm3676_vm15, %v9973_v62, %v3673_v37  ;;  %v3626_v62 = vadd.f32 %v3625_v0, %v13184_v30 }
 0x804   :  { %vm3752_vm5 = vmor %vm3750_vm8, %vm3751_vm3  ;;  %v3682_v22 = vsel %vm3679_vm9, %v3681_v26, %v3677_v47 }
 0x805   :  { %v3747_v43 = vsub.f32 1.0, %v3746_v34  ;;  %v3757_v34 = vor.u32 1.1754944e-38, %v3756_v50  ;;  %v9003_v5 = vmul.f32 -1.442695, %v3626_v62 }
 0x806   :  { %v3630_v19 = vpop.f32.mrf.mxu3 }
 0x807   :  { %v3748_v56 = vmul.f32 %v9975_v42, %v3747_v43  ;;  %v3631_v51 = vadd.f32 %v3630_v19, %v3514_v25 }
 0x808   :  { %v13188_v43 = vpop.f32.mrf.mxu1 }
 0x809   :  { %v3749_v61 = vadd.f32 %v9975_v42, %v3748_v56 }
 0x80b   :  { %v3753_v14 = vsel %vm3752_vm5, %v9975_v42, %v3749_v61  ;;  %v3621_v42 = vadd.f32 %v3620_v31, %v13180_v3  ;;  %v9000_v61 = vmul.f32 -1.442695, %v13182_v4 }
 0x80c   :  { %v3758_v27 = vsel %vm3755_vm7, %v3757_v34, %v3753_v14  ;;  %v9005_v14 = vmul.f32 -1.442695, %v3631_v51 }
 0x80d   :  { %v3885_v56 = vmul.f32 %v3758_v27, %v12814_v38  ;;  %v9001_v37 = vmul.f32 -1.442695, %v3621_v42  ;;  %v9004_v38 = vmul.f32 -1.442695, %v3629_v53 }
 0x80e   :  { %v3633_v58 = vpop.f32.mrf.mxu3 }
 0x80f   :  { %v3634_v21 = vadd.f32 %v3633_v58, %v3517_v40 }
 0x810   :  { %v13198_v50 = vpop.f32.mrf.mxu1 }
 0x811   :  { %9976 = vtanh.f32 %v3634_v21 }
 0x812   :  { %9978 = vpow2.f32 %v8999_v17 }
 0x813   :  { %9980 = vpow2.f32 %v9000_v61 }
 0x814   :  { %9982 = vpow2.f32 %v9001_v37 }
 0x816   :  { %v13190_v40 = vpop.f32.mrf.mxu3 }
 0x817   :  { %v9977_v36 = vpop.eup %9976 }
 0x818   :  { %v3889_v10 = vmul.f32 %v9977_v36, %v3682_v22  ;;  %v9979_v58 = vpop.eup %9978  ;;  %v3527_v30 = vpop.f32.mrf.mxu1 }
 0x819   :  { %v3666_v16 = vadd.f32 1.0, %v9979_v58  ;;  %v9981_v4 = vpop.eup %9980 }
 0x81a   :  { %v13193_v52 = vadd.f32 %v3889_v10, %v3885_v56  ;;  %v9983_v31 = vpop.eup %9982  ;;  %v13206_v46 = vadd.f32 1.0, %v9981_v4 }
 0x81b   :  { %9984 = vrcp.f32 %v3666_v16  ;;  %v13208_v19 = vadd.f32 1.0, %v9983_v31  ;;  %v3693_v31 = vand.u32 2147483647, %v3666_v16  ;;  %vm3689_vm4 = vweird.f32 %v3666_v16 }
 0x81c   :  { %9986 = vpow2.f32 %v9003_v5  ;;  %vm3704_vm8 = vweird.f32 %v13206_v46 }
 0x81d   :  { %9988 = vpow2.f32 %v9004_v38  ;;  %vm13250_vm3 = vcmp.eq.f32.partialorder %v3693_v31, 8.507059e+37  ;;  %vm3719_vm5 = vweird.f32 %v13208_v19 }
 0x81e   :  { %v13200_v21 = vpop.f32.mrf.mxu3  ;;  %9990 = vpow2.f32 %v9005_v14 }
 0x81f   :  { %9992 = vrcp.f32 %v13206_v46 }
 0x820   :  { %9994 = vrcp.f32 %v13208_v19  ;;  %v3529_v22 = vpop.f32.mrf.mxu1 }
 0x821   :  { %v13204_v9 = vpop.eup %9984 }
 0x822   :  { %v9987_v0 = vpop.eup %9986  ;;  %v3685_v26 = vmul.f32 %v13204_v9, %v3666_v16  ;;  %vm3690_vm11 = vweird.f32 %v13204_v9 }
 0x823   :  { %v9989_v25 = vpop.eup %9988  ;;  %v13210_v34 = vadd.f32 1.0, %v9987_v0  ;;  %v3695_v0 = vand.u32 2147483648, %v3666_v16  ;;  %vm13246_vm13 = vmor %vm3689_vm4, %vm3690_vm11 }
 0x824   :  { %v9991_v17 = vpop.eup %9990  ;;  %v13214_v27 = vadd.f32 1.0, %v9989_v25  ;;  %v3686_v56 = vsub.f32 1.0, %v3685_v26 }
 0x825   :  { %v13217_v36 = vadd.f32 1.0, %v9991_v17  ;;  %9996 = vrcp.f32 %v13210_v34  ;;  %v13222_v42 = vpop.eup %9992  ;;  %vm3765_vm15 = vweird.f32 %v13210_v34 }
 0x826   :  { %v13202_v3 = vpop.f32.mrf.mxu3  ;;  %9998 = vrcp.f32 %v13214_v27  ;;  %v13224_v58 = vpop.eup %9994  ;;  %v3687_v61 = vmul.f32 %v13204_v9, %v3686_v56  ;;  %v3700_v51 = vmul.f32 %v13222_v42, %v13206_v46  ;;  %vm3705_vm10 = vweird.f32 %v13222_v42 }
 0x827   :  { %10000 = vrcp.f32 %v13217_v36  ;;  %v3715_v14 = vmul.f32 %v13224_v58, %v13208_v19  ;;  %vm3720_vm12 = vweird.f32 %v13224_v58 }
 0x828   :  { %v3688_v17 = vadd.f32 %v13204_v9, %v3687_v61  ;;  %v3532_v56 = vpop.f32.mrf.mxu1  ;;  %vm13317_vm14 = vmor %vm3719_vm5, %vm3720_vm12  ;;  %vm3795_vm12 = vweird.f32 %v13217_v36 }
 0x82b   :  { %v13227_v37 = vpop.eup %9996 }
 0x82c   :  { %v13231_v38 = vpop.eup %9998  ;;  %v3761_v25 = vmul.f32 %v13227_v37, %v13210_v34  ;;  %vm3766_vm9 = vweird.f32 %v13227_v37 }
 0x82d   :  { %v3776_v26 = vmul.f32 %v13231_v38, %v13214_v27  ;;  %vm3781_vm4 = vweird.f32 %v13231_v38 }
 0x82e   :  { %v3643_v47 = vpop.f32.mrf.mxu3  ;;  %v3762_v8 = vsub.f32 1.0, %v3761_v25  ;;  %v3636_v25 = vadd.f32 %v13190_v40, %v13186_v57  ;;  %v3641_v57 = vadd.f32 %v13202_v3, %v13198_v50  ;;  %v3725_v40 = vand.u32 2147483648, %v13208_v19 }
 0x82f   :  { %v3644_v10 = vadd.f32 %v3643_v47, %v3527_v30  ;;  %v13235_v30 = vpop.eup %10000  ;;  %v3701_v47 = vsub.f32 1.0, %v3700_v51  ;;  %v3696_v51 = vor.u32 1.1754944e-38, %v3695_v0  ;;  %v3777_v45 = vsub.f32 1.0, %v3776_v26 }
 0x830   :  { %v3723_v26 = vand.u32 2147483647, %v13208_v19  ;;  %v3771_v50 = vand.u32 2147483648, %v13210_v34  ;;  %v3769_v3 = vand.u32 2147483647, %v13210_v34  ;;  %v3801_v19 = vand.u32 2147483648, %v13217_v36 }
 0x831   :  { %v9006_v5 = vmul.f32 -1.442695, %v3644_v10  ;;  %v3716_v10 = vsub.f32 1.0, %v3715_v14  ;;  %v3708_v14 = vand.u32 2147483647, %v13206_v46  ;;  %v3702_v49 = vmul.f32 %v13222_v42, %v3701_v47 }
 0x832   :  { %v3639_v47 = vadd.f32 %v13200_v21, %v13188_v43  ;;  %vm13296_vm11 = vcmp.eq.f32.partialorder %v3723_v26, 8.507059e+37 }
 0x833   :  { %vm13290_vm7 = vcmp.eq.f32.partialorder %v3708_v14, 8.507059e+37  ;;  %v3726_v14 = vor.u32 1.1754944e-38, %v3725_v40 }
 0x836   :  { %v3645_v62 = vpop.f32.mrf.mxu3 }
 0x837   :  { %v3646_v53 = vadd.f32 %v3645_v62, %v3529_v22  ;;  %v3710_v22 = vand.u32 2147483648, %v13206_v46  ;;  %v3791_v62 = vmul.f32 %v13235_v30, %v13217_v36 }
 0x839   :  { %v9007_v4 = vmul.f32 -1.442695, %v3646_v53  ;;  %v13261_v31 = vor.u32 1.1754944e-38, %v3710_v22  ;;  %v3792_v0 = vsub.f32 1.0, %v3791_v62  ;;  %v3717_v53 = vmul.f32 %v13224_v58, %v3716_v10 }
 0x83a   :  { %v3763_v22 = vmul.f32 %v13227_v37, %v3762_v8  ;;  %v3703_v10 = vadd.f32 %v13222_v42, %v3702_v49  ;;  %v3534_v49 = vpop.f32.mrf.mxu1 }
 0x83b   :  { %10002 = vpow2.f32 %v9007_v4  ;;  %v3793_v43 = vmul.f32 %v13235_v30, %v3792_v0  ;;  %v3718_v21 = vadd.f32 %v13224_v58, %v3717_v53 }
 0x83c   :  { %10004 = vpow2.f32 %v9006_v5  ;;  %v3692_v5 = vsel %vm13246_vm13, %v13204_v9, %v3688_v17  ;;  %v3764_v61 = vadd.f32 %v13227_v37, %v3763_v22  ;;  %vm13306_vm13 = vmor %vm3704_vm8, %vm3705_vm10  ;;  %vm3780_vm10 = vweird.f32 %v13214_v27 }
 0x83d   :  { %v13268_v41 = vsel %vm13250_vm3, %v3696_v51, %v3692_v5  ;;  %v3786_v5 = vand.u32 2147483648, %v13214_v27  ;;  %vm3796_vm3 = vweird.f32 %v13235_v30  ;;  %v3794_v46 = vadd.f32 %v13235_v30, %v3793_v43  ;;  %vm13327_vm8 = vmor %vm3765_vm15, %vm3766_vm9 }
 0x83e   :  { %v3648_v4 = vpop.f32.mrf.mxu3  ;;  %vm13338_vm5 = vmor %vm3780_vm10, %vm3781_vm4  ;;  %v3768_v34 = vsel %vm13327_vm8, %v13227_v37, %v3764_v61  ;;  %vm3770_vm9 = vcmp.eq.f32.partialorder %v3769_v3, 8.507059e+37 }
 0x83f   :  { %v3649_v16 = vadd.f32 %v3648_v4, %v3532_v56  ;;  %v3778_v56 = vmul.f32 %v13231_v38, %v3777_v45  ;;  %vm13349_vm15 = vmor %vm3795_vm12, %vm3796_vm3  ;;  %v3787_v37 = vor.u32 1.1754944e-38, %v3786_v5 }
 0x840   :  { %v3798_v61 = vsel %vm13349_vm15, %v13235_v30, %v3794_v46 }
 0x841   :  { %v10003_v63 = vpop.eup %10002  ;;  %v9008_v9 = vmul.f32 -1.442695, %v3649_v16  ;;  %v3779_v16 = vadd.f32 %v13231_v38, %v3778_v56 }
 0x842   :  { %v10005_v17 = vpop.eup %10004  ;;  %v13281_v62 = vadd.f32 1.0, %v10003_v63 }
 0x843   :  { %10006 = vpow2.f32 %v9008_v9  ;;  %v13285_v8 = vadd.f32 1.0, %v10005_v17  ;;  %v3784_v17 = vand.u32 2147483647, %v13214_v27  ;;  %v3772_v27 = vor.u32 1.1754944e-38, %v3771_v50 }
 0x844   :  { %10008 = vtanh.f32 %v3636_v25  ;;  %v3722_v50 = vsel %vm13317_vm14, %v13224_v58, %v3718_v21 }
 0x845   :  { %10010 = vtanh.f32 %v3639_v47  ;;  %vm3785_vm4 = vcmp.eq.f32.partialorder %v3784_v17, 8.507059e+37  ;;  %v3727_v30 = vsel %vm13296_vm11, %v3726_v14, %v3722_v50  ;;  %v3834_v50 = vand.u32 2147483647, %v13285_v8 }
 0x846   :  { %v3650_v63 = vpop.f32.mrf.mxu3  ;;  %10012 = vtanh.f32 %v3641_v57  ;;  %v3799_v57 = vand.u32 2147483647, %v13217_v36 }
 0x847   :  { %v3651_v4 = vadd.f32 %v3650_v63, %v3534_v49  ;;  %10014 = vrcp.f32 %v13281_v62  ;;  %v3707_v49 = vsel %vm13306_vm13, %v13222_v42, %v3703_v10  ;;  %v3783_v63 = vsel %vm13338_vm5, %v13231_v38, %v3779_v16 }
 0x848   :  { %10016 = vrcp.f32 %v13285_v8  ;;  %v3802_v42 = vor.u32 1.1754944e-38, %v3801_v19  ;;  %v3773_v10 = vsel %vm3770_vm9, %v3772_v27, %v3768_v34  ;;  %v3712_v3 = vsel %vm13290_vm7, %v13261_v31, %v3707_v49 }
 0x849   :  { %v10007_v0 = vpop.eup %10006  ;;  %v9009_v53 = vmul.f32 -1.442695, %v3651_v4  ;;  %v3788_v5 = vsel %vm3785_vm4, %v3787_v37, %v3783_v63  ;;  %vm3800_vm14 = vcmp.eq.f32.partialorder %v3799_v57, 8.507059e+37  ;;  %v3886_v25 = vmul.f32 %v3773_v10, %v13013_v23 }
 0x84a   :  { %v13334_v47 = vadd.f32 1.0, %v10007_v0  ;;  %v10009_v26 = vpop.eup %10008  ;;  %v3803_v21 = vsel %vm3800_vm14, %v3802_v42, %v3798_v61  ;;  %v13379_v0 = vld [vmem:[%s16997_s0 + $0x1c] sm:$0xf]  ;;  %v3887_v51 = vmul.f32 %v3788_v5, %v13019_v29  ;;  %vm3830_vm7 = vweird.f32 %v13285_v8 }
 0x84b   :  { %10018 = vpow2.f32 %v9009_v53  ;;  %v10011_v56 = vpop.eup %10010  ;;  %v3890_v16 = vmul.f32 %v10009_v26, %v13268_v41  ;;  %v3934_v31 = vand.u32 2147483647, %v13379_v0  ;;  %v3888_v17 = vmul.f32 %v3803_v21, %v13022_v6 }
 0x84c   :  { %10020 = vrcp.f32 %v13334_v47  ;;  %v10013_v36 = vpop.eup %10012  ;;  %v3891_v58 = vmul.f32 %v10011_v56, %v3712_v3  ;;  %vm3845_vm13 = vweird.f32 %v13281_v62  ;;  %v3866_v3 = vand.u32 2147483648, %v13334_v47 }
 0x84d   :  { %v13366_v4 = vpop.eup %10014  ;;  %v3892_v41 = vmul.f32 %v10013_v36, %v3727_v30  ;;  %v13392_v19 = vadd.f32 %v3890_v16, %v3886_v25  ;;  %v3935_v26 = vsel %vm51_vm6, %v3934_v31, 0.0  ;;  %v3864_v16 = vand.u32 2147483647, %v13334_v47 }
 0x84e   :  { %v13368_v38 = vpop.eup %10016  ;;  %v3841_v45 = vmul.f32 %v13366_v4, %v13281_v62  ;;  %v13398_v22 = vadd.f32 %v3891_v58, %v3887_v51  ;;  %v3936_v56 = vrot.slane %v3935_v26, 4  ;;  %vm3846_vm8 = vweird.f32 %v13366_v4 }
 0x84f   :  { %v3826_v53 = vmul.f32 %v13368_v38, %v13285_v8  ;;  %v13401_v34 = vadd.f32 %v3892_v41, %v3888_v17  ;;  %vm3831_vm11 = vweird.f32 %v13368_v38  ;;  %v3849_v5 = vand.u32 2147483647, %v13281_v62  ;;  %vm13439_vm9 = vmor %vm3845_vm13, %vm3846_vm8  ;;  %v9541_v41 = vld [vmem:[%s16998_s1 + $0x10] sm:$0xff] }
 0x850   :  { %v3842_v29 = vsub.f32 1.0, %v3841_v45  ;;  %v3937_v6 = vadd.f32 %v3936_v56, %v3935_v26  ;;  %vm3860_vm10 = vweird.f32 %v13334_v47  ;;  %vm3865_vm15 = vcmp.eq.f32.partialorder %v3864_v16, 8.507059e+37 }
 0x851   :  { %v10019_v40 = vpop.eup %10018  ;;  %v3827_v27 = vsub.f32 1.0, %v3826_v53  ;;  %v3851_v53 = vand.u32 2147483648, %v13281_v62  ;;  %vm13443_vm4 = vcmp.eq.f32.partialorder %v3849_v5, 8.507059e+37 }
 0x852   :  { %v13385_v46 = vpop.eup %10020  ;;  %v13390_v9 = vadd.f32 1.0, %v10019_v40  ;;  %v3843_v49 = vmul.f32 %v13366_v4, %v3842_v29  ;;  %v3938_v63 = vrot.slane %v3937_v6, 2  ;;  %v3867_v29 = vor.u32 1.1754944e-38, %v3866_v3 }
 0x853   :  { %v3856_v23 = vmul.f32 %v13385_v46, %v13334_v47  ;;  %v3828_v37 = vmul.f32 %v13368_v38, %v3827_v27  ;;  %vm3861_vm3 = vweird.f32 %v13385_v46 }
 0x854   :  { %10022 = vrcp.f32 %v13390_v9  ;;  %v3939_v10 = vadd.f32 %v3938_v63, %v3937_v6  ;;  %v3844_v21 = vadd.f32 %v13366_v4, %v3843_v49  ;;  %vm13423_vm5 = vmor %vm3860_vm10, %vm3861_vm3  ;;  %v3879_v45 = vand.u32 2147483647, %v13390_v9 }
 0x855   :  { %v3857_v57 = vsub.f32 1.0, %v3856_v23  ;;  %10024 = vtanh.f32 %v13193_v52  ;;  %v3881_v31 = vand.u32 2147483648, %v13390_v9  ;;  %v3829_v51 = vadd.f32 %v13368_v38, %v3828_v37  ;;  %vm13452_vm3 = vmor %vm3830_vm7, %vm3831_vm11 }
 0x856   :  { %10026 = vtanh.f32 %v13392_v19  ;;  %v3940_v40 = vrot.slane %v3939_v10, 1  ;;  %vm3875_vm14 = vweird.f32 %v13390_v9  ;;  %v3848_v62 = vsel %vm13439_vm9, %v13366_v4, %v3844_v21 }
 0x857   :  { %v3858_v43 = vmul.f32 %v13385_v46, %v3857_v57  ;;  %10028 = vtanh.f32 %v13398_v22  ;;  %v3836_v57 = vand.u32 2147483648, %v13285_v8  ;;  %v3882_v49 = vor.u32 1.1754944e-38, %v3881_v31  ;;  %v9542_v31 = vld [vmem:[%s16998_s1 + $0x18] sm:$0xff] }
 0x858   :  { %10030 = vtanh.f32 %v13401_v34  ;;  %v3941_v26 = vadd.f32 %v3940_v40, %v3939_v10  ;;  %v3852_v63 = vor.u32 1.1754944e-38, %v3851_v53  ;;  %vm3880_vm10 = vcmp.eq.f32.partialorder %v3879_v45, 8.507059e+37  ;;  %v9540_v40 = vld [vmem:[%s16998_s1 + $0x8] sm:$0xff]  ;;  %v9550_v45 = vld [vmem:[%s16996_s2 + $0x18] sm:$0xff]  ;;  %v9543_v53 = vld [vmem:[%s16998_s1 + $0x20] sm:$0xff] }
 0x859   :  { %v3859_v42 = vadd.f32 %v13385_v46, %v3858_v43  ;;  %v3833_v8 = vsel %vm13452_vm3, %v13368_v38, %v3829_v51  ;;  %v3837_v10 = vor.u32 1.1754944e-38, %v3836_v57  ;;  %vm3835_vm7 = vcmp.eq.f32.partialorder %v3834_v50, 8.507059e+37  ;;  %v9547_v50 = vld [vmem:[%s16996_s2] sm:$0xff]  ;;  %v9546_v57 = vld [vmem:[%s16998_s1 + $0x38] sm:$0xff] }
 0x85a   :  { %v10023_v36 = vpop.eup %10022  ;;  %vm3942_vm13 = vcmp.ne.f32.partialorder %v3941_v26, 0.0  ;;  %v3853_v4 = vsel %vm13443_vm4, %v3852_v63, %v3848_v62  ;;  %v9551_v51 = vld [vmem:[%s16996_s2 + $0x20] sm:$0xff]  ;;  %v9545_v26 = vld [vmem:[%s16998_s1 + $0x30] sm:$0xff]  ;;  %vm4584_vm11 = vcmask 1045504  }
 0x85b   :  { %v3871_v61 = vmul.f32 %v10023_v36, %v13390_v9  ;;  %v10025_v14 = vpop.eup %10024  ;;  %v3863_v47 = vsel %vm13423_vm5, %v13385_v46, %v3859_v42  ;;  %vm3876_vm12 = vweird.f32 %v10023_v36  ;;  %v3943_v37 = vsel %vm3942_vm13, 1, %v17222_v54 }
 0x85c   :  { %v10027_v58 = vpop.eup %10026  ;;  %v3868_v6 = vsel %vm3865_vm15, %v3867_v29, %v3863_v47  ;;  %vm3877_vm8 = vmor %vm3875_vm14, %vm3876_vm12  ;;  %v3838_v54 = vsel %vm3835_vm7, %v3837_v10, %v3833_v8  ;;  %v9544_v47 = vld [vmem:[%s16998_s1 + $0x28] sm:$0xff]  ;;  %v9554_v29 = vld [vmem:[%s16996_s2 + $0x38] sm:$0xff] }
 0x85d   :  { %v3872_v30 = vsub.f32 1.0, %v3871_v61  ;;  %v10029_v25 = vpop.eup %10028  ;;  %v13464_v61 = vadd.s32 %v3943_v37, %v13085_v2  ;;  %v13474_v5 = vmul.f32 %v10027_v58, %v3853_v4  ;;  %v3961_v2 = vpack.c.bf16 %v13379_v0, %v13379_v0  ;;  %v3910_v58 = vld [vmem:[%s16999_s3] sm:$0x7] }
 0x85e   :  { %v10031_v17 = vpop.eup %10030  ;;  %v13468_v16 = vmul.f32 %v10029_v25, %v3868_v6  ;;  %v13478_v38 = vmul.f32 %v10025_v14, %v3838_v54  ;;  %v9539_v0 = vld [vmem:[%s16998_s1] sm:$0xff]  ;;  %v9548_v14 = vld [vmem:[%s16996_s2 + $0x8] sm:$0xff]  ;;  %v9549_v25 = vld [vmem:[%s16996_s2 + $0x10] sm:$0xff] }
 0x85f   :  { %v3873_v23 = vmul.f32 %v10023_v36, %v3872_v30  ;;  %17253 = vst [vmem:[#allocation14_spill] sm:$0xff] %v13474_v5  ;;  %v4156_v21 = vsel %vm273_vm1, %v3961_v2, 0 }
 0x860   :  { %17254 = vst [vmem:[#allocation15_spill] sm:$0xff] %v13478_v38  ;;  %v3911_v30 = vpack.c.bf16 %v13474_v5, %v13478_v38 }
 0x861   :  { %v3874_v46 = vadd.f32 %v10023_v36, %v3873_v23  ;;  %v9553_v23 = vld [vmem:[%s16996_s2 + $0x30] sm:$0xff] }
 0x863   :  { %v3878_v9 = vsel %vm3877_vm8, %v10023_v36, %v3874_v46 }
 0x864   :  { %v3883_v42 = vsel %vm3880_vm10, %v3882_v49, %v3878_v9 }
 0x865   :  { %v13470_v3 = vmul.f32 %v10031_v17, %v3883_v42  ;;  %v9552_v17 = vld [vmem:[%s16996_s2 + $0x28] sm:$0xff] }
 0x867   :  { %17252 = vst [vmem:[#allocation13_spill] sm:$0xff] %v13470_v3  ;;  %v3912_v36 = vpack.c.bf16 %v13470_v3, %v13468_v16 }
 0x869   :  { %3922 = vmatpush.bf16.msra.mxu0 %v3912_v36  ;;  %4048 = vmatpush.bf16.msrb.mxu2 %v3912_v36 }
 0x86d   :  { %3923 = vmatpush.bf16.msra.mxu0 %v3911_v30  ;;  %4049 = vmatpush.bf16.msrb.mxu2 %v3911_v30 }
 0x870   :  { %9010 = vmatmul.msk.bf16.vlgmr.msra.gmra.mxu0 %vm134_vm0, %v3910_v58  ;;  %9045 = vmatmul.msk.bf16.vlgmr.msrb.gmra.mxu2 %vm134_vm0, %v9547_v50 }
 0x871   :  { %4165 = vmatpush.bf16.msrb.mxu0 %v4156_v21 }
 0x880   :  { %9085 = vmatmul.msk.bf16.vlgmr.msrb.gmra.mxu0 %vm248_vm2, %v9539_v0  ;;  %9046 = vmatmul.msk.bf16.gmra.mxu2 %vm134_vm0, %v9548_v14 }
 0x890   :  { %9086 = vmatmul.msk.bf16.gmra.mxu0 %vm248_vm2, %v9540_v40  ;;  %9047 = vmatmul.msk.bf16.gmra.mxu2 %vm134_vm0, %v9549_v25 }
 0x8a0   :  { %9087 = vmatmul.msk.bf16.gmra.mxu0 %vm248_vm2, %v9541_v41  ;;  %9048 = vmatmul.msk.bf16.gmra.mxu2 %vm134_vm0, %v9550_v45 }
 0x8b0   :  { %9088 = vmatmul.msk.bf16.gmra.mxu0 %vm248_vm2, %v9542_v31  ;;  %9049 = vmatmul.msk.bf16.gmra.mxu2 %vm134_vm0, %v9551_v51 }
 0x8c0   :  { %9089 = vmatmul.msk.bf16.gmra.mxu0 %vm248_vm2, %v9543_v53  ;;  %9050 = vmatmul.msk.bf16.gmra.mxu2 %vm134_vm0, %v9552_v17 }
 0x8d0   :  { %9090 = vmatmul.msk.bf16.gmra.mxu0 %vm248_vm2, %v9544_v47  ;;  %9051 = vmatmul.msk.bf16.gmra.mxu2 %vm134_vm0, %v9553_v23 }
 0x8e0   :  { %9091 = vmatmul.msk.bf16.gmra.mxu0 %vm248_vm2, %v9545_v26  ;;  %9052 = vmatmul.msk.bf16.gmra.mxu2 %vm134_vm0, %v9554_v29 }
 0x8ed   :  { %v3925_v56 = vpop.f32.mrf.mxu0 }
 0x8ee   :  { %v3929_v27 = vadd.f32 %v3925_v56, %v11648_v1  ;;  %v4571_v46 = vrot.slane %v3925_v56, 6 }
 0x8f0   :  { %9011 = vst [vmem:[%s17002_s11 + $0x18] sm:$0xf] %v3929_v27  ;;  %v13556_v43 = vsel %vm4584_vm11, %v13178_v11, %v4571_v46  ;;  %9092 = vmatmul.msk.bf16.gmra.mxu0 %vm248_vm2, %v9546_v57 }
 0x8f3   :  { %v4051_v62 = vpop.f32.mrf.mxu2 }
 0x8f5   :  { %v3927_v6 = vpop.f32.mrf.mxu0 }
 0x8fb   :  { %v4053_v49 = vpop.f32.mrf.mxu2 }
 0x8fd   :  { %v4167_v63 = vpop.f32.mrf.mxu0 }
 0x8fe   :  { %v4168_v37 = vadd.f32 %v4167_v63, %v4051_v62 }
 0x900   :  { %v9093_v2 = vmul.f32 -1.442695, %v4168_v37 }
 0x902   :  { %10032 = vpow2.f32 %v9093_v2 }
 0x903   :  { %v4056_v9 = vpop.f32.mrf.mxu2 }
 0x905   :  { %v4169_v8 = vpop.f32.mrf.mxu0 }
 0x908   :  { %v10033_v58 = vpop.eup %10032 }
 0x909   :  { %v4219_v40 = vadd.f32 1.0, %v10033_v58 }
 0x90b   :  { %v13559_v42 = vpop.f32.mrf.mxu2  ;;  %v4234_v2 = vand.u32 2147483648, %v4219_v40  ;;  %vm4228_vm9 = vweird.f32 %v4219_v40 }
 0x90d   :  { %v4172_v10 = vpop.f32.mrf.mxu0 }
 0x90e   :  { %v13561_v4 = vadd.f32 %v4172_v10, %v4056_v9 }
 0x913   :  { %v4061_v54 = vpop.f32.mrf.mxu2 }
 0x915   :  { %v4174_v36 = vpop.f32.mrf.mxu0 }
 0x91b   :  { %v13563_v30 = vpop.f32.mrf.mxu2 }
 0x91d   :  { %v4177_v11 = vpop.f32.mrf.mxu0 }
 0x91e   :  { %v4178_v21 = vadd.f32 %v4177_v11, %v4061_v54  ;;  %v4170_v54 = vadd.f32 %v4169_v8, %v4053_v49  ;;  %v4232_v11 = vand.u32 2147483647, %v4219_v40 }
 0x920   :  { %v9097_v50 = vmul.f32 -1.442695, %v4178_v21  ;;  %vm4233_vm3 = vcmp.eq.f32.partialorder %v4232_v11, 8.507059e+37 }
 0x922   :  { %10034 = vpow2.f32 %v9097_v50 }
 0x923   :  { %v4066_v0 = vpop.f32.mrf.mxu2  ;;  %10036 = vrcp.f32 %v4219_v40 }
 0x925   :  { %v4179_v14 = vpop.f32.mrf.mxu0 }
 0x928   :  { %v10035_v25 = vpop.eup %10034 }
 0x929   :  { %v4295_v41 = vadd.f32 1.0, %v10035_v25  ;;  %v10037_v51 = vpop.eup %10036 }
 0x92a   :  { %v4224_v47 = vmul.f32 %v10037_v51, %v4219_v40  ;;  %vm4229_vm12 = vweird.f32 %v10037_v51 }
 0x92b   :  { %10038 = vrcp.f32 %v4295_v41  ;;  %v4068_v45 = vpop.f32.mrf.mxu2  ;;  %v4310_v63 = vand.u32 2147483648, %v4295_v41  ;;  %vm4304_vm5 = vweird.f32 %v4295_v41  ;;  %v4308_v10 = vand.u32 2147483647, %v4295_v41  ;;  %vm4230_vm4 = vmor %vm4228_vm9, %vm4229_vm12 }
 0x92c   :  { %v4225_v57 = vsub.f32 1.0, %v4224_v47  ;;  %v4235_v47 = vor.u32 1.1754944e-38, %v4234_v2 }
 0x92d   :  { %v4182_v31 = vpop.f32.mrf.mxu0  ;;  %v4311_v50 = vor.u32 1.1754944e-38, %v4310_v63  ;;  %vm4309_vm14 = vcmp.eq.f32.partialorder %v4308_v10, 8.507059e+37 }
 0x92e   :  { %v4226_v46 = vmul.f32 %v10037_v51, %v4225_v57  ;;  %v4183_v63 = vadd.f32 %v4182_v31, %v4066_v0 }
 0x930   :  { %v4227_v9 = vadd.f32 %v10037_v51, %v4226_v46 }
 0x931   :  { %v10039_v53 = vpop.eup %10038 }
 0x932   :  { %v4300_v17 = vmul.f32 %v10039_v53, %v4295_v41  ;;  %vm4305_vm2 = vweird.f32 %v10039_v53  ;;  %v4231_v58 = vsel %vm4230_vm4, %v10037_v51, %v4227_v9  ;;  %v4175_v51 = vadd.f32 %v4174_v36, %v13559_v42 }
 0x933   :  { %v4071_v23 = vpop.f32.mrf.mxu2  ;;  %vm4306_vm15 = vmor %vm4304_vm5, %vm4305_vm2  ;;  %v4236_v49 = vsel %vm4233_vm3, %v4235_v47, %v4231_v58 }
 0x934   :  { %v4301_v26 = vsub.f32 1.0, %v4300_v17  ;;  %v9094_v17 = vmul.f32 -1.442695, %v4170_v54  ;;  %v9099_v54 = vmul.f32 -1.442695, %v4183_v63 }
 0x935   :  { %v4184_v29 = vpop.f32.mrf.mxu0 }
 0x936   :  { %v4302_v56 = vmul.f32 %v10039_v53, %v4301_v26  ;;  %v4185_v9 = vadd.f32 %v4184_v29, %v4068_v45 }
 0x938   :  { %v4303_v6 = vadd.f32 %v10039_v53, %v4302_v56 }
 0x93a   :  { %v4307_v21 = vsel %vm4306_vm15, %v10039_v53, %v4303_v6  ;;  %v9095_v53 = vmul.f32 -1.442695, %v13561_v4  ;;  %v4180_v6 = vadd.f32 %v4179_v14, %v13563_v30  ;;  %v9100_v4 = vmul.f32 -1.442695, %v4185_v9 }
 0x93b   :  { %v13565_v27 = vpop.f32.mrf.mxu2 }
 0x93c   :  { %v9098_v10 = vmul.f32 -1.442695, %v4180_v6 }
 0x93d   :  { %v4187_v62 = vpop.f32.mrf.mxu0 }
 0x93e   :  { %v4188_v37 = vadd.f32 %v4187_v62, %v4071_v23  ;;  %v4312_v23 = vsel %vm4309_vm14, %v4311_v50, %v4307_v21 }
 0x93f   :  { %v4439_v8 = vmul.f32 %v4312_v23, %v13193_v52 }
 0x940   :  { %10040 = vtanh.f32 %v4188_v37  ;;  %v9096_v37 = vmul.f32 -1.442695, %v4175_v51 }
 0x941   :  { %10042 = vpow2.f32 %v9094_v17 }
 0x942   :  { %10044 = vpow2.f32 %v9095_v53 }
 0x943   :  { %v13567_v25 = vpop.f32.mrf.mxu2  ;;  %10046 = vpow2.f32 %v9096_v37 }
 0x945   :  { %v13569_v26 = vpop.f32.mrf.mxu0 }
 0x946   :  { %v10041_v41 = vpop.eup %10040 }
 0x947   :  { %v4443_v57 = vmul.f32 %v10041_v41, %v4236_v49  ;;  %v10043_v62 = vpop.eup %10042 }
 0x948   :  { %v13581_v52 = vadd.f32 1.0, %v10043_v62  ;;  %v10045_v2 = vpop.eup %10044 }
 0x949   :  { %v13572_v40 = vadd.f32 %v4443_v57, %v4439_v8  ;;  %v13586_v36 = vadd.f32 1.0, %v10045_v2  ;;  %v10047_v30 = vpop.eup %10046 }
 0x94a   :  { %10048 = vrcp.f32 %v13581_v52  ;;  %v13591_v31 = vadd.f32 1.0, %v10047_v30  ;;  %v4247_v30 = vand.u32 2147483647, %v13581_v52  ;;  %vm4243_vm8 = vweird.f32 %v13581_v52 }
 0x94b   :  { %v13576_v56 = vpop.f32.mrf.mxu2  ;;  %10050 = vpow2.f32 %v9098_v10  ;;  %vm4258_vm2 = vweird.f32 %v13586_v36 }
 0x94c   :  { %10052 = vpow2.f32 %v9099_v54  ;;  %vm4248_vm7 = vcmp.eq.f32.partialorder %v4247_v30, 8.507059e+37  ;;  %vm4273_vm15 = vweird.f32 %v13591_v31 }
 0x94d   :  { %v13578_v46 = vpop.f32.mrf.mxu0  ;;  %10054 = vpow2.f32 %v9100_v4 }
 0x94e   :  { %10056 = vrcp.f32 %v13586_v36 }
 0x94f   :  { %10058 = vrcp.f32 %v13591_v31 }
 0x950   :  { %v13588_v0 = vpop.eup %10048 }
 0x951   :  { %v10051_v14 = vpop.eup %10050  ;;  %v4239_v50 = vmul.f32 %v13588_v0, %v13581_v52  ;;  %vm4244_vm13 = vweird.f32 %v13588_v0 }
 0x952   :  { %v10053_v45 = vpop.eup %10052  ;;  %v13595_v58 = vadd.f32 1.0, %v10051_v14  ;;  %v4249_v14 = vand.u32 2147483648, %v13581_v52  ;;  %vm13633_vm10 = vmor %vm4243_vm8, %vm4244_vm13 }
 0x953   :  { %v4081_v11 = vpop.f32.mrf.mxu2  ;;  %v10055_v21 = vpop.eup %10054  ;;  %v13597_v17 = vadd.f32 1.0, %v10053_v45  ;;  %v4240_v49 = vsub.f32 1.0, %v4239_v50  ;;  %v46_v50 = vld [vmem:[%s17003_s5] sm:$0xf] }
 0x954   :  { %v13599_v47 = vpop.eup %10056  ;;  %v13602_v23 = vadd.f32 1.0, %v10055_v21  ;;  %10060 = vrcp.f32 %v13595_v58  ;;  %4537 = vperm.xlu0 %9581, %v46_v50   ;;  %vm4319_vm14 = vweird.f32 %v13595_v58 }
 0x955   :  { %v13584_v42 = vpop.f32.mrf.mxu0  ;;  %v4254_v57 = vmul.f32 %v13599_v47, %v13586_v36  ;;  %10062 = vrcp.f32 %v13597_v17  ;;  %v4241_v51 = vmul.f32 %v13588_v0, %v4240_v49  ;;  %v13610_v6 = vpop.eup %10058  ;;  %vm4259_vm5 = vweird.f32 %v13599_v47 }
 0x956   :  { %10064 = vrcp.f32 %v13602_v23  ;;  %v4269_v2 = vmul.f32 %v13610_v6, %v13591_v31  ;;  %vm13660_vm12 = vmor %vm4258_vm2, %vm4259_vm5  ;;  %vm4274_vm4 = vweird.f32 %v13610_v6  ;;  %vm4334_vm2 = vweird.f32 %v13597_v17 }
 0x957   :  { %v4255_v37 = vsub.f32 1.0, %v4254_v57  ;;  %v4242_v4 = vadd.f32 %v13588_v0, %v4241_v51 }
 0x959   :  { %v4256_v21 = vmul.f32 %v13599_v47, %v4255_v37  ;;  %v4246_v51 = vsel %vm13633_vm10, %v13588_v0, %v4242_v4  ;;  %v4262_v37 = vand.u32 2147483647, %v13586_v36  ;;  %v4190_v0 = vadd.f32 %v13569_v26, %v13565_v27  ;;  %vm13706_vm10 = vmor %vm4273_vm15, %vm4274_vm4 }
 0x95a   :  { %v13612_v10 = vpop.eup %10060  ;;  %v4277_v27 = vand.u32 2147483647, %v13591_v31  ;;  %v4279_v26 = vand.u32 2147483648, %v13591_v31  ;;  %v4338_v31 = vand.u32 2147483647, %v13597_v17 }
 0x95b   :  { %v4083_v41 = vpop.f32.mrf.mxu2  ;;  %v13614_v54 = vpop.eup %10062  ;;  %v13646_v38 = vadd.f32 %v13599_v47, %v4256_v21  ;;  %vm13680_vm9 = vcmp.eq.f32.partialorder %v4262_v37, 8.507059e+37  ;;  %vm4320_vm3 = vweird.f32 %v13612_v10 }
 0x95c   :  { %vm4335_vm13 = vweird.f32 %v13614_v54  ;;  %vm4278_vm4 = vcmp.eq.f32.partialorder %v4277_v27, 8.507059e+37 }
 0x95d   :  { %v4197_v29 = vpop.f32.mrf.mxu0  ;;  %vm13723_vm5 = vmor %vm4334_vm2, %vm4335_vm13 }
 0x95e   :  { %v4198_v8 = vadd.f32 %v4197_v29, %v4081_v11  ;;  %v13620_v11 = vpop.eup %10064  ;;  %v4315_v29 = vmul.f32 %v13612_v10, %v13595_v58 }
 0x95f   :  { %v4345_v52 = vmul.f32 %v13620_v11, %v13602_v23  ;;  %vm4350_vm8 = vweird.f32 %v13620_v11 }
 0x960   :  { %v9101_v63 = vmul.f32 -1.442695, %v4198_v8  ;;  %v4264_v8 = vand.u32 2147483648, %v13586_v36  ;;  %v4316_v5 = vsub.f32 1.0, %v4315_v29  ;;  %v18_v36 = vstv %s17004_s6 }
 0x961   :  { %19 = vst [vmem:[#allocation3] sm:$0x1] %v18_v36 }
 0x962   :  { %v13653_v30 = vor.u32 1.1754944e-38, %v4264_v8  ;;  %v4317_v49 = vmul.f32 %v13612_v10, %v4316_v5  ;;  %v4195_v5 = vadd.f32 %v13584_v42, %v13576_v56 }
 0x963   :  { %v4086_v45 = vpop.f32.mrf.mxu2 }
 0x964   :  { %v4318_v42 = vadd.f32 %v13612_v10, %v4317_v49 }
 0x965   :  { %v4199_v53 = vpop.f32.mrf.mxu0 }
 0x966   :  { %v4200_v62 = vadd.f32 %v4199_v53, %v4083_v41  ;;  %v4330_v41 = vmul.f32 %v13614_v54, %v13597_v17  ;;  %v4270_v53 = vsub.f32 1.0, %v4269_v2 }
 0x968   :  { %v9102_v9 = vmul.f32 -1.442695, %v4200_v62  ;;  %v4331_v3 = vsub.f32 1.0, %v4330_v41  ;;  %v4271_v29 = vmul.f32 %v13610_v6, %v4270_v53 }
 0x96a   :  { %10066 = vpow2.f32 %v9102_v9  ;;  %v4332_v8 = vmul.f32 %v13614_v54, %v4331_v3  ;;  %v4325_v3 = vand.u32 2147483648, %v13595_v58 }
 0x96b   :  { %10068 = vpow2.f32 %v9101_v63  ;;  %v4250_v63 = vor.u32 1.1754944e-38, %v4249_v14  ;;  %v4346_v14 = vsub.f32 1.0, %v4345_v52  ;;  %v4088_v53 = vpop.f32.mrf.mxu2  ;;  %v4272_v52 = vadd.f32 %v13610_v6, %v4271_v29 }
 0x96c   :  { %v4333_v37 = vadd.f32 %v13614_v54, %v4332_v8  ;;  %v4355_v29 = vand.u32 2147483648, %v13602_v23  ;;  %v47_v8 = vld [vmem:[#allocation3] sm:$0x1] }
 0x96d   :  { %v4202_v57 = vpop.f32.mrf.mxu0  ;;  %v13651_v4 = vsel %vm4248_vm7, %v4250_v63, %v4246_v51  ;;  %vm13713_vm7 = vmor %vm4319_vm14, %vm4320_vm3  ;;  %v4276_v36 = vsel %vm13706_vm10, %v13610_v6, %v4272_v52  ;;  %4550 = vperm.xlu0 %9581, %v47_v8   ;;  %vm4339_vm3 = vcmp.eq.f32.partialorder %v4338_v31, 8.507059e+37 }
 0x96e   :  { %v4203_v62 = vadd.f32 %v4202_v57, %v4086_v45  ;;  %v4193_v45 = vadd.f32 %v13578_v46, %v13567_v25  ;;  %v4261_v25 = vsel %vm13660_vm12, %v13599_v47, %v13646_v38  ;;  %v4347_v47 = vmul.f32 %v13620_v11, %v4346_v14 }
 0x96f   :  { %vm4349_vm12 = vweird.f32 %v13602_v23  ;;  %v4266_v52 = vsel %vm13680_vm9, %v13653_v30, %v4261_v25 }
 0x970   :  { %v10067_v9 = vpop.eup %10066  ;;  %v9103_v2 = vmul.f32 -1.442695, %v4203_v62  ;;  %v4323_v62 = vand.u32 2147483647, %v13595_v58  ;;  %v4322_v58 = vsel %vm13713_vm7, %v13612_v10, %v4318_v42  ;;  %vm13739_vm15 = vmor %vm4349_vm12, %vm4350_vm8  ;;  %v4337_v10 = vsel %vm13723_vm5, %v13614_v54, %v4333_v37 }
 0x971   :  { %v10069_v50 = vpop.eup %10068  ;;  %v13667_v41 = vadd.f32 1.0, %v10067_v9 }
 0x972   :  { %10070 = vpow2.f32 %v9103_v2  ;;  %v13674_v46 = vadd.f32 1.0, %v10069_v50  ;;  %v4340_v2 = vand.u32 2147483648, %v13597_v17  ;;  %v4353_v17 = vand.u32 2147483647, %v13602_v23 }
 0x973   :  { %10072 = vtanh.f32 %v4190_v0  ;;  %v4348_v0 = vadd.f32 %v13620_v11, %v4347_v47  ;;  %v4280_v47 = vor.u32 1.1754944e-38, %v4279_v26  ;;  %vm4324_vm14 = vcmp.eq.f32.partialorder %v4323_v62, 8.507059e+37 }
 0x974   :  { %10074 = vtanh.f32 %v4193_v45  ;;  %v4341_v23 = vor.u32 1.1754944e-38, %v4340_v2  ;;  %vm4354_vm13 = vcmp.eq.f32.partialorder %v4353_v17, 8.507059e+37  ;;  %vm4399_vm10 = vweird.f32 %v13667_v41 }
 0x975   :  { %v4204_v38 = vpop.f32.mrf.mxu0  ;;  %10076 = vrcp.f32 %v13667_v41  ;;  %v4281_v54 = vsel %vm4278_vm4, %v4280_v47, %v4276_v36 }
 0x976   :  { %v4205_v51 = vadd.f32 %v4204_v38, %v4088_v53  ;;  %10078 = vrcp.f32 %v13674_v46  ;;  %v4326_v53 = vor.u32 1.1754944e-38, %v4325_v3 }
 0x977   :  { %10080 = vtanh.f32 %v4195_v5 }
 0x978   :  { %v10071_v56 = vpop.eup %10070  ;;  %v9104_v63 = vmul.f32 -1.442695, %v4205_v51  ;;  %v4352_v51 = vsel %vm13739_vm15, %v13620_v11, %v4348_v0  ;;  %v4327_v42 = vsel %vm4324_vm14, %v4326_v53, %v4322_v58  ;;  %vm4384_vm15 = vweird.f32 %v13674_v46 }
 0x979   :  { %v13698_v9 = vadd.f32 1.0, %v10071_v56  ;;  %v10073_v14 = vpop.eup %10072  ;;  %v4356_v56 = vor.u32 1.1754944e-38, %v4355_v29  ;;  %v4440_v2 = vmul.f32 %v4327_v42, %v13392_v19 }
 0x97a   :  { %10082 = vpow2.f32 %v9104_v63  ;;  %v10075_v21 = vpop.eup %10074  ;;  %v4444_v26 = vmul.f32 %v10073_v14, %v13651_v4  ;;  %v4342_v63 = vsel %vm4339_vm3, %v4341_v23, %v4337_v10 }
 0x97b   :  { %10084 = vrcp.f32 %v13698_v9  ;;  %v13735_v5 = vpop.eup %10076  ;;  %v4445_v57 = vmul.f32 %v10075_v21, %v4266_v52  ;;  %v4357_v30 = vsel %vm4354_vm13, %v4356_v56, %v4352_v51  ;;  %v4441_v45 = vmul.f32 %v4342_v63, %v13398_v22 }
 0x97c   :  { %v13746_v6 = vpop.eup %10078  ;;  %v4395_v62 = vmul.f32 %v13735_v5, %v13667_v41  ;;  %v4448_v4 = vadd.f32 %v4444_v26, %v4440_v2  ;;  %v4442_v14 = vmul.f32 %v4357_v30, %v13401_v34  ;;  %v4420_v38 = vand.u32 2147483648, %v13698_v9 }
 0x97d   :  { %v10081_v3 = vpop.eup %10080  ;;  %v4380_v25 = vmul.f32 %v13746_v6, %v13674_v46  ;;  %v4449_v49 = vadd.f32 %v4445_v57, %v4441_v45  ;;  %vm4385_vm8 = vweird.f32 %v13746_v6  ;;  %vm4400_vm7 = vweird.f32 %v13735_v5 }
 0x97e   :  { %v4446_v50 = vmul.f32 %v10081_v3, %v4281_v54  ;;  %v4396_v29 = vsub.f32 1.0, %v4395_v62  ;;  %vm4414_vm2 = vweird.f32 %v13698_v9  ;;  %v4418_v10 = vand.u32 2147483647, %v13698_v9  ;;  %vm13788_vm4 = vmor %vm4399_vm10, %vm4400_vm7 }
 0x97f   :  { %v4381_v21 = vsub.f32 1.0, %v4380_v25  ;;  %v4403_v3 = vand.u32 2147483647, %v13667_v41  ;;  %v4405_v56 = vand.u32 2147483648, %v13667_v41  ;;  %v4421_v63 = vor.u32 1.1754944e-38, %v4420_v38  ;;  %vm13794_vm13 = vmor %vm4384_vm15, %vm4385_vm8 }
 0x980   :  { %v10083_v27 = vpop.eup %10082  ;;  %v4450_v58 = vadd.f32 %v4446_v50, %v4442_v14  ;;  %v4397_v17 = vmul.f32 %v13735_v5, %v4396_v29  ;;  %v4388_v62 = vand.u32 2147483647, %v13674_v46  ;;  %v4390_v57 = vand.u32 2147483648, %v13674_v46 }
 0x981   :  { %v10085_v37 = vpop.eup %10084  ;;  %v4378_v11 = vadd.f32 1.0, %v10083_v27  ;;  %v4382_v19 = vmul.f32 %v13746_v6, %v4381_v21  ;;  %vm4419_vm14 = vcmp.eq.f32.partialorder %v4418_v10, 8.507059e+37  ;;  %vm4404_vm8 = vcmp.eq.f32.partialorder %v4403_v3, 8.507059e+37 }
 0x982   :  { %v4410_v0 = vmul.f32 %v10085_v37, %v13698_v9  ;;  %vm4415_vm9 = vweird.f32 %v10085_v37  ;;  %v4398_v47 = vadd.f32 %v13735_v5, %v4397_v17  ;;  %v4391_v14 = vor.u32 1.1754944e-38, %v4390_v57  ;;  %v4464_v17 = vld [vmem:[%s16999_s3] sm:$0x7] }
 0x983   :  { %10086 = vrcp.f32 %v4378_v11  ;;  %vm13772_vm5 = vmor %vm4414_vm2, %vm4415_vm9  ;;  %v4435_v52 = vand.u32 2147483648, %v4378_v11  ;;  %v4383_v51 = vadd.f32 %v13746_v6, %v4382_v19  ;;  %v4433_v9 = vand.u32 2147483647, %v4378_v11  ;;  %v4488_v19 = vld [vmem:[%s16997_s0] sm:$0xf] }
 0x984   :  { %v4411_v31 = vsub.f32 1.0, %v4410_v0  ;;  %10088 = vtanh.f32 %v4448_v4  ;;  %vm4429_vm3 = vweird.f32 %v4378_v11  ;;  %v4402_v46 = vsel %vm13788_vm4, %v13735_v5, %v4398_v47  ;;  %v9110_v47 = vld [vmem:[%s16997_s0 + $0xc] sm:$0xf] }
 0x985   :  { %10090 = vtanh.f32 %v4449_v49  ;;  %v4436_v50 = vor.u32 1.1754944e-38, %v4435_v52  ;;  %v4406_v0 = vor.u32 1.1754944e-38, %v4405_v56  ;;  %vm4434_vm10 = vcmp.eq.f32.partialorder %v4433_v9, 8.507059e+37  ;;  %v9113_v9 = vld [vmem:[%s16997_s0 + $0x18] sm:$0xf] }
 0x986   :  { %v4412_v36 = vmul.f32 %v10085_v37, %v4411_v31  ;;  %10092 = vtanh.f32 %v4450_v58  ;;  %vm4389_vm7 = vcmp.eq.f32.partialorder %v4388_v62, 8.507059e+37  ;;  %v9114_v62 = vld [vmem:[%s16997_s0 + $0x1c] sm:$0xf] }
 0x987   :  { %10094 = vtanh.f32 %v13572_v40  ;;  %v4407_v29 = vsel %vm4404_vm8, %v4406_v0, %v4402_v46 }
 0x988   :  { %v4413_v22 = vadd.f32 %v10085_v37, %v4412_v36 }
 0x989   :  { %v10087_v8 = vpop.eup %10086 }
 0x98a   :  { %v4425_v53 = vmul.f32 %v10087_v8, %v4378_v11  ;;  %v10089_v42 = vpop.eup %10088  ;;  %v4417_v54 = vsel %vm13772_vm5, %v10085_v37, %v4413_v22  ;;  %vm4430_vm12 = vweird.f32 %v10087_v8  ;;  %v4387_v11 = vsel %vm13794_vm13, %v13746_v6, %v4383_v51  ;;  %v9111_v51 = vld [vmem:[%s16997_s0 + $0x10] sm:$0xf] }
 0x98b   :  { %v10091_v26 = vpop.eup %10090  ;;  %v4422_v41 = vsel %vm4419_vm14, %v4421_v63, %v4417_v54  ;;  %vm4431_vm9 = vmor %vm4429_vm3, %vm4430_vm12  ;;  %v4392_v40 = vsel %vm4389_vm7, %v4391_v14, %v4387_v11  ;;  %v13812_v21 = vmul.f32 %v10089_v42, %v4407_v29  ;;  %v9112_v42 = vld [vmem:[%s16997_s0 + $0x14] sm:$0xf]  ;;  %v4589_v14 = vlaneseq }
 0x98c   :  { %v4426_v34 = vsub.f32 1.0, %v4425_v53  ;;  %v10093_v37 = vpop.eup %10092  ;;  %v13806_v31 = vmul.f32 %v10091_v26, %v4422_v41  ;;  %v9108_v53 = vld [vmem:[%s16997_s0 + $0x4] sm:$0xf]  ;;  %vm17038_vm13 = vcmask 1046528  }
 0x98d   :  { %v10095_v58 = vpop.eup %10094 }
 0x98e   :  { %v4427_v27 = vmul.f32 %v10087_v8, %v4426_v34  ;;  %v13814_v36 = vmul.f32 %v10095_v58, %v4392_v40 }
 0x990   :  { %v4428_v25 = vadd.f32 %v10087_v8, %v4427_v27  ;;  %v4465_v6 = vpack.c.bf16 %v13812_v21, %v13814_v36 }
 0x992   :  { %v4432_v45 = vsel %vm4431_vm9, %v10087_v8, %v4428_v25  ;;  %v13823_v8 = vadd.s32 4294967295, %v13464_v61  ;;  %v9109_v61 = vld [vmem:[%s16997_s0 + $0x8] sm:$0xf] }
 0x993   :  { %v4437_v4 = vsel %vm4434_vm10, %v4436_v50, %v4432_v45 }
 0x994   :  { %v13808_v5 = vmul.f32 %v10093_v37, %v4437_v4  ;;  %vm4487_vm2 = vcmp.eq.s32.totalorder %v13823_v8, 0  ;;  %vm4493_vm5 = vcmp.eq.s32.totalorder %v13823_v8, 1  ;;  %vm4499_vm12 = vcmp.eq.s32.totalorder %v13823_v8, 2 }
 0x995   :  { %v4491_v22 = vsel %vm4487_vm2, %v4488_v19, 0.0  ;;  %v4497_v38 = vsel %vm4493_vm5, %v9108_v53, 0.0  ;;  %v4503_v10 = vsel %vm4499_vm12, %v9109_v61, 0.0  ;;  %vm4511_vm15 = vcmp.eq.s32.totalorder %v13823_v8, 4 }
 0x996   :  { %v4466_v49 = vpack.c.bf16 %v13808_v5, %v13806_v31  ;;  %v4498_v34 = vadd.f32 %v4497_v38, %v4491_v22  ;;  %v4515_v56 = vsel %vm4511_vm15, %v9111_v51, 0.0  ;;  %vm4517_vm4 = vcmp.eq.s32.totalorder %v13823_v8, 5 }
 0x997   :  { %v4521_v27 = vsel %vm4517_vm4, %v9112_v42, 0.0  ;;  %vm4523_vm14 = vcmp.eq.s32.totalorder %v13823_v8, 6  ;;  %vm4529_vm3 = vcmp.eq.s32.totalorder %v13823_v8, 7  ;;  %vm4727_vm5 = vcmp.ge.s32.totalorder %v13823_v8, 1 }
 0x998   :  { %4476 = vmatpush.bf16.msrb.mxu1 %v4466_v49  ;;  %v4504_v23 = vadd.f32 %v4503_v10, %v4498_v34  ;;  %v4527_v63 = vsel %vm4523_vm14, %v9113_v9, 0.0  ;;  %v4533_v30 = vsel %vm4529_vm3, %v9114_v62, 0.0  ;;  %v4590_v49 = vshrl.u32 %v4589_v14, 7  ;;  %vm13903_vm12 = vmpackc.low %vm4727_vm5, %vm4727_vm5 }
 0x99a   :  { %vm4591_vm9 = vcmp.ge.s32.totalorder %v4590_v49, %v13823_v8 }
 0x99c   :  { %4477 = vmatpush.bf16.msrb.mxu1 %v4465_v6 }
 0x99f   :  { %9105 = vmatmul.msk.bf16.vlgmr.msrb.gmra.mxu1 %vm134_vm0, %v4464_v17  ;;  %vm4505_vm0 = vcmp.eq.s32.totalorder %v13823_v8, 3  ;;  %v9556_v8 = vld [vmem:[%s17005_s7 + $0x8] sm:$0xff] }
 0x9a0   :  { %v4509_v52 = vsel %vm4505_vm0, %v9110_v47, 0.0  ;;  %vm4808_vm0 = vcmask 326656  }
 0x9a1   :  { %v4510_v3 = vadd.f32 %v4509_v52, %v4504_v23 }
 0x9a3   :  { %v4516_v54 = vadd.f32 %v4515_v56, %v4510_v3 }
 0x9a5   :  { %v4522_v26 = vadd.f32 %v4521_v27, %v4516_v54 }
 0x9a7   :  { %v4528_v57 = vadd.f32 %v4527_v63, %v4522_v26 }
 0x9a9   :  { %v4534_v37 = vadd.f32 %v4533_v30, %v4528_v57 }
 0x9ab   :  { %v13866_v56 = vsel %vm51_vm6, %v4534_v37, 0.0 }
 0x9c6   :  { %v4538_v25 = vpop.permute.xlu0 %4537 }
 0x9c7   :  { %v4540_v2 = vmul.f32 %v4538_v25, %v4534_v37 }
 0x9c9   :  { %v4541_v46 = vsel %vm51_vm6, %v4540_v2, 0.0 }
 0x9ca   :  { %v4542_v41 = vrot.slane %v4541_v46, 4 }
 0x9cc   :  { %v4543_v50 = vadd.f32 %v4542_v41, %v4541_v46 }
 0x9ce   :  { %v4544_v0 = vrot.slane %v4543_v50, 2 }
 0x9d0   :  { %v4545_v45 = vadd.f32 %v4544_v0, %v4543_v50 }
 0x9d2   :  { %v4546_v11 = vrot.slane %v4545_v45, 1 }
 0x9d4   :  { %v4547_v29 = vadd.f32 %v4546_v11, %v4545_v45 }
 0x9df   :  { %v4551_v4 = vpop.permute.xlu0 %4550 }
 0x9e0   :  { %v4553_v40 = vperm.slane %v4551_v4, 0 }
 0x9e2   :  { %v4554_v19 = vadd.f32 %v4553_v40, %v4547_v29 }
 0xa1c   :  { %v4479_v58 = vpop.f32.mrf.mxu1 }
 0xa1d   :  { %v4483_v6 = vadd.f32 %v4479_v58, %v11648_v1  ;;  %v4574_v17 = vrot.slane %v4479_v58, 5 }
 0xa1f   :  { %9106 = vst [vmem:[%s17002_s11 + $0x1c] sm:$0xf] %v4483_v6  ;;  %v4587_v53 = vsel %vm17038_vm13, %v13556_v43, %v4574_v17  ;;  %v4757_v43 = vpack.c.bf16 %v13866_v56, %v13866_v56 }
 0xa20   :  { %v4588_v22 = vadd.f32 %v4587_v53, %v4554_v19 }
 0xa21   :  { %v4840_v54 = vsel %vm51_vm6, %v4757_v43, 0 }
 0xa22   :  { %v4592_v38 = vsel %vm4591_vm9, -1e+10, %v4588_v22  ;;  %4847 = vmatpush.bf16.msrb.mxu3 %v4840_v54  ;;  %5013 = vmatpush.bf16.msra.mxu1 %v4840_v54 }
 0xa23   :  { %v4593_v61 = vrot.slane %v4592_v38, 4 }
 0xa24   :  { %v4481_v34 = vpop.f32.mrf.mxu1 }
 0xa25   :  { %v4594_v10 = vmax.f32 %v4592_v38, %v4593_v61 }
 0xa27   :  { %v4595_v47 = vrot.slane %v4594_v10, 2 }
 0xa29   :  { %v4596_v23 = vmax.f32 %v4594_v10, %v4595_v47 }
 0xa2b   :  { %v4597_v52 = vrot.slane %v4596_v23, 1 }
 0xa2d   :  { %v4598_v1 = vmax.f32 %v4596_v23, %v4597_v52 }
 0xa2f   :  { %v4599_v51 = vsub.f32 %v4592_v38, %v4598_v1 }
 0xa31   :  { %v4600_v3 = vmul.f32 1.442695, %v4599_v51 }
 0xa33   :  { %10096 = vpow2.f32 %v4600_v3 }
 0xa39   :  { %v10097_v42 = vpop.eup %10096 }
 0xa3a   :  { %v4602_v27 = vrot.slane %v10097_v42, 4 }
 0xa3c   :  { %v4603_v9 = vadd.f32 %v10097_v42, %v4602_v27 }
 0xa3e   :  { %v4604_v26 = vrot.slane %v4603_v9, 2 }
 0xa40   :  { %v4605_v63 = vadd.f32 %v4604_v26, %v4603_v9  ;;  %v17275_v26 = vld [vmem:[#allocation10_spill] sm:$0xff] }
 0xa42   :  { %v4606_v62 = vrot.slane %v4605_v63, 1 }
 0xa44   :  { %v4607_v57 = vadd.f32 %v4606_v62, %v4605_v63  ;;  %v17276_v62 = vld [vmem:[#allocation7_spill] sm:$0xff] }
 0xa46   :  { %10098 = vrcp.f32 %v4607_v57  ;;  %v4619_v37 = vand.u32 2147483648, %v4607_v57  ;;  %v4617_v41 = vand.u32 2147483647, %v4607_v57  ;;  %vm4613_vm8 = vweird.f32 %v4607_v57 }
 0xa48   :  { %v4620_v0 = vor.u32 1.1754944e-38, %v4619_v37  ;;  %vm4618_vm2 = vcmp.eq.f32.partialorder %v4617_v41, 8.507059e+37  ;;  %v17278_v37 = vld [vmem:[#allocation13_spill] sm:$0xff] }
 0xa49   :  { %v17279_v41 = vld [vmem:[#allocation9_spill] sm:$0xff] }
 0xa4c   :  { %v10099_v30 = vpop.eup %10098 }
 0xa4d   :  { %v4609_v25 = vmul.f32 %v10099_v30, %v4607_v57  ;;  %vm4614_vm10 = vweird.f32 %v10099_v30 }
 0xa4e   :  { %vm4615_vm7 = vmor %vm4613_vm8, %vm4614_vm10 }
 0xa4f   :  { %v4610_v2 = vsub.f32 1.0, %v4609_v25 }
 0xa51   :  { %v4611_v46 = vmul.f32 %v10099_v30, %v4610_v2 }
 0xa53   :  { %v4612_v50 = vadd.f32 %v10099_v30, %v4611_v46 }
 0xa55   :  { %v4616_v45 = vsel %vm4615_vm7, %v10099_v30, %v4612_v50  ;;  %v17277_v30 = vld [vmem:[#allocation6_spill] sm:$0xff] }
 0xa56   :  { %v4621_v11 = vsel %vm4618_vm2, %v4620_v0, %v4616_v45  ;;  %v17280_v0 = vld [vmem:[#allocation8_spill] sm:$0xff] }
 0xa57   :  { %v4622_v4 = vmul.f32 %v10097_v42, %v4621_v11 }
 0xa59   :  { %v4627_v14 = vperm.slane %v4622_v4, 0  ;;  %v4640_v29 = vperm.slane %v4622_v4, 1  ;;  %v4653_v40 = vperm.slane %v4622_v4, 2  ;;  %v4666_v49 = vperm.slane %v4622_v4, 3 }
 0xa5a   :  { %v4679_v53 = vperm.slane %v4622_v4, 4  ;;  %v4692_v10 = vperm.slane %v4622_v4, 5  ;;  %v4705_v47 = vperm.slane %v4622_v4, 6  ;;  %v4718_v23 = vperm.slane %v4622_v4, 7 }
 0xa5b   :  { %v4630_v58 = vmul.f32 %v4627_v14, %v11193_v18  ;;  %v4631_v6 = vmul.f32 %v4627_v14, %v11195_v7  ;;  %v4643_v17 = vmul.f32 %v4640_v29, %v11587_v59  ;;  %v4644_v19 = vmul.f32 %v4640_v29, %v11589_v12 }
 0xa5c   :  { %v4656_v61 = vmul.f32 %v4653_v40, %v11958_v15  ;;  %v4657_v34 = vmul.f32 %v4653_v40, %v11960_v32  ;;  %v4669_v18 = vmul.f32 %v4666_v49, %v12334_v28  ;;  %v4670_v7 = vmul.f32 %v4666_v49, %v12336_v20 }
 0xa5d   :  { %v4647_v22 = vadd.f32 %v4643_v17, %v4630_v58  ;;  %v4648_v38 = vadd.f32 %v4644_v19, %v4631_v6  ;;  %v4628_v59 = vmul.f32 %v4627_v14, %v11201_v13  ;;  %v4629_v12 = vmul.f32 %v4627_v14, %v11199_v24  ;;  %v17282_v6 = vld [vmem:[#allocation11_spill] sm:$0xff] }
 0xa5e   :  { %v4641_v51 = vmul.f32 %v4640_v29, %v11595_v48  ;;  %v4642_v15 = vmul.f32 %v4640_v29, %v11593_v44  ;;  %v4682_v43 = vmul.f32 %v4679_v53, %v12710_v33  ;;  %v4683_v42 = vmul.f32 %v4679_v53, %v12712_v39 }
 0xa5f   :  { %v4660_v52 = vadd.f32 %v4656_v61, %v4647_v22  ;;  %v4661_v1 = vadd.f32 %v4657_v34, %v4648_v38  ;;  %v4654_v20 = vmul.f32 %v4653_v40, %v11968_v55  ;;  %v4655_v27 = vmul.f32 %v4653_v40, %v11964_v35 }
 0xa60   :  { %v4645_v54 = vadd.f32 %v4641_v51, %v4628_v59  ;;  %v4646_v28 = vadd.f32 %v4642_v15, %v4629_v12  ;;  %v4695_v24 = vmul.f32 %v4692_v10, %v13089_v60  ;;  %v4696_v48 = vmul.f32 %v4692_v10, %v17275_v26  ;;  %v14007_v26 = vld [vmem:[%s17006_s8 + $0x30] sm:$0xff] }
 0xa61   :  { %v4673_v32 = vadd.f32 %v4669_v18, %v4660_v52  ;;  %v4674_v3 = vadd.f32 %v4670_v7, %v4661_v1  ;;  %v4667_v57 = vmul.f32 %v4666_v49, %v17276_v62  ;;  %v4668_v33 = vmul.f32 %v4666_v49, %v17277_v30  ;;  %v17281_v49 = vld [vmem:[#allocation12_spill] sm:$0xff] }
 0xa62   :  { %v4658_v63 = vadd.f32 %v4654_v20, %v4645_v54  ;;  %v4659_v44 = vadd.f32 %v4655_v27, %v4646_v28  ;;  %v4708_v2 = vmul.f32 %v4705_v47, %v13468_v16  ;;  %v4709_v55 = vmul.f32 %v4705_v47, %v17278_v37  ;;  %v9558_v54 = vld [vmem:[%s17005_s7 + $0x18] sm:$0xff]  ;;  %v9559_v20 = vld [vmem:[%s17005_s7 + $0x20] sm:$0xff] }
 0xa63   :  { %v4686_v9 = vadd.f32 %v4682_v43, %v4673_v32  ;;  %v4687_v13 = vadd.f32 %v4683_v42, %v4674_v3  ;;  %v4680_v50 = vmul.f32 %v4679_v53, %v17279_v41  ;;  %v4681_v60 = vmul.f32 %v4679_v53, %v17280_v0  ;;  %v9557_v43 = vld [vmem:[%s17005_s7 + $0x10] sm:$0xff]  ;;  %v13974_v28 = vld [vmem:[%s17006_s8 + $0x18] sm:$0xff]  ;;  %v13985_v27 = vld [vmem:[%s17006_s8 + $0x20] sm:$0xff] }
 0xa64   :  { %v4671_v46 = vadd.f32 %v4667_v57, %v4658_v63  ;;  %v4672_v35 = vadd.f32 %v4668_v33, %v4659_v44  ;;  %v4721_v4 = vmul.f32 %v4718_v23, %v13806_v31  ;;  %v4722_v14 = vmul.f32 %v4718_v23, %v13808_v5  ;;  %v17285_v31 = vld [vmem:[#allocation15_spill] sm:$0xff]  ;;  %v17286_v5 = vld [vmem:[#allocation14_spill] sm:$0xff]  ;;  %v9563_v44 = vld [vmem:[%s17005_s7 + $0x40] sm:$0xff] }
 0xa65   :  { %v4699_v25 = vadd.f32 %v4695_v24, %v4686_v9  ;;  %v4700_v39 = vadd.f32 %v4696_v48, %v4687_v13  ;;  %v4693_v58 = vmul.f32 %v4692_v10, %v17281_v49  ;;  %v4694_v16 = vmul.f32 %v4692_v10, %v17282_v6  ;;  %v13963_v42 = vld [vmem:[%s17006_s8 + $0x10] sm:$0xff]  ;;  %v9560_v9 = vld [vmem:[%s17005_s7 + $0x28] sm:$0xff]  ;;  %v9562_v48 = vld [vmem:[%s17005_s7 + $0x38] sm:$0xff] }
 0xa66   :  { %v4684_v29 = vadd.f32 %v4680_v50, %v4671_v46  ;;  %v4685_v40 = vadd.f32 %v4681_v60, %v4672_v35  ;;  %v4706_v61 = vmul.f32 %v4705_v47, %v17285_v31  ;;  %v4707_v34 = vmul.f32 %v4705_v47, %v17286_v5  ;;  %v13996_v13 = vld [vmem:[%s17006_s8 + $0x28] sm:$0xff]  ;;  %v9561_v24 = vld [vmem:[%s17005_s7 + $0x30] sm:$0xff]  ;;  %v14018_v63 = vld [vmem:[%s17006_s8 + $0x38] sm:$0xff] }
 0xa67   :  { %v4712_v45 = vadd.f32 %v4708_v2, %v4699_v25  ;;  %v4713_v11 = vadd.f32 %v4709_v55, %v4700_v39  ;;  %v4719_v59 = vmul.f32 %v4718_v23, %v13814_v36  ;;  %v4720_v12 = vmul.f32 %v4718_v23, %v13812_v21  ;;  %v9555_v21 = vld [vmem:[%s17005_s7] sm:$0xff]  ;;  %v13952_v23 = vld [vmem:[%s17006_s8 + $0x8] sm:$0xff] }
 0xa68   :  { %v4697_v53 = vadd.f32 %v4693_v58, %v4684_v29  ;;  %v4698_v38 = vadd.f32 %v4694_v16, %v4685_v40  ;;  %v13937_v36 = vld [vmem:[%s17006_s8] sm:$0xff]  ;;  %v9564_v39 = vld [vmem:[%s17005_s7 + $0x48] sm:$0xff] }
 0xa69   :  { %v4725_v17 = vadd.f32 %v4721_v4, %v4712_v45  ;;  %v4726_v19 = vadd.f32 %v4722_v14, %v4713_v11  ;;  %v14029_v62 = vld [vmem:[%s17006_s8 + $0x40] sm:$0xff]  ;;  %v14046_v2 = vld [vmem:[%s17006_s8 + $0x48] sm:$0xff] }
 0xa6a   :  { %v4710_v18 = vadd.f32 %v4706_v61, %v4697_v53  ;;  %v4711_v7 = vadd.f32 %v4707_v34, %v4698_v38 }
 0xa6b   :  { %v13911_v52 = vsel %vm4727_vm5, %v4725_v17, 0.0  ;;  %v13915_v10 = vsel %vm4727_vm5, %v4726_v19, 0.0  ;;  %v9156_v1 = vpack.c.bf16 %v4726_v19, %v4725_v17 }
 0xa6c   :  { %v4723_v47 = vadd.f32 %v4719_v59, %v4710_v18  ;;  %v4724_v51 = vadd.f32 %v4720_v12, %v4711_v7 }
 0xa6d   :  { %9157 = vmatpush.bf16.msk.msrb.mxu3 %vm13903_vm12, %v9156_v1  ;;  %9213 = vmatpush.bf16.msk.msra.mxu1 %vm13903_vm12, %v9156_v1 }
 0xa6e   :  { %v13925_v15 = vsel %vm4727_vm5, %v4723_v47, 0.0  ;;  %v13929_v32 = vsel %vm4727_vm5, %v4724_v51, 0.0  ;;  %v9159_v3 = vpack.c.bf16 %v4724_v51, %v4723_v47 }
 0xa71   :  { %9160 = vmatpush.bf16.msk.msrb.mxu3 %vm13903_vm12, %v9159_v3  ;;  %9216 = vmatpush.bf16.msk.msra.mxu1 %vm13903_vm12, %v9159_v3 }
 0xa74   :  { %9161 = vmatmul.msk.bf16.vlgmr.msrb.gmra.mxu3 %vm4808_vm0, %v9555_v21  ;;  %9217 = vmatmul.msk.bf16.vlgmr.msra.gmra.mxu1 %vm4808_vm0, %v13937_v36 }
 0xa84   :  { %9162 = vmatmul.msk.bf16.gmra.mxu3 %vm4808_vm0, %v9556_v8  ;;  %9218 = vmatmul.msk.bf16.gmra.mxu1 %vm4808_vm0, %v13952_v23 }
 0xa94   :  { %9163 = vmatmul.msk.bf16.gmra.mxu3 %vm4808_vm0, %v9557_v43  ;;  %9219 = vmatmul.msk.bf16.gmra.mxu1 %vm4808_vm0, %v13963_v42 }
 0xaa4   :  { %9164 = vmatmul.msk.bf16.gmra.mxu3 %vm4808_vm0, %v9558_v54  ;;  %9220 = vmatmul.msk.bf16.gmra.mxu1 %vm4808_vm0, %v13974_v28 }
 0xab4   :  { %9165 = vmatmul.msk.bf16.gmra.mxu3 %vm4808_vm0, %v9559_v20  ;;  %9221 = vmatmul.msk.bf16.gmra.mxu1 %vm4808_vm0, %v13985_v27 }
 0xac4   :  { %9166 = vmatmul.msk.bf16.gmra.mxu3 %vm4808_vm0, %v9560_v9  ;;  %9222 = vmatmul.msk.bf16.gmra.mxu1 %vm4808_vm0, %v13996_v13 }
 0xad4   :  { %9167 = vmatmul.msk.bf16.gmra.mxu3 %vm4808_vm0, %v9561_v24  ;;  %9223 = vmatmul.msk.bf16.gmra.mxu1 %vm4808_vm0, %v14007_v26 }
 0xae4   :  { %9168 = vmatmul.msk.bf16.gmra.mxu3 %vm4808_vm0, %v9562_v48  ;;  %9224 = vmatmul.msk.bf16.gmra.mxu1 %vm4808_vm0, %v14018_v63 }
 0xaf1   :  { %v5017_v57 = vpop.f32.mrf.mxu1 }
 0xaf4   :  { %9169 = vmatmul.msk.bf16.gmra.mxu3 %vm4808_vm0, %v9563_v44  ;;  %9225 = vmatmul.msk.bf16.gmra.mxu1 %vm4808_vm0, %v14029_v62 }
 0xaf7   :  { %v14034_v30 = vpop.f32.mrf.mxu3 }
 0xaf8   :  { %v5070_v60 = vadd.f32 %v5017_v57, %v14034_v30 }
 0xaf9   :  { %v14036_v33 = vpop.f32.mrf.mxu1 }
 0xafa   :  { %v9228_v14 = vmul.f32 -1.442695, %v5070_v60 }
 0xaff   :  { %v14038_v25 = vpop.f32.mrf.mxu3 }
 0xb01   :  { %v5022_v37 = vpop.f32.mrf.mxu1 }
 0xb04   :  { %9170 = vmatmul.msk.bf16.gmra.mxu3 %vm4808_vm0, %v9564_v39  ;;  %9226 = vmatmul.msk.bf16.gmra.mxu1 %vm4808_vm0, %v14046_v2 }
 0xb07   :  { %v14051_v55 = vpop.f32.mrf.mxu3 }
 0xb08   :  { %17287 = vst [vmem:[#allocation10_spill] sm:$0xff] %v14051_v55  ;;  %v5072_v53 = vadd.f32 %v5022_v37, %v14051_v55 }
 0xb09   :  { %v14053_v46 = vpop.f32.mrf.mxu1 }
 0xb0a   :  { %v9230_v1 = vmul.f32 -1.442695, %v5072_v53 }
 0xb0f   :  { %v14055_v35 = vpop.f32.mrf.mxu3 }
 0xb10   :  { %17288 = vst [vmem:[#allocation7_spill] sm:$0xff] %v14055_v35 }
 0xb11   :  { %v14057_v41 = vpop.f32.mrf.mxu1 }
 0xb17   :  { %v14059_v50 = vpop.f32.mrf.mxu3 }
 0xb18   :  { %17289 = vst [vmem:[#allocation6_spill] sm:$0xff] %v14059_v50 }
 0xb19   :  { %v5029_v0 = vpop.f32.mrf.mxu1 }
 0xb1f   :  { %v14062_v45 = vpop.f32.mrf.mxu3 }
 0xb20   :  { %17290 = vst [vmem:[#allocation13_spill] sm:$0xff] %v14062_v45  ;;  %v5075_v11 = vadd.f32 %v5029_v0, %v14062_v45 }
 0xb21   :  { %v5032_v4 = vpop.f32.mrf.mxu1 }
 0xb22   :  { %v9233_v29 = vmul.f32 -1.442695, %v5075_v11 }
 0xb24   :  { %10100 = vpow2.f32 %v9233_v29 }
 0xb25   :  { %10102 = vpow2.f32 %v9228_v14 }
 0xb27   :  { %v14065_v40 = vpop.f32.mrf.mxu3 }
 0xb28   :  { %17291 = vst [vmem:[#allocation9_spill] sm:$0xff] %v14065_v40  ;;  %v5076_v49 = vadd.f32 %v5032_v4, %v14065_v40 }
 0xb29   :  { %v5034_v58 = vpop.f32.mrf.mxu1 }
 0xb2a   :  { %v9234_v6 = vmul.f32 -1.442695, %v5076_v49  ;;  %v10101_v16 = vpop.eup %10100 }
 0xb2b   :  { %v10103_v17 = vpop.eup %10102  ;;  %v14068_v19 = vadd.f32 1.0, %v10101_v16 }
 0xb2c   :  { %10104 = vpow2.f32 %v9234_v6  ;;  %v14070_v22 = vadd.f32 1.0, %v10103_v17 }
 0xb2d   :  { %10106 = vrcp.f32 %v14068_v19  ;;  %vm5210_vm8 = vweird.f32 %v14068_v19 }
 0xb2e   :  { %10108 = vrcp.f32 %v14070_v22  ;;  %vm5115_vm2 = vweird.f32 %v14070_v22 }
 0xb2f   :  { %v14073_v38 = vpop.f32.mrf.mxu3 }
 0xb30   :  { %17292 = vst [vmem:[#allocation8_spill] sm:$0xff] %v14073_v38  ;;  %v5077_v31 = vadd.f32 %v5034_v58, %v14073_v38 }
 0xb31   :  { %v5037_v61 = vpop.f32.mrf.mxu1 }
 0xb32   :  { %v10105_v5 = vpop.eup %10104  ;;  %v9235_v34 = vmul.f32 -1.442695, %v5077_v31 }
 0xb33   :  { %v5201_v18 = vadd.f32 1.0, %v10105_v5  ;;  %v14080_v59 = vpop.eup %10106 }
 0xb34   :  { %10110 = vpow2.f32 %v9235_v34  ;;  %v14083_v47 = vpop.eup %10108  ;;  %v5206_v43 = vmul.f32 %v14080_v59, %v14068_v19  ;;  %vm5211_vm9 = vweird.f32 %v14080_v59 }
 0xb35   :  { %10112 = vrcp.f32 %v5201_v18  ;;  %v5111_v9 = vmul.f32 %v14083_v47, %v14070_v22  ;;  %v5231_v0 = vand.u32 2147483648, %v5201_v18  ;;  %v5229_v4 = vand.u32 2147483647, %v5201_v18  ;;  %vm5212_vm7 = vmor %vm5210_vm8, %vm5211_vm9 }
 0xb36   :  { %10114 = vpow2.f32 %v9230_v1  ;;  %v5207_v57 = vsub.f32 1.0, %v5206_v43  ;;  %vm5225_vm4 = vweird.f32 %v5201_v18  ;;  %vm5116_vm10 = vweird.f32 %v14083_v47 }
 0xb37   :  { %v14078_v7 = vpop.f32.mrf.mxu3  ;;  %v5112_v11 = vsub.f32 1.0, %v5111_v9  ;;  %v5232_v16 = vor.u32 1.1754944e-38, %v5231_v0  ;;  %vm5230_vm3 = vcmp.eq.f32.partialorder %v5229_v4, 8.507059e+37  ;;  %vm14126_vm5 = vmor %vm5115_vm2, %vm5116_vm10 }
 0xb38   :  { %17293 = vst [vmem:[#allocation12_spill] sm:$0xff] %v14078_v7  ;;  %v5078_v12 = vadd.f32 %v5037_v61, %v14078_v7  ;;  %v5208_v58 = vmul.f32 %v14080_v59, %v5207_v57 }
 0xb39   :  { %v14085_v51 = vpop.f32.mrf.mxu1  ;;  %v5113_v17 = vmul.f32 %v14083_v47, %v5112_v11 }
 0xb3a   :  { %v10111_v3 = vpop.eup %10110  ;;  %v9236_v21 = vmul.f32 -1.442695, %v5078_v12  ;;  %v5209_v61 = vadd.f32 %v14080_v59, %v5208_v58 }
 0xb3b   :  { %v10113_v8 = vpop.eup %10112  ;;  %v14091_v24 = vadd.f32 1.0, %v10111_v3  ;;  %v5114_v3 = vadd.f32 %v14083_v47, %v5113_v17 }
 0xb3c   :  { %10116 = vpow2.f32 %v9236_v21  ;;  %v5221_v54 = vmul.f32 %v10113_v8, %v5201_v18  ;;  %v10115_v20 = vpop.eup %10114  ;;  %vm5226_vm15 = vweird.f32 %v10113_v8  ;;  %v5216_v18 = vand.u32 2147483648, %v14068_v19 }
 0xb3d   :  { %v14095_v39 = vadd.f32 1.0, %v10115_v20  ;;  %10118 = vrcp.f32 %v14091_v24  ;;  %vm5227_vm14 = vmor %vm5225_vm4, %vm5226_vm15  ;;  %v5214_v21 = vand.u32 2147483647, %v14068_v19  ;;  %v5119_v20 = vand.u32 2147483647, %v14070_v22 }
 0xb3e   :  { %v5222_v48 = vsub.f32 1.0, %v5221_v54  ;;  %v5213_v9 = vsel %vm5212_vm7, %v14080_v59, %v5209_v61  ;;  %v5217_v19 = vor.u32 1.1754944e-38, %v5216_v18  ;;  %v5118_v0 = vsel %vm14126_vm5, %v14083_v47, %v5114_v3 }
 0xb3f   :  { %v14093_v44 = vpop.f32.mrf.mxu3  ;;  %10120 = vrcp.f32 %v14095_v39  ;;  %vm5215_vm12 = vcmp.eq.f32.partialorder %v5214_v21, 8.507059e+37  ;;  %vm5120_vm15 = vcmp.eq.f32.partialorder %v5119_v20, 8.507059e+37  ;;  %v5246_v57 = vand.u32 2147483648, %v14091_v24 }
 0xb40   :  { %17294 = vst [vmem:[#allocation11_spill] sm:$0xff] %v14093_v44  ;;  %v5223_v37 = vmul.f32 %v10113_v8, %v5222_v48  ;;  %v5218_v4 = vsel %vm5215_vm12, %v5217_v19, %v5213_v9  ;;  %vm5240_vm7 = vweird.f32 %v14091_v24  ;;  %vm5145_vm5 = vweird.f32 %v14095_v39 }
 0xb41   :  { %v5042_v60 = vpop.f32.mrf.mxu1  ;;  %v5380_v61 = vmul.f32 %v5218_v4, %v13925_v15 }
 0xb42   :  { %v10117_v14 = vpop.eup %10116  ;;  %v5224_v29 = vadd.f32 %v10113_v8, %v5223_v37 }
 0xb43   :  { %v5203_v49 = vadd.f32 1.0, %v10117_v14  ;;  %v14108_v34 = vpop.eup %10118 }
 0xb44   :  { %v5228_v6 = vsel %vm5227_vm14, %v10113_v8, %v5224_v29  ;;  %v5236_v54 = vmul.f32 %v14108_v34, %v14091_v24  ;;  %vm5241_vm10 = vweird.f32 %v14108_v34 }
 0xb45   :  { %10122 = vrcp.f32 %v5203_v49  ;;  %v5233_v53 = vsel %vm5230_vm3, %v5232_v16, %v5228_v6  ;;  %v14118_v8 = vpop.eup %10120  ;;  %v5261_v14 = vand.u32 2147483648, %v5203_v49  ;;  %v5259_v6 = vand.u32 2147483647, %v5203_v49  ;;  %vm5242_vm2 = vmor %vm5240_vm7, %vm5241_vm10 }
 0xb46   :  { %v14106_v5 = vmul.f32 %v5233_v53, %v13929_v32  ;;  %v5121_v32 = vand.u32 2147483648, %v14070_v22  ;;  %v5141_v37 = vmul.f32 %v14118_v8, %v14095_v39  ;;  %v5237_v59 = vsub.f32 1.0, %v5236_v54 }
 0xb47   :  { %v14101_v31 = vpop.f32.mrf.mxu3  ;;  %vm5255_vm14 = vweird.f32 %v5203_v49  ;;  %v5262_v3 = vor.u32 1.1754944e-38, %v5261_v14  ;;  %vm5260_vm9 = vcmp.eq.f32.partialorder %v5259_v6, 8.507059e+37  ;;  %vm5146_vm8 = vweird.f32 %v14118_v8 }
 0xb48   :  { %17295 = vst [vmem:[#allocation15_spill] sm:$0xff] %v14101_v31  ;;  %v5080_v1 = vadd.f32 %v5042_v60, %v14101_v31  ;;  %v5122_v11 = vor.u32 1.1754944e-38, %v5121_v32  ;;  %v5142_v53 = vsub.f32 1.0, %v5141_v37  ;;  %v5238_v18 = vmul.f32 %v14108_v34, %v5237_v59  ;;  %vm5147_vm12 = vmor %vm5145_vm5, %vm5146_vm8 }
 0xb49   :  { %v14112_v12 = vpop.f32.mrf.mxu1  ;;  %v5151_v37 = vand.u32 2147483648, %v14095_v39 }
 0xb4a   :  { %10124 = vtanh.f32 %v5080_v1  ;;  %v5123_v16 = vsel %vm5120_vm15, %v5122_v11, %v5118_v0  ;;  %v5143_v54 = vmul.f32 %v14118_v8, %v5142_v53  ;;  %v5239_v15 = vadd.f32 %v14108_v34, %v5238_v18 }
 0xb4b   :  { %v10123_v43 = vpop.eup %10122  ;;  %v5149_v0 = vand.u32 2147483647, %v14095_v39  ;;  %v5247_v11 = vor.u32 1.1754944e-38, %v5246_v57  ;;  %v5152_v59 = vor.u32 1.1754944e-38, %v5151_v37  ;;  %v5071_v39 = vadd.f32 %v14036_v33, %v14038_v25 }
 0xb4c   :  { %v5251_v48 = vmul.f32 %v10123_v43, %v5203_v49  ;;  %vm5256_vm4 = vweird.f32 %v10123_v43 }
 0xb4d   :  { %vm5257_vm3 = vmor %vm5255_vm14, %vm5256_vm4  ;;  %vm5150_vm4 = vcmp.eq.f32.partialorder %v5149_v0, 8.507059e+37  ;;  %v9229_v53 = vmul.f32 -1.442695, %v5071_v39 }
 0xb4e   :  { %v5252_v60 = vsub.f32 1.0, %v5251_v48 }
 0xb4f   :  { %v14135_v22 = vpop.f32.mrf.mxu3 }
 0xb50   :  { %17298 = vst [vmem:[#allocation14_spill] sm:$0xff] %v14135_v22  ;;  %v10125_v29 = vpop.eup %10124  ;;  %v5253_v58 = vmul.f32 %v10123_v43, %v5252_v60  ;;  %v5243_v60 = vsel %vm5242_vm2, %v14108_v34, %v5239_v15 }
 0xb51   :  { %v5047_v17 = vpop.f32.mrf.mxu1  ;;  %v5385_v1 = vmul.f32 %v10125_v29, %v5123_v16 }
 0xb52   :  { %v5254_v47 = vadd.f32 %v10123_v43, %v5253_v58 }
 0xb53   :  { %v14139_v21 = vadd.f32 %v5385_v1, %v5380_v61  ;;  %v5073_v61 = vadd.f32 %v14053_v46, %v14055_v35 }
 0xb54   :  { %v5258_v32 = vsel %vm5257_vm3, %v10123_v43, %v5254_v47  ;;  %v5144_v43 = vadd.f32 %v14118_v8, %v5143_v54  ;;  %v5074_v47 = vadd.f32 %v14057_v41, %v14059_v50 }
 0xb55   :  { %v5263_v20 = vsel %vm5260_vm9, %v5262_v3, %v5258_v32  ;;  %v9231_v18 = vmul.f32 -1.442695, %v5073_v61 }
 0xb56   :  { %v14143_v9 = vmul.f32 %v5263_v20, %v13915_v10  ;;  %v5244_v10 = vand.u32 2147483647, %v14091_v24  ;;  %v5148_v4 = vsel %vm5147_vm12, %v14118_v8, %v5144_v43  ;;  %v9232_v3 = vmul.f32 -1.442695, %v5074_v47 }
 0xb57   :  { %v14145_v48 = vpop.f32.mrf.mxu3  ;;  %v5153_v58 = vsel %vm5150_vm4, %v5152_v59, %v5148_v4 }
 0xb58   :  { %17299 = vst [vmem:[#allocation16_spill] sm:$0xff] %v14145_v48  ;;  %v5082_v49 = vadd.f32 %v5047_v17, %v14145_v48  ;;  %vm5245_vm15 = vcmp.eq.f32.partialorder %v5244_v10, 8.507059e+37 }
 0xb59   :  { %v14151_v19 = vpop.f32.mrf.mxu1  ;;  %v5248_v14 = vsel %vm5245_vm15, %v5247_v11, %v5243_v60 }
 0xb5a   :  { %10126 = vtanh.f32 %v5082_v49  ;;  %v5382_v16 = vmul.f32 %v5248_v14, %v13911_v52  ;;  %v5079_v52 = vadd.f32 %v14085_v51, %v14093_v44 }
 0xb5b   :  { %10128 = vpow2.f32 %v9229_v53 }
 0xb5c   :  { %v9237_v32 = vmul.f32 -1.442695, %v5079_v52  ;;  %10130 = vpow2.f32 %v9231_v18 }
 0xb5d   :  { %10132 = vpow2.f32 %v9232_v3 }
 0xb5e   :  { %10134 = vpow2.f32 %v9237_v32 }
 0xb5f   :  { %v14162_v29 = vpop.f32.mrf.mxu3 }
 0xb60   :  { %17300 = vst [vmem:[#allocation17_spill] sm:$0xff] %v14162_v29  ;;  %v10127_v24 = vpop.eup %10126 }
 0xb61   :  { %v14164_v6 = vpop.f32.mrf.mxu1  ;;  %v5387_v17 = vmul.f32 %v10127_v24, %v5153_v58  ;;  %v10129_v54 = vpop.eup %10128 }
 0xb62   :  { %v14181_v15 = vadd.f32 1.0, %v10129_v54  ;;  %v10131_v46 = vpop.eup %10130 }
 0xb63   :  { %v14169_v34 = vadd.f32 %v5387_v17, %v5382_v16  ;;  %v10133_v41 = vpop.eup %10132  ;;  %v14186_v51 = vadd.f32 1.0, %v10131_v46 }
 0xb64   :  { %10136 = vrcp.f32 %v14181_v15  ;;  %v10135_v57 = vpop.eup %10134  ;;  %v14188_v43 = vadd.f32 1.0, %v10133_v41  ;;  %v5081_v41 = vadd.f32 %v14112_v12, %v14135_v22  ;;  %vm5130_vm3 = vweird.f32 %v14181_v15 }
 0xb65   :  { %v14190_v37 = vadd.f32 1.0, %v10135_v57  ;;  %10138 = vrcp.f32 %v14186_v51  ;;  %vm5160_vm10 = vweird.f32 %v14186_v51 }
 0xb66   :  { %10140 = vrcp.f32 %v14188_v43  ;;  %vm5175_vm5 = vweird.f32 %v14188_v43 }
 0xb67   :  { %v14171_v8 = vpop.f32.mrf.mxu3  ;;  %10142 = vrcp.f32 %v14190_v37  ;;  %vm5270_vm4 = vweird.f32 %v14190_v37 }
 0xb68   :  { %17301 = vst [vmem:[#allocation18_spill] sm:$0xff] %v14171_v8 }
 0xb69   :  { %v5054_v1 = vpop.f32.mrf.mxu1 }
 0xb6a   :  { %v14193_v60 = vpop.eup %10136 }
 0xb6b   :  { %v5126_v14 = vmul.f32 %v14193_v60, %v14181_v15  ;;  %v14204_v16 = vpop.eup %10138  ;;  %vm5131_vm14 = vweird.f32 %v14193_v60 }
 0xb6c   :  { %v14206_v17 = vpop.eup %10140  ;;  %v5156_v18 = vmul.f32 %v14204_v16, %v14186_v51  ;;  %vm14240_vm9 = vmor %vm5130_vm3, %vm5131_vm14  ;;  %vm5161_vm8 = vweird.f32 %v14204_v16 }
 0xb6d   :  { %v5127_v61 = vsub.f32 1.0, %v5126_v14  ;;  %v5171_v3 = vmul.f32 %v14206_v17, %v14188_v43  ;;  %vm5176_vm7 = vweird.f32 %v14206_v17  ;;  %vm14273_vm12 = vmor %vm5160_vm10, %vm5161_vm8 }
 0xb6e   :  { %vm14280_vm15 = vmor %vm5175_vm5, %vm5176_vm7 }
 0xb6f   :  { %v14179_v33 = vpop.f32.mrf.mxu3  ;;  %v5128_v54 = vmul.f32 %v14193_v60, %v5127_v61 }
 0xb70   :  { %17302 = vst [vmem:[#allocation19_spill] sm:$0xff] %v14179_v33  ;;  %v5085_v0 = vadd.f32 %v5054_v1, %v14179_v33  ;;  %v14208_v1 = vpop.eup %10142 }
 0xb71   :  { %v5057_v20 = vpop.f32.mrf.mxu1  ;;  %v5266_v32 = vmul.f32 %v14208_v1, %v14190_v37  ;;  %vm5271_vm2 = vweird.f32 %v14208_v1 }
 0xb72   :  { %v9238_v24 = vmul.f32 -1.442695, %v5085_v0  ;;  %v5157_v0 = vsub.f32 1.0, %v5156_v18  ;;  %vm14291_vm14 = vmor %vm5270_vm4, %vm5271_vm2 }
 0xb73   :  { %v5267_v14 = vsub.f32 1.0, %v5266_v32 }
 0xb74   :  { %10144 = vpow2.f32 %v9238_v24  ;;  %v5129_v24 = vadd.f32 %v14193_v60, %v5128_v54 }
 0xb75   :  { %v5268_v54 = vmul.f32 %v14208_v1, %v5267_v14 }
 0xb77   :  { %v14183_v49 = vpop.f32.mrf.mxu3  ;;  %v5269_v14 = vadd.f32 %v14208_v1, %v5268_v54  ;;  %v5274_v54 = vand.u32 2147483647, %v14190_v37 }
 0xb78   :  { %17303 = vst [vmem:[#allocation20_spill] sm:$0xff] %v14183_v49  ;;  %v5086_v59 = vadd.f32 %v5057_v20, %v14183_v49 }
 0xb79   :  { %v5059_v10 = vpop.f32.mrf.mxu1  ;;  %vm5275_vm8 = vcmp.eq.f32.partialorder %v5274_v54, 8.507059e+37 }
 0xb7a   :  { %v9239_v39 = vmul.f32 -1.442695, %v5086_v59  ;;  %v10145_v46 = vpop.eup %10144  ;;  %v5172_v59 = vsub.f32 1.0, %v5171_v3  ;;  %v5136_v3 = vand.u32 2147483648, %v14181_v15 }
 0xb7c   :  { %v5173_v32 = vmul.f32 %v14206_v17, %v5172_v59 }
 0xb7e   :  { %v5174_v59 = vadd.f32 %v14206_v17, %v5173_v32  ;;  %v5179_v32 = vand.u32 2147483647, %v14188_v43 }
 0xb7f   :  { %v14197_v11 = vpop.f32.mrf.mxu3 }
 0xb80   :  { %17304 = vst [vmem:[#allocation21_spill] sm:$0xff] %v14197_v11  ;;  %v5087_v4 = vadd.f32 %v5059_v10, %v14197_v11  ;;  %v5083_v10 = vadd.f32 %v14151_v19, %v14162_v29  ;;  %v5134_v19 = vand.u32 2147483647, %v14181_v15  ;;  %v5164_v15 = vand.u32 2147483647, %v14186_v51 }
 0xb81   :  { %v5062_v53 = vpop.f32.mrf.mxu1  ;;  %vm5180_vm10 = vcmp.eq.f32.partialorder %v5179_v32, 8.507059e+37 }
 0xb82   :  { %v9240_v58 = vmul.f32 -1.442695, %v5087_v4  ;;  %v5084_v4 = vadd.f32 %v14164_v6, %v14171_v8  ;;  %v5158_v6 = vmul.f32 %v14204_v16, %v5157_v0  ;;  %v5166_v0 = vand.u32 2147483648, %v14186_v51 }
 0xb83   :  { %v5137_v51 = vor.u32 1.1754944e-38, %v5136_v3  ;;  %vm5135_vm3 = vcmp.eq.f32.partialorder %v5134_v19, 8.507059e+37 }
 0xb84   :  { %10146 = vpow2.f32 %v9240_v58  ;;  %v14228_v58 = vadd.f32 1.0, %v10145_v46  ;;  %v5167_v3 = vor.u32 1.1754944e-38, %v5166_v0 }
 0xb85   :  { %10148 = vpow2.f32 %v9239_v39 }
 0xb87   :  { %v14210_v47 = vpop.f32.mrf.mxu3 }
 0xb88   :  { %17305 = vst [vmem:[#allocation22_spill] sm:$0xff] %v14210_v47  ;;  %v5088_v52 = vadd.f32 %v5062_v53, %v14210_v47 }
 0xb89   :  { %v5064_v53 = vpop.f32.mrf.mxu1 }
 0xb8a   :  { %v9241_v20 = vmul.f32 -1.442695, %v5088_v52  ;;  %v10147_v57 = vpop.eup %10146 }
 0xb8b   :  { %v10149_v39 = vpop.eup %10148  ;;  %v14232_v61 = vadd.f32 1.0, %v10147_v57 }
 0xb8c   :  { %10150 = vpow2.f32 %v9241_v20  ;;  %v5133_v20 = vsel %vm14240_vm9, %v14193_v60, %v5129_v24  ;;  %v14251_v57 = vadd.f32 1.0, %v10149_v39  ;;  %v5159_v60 = vadd.f32 %v14204_v16, %v5158_v6 }
 0xb8d   :  { %10152 = vtanh.f32 %v5081_v41  ;;  %v5181_v39 = vand.u32 2147483648, %v14188_v43  ;;  %v5178_v43 = vsel %vm14280_vm15, %v14206_v17, %v5174_v59  ;;  %v5138_v29 = vsel %vm5135_vm3, %v5137_v51, %v5133_v20 }
 0xb8e   :  { %10154 = vtanh.f32 %v5083_v10  ;;  %vm5165_vm9 = vcmp.eq.f32.partialorder %v5164_v15, 8.507059e+37  ;;  %vm5325_vm2 = vweird.f32 %v14251_v57  ;;  %v5329_v32 = vand.u32 2147483647, %v14251_v57 }
 0xb8f   :  { %v14230_v12 = vpop.f32.mrf.mxu3  ;;  %10156 = vtanh.f32 %v5084_v4  ;;  %v5182_v47 = vor.u32 1.1754944e-38, %v5181_v39 }
 0xb90   :  { %17306 = vst [vmem:[#allocation23_spill] sm:$0xff] %v14230_v12  ;;  %v5089_v52 = vadd.f32 %v5064_v53, %v14230_v12  ;;  %10158 = vrcp.f32 %v14228_v58  ;;  %v5276_v53 = vand.u32 2147483648, %v14190_v37  ;;  %v5163_v12 = vsel %vm14273_vm12, %v14204_v16, %v5159_v60 }
 0xb91   :  { %10160 = vrcp.f32 %v14232_v61  ;;  %v5273_v37 = vsel %vm14291_vm14, %v14208_v1, %v5269_v14  ;;  %v5168_v19 = vsel %vm5165_vm9, %v5167_v3, %v5163_v12  ;;  %v5183_v17 = vsel %vm5180_vm10, %v5182_v47, %v5178_v43 }
 0xb92   :  { %v10151_v46 = vpop.eup %10150  ;;  %v9242_v41 = vmul.f32 -1.442695, %v5089_v52  ;;  %v5277_v49 = vor.u32 1.1754944e-38, %v5276_v53  ;;  %vm5340_vm9 = vweird.f32 %v14232_v61 }
 0xb93   :  { %v14256_v10 = vadd.f32 1.0, %v10151_v46  ;;  %v10153_v4 = vpop.eup %10152 }
 0xb94   :  { %10162 = vpow2.f32 %v9242_v41  ;;  %v10155_v24 = vpop.eup %10154  ;;  %v5386_v11 = vmul.f32 %v10153_v4, %v5138_v29  ;;  %v5278_v59 = vsel %vm5275_vm8, %v5277_v49, %v5273_v37 }
 0xb95   :  { %10164 = vrcp.f32 %v14256_v10  ;;  %v10157_v6 = vpop.eup %10156  ;;  %v5388_v0 = vmul.f32 %v10155_v24, %v5168_v19  ;;  %v5361_v19 = vand.u32 2147483648, %v14256_v10  ;;  %vm5355_vm14 = vweird.f32 %v14256_v10 }
 0xb96   :  { %10166 = vrcp.f32 %v14251_v57  ;;  %v14287_v46 = vpop.eup %10158  ;;  %v5389_v20 = vmul.f32 %v10157_v6, %v5183_v17  ;;  %v14317_v4 = vadd.f32 %v5386_v11, %v14106_v5 }
 0xb97   :  { %v14298_v8 = vpop.eup %10160  ;;  %v5306_v29 = vmul.f32 %v14287_v46, %v14228_v58  ;;  %v14323_v47 = vadd.f32 %v5388_v0, %v14143_v9  ;;  %vm5311_vm7 = vweird.f32 %v14287_v46 }
 0xb98   :  { %v5336_v15 = vmul.f32 %v14298_v8, %v14232_v61  ;;  %vm5341_vm4 = vweird.f32 %v14298_v8 }
 0xb99   :  { %v5307_v39 = vsub.f32 1.0, %v5306_v29 }
 0xb9a   :  { %v10163_v22 = vpop.eup %10162  ;;  %v5337_v24 = vsub.f32 1.0, %v5336_v15  ;;  %v5346_v15 = vand.u32 2147483648, %v14232_v61 }
 0xb9b   :  { %v14306_v52 = vpop.eup %10164  ;;  %v5304_v16 = vadd.f32 1.0, %v10163_v22  ;;  %v5384_v22 = vmul.f32 %v5278_v59, %v13866_v56  ;;  %v5308_v18 = vmul.f32 %v14287_v46, %v5307_v39 }
 0xb9c   :  { %v14308_v60 = vpop.eup %10166  ;;  %v5351_v1 = vmul.f32 %v14306_v52, %v14256_v10  ;;  %v5338_v9 = vmul.f32 %v14298_v8, %v5337_v24  ;;  %vm5356_vm12 = vweird.f32 %v14306_v52 }
 0xb9d   :  { %10168 = vrcp.f32 %v5304_v16  ;;  %v5321_v49 = vmul.f32 %v14308_v60, %v14251_v57  ;;  %v14325_v14 = vadd.f32 %v5389_v20, %v5384_v22  ;;  %vm5326_vm5 = vweird.f32 %v14308_v60  ;;  %vm14350_vm10 = vmor %vm5355_vm14, %vm5356_vm12 }
 0xb9e   :  { %v5352_v12 = vsub.f32 1.0, %v5351_v1  ;;  %10170 = vtanh.f32 %v14317_v4  ;;  %v5376_v54 = vand.u32 2147483648, %v5304_v16  ;;  %v5374_v3 = vand.u32 2147483647, %v5304_v16  ;;  %vm14362_vm12 = vmor %vm5340_vm9, %vm5341_vm4 }
 0xb9f   :  { %10172 = vtanh.f32 %v14169_v34  ;;  %v5322_v5 = vsub.f32 1.0, %v5321_v49  ;;  %v5339_v59 = vadd.f32 %v14298_v8, %v5338_v9  ;;  %v5359_v1 = vand.u32 2147483647, %v14256_v10  ;;  %vm14376_vm4 = vmor %vm5325_vm2, %vm5326_vm5 }
 0xba0   :  { %v5353_v6 = vmul.f32 %v14306_v52, %v5352_v12  ;;  %10174 = vtanh.f32 %v14323_v47  ;;  %vm5370_vm3 = vweird.f32 %v5304_v16  ;;  %v5377_v12 = vor.u32 1.1754944e-38, %v5376_v54 }
 0xba1   :  { %10176 = vtanh.f32 %v14325_v14  ;;  %v5323_v41 = vmul.f32 %v14308_v60, %v5322_v5  ;;  %v5344_v49 = vand.u32 2147483647, %v14232_v61  ;;  %vm5375_vm13 = vcmp.eq.f32.partialorder %v5374_v3, 8.507059e+37 }
 0xba2   :  { %v5354_v51 = vadd.f32 %v14306_v52, %v5353_v6  ;;  %v5362_v6 = vor.u32 1.1754944e-38, %v5361_v19  ;;  %v5331_v5 = vand.u32 2147483648, %v14251_v57  ;;  %v5343_v61 = vsel %vm14362_vm12, %v14298_v8, %v5339_v59 }
 0xba3   :  { %v10169_v53 = vpop.eup %10168  ;;  %v5316_v54 = vand.u32 2147483648, %v14228_v58  ;;  %vm5310_vm14 = vweird.f32 %v14228_v58  ;;  %v5314_v8 = vand.u32 2147483647, %v14228_v58  ;;  %10178 = vtanh.f32 %v14139_v21 }
 0xba4   :  { %v5366_v56 = vmul.f32 %v10169_v53, %v5304_v16  ;;  %v10171_v43 = vpop.eup %10170  ;;  %vm5371_vm15 = vweird.f32 %v10169_v53  ;;  %v5358_v10 = vsel %vm14350_vm10, %v14306_v52, %v5354_v51  ;;  %v5324_v16 = vadd.f32 %v14308_v60, %v5323_v41 }
 0xba5   :  { %v10173_v17 = vpop.eup %10172  ;;  %vm5372_vm8 = vmor %vm5370_vm3, %vm5371_vm15  ;;  %vm5360_vm15 = vcmp.eq.f32.partialorder %v5359_v1, 8.507059e+37  ;;  %v5309_v52 = vadd.f32 %v14287_v46, %v5308_v18  ;;  %v5332_v3 = vor.u32 1.1754944e-38, %v5331_v5  ;;  %vm5330_vm2 = vcmp.eq.f32.partialorder %v5329_v32, 8.507059e+37 }
 0xba6   :  { %v5367_v11 = vsub.f32 1.0, %v5366_v56  ;;  %v10175_v0 = vpop.eup %10174  ;;  %v5328_v18 = vsel %vm14376_vm4, %v14308_v60, %v5324_v16  ;;  %vm5312_vm3 = vmor %vm5310_vm14, %vm5311_vm7  ;;  %v5317_v1 = vor.u32 1.1754944e-38, %v5316_v54  ;;  %vm5315_vm5 = vcmp.eq.f32.partialorder %v5314_v8, 8.507059e+37 }
 0xba7   :  { %v10177_v22 = vpop.eup %10176  ;;  %v5313_v19 = vsel %vm5312_vm3, %v14287_v46, %v5309_v52  ;;  %v5333_v58 = vsel %vm5330_vm2, %v5332_v3, %v5328_v18 }
 0xba8   :  { %v5368_v37 = vmul.f32 %v10169_v53, %v5367_v11  ;;  %v5363_v11 = vsel %vm5360_vm15, %v5362_v6, %v5358_v10  ;;  %v5318_v60 = vsel %vm5315_vm5, %v5317_v1, %v5313_v19  ;;  %v5401_v29 = vmul.f32 %v10171_v43, %v5333_v58 }
 0xba9   :  { %v5403_v57 = vmul.f32 %v10175_v0, %v5363_v11 }
 0xbaa   :  { %v5369_v20 = vadd.f32 %v10169_v53, %v5368_v37 }
 0xbac   :  { %v5373_v24 = vsel %vm5372_vm8, %v10169_v53, %v5369_v20  ;;  %v5347_v53 = vor.u32 1.1754944e-38, %v5346_v15 }
 0xbad   :  { %v5378_v56 = vsel %vm5375_vm13, %v5377_v12, %v5373_v24  ;;  %vm5345_vm13 = vcmp.eq.f32.partialorder %v5344_v49, 8.507059e+37 }
 0xbae   :  { %v5404_v9 = vmul.f32 %v10177_v22, %v5378_v56  ;;  %v5348_v37 = vsel %vm5345_vm13, %v5347_v53, %v5343_v61  ;;  %v10179_v22 = vpop.eup %10178 }
 0xbaf   :  { %v5402_v20 = vmul.f32 %v10173_v17, %v5348_v37  ;;  %v5400_v12 = vmul.f32 %v10179_v22, %v5318_v60 }
 0xbb0   :  { %v5407_v41 = vpack.c.bf16 %v5404_v9, %v5404_v9 }
 0xbb1   :  { %v5406_v15 = vpack.c.bf16 %v5403_v57, %v5402_v20  ;;  %v5405_v49 = vpack.c.bf16 %v5401_v29, %v5400_v12 }
 0xbb2   :  { %v5409_v59 = vsel %vm51_vm6, %v5407_v41, 0 }
 0xbb3   :  { %5416 = vmatpush.bf16.msra.mxu2 %v5409_v59 }
 0xbb7   :  { %5417 = vmatpush.bf16.msra.mxu2 %v5406_v15 }
 0xbbb   :  { %5418 = vmatpush.bf16.msra.mxu2 %v5405_v49 }
 0xbbe   :  { %9243 = vmatmul.msk.bf16.vlgmr.msra.gmra.mxu2 %vm4808_vm0, %v13937_v36 }
 0xbce   :  { %9244 = vmatmul.msk.bf16.gmra.mxu2 %vm4808_vm0, %v13952_v23 }
 0xbde   :  { %9245 = vmatmul.msk.bf16.gmra.mxu2 %vm4808_vm0, %v13963_v42 }
 0xbee   :  { %9246 = vmatmul.msk.bf16.gmra.mxu2 %vm4808_vm0, %v13974_v28 }
 0xbfe   :  { %9247 = vmatmul.msk.bf16.gmra.mxu2 %vm4808_vm0, %v13985_v27 }
 0xc0e   :  { %9248 = vmatmul.msk.bf16.gmra.mxu2 %vm4808_vm0, %v13996_v13 }
 0xc1e   :  { %9249 = vmatmul.msk.bf16.gmra.mxu2 %vm4808_vm0, %v14007_v26 }
 0xc2e   :  { %9250 = vmatmul.msk.bf16.gmra.mxu2 %vm4808_vm0, %v14018_v63 }
 0xc3e   :  { %9251 = vmatmul.msk.bf16.gmra.mxu2 %vm4808_vm0, %v14029_v62 }
 0xc41   :  { %v5420_v36 = vpop.f32.mrf.mxu2 }
 0xc42   :  { %v5474_v46 = vadd.f32 %v5420_v36, %v14034_v30 }
 0xc44   :  { %v9254_v32 = vmul.f32 -1.442695, %v5474_v46 }
 0xc46   :  { %10180 = vpow2.f32 %v9254_v32 }
 0xc49   :  { %v5422_v23 = vpop.f32.mrf.mxu2 }
 0xc4a   :  { %v5475_v57 = vadd.f32 %v5422_v23, %v14038_v25 }
 0xc4c   :  { %v10181_v63 = vpop.eup %10180  ;;  %v9255_v1 = vmul.f32 -1.442695, %v5475_v57 }
 0xc4d   :  { %v5509_v17 = vadd.f32 1.0, %v10181_v63 }
 0xc4e   :  { %9252 = vmatmul.msk.bf16.gmra.mxu2 %vm4808_vm0, %v14046_v2 }
 0xc4f   :  { %10182 = vrcp.f32 %v5509_v17  ;;  %v5525_v11 = vand.u32 2147483648, %v5509_v17  ;;  %vm5519_vm9 = vweird.f32 %v5509_v17  ;;  %v5523_v54 = vand.u32 2147483647, %v5509_v17 }
 0xc51   :  { %v5425_v42 = vpop.f32.mrf.mxu2  ;;  %v5526_v18 = vor.u32 1.1754944e-38, %v5525_v11  ;;  %vm5524_vm8 = vcmp.eq.f32.partialorder %v5523_v54, 8.507059e+37 }
 0xc52   :  { %v5476_v43 = vadd.f32 %v5425_v42, %v14051_v55 }
 0xc54   :  { %v9256_v0 = vmul.f32 -1.442695, %v5476_v43 }
 0xc55   :  { %v10183_v10 = vpop.eup %10182 }
 0xc56   :  { %10184 = vpow2.f32 %v9256_v0  ;;  %v5515_v24 = vmul.f32 %v10183_v10, %v5509_v17  ;;  %vm5520_vm7 = vweird.f32 %v10183_v10 }
 0xc57   :  { %vm5521_vm10 = vmor %vm5519_vm9, %vm5520_vm7 }
 0xc58   :  { %v5516_v5 = vsub.f32 1.0, %v5515_v24 }
 0xc59   :  { %v5427_v28 = vpop.f32.mrf.mxu2 }
 0xc5a   :  { %v5517_v56 = vmul.f32 %v10183_v10, %v5516_v5  ;;  %v5477_v29 = vadd.f32 %v5427_v28, %v14055_v35 }
 0xc5c   :  { %v10185_v16 = vpop.eup %10184  ;;  %v5518_v9 = vadd.f32 %v10183_v10, %v5517_v56  ;;  %v9257_v36 = vmul.f32 -1.442695, %v5477_v29 }
 0xc5d   :  { %v5511_v6 = vadd.f32 1.0, %v10185_v16 }
 0xc5e   :  { %v5522_v8 = vsel %vm5521_vm10, %v10183_v10, %v5518_v9 }
 0xc5f   :  { %10186 = vrcp.f32 %v5511_v6  ;;  %v5527_v3 = vsel %vm5524_vm8, %v5526_v18, %v5522_v8  ;;  %v5555_v22 = vand.u32 2147483648, %v5511_v6  ;;  %vm5549_vm15 = vweird.f32 %v5511_v6 }
 0xc60   :  { %v5553_v12 = vand.u32 2147483647, %v5511_v6 }
 0xc61   :  { %v5430_v27 = vpop.f32.mrf.mxu2  ;;  %v5556_v23 = vor.u32 1.1754944e-38, %v5555_v22 }
 0xc62   :  { %v5478_v46 = vadd.f32 %v5430_v27, %v14059_v50  ;;  %vm5554_vm13 = vcmp.eq.f32.partialorder %v5553_v12, 8.507059e+37 }
 0xc64   :  { %v9258_v28 = vmul.f32 -1.442695, %v5478_v46 }
 0xc65   :  { %v10187_v53 = vpop.eup %10186 }
 0xc66   :  { %v5545_v51 = vmul.f32 %v10187_v53, %v5511_v6  ;;  %vm5550_vm12 = vweird.f32 %v10187_v53 }
 0xc67   :  { %vm5551_vm4 = vmor %vm5549_vm15, %vm5550_vm12 }
 0xc68   :  { %v5546_v19 = vsub.f32 1.0, %v5545_v51 }
 0xc69   :  { %v14411_v13 = vpop.f32.mrf.mxu2 }
 0xc6a   :  { %v5547_v58 = vmul.f32 %v10187_v53, %v5546_v19  ;;  %v5479_v24 = vadd.f32 %v14411_v13, %v14062_v45 }
 0xc6c   :  { %v5548_v15 = vadd.f32 %v10187_v53, %v5547_v58 }
 0xc6e   :  { %v5552_v49 = vsel %vm5551_vm4, %v10187_v53, %v5548_v15 }
 0xc6f   :  { %v5557_v43 = vsel %vm5554_vm13, %v5556_v23, %v5552_v49 }
 0xc71   :  { %v14413_v26 = vpop.f32.mrf.mxu2 }
 0xc72   :  { %v5480_v10 = vadd.f32 %v14413_v26, %v14065_v40  ;;  %v9259_v26 = vmul.f32 -1.442695, %v5479_v24 }
 0xc74   :  { %v9260_v5 = vmul.f32 -1.442695, %v5480_v10 }
 0xc79   :  { %v14416_v62 = vpop.f32.mrf.mxu2 }
 0xc7a   :  { %v5481_v6 = vadd.f32 %v14416_v62, %v14073_v38 }
 0xc7c   :  { %v9261_v11 = vmul.f32 -1.442695, %v5481_v6 }
 0xc81   :  { %v14418_v2 = vpop.f32.mrf.mxu2 }
 0xc82   :  { %v5482_v56 = vadd.f32 %v14418_v2, %v14078_v7 }
 0xc84   :  { %v9262_v54 = vmul.f32 -1.442695, %v5482_v56 }
 0xc89   :  { %v5442_v39 = vpop.f32.mrf.mxu2 }
 0xc91   :  { %v5445_v61 = vpop.f32.mrf.mxu2 }
 0xc92   :  { %v5484_v52 = vadd.f32 %v5445_v61, %v14101_v31 }
 0xc94   :  { %10188 = vtanh.f32 %v5484_v52  ;;  %v5483_v52 = vadd.f32 %v5442_v39, %v14093_v44 }
 0xc95   :  { %10190 = vpow2.f32 %v9255_v1 }
 0xc96   :  { %v9263_v13 = vmul.f32 -1.442695, %v5483_v52 }
 0xc99   :  { %v14421_v41 = vpop.f32.mrf.mxu2 }
 0xc9a   :  { %v10189_v37 = vpop.eup %10188 }
 0xc9b   :  { %v14424_v59 = vmul.f32 %v10189_v37, %v5527_v3  ;;  %v10191_v42 = vpop.eup %10190 }
 0xc9c   :  { %v14433_v0 = vadd.f32 1.0, %v10191_v42 }
 0xc9e   :  { %v5540_v49 = vand.u32 2147483648, %v14433_v0  ;;  %vm5534_vm3 = vweird.f32 %v14433_v0 }
 0xca0   :  { %v5541_v10 = vor.u32 1.1754944e-38, %v5540_v49 }
 0xca1   :  { %v5450_v20 = vpop.f32.mrf.mxu2 }
 0xca2   :  { %v5486_v60 = vadd.f32 %v5450_v20, %v14145_v48 }
 0xca4   :  { %10192 = vtanh.f32 %v5486_v60 }
 0xca5   :  { %10194 = vpow2.f32 %v9257_v36 }
 0xca6   :  { %10196 = vrcp.f32 %v14433_v0 }
 0xca7   :  { %10198 = vpow2.f32 %v9258_v28 }
 0xca8   :  { %10200 = vpow2.f32 %v9260_v5  ;;  %v17323_v5 = vld [vmem:[#allocation21_spill] sm:$0xff] }
 0xca9   :  { %v14429_v32 = vpop.f32.mrf.mxu2 }
 0xcaa   :  { %v10193_v63 = vpop.eup %10192 }
 0xcab   :  { %v14431_v17 = vmul.f32 %v10193_v63, %v5557_v43  ;;  %v10195_v27 = vpop.eup %10194  ;;  %v5538_v43 = vand.u32 2147483647, %v14433_v0 }
 0xcac   :  { %v14446_v61 = vadd.f32 1.0, %v10195_v27  ;;  %v10197_v9 = vpop.eup %10196 }
 0xcad   :  { %v10199_v53 = vpop.eup %10198  ;;  %v5530_v62 = vmul.f32 %v10197_v9, %v14433_v0  ;;  %vm5535_vm14 = vweird.f32 %v10197_v9  ;;  %vm5539_vm5 = vcmp.eq.f32.partialorder %v5538_v43, 8.507059e+37 }
 0xcae   :  { %10202 = vrcp.f32 %v14446_v61  ;;  %v14451_v8 = vadd.f32 1.0, %v10199_v53  ;;  %v10201_v2 = vpop.eup %10200  ;;  %vm14480_vm2 = vmor %vm5534_vm3, %vm5535_vm14  ;;  %vm5564_vm7 = vweird.f32 %v14446_v61 }
 0xcaf   :  { %10204 = vpow2.f32 %v9259_v26  ;;  %v5531_v39 = vsub.f32 1.0, %v5530_v62  ;;  %v14456_v57 = vadd.f32 1.0, %v10201_v2  ;;  %v5568_v26 = vand.u32 2147483647, %v14446_v61 }
 0xcb0   :  { %10206 = vpow2.f32 %v9261_v11  ;;  %v17324_v11 = vld [vmem:[#allocation20_spill] sm:$0xff]  ;;  %vm5579_vm8 = vweird.f32 %v14451_v8 }
 0xcb1   :  { %v14438_v16 = vpop.f32.mrf.mxu2  ;;  %10208 = vpow2.f32 %v9262_v54  ;;  %v5532_v20 = vmul.f32 %v10197_v9, %v5531_v39  ;;  %vm14508_vm10 = vcmp.eq.f32.partialorder %v5568_v26, 8.507059e+37  ;;  %vm5629_vm13 = vweird.f32 %v14456_v57 }
 0xcb2   :  { %10210 = vpow2.f32 %v9263_v13  ;;  %v5570_v13 = vand.u32 2147483648, %v14446_v61 }
 0xcb3   :  { %10212 = vrcp.f32 %v14451_v8  ;;  %v5533_v42 = vadd.f32 %v10197_v9, %v5532_v20 }
 0xcb4   :  { %v14454_v18 = vpop.eup %10202  ;;  %10214 = vrcp.f32 %v14456_v57 }
 0xcb5   :  { %v10205_v37 = vpop.eup %10204  ;;  %v5560_v58 = vmul.f32 %v14454_v18, %v14446_v61  ;;  %v5537_v24 = vsel %vm14480_vm2, %v10197_v9, %v5533_v42  ;;  %v5585_v9 = vand.u32 2147483648, %v14451_v8  ;;  %vm5565_vm9 = vweird.f32 %v14454_v18 }
 0xcb6   :  { %v10207_v3 = vpop.eup %10206  ;;  %v14460_v15 = vadd.f32 1.0, %v10205_v37  ;;  %v14496_v2 = vsel %vm5539_vm5, %v5541_v10, %v5537_v24  ;;  %vm14521_vm12 = vmor %vm5564_vm7, %vm5565_vm9 }
 0xcb7   :  { %v10209_v1 = vpop.eup %10208  ;;  %v14464_v22 = vadd.f32 1.0, %v10207_v3  ;;  %v5561_v36 = vsub.f32 1.0, %v5560_v58  ;;  %v14526_v43 = vor.u32 1.1754944e-38, %v5585_v9 }
 0xcb8   :  { %v10211_v60 = vpop.eup %10210  ;;  %v14467_v12 = vadd.f32 1.0, %v10209_v1  ;;  %10216 = vrcp.f32 %v14460_v15  ;;  %v5620_v61 = vand.u32 2147483648, %v14460_v15  ;;  %v17334_v1 = vld [vmem:[#allocation18_spill] sm:$0xff]  ;;  %vm5614_vm5 = vweird.f32 %v14460_v15 }
 0xcb9   :  { %v5457_v51 = vpop.f32.mrf.mxu2  ;;  %v14462_v29 = vpop.eup %10212  ;;  %v14470_v23 = vadd.f32 1.0, %v10211_v60  ;;  %10218 = vrcp.f32 %v14464_v22  ;;  %v5562_v6 = vmul.f32 %v14454_v18, %v5561_v36  ;;  %v5571_v36 = vor.u32 1.1754944e-38, %v5570_v13 }
 0xcba   :  { %v5575_v46 = vmul.f32 %v14462_v29, %v14451_v8  ;;  %v5489_v63 = vadd.f32 %v5457_v51, %v14179_v33  ;;  %10220 = vrcp.f32 %v14467_v12  ;;  %v14489_v52 = vpop.eup %10214  ;;  %vm5580_vm15 = vweird.f32 %v14462_v29 }
 0xcbb   :  { %10222 = vrcp.f32 %v14470_v23  ;;  %v5625_v37 = vmul.f32 %v14489_v52, %v14456_v57  ;;  %v5563_v3 = vadd.f32 %v14454_v18, %v5562_v6  ;;  %v17329_v6 = vld [vmem:[#allocation22_spill] sm:$0xff]  ;;  %v5618_v13 = vand.u32 2147483647, %v14460_v15  ;;  %vm14557_vm4 = vmor %vm5579_vm8, %vm5580_vm15 }
 0xcbc   :  { %v5576_v0 = vsub.f32 1.0, %v5575_v46  ;;  %v9264_v53 = vmul.f32 -1.442695, %v5489_v63  ;;  %v5583_v63 = vand.u32 2147483647, %v14451_v8  ;;  %vm5630_vm14 = vweird.f32 %v14489_v52 }
 0xcbd   :  { %v5626_v10 = vsub.f32 1.0, %v5625_v37  ;;  %v5567_v24 = vsel %vm14521_vm12, %v14454_v18, %v5563_v3  ;;  %v14542_v18 = vor.u32 1.1754944e-38, %v5620_v61  ;;  %v17330_v3 = vld [vmem:[#allocation14_spill] sm:$0xff]  ;;  %v5633_v8 = vand.u32 2147483647, %v14456_v57  ;;  %vm14596_vm9 = vmor %vm5629_vm13, %vm5630_vm14 }
 0xcbe   :  { %v14494_v62 = vpop.eup %10216  ;;  %v5577_v58 = vmul.f32 %v14462_v29, %v5576_v0  ;;  %10224 = vpow2.f32 %v9264_v53  ;;  %v5485_v46 = vadd.f32 %v14421_v41, %v17330_v3  ;;  %vm14575_vm2 = vcmp.eq.f32.partialorder %v5583_v63, 8.507059e+37 }
 0xcbf   :  { %v14499_v39 = vpop.eup %10218  ;;  %v5610_v49 = vmul.f32 %v14494_v62, %v14460_v15  ;;  %vm5615_vm3 = vweird.f32 %v14494_v62  ;;  %vm5644_vm7 = vweird.f32 %v14464_v22  ;;  %vm14611_vm12 = vcmp.eq.f32.partialorder %v5618_v13, 8.507059e+37 }
 0xcc0   :  { %v5640_v42 = vmul.f32 %v14499_v39, %v14464_v22  ;;  %v14537_v26 = vadd.f32 %v14462_v29, %v5577_v58  ;;  %v14548_v58 = vsel %vm14508_vm10, %v5571_v36, %v5567_v24  ;;  %v5488_v36 = vadd.f32 %v14438_v16, %v17334_v1 }
 0xcc1   :  { %v5460_v19 = vpop.f32.mrf.mxu2  ;;  %v5611_v53 = vsub.f32 1.0, %v5610_v49  ;;  %vm5645_vm10 = vweird.f32 %v14499_v39 }
 0xcc2   :  { %v5490_v54 = vadd.f32 %v5460_v19, %v17324_v11  ;;  %v14506_v19 = vpop.eup %10220  ;;  %v5641_v37 = vsub.f32 1.0, %v5640_v42  ;;  %vm14625_vm13 = vmor %vm5644_vm7, %vm5645_vm10  ;;  %vm5634_vm7 = vcmp.eq.f32.partialorder %v5633_v8, 8.507059e+37 }
 0xcc3   :  { %v14513_v60 = vpop.eup %10222  ;;  %v5612_v42 = vmul.f32 %v14494_v62, %v5611_v53  ;;  %vm5660_vm8 = vweird.f32 %v14506_v19 }
 0xcc4   :  { %v9265_v20 = vmul.f32 -1.442695, %v5490_v54  ;;  %v5670_v0 = vmul.f32 %v14513_v60, %v14470_v23  ;;  %v5635_v54 = vand.u32 2147483648, %v14456_v57  ;;  %v10225_v9 = vpop.eup %10224  ;;  %vm5675_vm15 = vweird.f32 %v14513_v60 }
 0xcc6   :  { %v5671_v41 = vsub.f32 1.0, %v5670_v0 }
 0xcc8   :  { %v5672_v63 = vmul.f32 %v14513_v60, %v5671_v41 }
 0xcc9   :  { %v5462_v27 = vpop.f32.mrf.mxu2 }
 0xcca   :  { %v5491_v56 = vadd.f32 %v5462_v27, %v17323_v5  ;;  %v5655_v27 = vmul.f32 %v14506_v19, %v14467_v12 }
 0xccc   :  { %v9266_v51 = vmul.f32 -1.442695, %v5491_v56  ;;  %v5656_v49 = vsub.f32 1.0, %v5655_v27  ;;  %v14570_v27 = vadd.f32 1.0, %v10225_v9  ;;  %v5650_v9 = vand.u32 2147483648, %v14464_v22 }
 0xcce   :  { %10226 = vpow2.f32 %v9266_v51  ;;  %v5657_v53 = vmul.f32 %v14506_v19, %v5656_v49 }
 0xccf   :  { %10228 = vpow2.f32 %v9265_v20  ;;  %v5627_v20 = vmul.f32 %v14489_v52, %v5626_v10  ;;  %v5636_v10 = vor.u32 1.1754944e-38, %v5635_v54  ;;  %v17337_v54 = vld [vmem:[#allocation23_spill] sm:$0xff] }
 0xcd0   :  { %v5658_v41 = vadd.f32 %v14506_v19, %v5657_v53 }
 0xcd1   :  { %v5465_v28 = vpop.f32.mrf.mxu2 }
 0xcd2   :  { %v5492_v56 = vadd.f32 %v5465_v28, %v17329_v6  ;;  %v17331_v6 = vld [vmem:[#allocation17_spill] sm:$0xff] }
 0xcd3   :  { %v5487_v11 = vadd.f32 %v14429_v32, %v17331_v6  ;;  %v5582_v32 = vsel %vm14557_vm4, %v14462_v29, %v14537_v26  ;;  %v5628_v26 = vadd.f32 %v14489_v52, %v5627_v20  ;;  %vm5659_vm4 = vweird.f32 %v14467_v12 }
 0xcd4   :  { %v9267_v51 = vmul.f32 -1.442695, %v5492_v56  ;;  %v10227_v28 = vpop.eup %10226  ;;  %v5642_v56 = vmul.f32 %v14499_v39, %v5641_v37  ;;  %vm14632_vm14 = vmor %vm5659_vm4, %vm5660_vm8  ;;  %v5587_v1 = vsel %vm14575_vm2, %v14526_v43, %v5582_v32 }
 0xcd5   :  { %v10229_v24 = vpop.eup %10228  ;;  %v14579_v29 = vadd.f32 1.0, %v10227_v28  ;;  %v5632_v57 = vsel %vm14596_vm9, %v14489_v52, %v5628_v26  ;;  %v5680_v52 = vand.u32 2147483648, %v14470_v23  ;;  %vm5674_vm9 = vweird.f32 %v14470_v23  ;;  %vm14665_vm2 = vmor %vm5614_vm5, %vm5615_vm3 }
 0xcd6   :  { %10230 = vpow2.f32 %v9267_v51  ;;  %v14590_v28 = vadd.f32 1.0, %v10229_v24  ;;  %v5643_v49 = vadd.f32 %v14499_v39, %v5642_v56  ;;  %v5665_v24 = vand.u32 2147483648, %v14467_v12  ;;  %vm14652_vm10 = vmor %vm5674_vm9, %vm5675_vm15 }
 0xcd7   :  { %10232 = vtanh.f32 %v5485_v46  ;;  %v5648_v46 = vand.u32 2147483647, %v14464_v22 }
 0xcd8   :  { %10234 = vtanh.f32 %v5487_v11  ;;  %v5647_v22 = vsel %vm14625_vm13, %v14499_v39, %v5643_v49  ;;  %v5651_v11 = vor.u32 1.1754944e-38, %v5650_v9  ;;  %v5637_v49 = vsel %vm5634_vm7, %v5636_v10, %v5632_v57 }
 0xcd9   :  { %v5467_v0 = vpop.f32.mrf.mxu2  ;;  %10236 = vtanh.f32 %v5488_v36  ;;  %vm5649_vm8 = vcmp.eq.f32.partialorder %v5648_v46, 8.507059e+37  ;;  %v5681_v9 = vor.u32 1.1754944e-38, %v5680_v52  ;;  %v5785_v15 = vmul.f32 %v5637_v49, %v14317_v4 }
 0xcda   :  { %v5493_v51 = vadd.f32 %v5467_v0, %v17337_v54  ;;  %10238 = vrcp.f32 %v14570_v27  ;;  %v5673_v0 = vadd.f32 %v14513_v60, %v5672_v63  ;;  %v5662_v54 = vsel %vm14632_vm14, %v14506_v19, %v5658_v41 }
 0xcdb   :  { %10240 = vrcp.f32 %v14579_v29  ;;  %v5652_v16 = vsel %vm5649_vm8, %v5651_v11, %v5647_v22  ;;  %vm5729_vm5 = vweird.f32 %v14590_v28  ;;  %vm5744_vm8 = vweird.f32 %v14579_v29 }
 0xcdc   :  { %v10231_v37 = vpop.eup %10230  ;;  %v9268_v20 = vmul.f32 -1.442695, %v5493_v51  ;;  %v5663_v51 = vand.u32 2147483647, %v14467_v12  ;;  %v5613_v12 = vadd.f32 %v14494_v62, %v5612_v42  ;;  %v5677_v8 = vsel %vm14652_vm10, %v14513_v60, %v5673_v0 }
 0xcdd   :  { %v14603_v61 = vadd.f32 1.0, %v10231_v37  ;;  %v10233_v36 = vpop.eup %10232  ;;  %v5678_v37 = vand.u32 2147483647, %v14470_v23  ;;  %v5666_v23 = vor.u32 1.1754944e-38, %v5665_v24 }
 0xcde   :  { %10242 = vpow2.f32 %v9268_v20  ;;  %v10235_v53 = vpop.eup %10234  ;;  %vm5664_vm4 = vcmp.eq.f32.partialorder %v5663_v51, 8.507059e+37  ;;  %v5790_v32 = vmul.f32 %v10233_v36, %v14496_v2  ;;  %v5617_v60 = vsel %vm14665_vm2, %v14494_v62, %v5613_v12 }
 0xcdf   :  { %10244 = vrcp.f32 %v14603_v61  ;;  %v10237_v26 = vpop.eup %10236  ;;  %v5667_v46 = vsel %vm5664_vm4, %v5666_v23, %v5662_v54  ;;  %vm5679_vm15 = vcmp.eq.f32.partialorder %v5678_v37, 8.507059e+37  ;;  %v5792_v24 = vmul.f32 %v10235_v53, %v14548_v58 }
 0xce0   :  { %10246 = vrcp.f32 %v14590_v28  ;;  %v14642_v20 = vpop.eup %10238  ;;  %v5682_v0 = vsel %vm5679_vm15, %v5681_v9, %v5677_v8  ;;  %v5786_v36 = vmul.f32 %v5652_v16, %v14169_v34  ;;  %v5793_v51 = vmul.f32 %v10237_v26, %v5587_v1 }
 0xce1   :  { %v14656_v39 = vpop.eup %10240  ;;  %v5622_v54 = vsel %vm14611_vm12, %v14542_v18, %v5617_v60  ;;  %v14690_v52 = vadd.f32 %v5790_v32, %v5785_v15  ;;  %v5787_v4 = vmul.f32 %v5667_v46, %v14323_v47  ;;  %v5710_v58 = vmul.f32 %v14642_v20, %v14570_v27 }
 0xce2   :  { %v5740_v62 = vmul.f32 %v14656_v39, %v14579_v29  ;;  %v14696_v53 = vadd.f32 %v14431_v17, %v5786_v36  ;;  %v5788_v34 = vmul.f32 %v5682_v0, %v14325_v14  ;;  %v5784_v63 = vmul.f32 %v5622_v54, %v14139_v21 }
 0xce3   :  { %v14701_v26 = vadd.f32 %v5792_v24, %v5787_v4  ;;  %v5711_v47 = vsub.f32 1.0, %v5710_v58  ;;  %vm5715_vm3 = vweird.f32 %v14642_v20  ;;  %v5765_v16 = vand.u32 2147483648, %v14603_v61 }
 0xce4   :  { %v10243_v19 = vpop.eup %10242  ;;  %v14703_v56 = vadd.f32 %v5793_v51, %v5788_v34  ;;  %v5741_v18 = vsub.f32 1.0, %v5740_v62  ;;  %v14710_v22 = vadd.f32 %v14424_v59, %v5784_v63  ;;  %v5733_v59 = vand.u32 2147483647, %v14590_v28 }
 0xce5   :  { %v14670_v10 = vpop.eup %10244  ;;  %v14675_v41 = vadd.f32 1.0, %v10243_v19  ;;  %v5712_v42 = vmul.f32 %v14642_v20, %v5711_v47  ;;  %vm5745_vm9 = vweird.f32 %v14656_v39  ;;  %vm5759_vm7 = vweird.f32 %v14603_v61 }
 0xce6   :  { %v14677_v57 = vpop.eup %10246  ;;  %v5755_v2 = vmul.f32 %v14670_v10, %v14603_v61  ;;  %v5742_v21 = vmul.f32 %v14656_v39, %v5741_v18  ;;  %vm5760_vm13 = vweird.f32 %v14670_v10  ;;  %v5763_v46 = vand.u32 2147483647, %v14603_v61 }
 0xce7   :  { %10248 = vrcp.f32 %v14675_v41  ;;  %v5725_v1 = vmul.f32 %v14677_v57, %v14590_v28  ;;  %vm5730_vm12 = vweird.f32 %v14677_v57  ;;  %v5780_v23 = vand.u32 2147483648, %v14675_v41  ;;  %vm14736_vm4 = vmor %vm5759_vm7, %vm5760_vm13 }
 0xce8   :  { %v5756_v13 = vsub.f32 1.0, %v5755_v2  ;;  %10250 = vtanh.f32 %v14690_v52  ;;  %v5778_v32 = vand.u32 2147483647, %v14675_v41  ;;  %v5743_v60 = vadd.f32 %v14656_v39, %v5742_v21  ;;  %vm14748_vm13 = vmor %vm5744_vm8, %vm5745_vm9 }
 0xce9   :  { %10252 = vtanh.f32 %v14696_v53  ;;  %v5726_v17 = vsub.f32 1.0, %v5725_v1  ;;  %vm5774_vm10 = vweird.f32 %v14675_v41  ;;  %v5750_v0 = vand.u32 2147483648, %v14579_v29  ;;  %vm14762_vm9 = vmor %vm5729_vm5, %vm5730_vm12 }
 0xcea   :  { %v5757_v14 = vmul.f32 %v14670_v10, %v5756_v13  ;;  %10254 = vtanh.f32 %v14701_v26  ;;  %v5781_v51 = vor.u32 1.1754944e-38, %v5780_v23  ;;  %v5748_v61 = vand.u32 2147483647, %v14579_v29 }
 0xceb   :  { %10256 = vtanh.f32 %v14703_v56  ;;  %v5727_v8 = vmul.f32 %v14677_v57, %v5726_v17  ;;  %vm5779_vm15 = vcmp.eq.f32.partialorder %v5778_v32, 8.507059e+37  ;;  %v5766_v58 = vor.u32 1.1754944e-38, %v5765_v16 }
 0xcec   :  { %v5758_v49 = vadd.f32 %v14670_v10, %v5757_v14  ;;  %v5735_v34 = vand.u32 2147483648, %v14590_v28  ;;  %v5747_v29 = vsel %vm14748_vm13, %v14656_v39, %v5743_v60  ;;  %v5751_v18 = vor.u32 1.1754944e-38, %v5750_v0  ;;  %v14828_v0 = vld [vmem:[%s17006_s8 + $0x38] sm:$0xff] }
 0xced   :  { %v10249_v12 = vpop.eup %10248  ;;  %v5728_v62 = vadd.f32 %v14677_v57, %v5727_v8  ;;  %v5720_v47 = vand.u32 2147483648, %v14570_v27  ;;  %vm5749_vm7 = vcmp.eq.f32.partialorder %v5748_v61, 8.507059e+37  ;;  %v5718_v39 = vand.u32 2147483647, %v14570_v27 }
 0xcee   :  { %v5770_v37 = vmul.f32 %v10249_v12, %v14675_v41  ;;  %v10251_v19 = vpop.eup %10250  ;;  %vm5775_vm14 = vweird.f32 %v10249_v12  ;;  %v5762_v41 = vsel %vm14736_vm4, %v14670_v10, %v5758_v49  ;;  %v5713_v10 = vadd.f32 %v14642_v20, %v5712_v42 }
 0xcef   :  { %v10253_v9 = vpop.eup %10252  ;;  %vm5776_vm2 = vmor %vm5774_vm10, %vm5775_vm14  ;;  %vm5764_vm14 = vcmp.eq.f32.partialorder %v5763_v46, 8.507059e+37  ;;  %vm5714_vm10 = vweird.f32 %v14570_v27  ;;  %v5732_v17 = vsel %vm14762_vm9, %v14677_v57, %v5728_v62  ;;  %10258 = vtanh.f32 %v14710_v22  ;;  %v14807_v46 = vld [vmem:[%s17006_s8 + $0x20] sm:$0xff] }
 0xcf0   :  { %v5771_v11 = vsub.f32 1.0, %v5770_v37  ;;  %v10255_v15 = vpop.eup %10254  ;;  %v5767_v63 = vsel %vm5764_vm14, %v5766_v58, %v5762_v41  ;;  %v5752_v37 = vsel %vm5749_vm7, %v5751_v18, %v5747_v29  ;;  %vm5716_vm8 = vmor %vm5714_vm10, %vm5715_vm3  ;;  %v5736_v28 = vor.u32 1.1754944e-38, %v5735_v34  ;;  %v14842_v41 = vld [vmem:[%s17006_s8 + $0x48] sm:$0xff] }
 0xcf1   :  { %v10257_v36 = vpop.eup %10256  ;;  %v5807_v21 = vmul.f32 %v10255_v15, %v5767_v63  ;;  %vm5734_vm5 = vcmp.eq.f32.partialorder %v5733_v59, 8.507059e+37  ;;  %v5721_v23 = vor.u32 1.1754944e-38, %v5720_v47  ;;  %v5806_v49 = vmul.f32 %v10253_v9, %v5752_v37  ;;  %v14786_v59 = vld [vmem:[%s17006_s8 + $0x8] sm:$0xff]  ;;  %v14800_v9 = vld [vmem:[%s17006_s8 + $0x18] sm:$0xff] }
 0xcf2   :  { %v5772_v43 = vmul.f32 %v10249_v12, %v5771_v11  ;;  %v5717_v11 = vsel %vm5716_vm8, %v14642_v20, %v5713_v10  ;;  %v5737_v27 = vsel %vm5734_vm5, %v5736_v28, %v5732_v17  ;;  %vm5719_vm12 = vcmp.eq.f32.partialorder %v5718_v39, 8.507059e+37  ;;  %v14779_v20 = vld [vmem:[%s17006_s8] sm:$0xff]  ;;  %v14814_v15 = vld [vmem:[%s17006_s8 + $0x28] sm:$0xff] }
 0xcf3   :  { %v5722_v57 = vsel %vm5719_vm12, %v5721_v23, %v5717_v11  ;;  %v5810_v8 = vpack.c.bf16 %v5807_v21, %v5806_v49 }
 0xcf4   :  { %v5773_v24 = vadd.f32 %v10249_v12, %v5772_v43  ;;  %v5805_v43 = vmul.f32 %v10251_v19, %v5737_v27  ;;  %v14793_v19 = vld [vmem:[%s17006_s8 + $0x10] sm:$0xff] }
 0xcf5   :  { %v10259_v32 = vpop.eup %10258 }
 0xcf6   :  { %v5777_v54 = vsel %vm5776_vm2, %v10249_v12, %v5773_v24  ;;  %v5804_v16 = vmul.f32 %v10259_v32, %v5722_v57  ;;  %v14821_v24 = vld [vmem:[%s17006_s8 + $0x30] sm:$0xff] }
 0xcf7   :  { %v5782_v1 = vsel %vm5779_vm15, %v5781_v51, %v5777_v54 }
 0xcf8   :  { %v5808_v13 = vmul.f32 %v10257_v36, %v5782_v1  ;;  %v5809_v60 = vpack.c.bf16 %v5805_v43, %v5804_v16  ;;  %v14835_v36 = vld [vmem:[%s17006_s8 + $0x40] sm:$0xff] }
 0xcfa   :  { %v5811_v14 = vpack.c.bf16 %v5808_v13, %v5808_v13 }
 0xcfc   :  { %v5813_v42 = vsel %vm51_vm6, %v5811_v14, 0 }
 0xcfd   :  { %5820 = vmatpush.bf16.msra.mxu0 %v5813_v42 }
 0xd01   :  { %5821 = vmatpush.bf16.msra.mxu0 %v5810_v8 }
 0xd05   :  { %5822 = vmatpush.bf16.msra.mxu0 %v5809_v60 }
 0xd08   :  { %9269 = vmatmul.msk.bf16.vlgmr.msra.gmra.mxu0 %vm4808_vm0, %v14779_v20 }
 0xd18   :  { %9270 = vmatmul.msk.bf16.gmra.mxu0 %vm4808_vm0, %v14786_v59 }
 0xd28   :  { %9271 = vmatmul.msk.bf16.gmra.mxu0 %vm4808_vm0, %v14793_v19 }
 0xd38   :  { %9272 = vmatmul.msk.bf16.gmra.mxu0 %vm4808_vm0, %v14800_v9 }
 0xd48   :  { %9273 = vmatmul.msk.bf16.gmra.mxu0 %vm4808_vm0, %v14807_v46 }
 0xd58   :  { %9274 = vmatmul.msk.bf16.gmra.mxu0 %vm4808_vm0, %v14814_v15 }
 0xd68   :  { %9275 = vmatmul.msk.bf16.gmra.mxu0 %vm4808_vm0, %v14821_v24 }
 0xd78   :  { %9276 = vmatmul.msk.bf16.gmra.mxu0 %vm4808_vm0, %v14828_v0 }
 0xd85   :  { %v5824_v2 = vpop.f32.mrf.mxu0 }
 0xd86   :  { %v5878_v4 = vadd.f32 %v5824_v2, %v14034_v30 }
 0xd88   :  { %9277 = vmatmul.msk.bf16.gmra.mxu0 %vm4808_vm0, %v14835_v36  ;;  %v9280_v34 = vmul.f32 -1.442695, %v5878_v4 }
 0xd8a   :  { %10260 = vpow2.f32 %v9280_v34 }
 0xd8d   :  { %v5826_v51 = vpop.f32.mrf.mxu0 }
 0xd90   :  { %v10261_v29 = vpop.eup %10260 }
 0xd91   :  { %v5913_v18 = vadd.f32 1.0, %v10261_v29 }
 0xd93   :  { %10262 = vrcp.f32 %v5913_v18  ;;  %v5929_v49 = vand.u32 2147483648, %v5913_v18  ;;  %vm5923_vm4 = vweird.f32 %v5913_v18  ;;  %v5927_v57 = vand.u32 2147483647, %v5913_v18 }
 0xd95   :  { %v5829_v61 = vpop.f32.mrf.mxu0  ;;  %v5930_v32 = vor.u32 1.1754944e-38, %v5929_v49  ;;  %vm5928_vm15 = vcmp.eq.f32.partialorder %v5927_v57, 8.507059e+37 }
 0xd96   :  { %v5880_v10 = vadd.f32 %v5829_v61, %v14051_v55  ;;  %v5879_v61 = vadd.f32 %v5826_v51, %v14038_v25 }
 0xd98   :  { %9278 = vmatmul.msk.bf16.gmra.mxu0 %vm4808_vm0, %v14842_v41  ;;  %v9282_v63 = vmul.f32 -1.442695, %v5880_v10  ;;  %v9281_v29 = vmul.f32 -1.442695, %v5879_v61 }
 0xd99   :  { %v10263_v12 = vpop.eup %10262 }
 0xd9a   :  { %10264 = vpow2.f32 %v9282_v63  ;;  %v5919_v17 = vmul.f32 %v10263_v12, %v5913_v18  ;;  %vm5924_vm3 = vweird.f32 %v10263_v12 }
 0xd9b   :  { %vm5925_vm2 = vmor %vm5923_vm4, %vm5924_vm3 }
 0xd9c   :  { %v5920_v28 = vsub.f32 1.0, %v5919_v17 }
 0xd9d   :  { %v5831_v62 = vpop.f32.mrf.mxu0 }
 0xd9e   :  { %v5921_v21 = vmul.f32 %v10263_v12, %v5920_v28 }
 0xda0   :  { %v10265_v39 = vpop.eup %10264  ;;  %v5922_v23 = vadd.f32 %v10263_v12, %v5921_v21 }
 0xda1   :  { %v5915_v37 = vadd.f32 1.0, %v10265_v39 }
 0xda2   :  { %v5926_v43 = vsel %vm5925_vm2, %v10263_v12, %v5922_v23  ;;  %v5881_v12 = vadd.f32 %v5831_v62, %v14055_v35 }
 0xda3   :  { %10266 = vrcp.f32 %v5915_v37  ;;  %v5931_v2 = vsel %vm5928_vm15, %v5930_v32, %v5926_v43  ;;  %v5959_v17 = vand.u32 2147483648, %v5915_v37  ;;  %vm5953_vm14 = vweird.f32 %v5915_v37 }
 0xda4   :  { %v5957_v28 = vand.u32 2147483647, %v5915_v37  ;;  %v9283_v51 = vmul.f32 -1.442695, %v5881_v12 }
 0xda5   :  { %v5834_v54 = vpop.f32.mrf.mxu0 }
 0xda6   :  { %v5882_v23 = vadd.f32 %v5834_v54, %v14059_v50  ;;  %vm5958_vm7 = vcmp.eq.f32.partialorder %v5957_v28, 8.507059e+37 }
 0xda8   :  { %v9284_v62 = vmul.f32 -1.442695, %v5882_v23 }
 0xda9   :  { %v10267_v27 = vpop.eup %10266 }
 0xdaa   :  { %v5949_v8 = vmul.f32 %v10267_v27, %v5915_v37  ;;  %vm5954_vm13 = vweird.f32 %v10267_v27 }
 0xdab   :  { %vm5955_vm9 = vmor %vm5953_vm14, %vm5954_vm13 }
 0xdac   :  { %v5950_v4 = vsub.f32 1.0, %v5949_v8 }
 0xdad   :  { %v14847_v58 = vpop.f32.mrf.mxu0 }
 0xdae   :  { %v5951_v10 = vmul.f32 %v10267_v27, %v5950_v4 }
 0xdb0   :  { %v5952_v18 = vadd.f32 %v10267_v27, %v5951_v10 }
 0xdb2   :  { %v5956_v21 = vsel %vm5955_vm9, %v10267_v27, %v5952_v18 }
 0xdb5   :  { %v14849_v1 = vpop.f32.mrf.mxu0 }
 0xdb6   :  { %v5884_v37 = vadd.f32 %v14849_v1, %v14065_v40 }
 0xdb8   :  { %v9286_v61 = vmul.f32 -1.442695, %v5884_v37 }
 0xdbd   :  { %v14852_v13 = vpop.f32.mrf.mxu0 }
 0xdc5   :  { %v14854_v47 = vpop.f32.mrf.mxu0 }
 0xdc6   :  { %v5886_v4 = vadd.f32 %v14854_v47, %v14078_v7 }
 0xdc8   :  { %v9288_v12 = vmul.f32 -1.442695, %v5886_v4 }
 0xdcd   :  { %v5846_v14 = vpop.f32.mrf.mxu0 }
 0xdce   :  { %v5887_v10 = vadd.f32 %v5846_v14, %v14093_v44 }
 0xdd5   :  { %v5849_v11 = vpop.f32.mrf.mxu0 }
 0xdd6   :  { %v5888_v42 = vadd.f32 %v5849_v11, %v14101_v31  ;;  %v5960_v11 = vor.u32 1.1754944e-38, %v5959_v17 }
 0xdd8   :  { %10268 = vtanh.f32 %v5888_v42  ;;  %v5961_v8 = vsel %vm5958_vm7, %v5960_v11, %v5956_v21 }
 0xdd9   :  { %10270 = vpow2.f32 %v9281_v29 }
 0xddd   :  { %v14857_v16 = vpop.f32.mrf.mxu0 }
 0xdde   :  { %v10269_v60 = vpop.eup %10268 }
 0xddf   :  { %v14860_v34 = vmul.f32 %v10269_v60, %v5931_v2  ;;  %v10271_v42 = vpop.eup %10270  ;;  %v5883_v60 = vadd.f32 %v14847_v58, %v14062_v45  ;;  %v5885_v2 = vadd.f32 %v14852_v13, %v14073_v38  ;;  %v9289_v58 = vmul.f32 -1.442695, %v5887_v10 }
 0xde0   :  { %v14869_v32 = vadd.f32 1.0, %v10271_v42 }
 0xde1   :  { %v9285_v1 = vmul.f32 -1.442695, %v5883_v60  ;;  %v9287_v18 = vmul.f32 -1.442695, %v5885_v2 }
 0xde2   :  { %v5944_v4 = vand.u32 2147483648, %v14869_v32  ;;  %vm5938_vm8 = vweird.f32 %v14869_v32 }
 0xde5   :  { %v5854_v63 = vpop.f32.mrf.mxu0 }
 0xde6   :  { %v5890_v39 = vadd.f32 %v5854_v63, %v14145_v48 }
 0xde8   :  { %10272 = vtanh.f32 %v5890_v39 }
 0xde9   :  { %10274 = vpow2.f32 %v9283_v51 }
 0xdea   :  { %10276 = vrcp.f32 %v14869_v32 }
 0xdeb   :  { %10278 = vpow2.f32 %v9284_v62 }
 0xdec   :  { %10280 = vpow2.f32 %v9286_v61 }
 0xded   :  { %v14865_v49 = vpop.f32.mrf.mxu0 }
 0xdee   :  { %v10273_v57 = vpop.eup %10272 }
 0xdef   :  { %v14867_v43 = vmul.f32 %v10273_v57, %v5961_v8  ;;  %v10275_v54 = vpop.eup %10274 }
 0xdf0   :  { %v14882_v29 = vadd.f32 1.0, %v10275_v54  ;;  %v10277_v63 = vpop.eup %10276 }
 0xdf1   :  { %v10279_v39 = vpop.eup %10278  ;;  %v5934_v13 = vmul.f32 %v10277_v63, %v14869_v32  ;;  %vm5939_vm10 = vweird.f32 %v10277_v63 }
 0xdf2   :  { %10282 = vrcp.f32 %v14882_v29  ;;  %v14887_v28 = vadd.f32 1.0, %v10279_v39  ;;  %v10281_v47 = vpop.eup %10280  ;;  %vm14916_vm5 = vmor %vm5938_vm8, %vm5939_vm10  ;;  %vm5968_vm3 = vweird.f32 %v14882_v29 }
 0xdf3   :  { %10284 = vpow2.f32 %v9285_v1  ;;  %v5935_v14 = vsub.f32 1.0, %v5934_v13  ;;  %v14892_v42 = vadd.f32 1.0, %v10281_v47  ;;  %v5945_v47 = vor.u32 1.1754944e-38, %v5944_v4 }
 0xdf4   :  { %10286 = vpow2.f32 %v9287_v18  ;;  %v5974_v4 = vand.u32 2147483648, %v14882_v29  ;;  %vm5983_vm15 = vweird.f32 %v14887_v28 }
 0xdf5   :  { %v14874_v27 = vpop.f32.mrf.mxu0  ;;  %10288 = vpow2.f32 %v9288_v12  ;;  %v5936_v62 = vmul.f32 %v10277_v63, %v5935_v14  ;;  %vm6033_vm7 = vweird.f32 %v14892_v42 }
 0xdf6   :  { %10290 = vpow2.f32 %v9289_v58  ;;  %v5942_v58 = vand.u32 2147483647, %v14869_v32 }
 0xdf7   :  { %10292 = vrcp.f32 %v14887_v28  ;;  %v5937_v39 = vadd.f32 %v10277_v63, %v5936_v62 }
 0xdf8   :  { %v14890_v21 = vpop.eup %10282  ;;  %10294 = vrcp.f32 %v14892_v42  ;;  %vm5943_vm12 = vcmp.eq.f32.partialorder %v5942_v58, 8.507059e+37 }
 0xdf9   :  { %v10285_v51 = vpop.eup %10284  ;;  %v5964_v8 = vmul.f32 %v14890_v21, %v14882_v29  ;;  %vm5969_vm4 = vweird.f32 %v14890_v21 }
 0xdfa   :  { %v10287_v11 = vpop.eup %10286  ;;  %v14896_v54 = vadd.f32 1.0, %v10285_v51  ;;  %v5941_v51 = vsel %vm14916_vm5, %v10277_v63, %v5937_v39  ;;  %v5989_v63 = vand.u32 2147483648, %v14887_v28  ;;  %vm14957_vm13 = vmor %vm5968_vm3, %vm5969_vm4 }
 0xdfb   :  { %v10289_v57 = vpop.eup %10288  ;;  %v14900_v2 = vadd.f32 1.0, %v10287_v11  ;;  %v5965_v10 = vsub.f32 1.0, %v5964_v8  ;;  %v5972_v8 = vand.u32 2147483647, %v14882_v29  ;;  %v14932_v13 = vsel %vm5943_vm12, %v5945_v47, %v5941_v51 }
 0xdfc   :  { %v10291_v37 = vpop.eup %10290  ;;  %v14903_v61 = vadd.f32 1.0, %v10289_v57  ;;  %10296 = vrcp.f32 %v14896_v54  ;;  %v6024_v29 = vand.u32 2147483648, %v14896_v54  ;;  %v6022_v50 = vand.u32 2147483647, %v14896_v54 }
 0xdfd   :  { %v5861_v17 = vpop.f32.mrf.mxu0  ;;  %v14898_v60 = vpop.eup %10292  ;;  %v14906_v1 = vadd.f32 1.0, %v10291_v37  ;;  %10298 = vrcp.f32 %v14900_v2  ;;  %v17358_v37 = vld [vmem:[#allocation20_spill] sm:$0xff]  ;;  %vm14944_vm2 = vcmp.eq.f32.partialorder %v5972_v8, 8.507059e+37  ;;  %vm6018_vm12 = vweird.f32 %v14896_v54 }
 0xdfe   :  { %v5979_v18 = vmul.f32 %v14898_v60, %v14887_v28  ;;  %v5893_v12 = vadd.f32 %v5861_v17, %v14179_v33  ;;  %10300 = vrcp.f32 %v14903_v61  ;;  %v5966_v17 = vmul.f32 %v14890_v21, %v5965_v10  ;;  %v14925_v57 = vpop.eup %10294 }
 0xdff   :  { %10302 = vrcp.f32 %v14906_v1  ;;  %v6029_v39 = vmul.f32 %v14925_v57, %v14892_v42  ;;  %vm5984_vm14 = vweird.f32 %v14898_v60  ;;  %vm6034_vm10 = vweird.f32 %v14925_v57 }
 0xe00   :  { %v5980_v32 = vsub.f32 1.0, %v5979_v18  ;;  %v9290_v62 = vmul.f32 -1.442695, %v5893_v12  ;;  %v5967_v18 = vadd.f32 %v14890_v21, %v5966_v17  ;;  %v5975_v17 = vor.u32 1.1754944e-38, %v5974_v4  ;;  %vm14993_vm9 = vmor %vm5983_vm15, %vm5984_vm14  ;;  %v17366_v12 = vld [vmem:[#allocation18_spill] sm:$0xff] }
 0xe01   :  { %vm6048_vm3 = vweird.f32 %v14900_v2  ;;  %vm15032_vm4 = vmor %vm6033_vm7, %vm6034_vm10 }
 0xe02   :  { %v14930_v7 = vpop.eup %10296  ;;  %v5981_v58 = vmul.f32 %v14898_v60, %v5980_v32  ;;  %10304 = vpow2.f32 %v9290_v62  ;;  %v14962_v32 = vor.u32 1.1754944e-38, %v5989_v63 }
 0xe03   :  { %v14935_v10 = vpop.eup %10298  ;;  %v6014_v51 = vmul.f32 %v14930_v7, %v14896_v54  ;;  %vm6019_vm8 = vweird.f32 %v14930_v7 }
 0xe04   :  { %v14973_v40 = vadd.f32 %v14898_v60, %v5981_v58 }
 0xe05   :  { %v5864_v23 = vpop.f32.mrf.mxu0  ;;  %v6015_v63 = vsub.f32 1.0, %v6014_v51 }
 0xe06   :  { %v5894_v33 = vadd.f32 %v5864_v23, %v17358_v37  ;;  %v14942_v23 = vpop.eup %10300  ;;  %v6030_v37 = vsub.f32 1.0, %v6029_v39  ;;  %v6039_v39 = vand.u32 2147483648, %v14892_v42 }
 0xe07   :  { %v6059_v4 = vmul.f32 %v14942_v23, %v14903_v61  ;;  %vm6064_vm15 = vweird.f32 %v14942_v23 }
 0xe08   :  { %v9291_v47 = vmul.f32 -1.442695, %v5894_v33  ;;  %v5987_v33 = vand.u32 2147483647, %v14887_v28  ;;  %v6037_v28 = vand.u32 2147483647, %v14892_v42 }
 0xe09   :  { %v6060_v51 = vsub.f32 1.0, %v6059_v4 }
 0xe0a   :  { %vm15011_vm5 = vcmp.eq.f32.partialorder %v5987_v33, 8.507059e+37 }
 0xe0d   :  { %v5866_v14 = vpop.f32.mrf.mxu0 }
 0xe0e   :  { %v5895_v11 = vadd.f32 %v5866_v14, %v17323_v5  ;;  %v14949_v14 = vpop.eup %10302  ;;  %v17363_v5 = vld [vmem:[#allocation22_spill] sm:$0xff] }
 0xe0f   :  { %v6074_v45 = vmul.f32 %v14949_v14, %v14906_v1  ;;  %v10305_v35 = vpop.eup %10304  ;;  %vm6079_vm14 = vweird.f32 %v14949_v14 }
 0xe10   :  { %v9292_v44 = vmul.f32 -1.442695, %v5895_v11  ;;  %v6044_v11 = vmul.f32 %v14935_v10, %v14900_v2 }
 0xe12   :  { %10306 = vpow2.f32 %v9292_v44  ;;  %v5971_v44 = vsel %vm14957_vm13, %v14890_v21, %v5967_v18  ;;  %v6045_v8 = vsub.f32 1.0, %v6044_v11  ;;  %v14978_v21 = vor.u32 1.1754944e-38, %v6024_v29 }
 0xe13   :  { %10308 = vpow2.f32 %v9291_v47  ;;  %v5889_v18 = vadd.f32 %v14857_v16, %v17330_v3  ;;  %v14984_v58 = vsel %vm14944_vm2, %v5975_v17, %v5971_v44  ;;  %v6031_v47 = vmul.f32 %v14925_v57, %v6030_v37  ;;  %v17369_v44 = vld [vmem:[#allocation23_spill] sm:$0xff] }
 0xe14   :  { %v6075_v16 = vsub.f32 1.0, %v6074_v45  ;;  %v5892_v17 = vadd.f32 %v14874_v27, %v17366_v12  ;;  %v6016_v37 = vmul.f32 %v14930_v7, %v6015_v63  ;;  %v6040_v29 = vor.u32 1.1754944e-38, %v6039_v39 }
 0xe15   :  { %v5869_v62 = vpop.f32.mrf.mxu0  ;;  %v15006_v11 = vadd.f32 1.0, %v10305_v35  ;;  %v6046_v45 = vmul.f32 %v14935_v10, %v6045_v8  ;;  %v6061_v35 = vmul.f32 %v14942_v23, %v6060_v51  ;;  %v6054_v39 = vand.u32 2147483648, %v14900_v2 }
 0xe16   :  { %v5896_v38 = vadd.f32 %v5869_v62, %v17363_v5  ;;  %v5891_v5 = vadd.f32 %v14865_v49, %v17331_v6  ;;  %v5986_v49 = vsel %vm14993_vm9, %v14898_v60, %v14973_v40  ;;  %v6032_v60 = vadd.f32 %v14925_v57, %v6031_v47 }
 0xe17   :  { %v6076_v33 = vmul.f32 %v14949_v14, %v6075_v16  ;;  %v6047_v51 = vadd.f32 %v14935_v10, %v6046_v45  ;;  %vm6049_vm2 = vweird.f32 %v14935_v10  ;;  %v6062_v16 = vadd.f32 %v14942_v23, %v6061_v35 }
 0xe18   :  { %v9293_v48 = vmul.f32 -1.442695, %v5896_v38  ;;  %v10307_v62 = vpop.eup %10306  ;;  %v6036_v42 = vsel %vm15032_vm4, %v14925_v57, %v6032_v60  ;;  %vm15047_vm13 = vcmp.eq.f32.partialorder %v6022_v50, 8.507059e+37  ;;  %vm6063_vm9 = vweird.f32 %v14903_v61  ;;  %vm15061_vm7 = vmor %vm6048_vm3, %vm6049_vm2 }
 0xe19   :  { %v10309_v4 = vpop.eup %10308  ;;  %v15015_v40 = vadd.f32 1.0, %v10307_v62  ;;  %v6084_v57 = vand.u32 2147483648, %v14906_v1  ;;  %vm15068_vm10 = vmor %vm6063_vm9, %vm6064_vm15  ;;  %vm6078_vm4 = vweird.f32 %v14906_v1  ;;  %vm6038_vm3 = vcmp.eq.f32.partialorder %v6037_v28, 8.507059e+37 }
 0xe1a   :  { %10310 = vpow2.f32 %v9293_v48  ;;  %v15026_v62 = vadd.f32 1.0, %v10309_v4  ;;  %v6069_v4 = vand.u32 2147483648, %v14903_v61  ;;  %v5991_v12 = vsel %vm15011_vm5, %v14962_v32, %v5986_v49  ;;  %vm15088_vm2 = vmor %vm6078_vm4, %vm6079_vm14 }
 0xe1b   :  { %10312 = vtanh.f32 %v5889_v18  ;;  %v6052_v18 = vand.u32 2147483647, %v14900_v2  ;;  %v6051_v2 = vsel %vm15061_vm7, %v14935_v10, %v6047_v51  ;;  %v6041_v51 = vsel %vm6038_vm3, %v6040_v29, %v6036_v42  ;;  %vm15101_vm5 = vmor %vm6018_vm12, %vm6019_vm8 }
 0xe1c   :  { %10314 = vtanh.f32 %v5891_v5  ;;  %v6055_v5 = vor.u32 1.1754944e-38, %v6054_v39  ;;  %v6085_v39 = vor.u32 1.1754944e-38, %v6084_v57  ;;  %v6189_v54 = vmul.f32 %v6041_v51, %v14690_v52 }
 0xe1d   :  { %v5871_v27 = vpop.f32.mrf.mxu0  ;;  %10316 = vtanh.f32 %v5892_v17  ;;  %vm6053_vm15 = vcmp.eq.f32.partialorder %v6052_v18, 8.507059e+37  ;;  %vm6133_vm12 = vweird.f32 %v15026_v62 }
 0xe1e   :  { %v5897_v63 = vadd.f32 %v5871_v27, %v17369_v44  ;;  %10318 = vrcp.f32 %v15006_v11  ;;  %v6077_v27 = vadd.f32 %v14949_v14, %v6076_v33  ;;  %v6066_v44 = vsel %vm15068_vm10, %v14942_v23, %v6062_v16 }
 0xe1f   :  { %10320 = vrcp.f32 %v15015_v40  ;;  %v6056_v48 = vsel %vm6053_vm15, %v6055_v5, %v6051_v2  ;;  %vm6148_vm15 = vweird.f32 %v15015_v40 }
 0xe20   :  { %v10311_v8 = vpop.eup %10310  ;;  %v9294_v47 = vmul.f32 -1.442695, %v5897_v63  ;;  %v6067_v63 = vand.u32 2147483647, %v14903_v61  ;;  %v6017_v61 = vadd.f32 %v14930_v7, %v6016_v37  ;;  %v6081_v28 = vsel %vm15088_vm2, %v14949_v14, %v6077_v27 }
 0xe21   :  { %v15039_v38 = vadd.f32 1.0, %v10311_v8  ;;  %v10313_v17 = vpop.eup %10312  ;;  %v6082_v8 = vand.u32 2147483647, %v14906_v1  ;;  %v6070_v1 = vor.u32 1.1754944e-38, %v6069_v4 }
 0xe22   :  { %10322 = vpow2.f32 %v9294_v47  ;;  %v10315_v35 = vpop.eup %10314  ;;  %vm6068_vm9 = vcmp.eq.f32.partialorder %v6067_v63, 8.507059e+37  ;;  %v6194_v49 = vmul.f32 %v10313_v17, %v14932_v13  ;;  %v6021_v14 = vsel %vm15101_vm5, %v14930_v7, %v6017_v61 }
 0xe23   :  { %10324 = vrcp.f32 %v15039_v38  ;;  %v10317_v60 = vpop.eup %10316  ;;  %v6071_v18 = vsel %vm6068_vm9, %v6070_v1, %v6066_v44  ;;  %vm6083_vm14 = vcmp.eq.f32.partialorder %v6082_v8, 8.507059e+37  ;;  %v6196_v4 = vmul.f32 %v10315_v35, %v14984_v58 }
 0xe24   :  { %10326 = vrcp.f32 %v15026_v62  ;;  %v15078_v47 = vpop.eup %10318  ;;  %v6086_v27 = vsel %vm6083_vm14, %v6085_v39, %v6081_v28  ;;  %v6190_v17 = vmul.f32 %v6056_v48, %v14696_v53  ;;  %v6197_v63 = vmul.f32 %v10317_v60, %v5991_v12 }
 0xe25   :  { %v15092_v10 = vpop.eup %10320  ;;  %v6026_v44 = vsel %vm15047_vm13, %v14978_v21, %v6021_v14  ;;  %v15126_v57 = vadd.f32 %v6194_v49, %v6189_v54  ;;  %v6191_v52 = vmul.f32 %v6071_v18, %v14701_v26  ;;  %v6114_v58 = vmul.f32 %v15078_v47, %v15006_v11 }
 0xe26   :  { %v6144_v7 = vmul.f32 %v15092_v10, %v15015_v40  ;;  %v15132_v35 = vadd.f32 %v14867_v43, %v6190_v17  ;;  %v6192_v53 = vmul.f32 %v6086_v27, %v14703_v56  ;;  %v6188_v33 = vmul.f32 %v6026_v44, %v14710_v22 }
 0xe27   :  { %v15137_v60 = vadd.f32 %v6196_v4, %v6191_v52  ;;  %v6115_v26 = vsub.f32 1.0, %v6114_v58  ;;  %vm6119_vm8 = vweird.f32 %v15078_v47  ;;  %v6169_v48 = vand.u32 2147483648, %v15039_v38 }
 0xe28   :  { %v10323_v23 = vpop.eup %10322  ;;  %v15139_v45 = vadd.f32 %v6197_v63, %v6192_v53  ;;  %v6145_v21 = vsub.f32 1.0, %v6144_v7  ;;  %v15146_v2 = vadd.f32 %v14860_v34, %v6188_v33  ;;  %v6137_v34 = vand.u32 2147483647, %v15026_v62 }
 0xe29   :  { %v15106_v29 = vpop.eup %10324  ;;  %v15111_v16 = vadd.f32 1.0, %v10323_v23  ;;  %v6116_v37 = vmul.f32 %v15078_v47, %v6115_v26  ;;  %vm6149_vm4 = vweird.f32 %v15092_v10  ;;  %vm6163_vm3 = vweird.f32 %v15039_v38 }
 0xe2a   :  { %v15113_v42 = vpop.eup %10326  ;;  %v6159_v13 = vmul.f32 %v15106_v29, %v15039_v38  ;;  %v6146_v22 = vmul.f32 %v15092_v10, %v6145_v21  ;;  %vm6164_vm7 = vweird.f32 %v15106_v29  ;;  %v6167_v18 = vand.u32 2147483647, %v15039_v38 }
 0xe2b   :  { %10328 = vrcp.f32 %v15111_v16  ;;  %v6129_v12 = vmul.f32 %v15113_v42, %v15026_v62  ;;  %vm6134_vm13 = vweird.f32 %v15113_v42  ;;  %v6184_v1 = vand.u32 2147483648, %v15111_v16  ;;  %vm15172_vm9 = vmor %vm6163_vm3, %vm6164_vm7 }
 0xe2c   :  { %v6160_v50 = vsub.f32 1.0, %v6159_v13  ;;  %10330 = vtanh.f32 %v15126_v57  ;;  %v6182_v49 = vand.u32 2147483647, %v15111_v16  ;;  %v6147_v14 = vadd.f32 %v15092_v10, %v6146_v22  ;;  %vm15184_vm7 = vmor %vm6148_vm15, %vm6149_vm4 }
 0xe2d   :  { %10332 = vtanh.f32 %v15132_v35  ;;  %v6130_v43 = vsub.f32 1.0, %v6129_v12  ;;  %vm6178_vm2 = vweird.f32 %v15111_v16  ;;  %v6154_v27 = vand.u32 2147483648, %v15015_v40  ;;  %vm15198_vm4 = vmor %vm6133_vm12, %vm6134_vm13 }
 0xe2e   :  { %v6161_v56 = vmul.f32 %v15106_v29, %v6160_v50  ;;  %10334 = vtanh.f32 %v15137_v60  ;;  %v6185_v63 = vor.u32 1.1754944e-38, %v6184_v1  ;;  %v6152_v38 = vand.u32 2147483647, %v15015_v40 }
 0xe2f   :  { %10336 = vtanh.f32 %v15139_v45  ;;  %v6131_v28 = vmul.f32 %v15113_v42, %v6130_v43  ;;  %vm6183_vm14 = vcmp.eq.f32.partialorder %v6182_v49, 8.507059e+37  ;;  %v6170_v58 = vor.u32 1.1754944e-38, %v6169_v48 }
 0xe30   :  { %v6162_v51 = vadd.f32 %v15106_v29, %v6161_v56  ;;  %v6139_v53 = vand.u32 2147483648, %v15026_v62  ;;  %v6151_v40 = vsel %vm15184_vm7, %v15092_v10, %v6147_v14  ;;  %v6155_v21 = vor.u32 1.1754944e-38, %v6154_v27 }
 0xe31   :  { %v10329_v61 = vpop.eup %10328  ;;  %v6132_v7 = vadd.f32 %v15113_v42, %v6131_v28  ;;  %v6124_v26 = vand.u32 2147483648, %v15006_v11  ;;  %vm6153_vm3 = vcmp.eq.f32.partialorder %v6152_v38, 8.507059e+37  ;;  %v6122_v10 = vand.u32 2147483647, %v15006_v11 }
 0xe32   :  { %v6174_v8 = vmul.f32 %v10329_v61, %v15111_v16  ;;  %v10331_v23 = vpop.eup %10330  ;;  %vm6179_vm10 = vweird.f32 %v10329_v61  ;;  %v6166_v16 = vsel %vm15172_vm9, %v15106_v29, %v6162_v51  ;;  %v6117_v29 = vadd.f32 %v15078_v47, %v6116_v37 }
 0xe33   :  { %v10333_v39 = vpop.eup %10332  ;;  %vm6180_vm5 = vmor %vm6178_vm2, %vm6179_vm10  ;;  %vm6168_vm10 = vcmp.eq.f32.partialorder %v6167_v18, 8.507059e+37  ;;  %vm6118_vm2 = vweird.f32 %v15006_v11  ;;  %v6136_v43 = vsel %vm15198_vm4, %v15113_v42, %v6132_v7  ;;  %10338 = vtanh.f32 %v15146_v2 }
 0xe34   :  { %v6175_v5 = vsub.f32 1.0, %v6174_v8  ;;  %v10335_v54 = vpop.eup %10334  ;;  %v6171_v33 = vsel %vm6168_vm10, %v6170_v58, %v6166_v16  ;;  %v6156_v8 = vsel %vm6153_vm3, %v6155_v21, %v6151_v40  ;;  %vm6120_vm15 = vmor %vm6118_vm2, %vm6119_vm8  ;;  %v6140_v62 = vor.u32 1.1754944e-38, %v6139_v53 }
 0xe35   :  { %v10337_v17 = vpop.eup %10336  ;;  %v6211_v22 = vmul.f32 %v10335_v54, %v6171_v33  ;;  %vm6138_vm12 = vcmp.eq.f32.partialorder %v6137_v34, 8.507059e+37  ;;  %v6125_v1 = vor.u32 1.1754944e-38, %v6124_v26  ;;  %v6210_v51 = vmul.f32 %v10333_v39, %v6156_v8 }
 0xe36   :  { %v6176_v32 = vmul.f32 %v10329_v61, %v6175_v5  ;;  %v6121_v5 = vsel %vm6120_vm15, %v15078_v47, %v6117_v29  ;;  %v6141_v11 = vsel %vm6138_vm12, %v6140_v62, %v6136_v43  ;;  %vm6123_vm13 = vcmp.eq.f32.partialorder %v6122_v10, 8.507059e+37  ;;  %v17388_v62 = vld [vmem:[#allocation7_spill] sm:$0xff] }
 0xe37   :  { %v6126_v42 = vsel %vm6123_vm13, %v6125_v1, %v6121_v5  ;;  %v6214_v28 = vpack.c.bf16 %v6211_v22, %v6210_v51  ;;  %v17389_v5 = vld [vmem:[#allocation16_spill] sm:$0xff] }
 0xe38   :  { %v6177_v4 = vadd.f32 %v10329_v61, %v6176_v32  ;;  %v6209_v32 = vmul.f32 %v10331_v23, %v6141_v11 }
 0xe39   :  { %v10339_v49 = vpop.eup %10338 }
 0xe3a   :  { %v6181_v44 = vsel %vm6180_vm5, %v10329_v61, %v6177_v4  ;;  %v6208_v48 = vmul.f32 %v10339_v49, %v6126_v42 }
 0xe3b   :  { %v6186_v12 = vsel %vm6183_vm14, %v6185_v63, %v6181_v44 }
 0xe3c   :  { %v6212_v50 = vmul.f32 %v10337_v17, %v6186_v12  ;;  %v6213_v14 = vpack.c.bf16 %v6209_v32, %v6208_v48  ;;  %v17390_v48 = vld [vmem:[#allocation6_spill] sm:$0xff] }
 0xe3e   :  { %v6215_v56 = vpack.c.bf16 %v6212_v50, %v6212_v50 }
 0xe40   :  { %v6217_v37 = vsel %vm51_vm6, %v6215_v56, 0 }
 0xe41   :  { %6224 = vmatpush.bf16.msra.mxu3 %v6217_v37 }
 0xe45   :  { %6225 = vmatpush.bf16.msra.mxu3 %v6214_v28 }
 0xe49   :  { %6226 = vmatpush.bf16.msra.mxu3 %v6213_v14 }
 0xe4c   :  { %9295 = vmatmul.msk.bf16.vlgmr.msra.gmra.mxu3 %vm4808_vm0, %v14779_v20 }
 0xe5c   :  { %9296 = vmatmul.msk.bf16.gmra.mxu3 %vm4808_vm0, %v14786_v59 }
 0xe6c   :  { %9297 = vmatmul.msk.bf16.gmra.mxu3 %vm4808_vm0, %v14793_v19 }
 0xe7c   :  { %9298 = vmatmul.msk.bf16.gmra.mxu3 %vm4808_vm0, %v14800_v9 }
 0xe8c   :  { %9299 = vmatmul.msk.bf16.gmra.mxu3 %vm4808_vm0, %v14807_v46 }
 0xe9c   :  { %9300 = vmatmul.msk.bf16.gmra.mxu3 %vm4808_vm0, %v14814_v15 }
 0xeac   :  { %9301 = vmatmul.msk.bf16.gmra.mxu3 %vm4808_vm0, %v14821_v24 }
 0xebc   :  { %9302 = vmatmul.msk.bf16.gmra.mxu3 %vm4808_vm0, %v14828_v0 }
 0xecc   :  { %9303 = vmatmul.msk.bf16.gmra.mxu3 %vm4808_vm0, %v14835_v36 }
 0xecf   :  { %v6228_v20 = vpop.f32.mrf.mxu3 }
 0xed0   :  { %v6282_v47 = vadd.f32 %v6228_v20, %v14034_v30 }
 0xed2   :  { %v9306_v34 = vmul.f32 -1.442695, %v6282_v47 }
 0xed4   :  { %10340 = vpow2.f32 %v9306_v34 }
 0xed7   :  { %v6230_v59 = vpop.f32.mrf.mxu3 }
 0xed8   :  { %v6283_v26 = vadd.f32 %v6230_v59, %v14038_v25 }
 0xeda   :  { %v10341_v0 = vpop.eup %10340  ;;  %v9307_v43 = vmul.f32 -1.442695, %v6283_v26 }
 0xedb   :  { %v6317_v39 = vadd.f32 1.0, %v10341_v0 }
 0xedc   :  { %9304 = vmatmul.msk.bf16.gmra.mxu3 %vm4808_vm0, %v14842_v41 }
 0xedd   :  { %10342 = vrcp.f32 %v6317_v39  ;;  %v6333_v58 = vand.u32 2147483648, %v6317_v39  ;;  %vm6327_vm9 = vweird.f32 %v6317_v39  ;;  %v6331_v53 = vand.u32 2147483647, %v6317_v39 }
 0xedf   :  { %v6233_v19 = vpop.f32.mrf.mxu3  ;;  %v6334_v29 = vor.u32 1.1754944e-38, %v6333_v58  ;;  %vm6332_vm14 = vcmp.eq.f32.partialorder %v6331_v53, 8.507059e+37 }
 0xee0   :  { %v6284_v23 = vadd.f32 %v6233_v19, %v14051_v55 }
 0xee2   :  { %v9308_v18 = vmul.f32 -1.442695, %v6284_v23  ;;  %v17391_v23 = vld [vmem:[#allocation9_spill] sm:$0xff] }
 0xee3   :  { %v10343_v54 = vpop.eup %10342 }
 0xee4   :  { %10344 = vpow2.f32 %v9308_v18  ;;  %v6323_v27 = vmul.f32 %v10343_v54, %v6317_v39  ;;  %vm6328_vm8 = vweird.f32 %v10343_v54 }
 0xee5   :  { %vm6329_vm5 = vmor %vm6327_vm9, %vm6328_vm8 }
 0xee6   :  { %v6324_v63 = vsub.f32 1.0, %v6323_v27  ;;  %v17393_v27 = vld [vmem:[#allocation8_spill] sm:$0xff] }
 0xee7   :  { %v6235_v9 = vpop.f32.mrf.mxu3 }
 0xee8   :  { %v6325_v38 = vmul.f32 %v10343_v54, %v6324_v63  ;;  %v6285_v22 = vadd.f32 %v6235_v9, %v17388_v62 }
 0xeea   :  { %v10345_v4 = vpop.eup %10344  ;;  %v6326_v44 = vadd.f32 %v10343_v54, %v6325_v38  ;;  %v9309_v42 = vmul.f32 -1.442695, %v6285_v22  ;;  %v17394_v38 = vld [vmem:[#allocation12_spill] sm:$0xff] }
 0xeeb   :  { %v6319_v17 = vadd.f32 1.0, %v10345_v4 }
 0xeec   :  { %v6330_v40 = vsel %vm6329_vm5, %v10343_v54, %v6326_v44 }
 0xeed   :  { %10346 = vrcp.f32 %v6319_v17  ;;  %v6335_v33 = vsel %vm6332_vm14, %v6334_v29, %v6330_v40  ;;  %v6363_v11 = vand.u32 2147483648, %v6319_v17  ;;  %vm6357_vm10 = vweird.f32 %v6319_v17 }
 0xeee   :  { %v6361_v51 = vand.u32 2147483647, %v6319_v17 }
 0xeef   :  { %v6238_v46 = vpop.f32.mrf.mxu3  ;;  %v6364_v32 = vor.u32 1.1754944e-38, %v6363_v11 }
 0xef0   :  { %v6286_v14 = vadd.f32 %v6238_v46, %v17390_v48  ;;  %vm6362_vm3 = vcmp.eq.f32.partialorder %v6361_v51, 8.507059e+37  ;;  %v17392_v46 = vld [vmem:[#allocation13_spill] sm:$0xff] }
 0xef2   :  { %v9310_v34 = vmul.f32 -1.442695, %v6286_v14 }
 0xef3   :  { %v10347_v52 = vpop.eup %10346 }
 0xef4   :  { %v6353_v12 = vmul.f32 %v10347_v52, %v6319_v17  ;;  %vm6358_vm7 = vweird.f32 %v10347_v52 }
 0xef5   :  { %vm6359_vm4 = vmor %vm6357_vm10, %vm6358_vm7 }
 0xef6   :  { %v6354_v61 = vsub.f32 1.0, %v6353_v12 }
 0xef7   :  { %v15233_v15 = vpop.f32.mrf.mxu3 }
 0xef8   :  { %v6355_v56 = vmul.f32 %v10347_v52, %v6354_v61  ;;  %v6287_v54 = vadd.f32 %v15233_v15, %v17392_v46 }
 0xefa   :  { %v6356_v1 = vadd.f32 %v10347_v52, %v6355_v56 }
 0xefc   :  { %v6360_v28 = vsel %vm6359_vm4, %v10347_v52, %v6356_v1 }
 0xefd   :  { %v6365_v19 = vsel %vm6362_vm3, %v6364_v32, %v6360_v28 }
 0xeff   :  { %v15235_v24 = vpop.f32.mrf.mxu3 }
 0xf00   :  { %v6288_v39 = vadd.f32 %v15235_v24, %v17391_v23  ;;  %v9311_v24 = vmul.f32 -1.442695, %v6287_v54 }
 0xf02   :  { %v9312_v63 = vmul.f32 -1.442695, %v6288_v39 }
 0xf07   :  { %v15238_v36 = vpop.f32.mrf.mxu3 }
 0xf08   :  { %v6289_v17 = vadd.f32 %v15238_v36, %v17393_v27 }
 0xf0a   :  { %v9313_v53 = vmul.f32 -1.442695, %v6289_v17 }
 0xf0f   :  { %v15240_v41 = vpop.f32.mrf.mxu3 }
 0xf17   :  { %v6250_v13 = vpop.f32.mrf.mxu3 }
 0xf1f   :  { %v6253_v16 = vpop.f32.mrf.mxu3 }
 0xf20   :  { %v6292_v7 = vadd.f32 %v6253_v16, %v14101_v31  ;;  %v6290_v16 = vadd.f32 %v15240_v41, %v17394_v38 }
 0xf22   :  { %10348 = vtanh.f32 %v6292_v7  ;;  %v17395_v7 = vld [vmem:[#allocation11_spill] sm:$0xff]  ;;  %v9314_v15 = vmul.f32 -1.442695, %v6290_v16 }
 0xf23   :  { %10350 = vpow2.f32 %v9307_v43  ;;  %v6291_v44 = vadd.f32 %v6250_v13, %v17395_v7 }
 0xf25   :  { %v9315_v40 = vmul.f32 -1.442695, %v6291_v44 }
 0xf27   :  { %v15243_v50 = vpop.f32.mrf.mxu3 }
 0xf28   :  { %v10349_v21 = vpop.eup %10348 }
 0xf29   :  { %v15246_v10 = vmul.f32 %v10349_v21, %v6335_v33  ;;  %v10351_v49 = vpop.eup %10350 }
 0xf2a   :  { %v15255_v47 = vadd.f32 1.0, %v10351_v49 }
 0xf2c   :  { %vm6342_vm15 = vweird.f32 %v15255_v47  ;;  %v6346_v39 = vand.u32 2147483647, %v15255_v47 }
 0xf2e   :  { %vm6347_vm13 = vcmp.eq.f32.partialorder %v6346_v39, 8.507059e+37  ;;  %v4921_v39 = vld [vmem:[%s17006_s8 + $0x50] sm:$0x1] }
 0xf2f   :  { %v6258_v8 = vpop.f32.mrf.mxu3 }
 0xf30   :  { %v6294_v37 = vadd.f32 %v6258_v8, %v17389_v5 }
 0xf32   :  { %10352 = vtanh.f32 %v6294_v37 }
 0xf33   :  { %10354 = vpow2.f32 %v9309_v42 }
 0xf34   :  { %10356 = vrcp.f32 %v15255_v47 }
 0xf35   :  { %10358 = vpow2.f32 %v9310_v34 }
 0xf37   :  { %v15251_v20 = vpop.f32.mrf.mxu3 }
 0xf38   :  { %v10353_v59 = vpop.eup %10352 }
 0xf39   :  { %v15253_v9 = vmul.f32 %v10353_v59, %v6365_v19  ;;  %v10355_v0 = vpop.eup %10354  ;;  %v6348_v59 = vand.u32 2147483648, %v15255_v47  ;;  %v17396_v19 = vld [vmem:[#allocation19_spill] sm:$0xff] }
 0xf3a   :  { %v15264_v4 = vadd.f32 1.0, %v10355_v0  ;;  %v15271_v52 = vpop.eup %10356 }
 0xf3b   :  { %v10359_v58 = vpop.eup %10358  ;;  %v6338_v12 = vmul.f32 %v15271_v52, %v15255_v47  ;;  %vm6343_vm2 = vweird.f32 %v15271_v52 }
 0xf3c   :  { %10360 = vrcp.f32 %v15264_v4  ;;  %v15276_v29 = vadd.f32 1.0, %v10359_v58  ;;  %vm15306_vm12 = vmor %vm6342_vm15, %vm6343_vm2  ;;  %v6376_v16 = vand.u32 2147483647, %v15264_v4  ;;  %v6378_v44 = vand.u32 2147483648, %v15264_v4 }
 0xf3d   :  { %10362 = vpow2.f32 %v9312_v63  ;;  %v6339_v13 = vsub.f32 1.0, %v6338_v12  ;;  %vm6372_vm9 = vweird.f32 %v15264_v4 }
 0xf3e   :  { %10364 = vpow2.f32 %v9311_v24  ;;  %v17399_v24 = vld [vmem:[#allocation21_spill] sm:$0xff]  ;;  %vm15335_vm5 = vcmp.eq.f32.partialorder %v6376_v16, 8.507059e+37  ;;  %vm6387_vm14 = vweird.f32 %v15276_v29 }
 0xf3f   :  { %v15260_v18 = vpop.f32.mrf.mxu3  ;;  %10366 = vpow2.f32 %v9313_v53  ;;  %v6340_v56 = vmul.f32 %v15271_v52, %v6339_v13 }
 0xf40   :  { %10368 = vpow2.f32 %v9314_v15  ;;  %v6349_v15 = vor.u32 1.1754944e-38, %v6348_v59 }
 0xf41   :  { %10370 = vpow2.f32 %v9315_v40  ;;  %v6341_v32 = vadd.f32 %v15271_v52, %v6340_v56  ;;  %v17400_v40 = vld [vmem:[#allocation20_spill] sm:$0xff] }
 0xf42   :  { %v15278_v41 = vpop.eup %10360  ;;  %10372 = vrcp.f32 %v15276_v29 }
 0xf43   :  { %v10363_v21 = vpop.eup %10362  ;;  %v6368_v61 = vmul.f32 %v15278_v41, %v15264_v4  ;;  %v6345_v54 = vsel %vm15306_vm12, %v15271_v52, %v6341_v32  ;;  %v6393_v52 = vand.u32 2147483648, %v15276_v29  ;;  %vm6373_vm8 = vweird.f32 %v15278_v41 }
 0xf44   :  { %v10365_v33 = vpop.eup %10364  ;;  %v15283_v43 = vadd.f32 1.0, %v10363_v21  ;;  %vm15347_vm7 = vmor %vm6372_vm9, %vm6373_vm8 }
 0xf45   :  { %v10367_v26 = vpop.eup %10366  ;;  %v15286_v1 = vadd.f32 1.0, %v10365_v33  ;;  %v6369_v42 = vsub.f32 1.0, %v6368_v61  ;;  %v15326_v33 = vsel %vm6347_vm13, %v6349_v15, %v6345_v54  ;;  %v15352_v0 = vor.u32 1.1754944e-38, %v6393_v52  ;;  %v17405_v15 = vld [vmem:[#allocation22_spill] sm:$0xff] }
 0xf46   :  { %v10369_v22 = vpop.eup %10368  ;;  %v15290_v51 = vadd.f32 1.0, %v10367_v26  ;;  %10374 = vrcp.f32 %v15283_v43  ;;  %vm6437_vm3 = vweird.f32 %v15283_v43 }
 0xf47   :  { %v6265_v36 = vpop.f32.mrf.mxu3  ;;  %v10371_v37 = vpop.eup %10370  ;;  %v15294_v28 = vadd.f32 1.0, %v10369_v22  ;;  %10376 = vrcp.f32 %v15286_v1  ;;  %v6370_v17 = vmul.f32 %v15278_v41, %v6369_v42  ;;  %v6379_v22 = vor.u32 1.1754944e-38, %v6378_v44 }
 0xf48   :  { %v15288_v11 = vpop.eup %10372  ;;  %v15297_v49 = vadd.f32 1.0, %v10371_v37  ;;  %v6297_v34 = vadd.f32 %v6265_v36, %v17396_v19  ;;  %10378 = vrcp.f32 %v15290_v51  ;;  %v6428_v54 = vand.u32 2147483648, %v15286_v1 }
 0xf49   :  { %v6383_v14 = vmul.f32 %v15288_v11, %v15276_v29  ;;  %10380 = vrcp.f32 %v15294_v28  ;;  %v6371_v26 = vadd.f32 %v15278_v41, %v6370_v17  ;;  %v4963_v44 = vunpack.c.l.b16 %v4921_v39 }
 0xf4a   :  { %10382 = vrcp.f32 %v15297_v49  ;;  %v9316_v12 = vmul.f32 -1.442695, %v6297_v34  ;;  %v6391_v34 = vand.u32 2147483647, %v15276_v29  ;;  %vm6388_vm10 = vweird.f32 %v15288_v11 }
 0xf4b   :  { %v6384_v47 = vsub.f32 1.0, %v6383_v14  ;;  %vm15395_vm4 = vmor %vm6387_vm14, %vm6388_vm10  ;;  %vm6422_vm13 = vweird.f32 %v15286_v1  ;;  %vm6452_vm8 = vweird.f32 %v15290_v51 }
 0xf4c   :  { %v15320_v53 = vpop.eup %10374  ;;  %10384 = vpow2.f32 %v9316_v12  ;;  %vm15417_vm12 = vcmp.eq.f32.partialorder %v6391_v34, 8.507059e+37 }
 0xf4d   :  { %v15324_v21 = vpop.eup %10376  ;;  %v6433_v56 = vmul.f32 %v15320_v53, %v15283_v43  ;;  %v6385_v42 = vmul.f32 %v15288_v11, %v6384_v47  ;;  %vm6438_vm2 = vweird.f32 %v15320_v53 }
 0xf4e   :  { %v15330_v61 = vpop.eup %10378  ;;  %v6418_v59 = vmul.f32 %v15324_v21, %v15286_v1  ;;  %vm6423_vm15 = vweird.f32 %v15324_v21  ;;  %vm15438_vm9 = vmor %vm6437_vm3, %vm6438_vm2 }
 0xf4f   :  { %v6268_v8 = vpop.f32.mrf.mxu3  ;;  %v15339_v37 = vpop.eup %10380  ;;  %v6448_v17 = vmul.f32 %v15330_v61, %v15290_v51  ;;  %v15370_v52 = vadd.f32 %v15288_v11, %v6385_v42 }
 0xf50   :  { %v6298_v36 = vadd.f32 %v6268_v8, %v17400_v40  ;;  %v15343_v14 = vpop.eup %10382  ;;  %v6463_v47 = vmul.f32 %v15339_v37, %v15294_v28  ;;  %vm6468_vm14 = vweird.f32 %v15339_v37 }
 0xf51   :  { %v6449_v40 = vsub.f32 1.0, %v6448_v17  ;;  %v6390_v29 = vsel %vm15395_vm4, %v15288_v11, %v15370_v52  ;;  %vm6483_vm10 = vweird.f32 %v15343_v14  ;;  %vm6467_vm4 = vweird.f32 %v15294_v28 }
 0xf52   :  { %v9317_v32 = vmul.f32 -1.442695, %v6298_v36  ;;  %v6478_v36 = vmul.f32 %v15343_v14, %v15297_v49  ;;  %v10385_v39 = vpop.eup %10384  ;;  %vm15474_vm2 = vmor %vm6467_vm4, %vm6468_vm14  ;;  %v6395_v19 = vsel %vm15417_vm12, %v15352_v0, %v6390_v29 }
 0xf53   :  { %vm15507_vm12 = vmor %vm6422_vm13, %vm6423_vm15 }
 0xf54   :  { %v6479_v8 = vsub.f32 1.0, %v6478_v36  ;;  %v6450_v36 = vmul.f32 %v15330_v61, %v6449_v40  ;;  %v6458_v40 = vand.u32 2147483648, %v15290_v51 }
 0xf56   :  { %v6480_v34 = vmul.f32 %v15343_v14, %v6479_v8 }
 0xf57   :  { %v6270_v63 = vpop.f32.mrf.mxu3 }
 0xf58   :  { %v6299_v58 = vadd.f32 %v6270_v63, %v17399_v24  ;;  %v6375_v63 = vsel %vm15347_vm7, %v15278_v41, %v6371_v26  ;;  %v6419_v41 = vsub.f32 1.0, %v6418_v59  ;;  %v6443_v26 = vand.u32 2147483648, %v15283_v43 }
 0xf59   :  { %v15376_v24 = vor.u32 1.1754944e-38, %v6428_v54  ;;  %v15382_v42 = vsel %vm15335_vm5, %v6379_v22, %v6375_v63  ;;  %v6295_v54 = vadd.f32 %v15251_v20, %v17331_v6  ;;  %v17408_v22 = vld [vmem:[#allocation18_spill] sm:$0xff]  ;;  %v6441_v63 = vand.u32 2147483647, %v15283_v43 }
 0xf5a   :  { %v9318_v13 = vmul.f32 -1.442695, %v6299_v58  ;;  %v6434_v58 = vsub.f32 1.0, %v6433_v56  ;;  %v6426_v56 = vand.u32 2147483647, %v15286_v1  ;;  %v6296_v20 = vadd.f32 %v15260_v18, %v17408_v22 }
 0xf5b   :  { %v6420_v17 = vmul.f32 %v15324_v21, %v6419_v41  ;;  %vm6453_vm5 = vweird.f32 %v15330_v61 }
 0xf5c   :  { %10386 = vpow2.f32 %v9318_v13  ;;  %v15372_v13 = vpack.c.b16 %v4963_v44, %v4963_v44  ;;  %v6435_v59 = vmul.f32 %v15320_v53, %v6434_v58  ;;  %v6464_v44 = vsub.f32 1.0, %v6463_v47  ;;  %vm15467_vm3 = vmor %vm6452_vm8, %vm6453_vm5 }
 0xf5d   :  { %10388 = vpow2.f32 %v9317_v32  ;;  %v6444_v58 = vor.u32 1.1754944e-38, %v6443_v26  ;;  %v15412_v47 = vadd.f32 1.0, %v10385_v39  ;;  %vm15453_vm7 = vcmp.eq.f32.partialorder %v6426_v56, 8.507059e+37 }
 0xf5e   :  { %9227 = vmatmul.msk.bf16.gmra.mxu1 %vm4808_vm0, %v15372_v13  ;;  %9253 = vmatmul.msk.bf16.gmra.mxu2 %vm4808_vm0, %v15372_v13  ;;  %v6436_v41 = vadd.f32 %v15320_v53, %v6435_v59  ;;  %v6465_v26 = vmul.f32 %v15339_v37, %v6464_v44  ;;  %vm6442_vm8 = vcmp.eq.f32.partialorder %v6441_v63, 8.507059e+37 }
 0xf5f   :  { %v6273_v16 = vpop.f32.mrf.mxu3  ;;  %9305 = vmatmul.msk.bf16.gmra.mxu3 %vm4808_vm0, %v15372_v13  ;;  %9279 = vmatmul.msk.bf16.gmra.mxu0 %vm4808_vm0, %v15372_v13 }
 0xf60   :  { %v6300_v12 = vadd.f32 %v6273_v16, %v17405_v15  ;;  %v6293_v16 = vadd.f32 %v15243_v50, %v17330_v3  ;;  %v6451_v50 = vadd.f32 %v15330_v61, %v6450_v36  ;;  %v6440_v43 = vsel %vm15438_vm9, %v15320_v53, %v6436_v41 }
 0xf61   :  { %v6488_v53 = vand.u32 2147483648, %v15297_v49  ;;  %vm6482_vm9 = vweird.f32 %v15297_v49 }
 0xf62   :  { %v9319_v4 = vmul.f32 -1.442695, %v6300_v12  ;;  %v10387_v32 = vpop.eup %10386  ;;  %vm15494_vm5 = vmor %vm6482_vm9, %vm6483_vm10 }
 0xf63   :  { %v10389_v12 = vpop.eup %10388  ;;  %v15421_v11 = vadd.f32 1.0, %v10387_v32  ;;  %v6456_v32 = vand.u32 2147483647, %v15290_v51  ;;  %v6455_v51 = vsel %vm15467_vm3, %v15330_v61, %v6451_v50  ;;  %v6445_v50 = vsel %vm6442_vm8, %v6444_v58, %v6440_v43 }
 0xf64   :  { %10390 = vpow2.f32 %v9319_v4  ;;  %v17411_v4 = vld [vmem:[#allocation23_spill] sm:$0xff]  ;;  %v15432_v59 = vadd.f32 1.0, %v10389_v12  ;;  %v6593_v1 = vmul.f32 %v6445_v50, %v15126_v57 }
 0xf65   :  { %10392 = vtanh.f32 %v6293_v16  ;;  %vm6457_vm14 = vcmp.eq.f32.partialorder %v6456_v32, 8.507059e+37 }
 0xf66   :  { %10394 = vtanh.f32 %v6295_v54  ;;  %vm6537_vm13 = vweird.f32 %v15432_v59 }
 0xf67   :  { %v6275_v52 = vpop.f32.mrf.mxu3  ;;  %10396 = vtanh.f32 %v6296_v20  ;;  %v6466_v20 = vadd.f32 %v15339_v37, %v6465_v26 }
 0xf68   :  { %v6301_v39 = vadd.f32 %v6275_v52, %v17411_v4  ;;  %10398 = vrcp.f32 %v15412_v47  ;;  %v6473_v52 = vand.u32 2147483648, %v15294_v28  ;;  %v6459_v4 = vor.u32 1.1754944e-38, %v6458_v40 }
 0xf69   :  { %10400 = vrcp.f32 %v15421_v11  ;;  %v6470_v15 = vsel %vm15474_vm2, %v15339_v37, %v6466_v20  ;;  %v6489_v40 = vor.u32 1.1754944e-38, %v6488_v53 }
 0xf6a   :  { %v10391_v16 = vpop.eup %10390  ;;  %v9320_v44 = vmul.f32 -1.442695, %v6301_v39  ;;  %v6481_v39 = vadd.f32 %v15343_v14, %v6480_v34  ;;  %v6460_v18 = vsel %vm6457_vm14, %v6459_v4, %v6455_v51  ;;  %vm6552_vm14 = vweird.f32 %v15421_v11 }
 0xf6b   :  { %v15445_v8 = vadd.f32 1.0, %v10391_v16  ;;  %v10393_v12 = vpop.eup %10392  ;;  %v6471_v16 = vand.u32 2147483647, %v15294_v28  ;;  %v6421_v28 = vadd.f32 %v15324_v21, %v6420_v17  ;;  %v6594_v4 = vmul.f32 %v6460_v18, %v15132_v35 }
 0xf6c   :  { %10402 = vpow2.f32 %v9320_v44  ;;  %v10395_v26 = vpop.eup %10394  ;;  %v6486_v44 = vand.u32 2147483647, %v15297_v49  ;;  %v6474_v49 = vor.u32 1.1754944e-38, %v6473_v52  ;;  %v6485_v63 = vsel %vm15494_vm5, %v15343_v14, %v6481_v39 }
 0xf6d   :  { %10404 = vrcp.f32 %v15445_v8  ;;  %v10397_v41 = vpop.eup %10396  ;;  %vm6472_vm4 = vcmp.eq.f32.partialorder %v6471_v16, 8.507059e+37  ;;  %v6598_v29 = vmul.f32 %v10393_v12, %v15326_v33  ;;  %v6425_v14 = vsel %vm15507_vm12, %v15324_v21, %v6421_v28 }
 0xf6e   :  { %10406 = vrcp.f32 %v15432_v59  ;;  %v15484_v54 = vpop.eup %10398  ;;  %v6475_v32 = vsel %vm6472_vm4, %v6474_v49, %v6470_v15  ;;  %vm6487_vm10 = vcmp.eq.f32.partialorder %v6486_v44, 8.507059e+37  ;;  %v6600_v52 = vmul.f32 %v10395_v26, %v15382_v42 }
 0xf6f   :  { %v15498_v61 = vpop.eup %10400  ;;  %v6490_v39 = vsel %vm6487_vm10, %v6489_v40, %v6485_v63  ;;  %v6601_v12 = vmul.f32 %v10397_v41, %v6395_v19  ;;  %v6430_v15 = vsel %vm15453_vm7, %v15376_v24, %v6425_v14  ;;  %v15532_v16 = vadd.f32 %v6598_v29, %v6593_v1 }
 0xf70   :  { %v6548_v21 = vmul.f32 %v15498_v61, %v15421_v11  ;;  %v6595_v57 = vmul.f32 %v6475_v32, %v15137_v60  ;;  %v6518_v42 = vmul.f32 %v15484_v54, %v15412_v47  ;;  %v15538_v26 = vadd.f32 %v15253_v9, %v6594_v4 }
 0xf71   :  { %v6596_v35 = vmul.f32 %v6490_v39, %v15139_v45  ;;  %v6592_v41 = vmul.f32 %v6430_v15, %v15146_v2  ;;  %vm6523_vm15 = vweird.f32 %v15484_v54  ;;  %v6573_v18 = vand.u32 2147483648, %v15445_v8 }
 0xf72   :  { %v10403_v37 = vpop.eup %10402  ;;  %v15543_v56 = vadd.f32 %v6600_v52, %v6595_v57  ;;  %v6549_v24 = vsub.f32 1.0, %v6548_v21  ;;  %v6519_v60 = vsub.f32 1.0, %v6518_v42  ;;  %vm6553_vm9 = vweird.f32 %v15498_v61 }
 0xf73   :  { %v15512_v58 = vpop.eup %10404  ;;  %v15517_v20 = vadd.f32 1.0, %v10403_v37  ;;  %v15545_v36 = vadd.f32 %v6601_v12, %v6596_v35  ;;  %v15552_v28 = vadd.f32 %v15246_v10, %v6592_v41  ;;  %v6541_v10 = vand.u32 2147483647, %v15432_v59 }
 0xf74   :  { %v15519_v43 = vpop.eup %10406  ;;  %v6563_v33 = vmul.f32 %v15512_v58, %v15445_v8  ;;  %v6550_v2 = vmul.f32 %v15498_v61, %v6549_v24  ;;  %v6520_v17 = vmul.f32 %v15484_v54, %v6519_v60  ;;  %vm6568_vm3 = vweird.f32 %v15512_v58 }
 0xf75   :  { %10408 = vrcp.f32 %v15517_v20  ;;  %v6533_v19 = vmul.f32 %v15519_v43, %v15432_v59  ;;  %vm6538_vm7 = vweird.f32 %v15519_v43  ;;  %v6588_v49 = vand.u32 2147483648, %v15517_v20 }
 0xf76   :  { %v6564_v53 = vsub.f32 1.0, %v6563_v33  ;;  %10410 = vtanh.f32 %v15532_v16  ;;  %v6586_v29 = vand.u32 2147483647, %v15517_v20  ;;  %v6551_v14 = vadd.f32 %v15498_v61, %v6550_v2  ;;  %v15663_v33 = vld [vmem:[%s17006_s8 + $0x30] sm:$0xff] }
 0xf77   :  { %10412 = vtanh.f32 %v15538_v26  ;;  %v6534_v9 = vsub.f32 1.0, %v6533_v19  ;;  %vm6567_vm8 = vweird.f32 %v15445_v8  ;;  %v6571_v32 = vand.u32 2147483647, %v15445_v8 }
 0xf78   :  { %v6565_v45 = vmul.f32 %v15512_v58, %v6564_v53  ;;  %10414 = vtanh.f32 %v15543_v56  ;;  %vm6582_vm5 = vweird.f32 %v15517_v20  ;;  %v6558_v39 = vand.u32 2147483648, %v15421_v11  ;;  %vm15578_vm4 = vmor %vm6567_vm8, %vm6568_vm3 }
 0xf79   :  { %10416 = vtanh.f32 %v15545_v36  ;;  %v6535_v63 = vmul.f32 %v15519_v43, %v6534_v9  ;;  %v6589_v12 = vor.u32 1.1754944e-38, %v6588_v49  ;;  %v6556_v8 = vand.u32 2147483647, %v15421_v11  ;;  %vm15590_vm3 = vmor %vm6552_vm14, %vm6553_vm9 }
 0xf7a   :  { %v6566_v50 = vadd.f32 %v15512_v58, %v6565_v45  ;;  %vm6587_vm10 = vcmp.eq.f32.partialorder %v6586_v29, 8.507059e+37  ;;  %v6574_v42 = vor.u32 1.1754944e-38, %v6573_v18  ;;  %v6543_v35 = vand.u32 2147483648, %v15432_v59  ;;  %vm15604_vm9 = vmor %vm6537_vm13, %vm6538_vm7 }
 0xf7b   :  { %v10409_v34 = vpop.eup %10408  ;;  %v6536_v21 = vadd.f32 %v15519_v43, %v6535_v63  ;;  %v6555_v11 = vsel %vm15590_vm3, %v15498_v61, %v6551_v14  ;;  %v6559_v24 = vor.u32 1.1754944e-38, %v6558_v39  ;;  %v6528_v60 = vand.u32 2147483648, %v15412_v47 }
 0xf7c   :  { %v6578_v51 = vmul.f32 %v10409_v34, %v15517_v20  ;;  %v10411_v37 = vpop.eup %10410  ;;  %vm6583_vm2 = vweird.f32 %v10409_v34  ;;  %v6570_v20 = vsel %vm15578_vm4, %v15512_v58, %v6566_v50  ;;  %v6521_v58 = vadd.f32 %v15484_v54, %v6520_v17 }
 0xf7d   :  { %v10413_v40 = vpop.eup %10412  ;;  %vm6584_vm12 = vmor %vm6582_vm5, %vm6583_vm2  ;;  %vm6572_vm2 = vcmp.eq.f32.partialorder %v6571_v32, 8.507059e+37  ;;  %vm6557_vm8 = vcmp.eq.f32.partialorder %v6556_v8, 8.507059e+37  ;;  %vm6522_vm5 = vweird.f32 %v15412_v47  ;;  %v6526_v61 = vand.u32 2147483647, %v15412_v47  ;;  %v15649_v32 = vld [vmem:[%s17006_s8 + $0x20] sm:$0xff] }
 0xf7e   :  { %v6579_v44 = vsub.f32 1.0, %v6578_v51  ;;  %v10415_v1 = vpop.eup %10414  ;;  %v6575_v41 = vsel %vm6572_vm2, %v6574_v42, %v6570_v20  ;;  %v6540_v9 = vsel %vm15604_vm9, %v15519_v43, %v6536_v21  ;;  %10418 = vtanh.f32 %v15552_v28  ;;  %vm6524_vm14 = vmor %vm6522_vm5, %vm6523_vm15  ;;  %v15677_v8 = vld [vmem:[%s17006_s8 + $0x40] sm:$0xff] }
 0xf7f   :  { %v10417_v4 = vpop.eup %10416  ;;  %v6560_v51 = vsel %vm6557_vm8, %v6559_v24, %v6555_v11  ;;  %v6544_v59 = vor.u32 1.1754944e-38, %v6543_v35  ;;  %v6615_v2 = vmul.f32 %v10415_v1, %v6575_v41  ;;  %vm6542_vm13 = vcmp.eq.f32.partialorder %v6541_v10, 8.507059e+37  ;;  %v15628_v10 = vld [vmem:[%s17006_s8 + $0x8] sm:$0xff] }
 0xf80   :  { %v6580_v0 = vmul.f32 %v10409_v34, %v6579_v44  ;;  %v6525_v44 = vsel %vm6524_vm14, %v15484_v54, %v6521_v58  ;;  %v6529_v49 = vor.u32 1.1754944e-38, %v6528_v60  ;;  %v6614_v50 = vmul.f32 %v10413_v40, %v6560_v51  ;;  %v15621_v54 = vld [vmem:[%s17006_s8] sm:$0xff]  ;;  %v15642_v40 = vld [vmem:[%s17006_s8 + $0x18] sm:$0xff] }
 0xf81   :  { %v6545_v47 = vsel %vm6542_vm13, %v6544_v59, %v6540_v9  ;;  %vm6527_vm7 = vcmp.eq.f32.partialorder %v6526_v61, 8.507059e+37 }
 0xf82   :  { %v6581_v52 = vadd.f32 %v10409_v34, %v6580_v0  ;;  %v6530_v43 = vsel %vm6527_vm7, %v6529_v49, %v6525_v44  ;;  %v6618_v63 = vpack.c.bf16 %v6615_v2, %v6614_v50  ;;  %v6613_v0 = vmul.f32 %v10411_v37, %v6545_v47  ;;  %v15635_v37 = vld [vmem:[%s17006_s8 + $0x10] sm:$0xff] }
 0xf84   :  { %v6585_v15 = vsel %vm6584_vm12, %v10409_v34, %v6581_v52  ;;  %v10419_v29 = vpop.eup %10418  ;;  %v15656_v52 = vld [vmem:[%s17006_s8 + $0x28] sm:$0xff] }
 0xf85   :  { %v6590_v19 = vsel %vm6587_vm10, %v6589_v12, %v6585_v15  ;;  %v6612_v18 = vmul.f32 %v10419_v29, %v6530_v43  ;;  %v15684_v15 = vld [vmem:[%s17006_s8 + $0x48] sm:$0xff] }
 0xf86   :  { %v6616_v53 = vmul.f32 %v10417_v4, %v6590_v19  ;;  %v15670_v4 = vld [vmem:[%s17006_s8 + $0x38] sm:$0xff] }
 0xf87   :  { %v6617_v14 = vpack.c.bf16 %v6613_v0, %v6612_v18 }
 0xf88   :  { %v6619_v45 = vpack.c.bf16 %v6616_v53, %v6616_v53 }
 0xf8a   :  { %v6621_v17 = vsel %vm51_vm6, %v6619_v45, 0 }
 0xf8b   :  { %6628 = vmatpush.bf16.msrb.mxu1 %v6621_v17 }
 0xf8f   :  { %6629 = vmatpush.bf16.msrb.mxu1 %v6618_v63 }
 0xf93   :  { %6630 = vmatpush.bf16.msrb.mxu1 %v6617_v14 }
 0xf96   :  { %9321 = vmatmul.msk.bf16.vlgmr.msrb.gmra.mxu1 %vm4808_vm0, %v15621_v54 }
 0xfa6   :  { %9322 = vmatmul.msk.bf16.gmra.mxu1 %vm4808_vm0, %v15628_v10 }
 0xfb6   :  { %9323 = vmatmul.msk.bf16.gmra.mxu1 %vm4808_vm0, %v15635_v37 }
 0xfc6   :  { %9324 = vmatmul.msk.bf16.gmra.mxu1 %vm4808_vm0, %v15642_v40 }
 0xfd6   :  { %9325 = vmatmul.msk.bf16.gmra.mxu1 %vm4808_vm0, %v15649_v32 }
 0xfdb   :  { %v5067_v1 = vpop.f32.mrf.mxu1 }
 0xfe3   :  { %v5068_v39 = vpop.f32.mrf.mxu1 }
 0xfe6   :  { %9326 = vmatmul.msk.bf16.gmra.mxu1 %vm4808_vm0, %v15656_v52 }
 0xff6   :  { %9327 = vmatmul.msk.bf16.gmra.mxu1 %vm4808_vm0, %v15663_v33 }
0x1006   :  { %9328 = vmatmul.msk.bf16.gmra.mxu1 %vm4808_vm0, %v15670_v4 }
0x1013   :  { %v6632_v12 = vpop.f32.mrf.mxu1 }
0x1014   :  { %v6686_v35 = vadd.f32 %v6632_v12, %v14034_v30 }
0x1016   :  { %9329 = vmatmul.msk.bf16.gmra.mxu1 %vm4808_vm0, %v15677_v8  ;;  %v9332_v11 = vmul.f32 -1.442695, %v6686_v35 }
0x1018   :  { %10420 = vpow2.f32 %v9332_v11 }
0x101b   :  { %v6634_v20 = vpop.f32.mrf.mxu1 }
0x101c   :  { %v6687_v24 = vadd.f32 %v6634_v20, %v14038_v25 }
0x101e   :  { %v9333_v60 = vmul.f32 -1.442695, %v6687_v24  ;;  %v10421_v61 = vpop.eup %10420 }
0x101f   :  { %v15695_v59 = vadd.f32 1.0, %v10421_v61 }
0x1021   :  { %vm6731_vm12 = vweird.f32 %v15695_v59 }
0x1023   :  { %v6637_v21 = vpop.f32.mrf.mxu1 }
0x1024   :  { %v6688_v51 = vadd.f32 %v6637_v21, %v14051_v55 }
0x1026   :  { %9330 = vmatmul.msk.bf16.gmra.mxu1 %vm4808_vm0, %v15684_v15  ;;  %v9334_v17 = vmul.f32 -1.442695, %v6688_v51 }
0x102b   :  { %v6639_v57 = vpop.f32.mrf.mxu1 }
0x102c   :  { %v6689_v0 = vadd.f32 %v6639_v57, %v17388_v62 }
0x102e   :  { %v9335_v21 = vmul.f32 -1.442695, %v6689_v0 }
0x1033   :  { %v6642_v42 = vpop.f32.mrf.mxu1 }
0x1036   :  { %9331 = vmatmul.msk.bf16.gmra.mxu1 %vm4808_vm0, %v15372_v13 }
0x103b   :  { %v6644_v19 = vpop.f32.mrf.mxu1 }
0x103c   :  { %v6691_v58 = vadd.f32 %v6644_v19, %v17392_v46  ;;  %v6690_v19 = vadd.f32 %v6642_v42, %v17390_v48 }
0x103e   :  { %v9337_v53 = vmul.f32 -1.442695, %v6691_v58 }
0x1040   :  { %10422 = vpow2.f32 %v9337_v53 }
0x1041   :  { %10424 = vpow2.f32 %v9333_v60  ;;  %v9336_v60 = vmul.f32 -1.442695, %v6690_v19 }
0x1043   :  { %v6647_v41 = vpop.f32.mrf.mxu1 }
0x1044   :  { %v6692_v34 = vadd.f32 %v6647_v41, %v17391_v23 }
0x1046   :  { %v9338_v9 = vmul.f32 -1.442695, %v6692_v34  ;;  %v10423_v45 = vpop.eup %10422 }
0x1047   :  { %v15697_v2 = vadd.f32 1.0, %v10423_v45  ;;  %v10425_v47 = vpop.eup %10424 }
0x1048   :  { %10426 = vpow2.f32 %v9338_v9  ;;  %v15702_v63 = vadd.f32 1.0, %v10425_v47 }
0x1049   :  { %10428 = vrcp.f32 %v15695_v59  ;;  %v6832_v19 = vand.u32 2147483648, %v15697_v2  ;;  %vm6826_vm10 = vweird.f32 %v15697_v2 }
0x104a   :  { %10430 = vrcp.f32 %v15697_v2 }
0x104b   :  { %v6649_v44 = vpop.f32.mrf.mxu1  ;;  %10432 = vpow2.f32 %v9334_v17 }
0x104c   :  { %v6693_v49 = vadd.f32 %v6649_v44, %v17393_v27 }
0x104e   :  { %v9339_v50 = vmul.f32 -1.442695, %v6693_v49  ;;  %v10427_v43 = vpop.eup %10426 }
0x104f   :  { %v15705_v29 = vadd.f32 1.0, %v10427_v43  ;;  %v15707_v18 = vpop.eup %10428 }
0x1050   :  { %10434 = vpow2.f32 %v9339_v50  ;;  %v15709_v1 = vpop.eup %10430  ;;  %v6727_v20 = vmul.f32 %v15707_v18, %v15695_v59  ;;  %vm6732_vm15 = vweird.f32 %v15707_v18 }
0x1051   :  { %10436 = vrcp.f32 %v15702_v63  ;;  %v10433_v12 = vpop.eup %10432  ;;  %v6822_v11 = vmul.f32 %v15709_v1, %v15697_v2  ;;  %vm6827_vm4 = vweird.f32 %v15709_v1  ;;  %vm15756_vm3 = vmor %vm6731_vm12, %vm6732_vm15  ;;  %vm6841_vm13 = vweird.f32 %v15705_v29 }
0x1052   :  { %10438 = vrcp.f32 %v15705_v29  ;;  %v15719_v58 = vadd.f32 1.0, %v10433_v12  ;;  %v6728_v53 = vsub.f32 1.0, %v6727_v20  ;;  %vm15766_vm2 = vmor %vm6826_vm10, %vm6827_vm4  ;;  %vm6746_vm15 = vweird.f32 %v15702_v63 }
0x1053   :  { %v6652_v14 = vpop.f32.mrf.mxu1  ;;  %v6823_v34 = vsub.f32 1.0, %v6822_v11 }
0x1054   :  { %v6694_v39 = vadd.f32 %v6652_v14, %v17394_v38  ;;  %v6729_v17 = vmul.f32 %v15707_v18, %v6728_v53  ;;  %v6737_v53 = vand.u32 2147483648, %v15695_v59 }
0x1055   :  { %v6824_v49 = vmul.f32 %v15709_v1, %v6823_v34 }
0x1056   :  { %v9340_v35 = vmul.f32 -1.442695, %v6694_v39  ;;  %v10435_v57 = vpop.eup %10434  ;;  %v6730_v14 = vadd.f32 %v15707_v18, %v6729_v17 }
0x1057   :  { %v15721_v24 = vadd.f32 1.0, %v10435_v57  ;;  %v15723_v41 = vpop.eup %10436 }
0x1058   :  { %10440 = vpow2.f32 %v9340_v35  ;;  %v15725_v9 = vpop.eup %10438  ;;  %v6742_v51 = vmul.f32 %v15723_v41, %v15702_v63  ;;  %v6825_v35 = vadd.f32 %v15709_v1, %v6824_v49  ;;  %v6734_v17 = vsel %vm15756_vm3, %v15707_v18, %v6730_v14 }
0x1059   :  { %10442 = vpow2.f32 %v9335_v21  ;;  %v6837_v47 = vmul.f32 %v15725_v9, %v15705_v29  ;;  %v6752_v18 = vand.u32 2147483648, %v15702_v63  ;;  %vm6747_vm5 = vweird.f32 %v15723_v41 }
0x105a   :  { %10444 = vrcp.f32 %v15719_v58  ;;  %v6743_v0 = vsub.f32 1.0, %v6742_v51  ;;  %vm6842_vm14 = vweird.f32 %v15725_v9  ;;  %vm15814_vm4 = vmor %vm6746_vm15, %vm6747_vm5  ;;  %vm6761_vm5 = vweird.f32 %v15719_v58 }
0x105b   :  { %v6654_v61 = vpop.f32.mrf.mxu1  ;;  %10446 = vrcp.f32 %v15721_v24  ;;  %v6838_v20 = vsub.f32 1.0, %v6837_v47  ;;  %v6829_v47 = vsel %vm15766_vm2, %v15709_v1, %v6825_v35  ;;  %vm15801_vm7 = vmor %vm6841_vm13, %vm6842_vm14 }
0x105c   :  { %v6695_v45 = vadd.f32 %v6654_v61, %v17395_v7  ;;  %10448 = vpow2.f32 %v9336_v60  ;;  %v6735_v61 = vand.u32 2147483647, %v15695_v59  ;;  %v6744_v49 = vmul.f32 %v15723_v41, %v6743_v0 }
0x105d   :  { %v6839_v59 = vmul.f32 %v15725_v9, %v6838_v20 }
0x105e   :  { %v10441_v42 = vpop.eup %10440  ;;  %v9341_v44 = vmul.f32 -1.442695, %v6695_v45  ;;  %v6830_v45 = vand.u32 2147483647, %v15697_v2  ;;  %vm6736_vm9 = vcmp.eq.f32.partialorder %v6735_v61, 8.507059e+37  ;;  %v6745_v20 = vadd.f32 %v15723_v41, %v6744_v49 }
0x105f   :  { %v10443_v50 = vpop.eup %10442  ;;  %v15736_v43 = vadd.f32 1.0, %v10441_v42  ;;  %v6750_v49 = vand.u32 2147483647, %v15702_v63 }
0x1060   :  { %10450 = vpow2.f32 %v9341_v44  ;;  %v15740_v39 = vpop.eup %10444  ;;  %v15742_v12 = vadd.f32 1.0, %v10443_v50  ;;  %vm6831_vm8 = vcmp.eq.f32.partialorder %v6830_v45, 8.507059e+37 }
0x1061   :  { %v15746_v57 = vpop.eup %10446  ;;  %10452 = vrcp.f32 %v15736_v43  ;;  %v6757_v51 = vmul.f32 %v15740_v39, %v15719_v58  ;;  %vm6751_vm10 = vcmp.eq.f32.partialorder %v6750_v49, 8.507059e+37  ;;  %vm6762_vm3 = vweird.f32 %v15740_v39 }
0x1062   :  { %v10449_v60 = vpop.eup %10448  ;;  %v6852_v2 = vmul.f32 %v15746_v57, %v15721_v24  ;;  %vm6857_vm2 = vweird.f32 %v15746_v57  ;;  %vm6763_vm14 = vmor %vm6761_vm5, %vm6762_vm3  ;;  %vm6776_vm3 = vweird.f32 %v15742_v12 }
0x1063   :  { %v6657_v21 = vpop.f32.mrf.mxu1  ;;  %v15781_v50 = vadd.f32 1.0, %v10449_v60  ;;  %v6758_v44 = vsub.f32 1.0, %v6757_v51  ;;  %v6845_v51 = vand.u32 2147483647, %v15705_v29 }
0x1064   :  { %v6696_v11 = vadd.f32 %v6657_v21, %v14101_v31  ;;  %v6833_v21 = vor.u32 1.1754944e-38, %v6832_v19  ;;  %v6738_v31 = vor.u32 1.1754944e-38, %v6737_v53  ;;  %v6853_v1 = vsub.f32 1.0, %v6852_v2 }
0x1065   :  { %v6840_v19 = vadd.f32 %v15725_v9, %v6839_v59  ;;  %vm6846_vm12 = vcmp.eq.f32.partialorder %v6845_v51, 8.507059e+37 }
0x1066   :  { %v10451_v42 = vpop.eup %10450  ;;  %10454 = vtanh.f32 %v6696_v11  ;;  %v6739_v0 = vsel %vm6736_vm9, %v6738_v31, %v6734_v17  ;;  %v6834_v14 = vsel %vm6831_vm8, %v6833_v21, %v6829_v47  ;;  %v6847_v31 = vand.u32 2147483648, %v15705_v29 }
0x1067   :  { %10456 = vrcp.f32 %v15742_v12  ;;  %v15783_v34 = vadd.f32 1.0, %v10451_v42  ;;  %v15788_v11 = vpop.eup %10452  ;;  %v6996_v45 = vmul.f32 %v6834_v14, %v15552_v28  ;;  %v6854_v59 = vmul.f32 %v15746_v57, %v6853_v1 }
0x1068   :  { %10458 = vrcp.f32 %v15781_v50  ;;  %v6867_v2 = vmul.f32 %v15788_v11, %v15736_v43  ;;  %v6844_v29 = vsel %vm15801_vm7, %v15725_v9, %v6840_v19  ;;  %v6848_v21 = vor.u32 1.1754944e-38, %v6847_v31 }
0x1069   :  { %10460 = vrcp.f32 %v15783_v34  ;;  %v6759_v14 = vmul.f32 %v15740_v39, %v6758_v44  ;;  %v6753_v1 = vor.u32 1.1754944e-38, %v6752_v18  ;;  %v6767_v9 = vand.u32 2147483648, %v15719_v58 }
0x106a   :  { %v6868_v31 = vsub.f32 1.0, %v6867_v2  ;;  %v6862_v44 = vand.u32 2147483648, %v15721_v24  ;;  %vm6856_vm9 = vweird.f32 %v15721_v24  ;;  %v6860_v28 = vand.u32 2147483647, %v15721_v24 }
0x106b   :  { %v6659_v35 = vpop.f32.mrf.mxu1  ;;  %v6760_v51 = vadd.f32 %v15740_v39, %v6759_v14  ;;  %vm15841_vm8 = vmor %vm6856_vm9, %vm6857_vm2  ;;  %v6780_v2 = vand.u32 2147483647, %v15742_v12 }
0x106c   :  { %v10455_v53 = vpop.eup %10454  ;;  %v6697_v60 = vadd.f32 %v6659_v35, %v17330_v3  ;;  %vm6861_vm13 = vcmp.eq.f32.partialorder %v6860_v28, 8.507059e+37 }
0x106d   :  { %v15796_v61 = vpop.eup %10456  ;;  %v7001_v42 = vmul.f32 %v10455_v53, %v6739_v0  ;;  %v6749_v0 = vsel %vm15814_vm4, %v15723_v41, %v6745_v20  ;;  %v6849_v53 = vsel %vm6846_vm12, %v6848_v21, %v6844_v29  ;;  %v6855_v41 = vadd.f32 %v15746_v57, %v6854_v59 }
0x106e   :  { %10462 = vtanh.f32 %v6697_v60  ;;  %v6772_v63 = vmul.f32 %v15796_v61, %v15742_v12  ;;  %v15827_v35 = vpop.eup %10458  ;;  %v6754_v60 = vsel %vm6751_vm10, %v6753_v1, %v6749_v0  ;;  %v6997_v17 = vmul.f32 %v6849_v53, %v15532_v16 }
0x106f   :  { %v15810_v47 = vadd.f32 %v7001_v42, %v6996_v45  ;;  %v15831_v19 = vpop.eup %10460  ;;  %v6765_v59 = vand.u32 2147483647, %v15719_v58  ;;  %v6869_v29 = vmul.f32 %v15788_v11, %v6868_v31  ;;  %v6859_v16 = vsel %vm15841_vm8, %v15746_v57, %v6855_v41 }
0x1070   :  { %v6773_v18 = vsub.f32 1.0, %v6772_v63  ;;  %v6882_v63 = vmul.f32 %v15831_v19, %v15783_v34  ;;  %v6787_v24 = vmul.f32 %v15827_v35, %v15781_v50  ;;  %v6863_v0 = vor.u32 1.1754944e-38, %v6862_v44 }
0x1071   :  { %v6764_v58 = vsel %vm6763_vm14, %v15740_v39, %v6760_v51  ;;  %v6768_v1 = vor.u32 1.1754944e-38, %v6767_v9  ;;  %vm6766_vm7 = vcmp.eq.f32.partialorder %v6765_v59, 8.507059e+37  ;;  %vm6777_vm15 = vweird.f32 %v15796_v61 }
0x1072   :  { %v6774_v14 = vmul.f32 %v15796_v61, %v6773_v18  ;;  %v6864_v53 = vsel %vm6861_vm13, %v6863_v0, %v6859_v16  ;;  %vm6872_vm4 = vweird.f32 %v15788_v11  ;;  %v6883_v31 = vsub.f32 1.0, %v6882_v63  ;;  %vm6778_vm2 = vmor %vm6776_vm3, %vm6777_vm15 }
0x1073   :  { %v6662_v45 = vpop.f32.mrf.mxu1  ;;  %v6870_v57 = vadd.f32 %v15788_v11, %v6869_v29  ;;  %v6877_v44 = vand.u32 2147483648, %v15736_v43  ;;  %vm6871_vm12 = vweird.f32 %v15736_v43  ;;  %v6998_v18 = vmul.f32 %v6864_v53, %v15538_v26 }
0x1074   :  { %v10463_v20 = vpop.eup %10462  ;;  %v6698_v42 = vadd.f32 %v6662_v45, %v17389_v5  ;;  %v6775_v9 = vadd.f32 %v15796_v61, %v6774_v14  ;;  %v6875_v51 = vand.u32 2147483647, %v15736_v43  ;;  %vm6873_vm10 = vmor %vm6871_vm12, %vm6872_vm4  ;;  %vm6887_vm8 = vweird.f32 %v15831_v19 }
0x1075   :  { %v7002_v49 = vmul.f32 %v10463_v20, %v6754_v60  ;;  %v6769_v60 = vsel %vm6766_vm7, %v6768_v1, %v6764_v58  ;;  %v6788_v20 = vsub.f32 1.0, %v6787_v24  ;;  %v6874_v59 = vsel %vm6873_vm10, %v15788_v11, %v6870_v57 }
0x1076   :  { %10464 = vtanh.f32 %v6698_v42  ;;  %v6878_v29 = vor.u32 1.1754944e-38, %v6877_v44  ;;  %v6779_v43 = vsel %vm6778_vm2, %v15796_v61, %v6775_v9  ;;  %vm6876_vm9 = vcmp.eq.f32.partialorder %v6875_v51, 8.507059e+37 }
0x1077   :  { %v15850_v21 = vadd.f32 %v7002_v49, %v6997_v17  ;;  %v6782_v17 = vand.u32 2147483648, %v15742_v12  ;;  %v6884_v49 = vmul.f32 %v15831_v19, %v6883_v31  ;;  %v6789_v26 = vmul.f32 %v15827_v35, %v6788_v20 }
0x1078   :  { %v6879_v16 = vsel %vm6876_vm9, %v6878_v29, %v6874_v59  ;;  %vm6781_vm5 = vcmp.eq.f32.partialorder %v6780_v2, 8.507059e+37  ;;  %vm6792_vm14 = vweird.f32 %v15827_v35  ;;  %v6892_v0 = vand.u32 2147483648, %v15783_v34  ;;  %v17441_v59 = vld [vmem:[#allocation21_spill] sm:$0xff] }
0x1079   :  { %v6783_v63 = vor.u32 1.1754944e-38, %v6782_v17  ;;  %v6885_v12 = vadd.f32 %v15831_v19, %v6884_v49  ;;  %v6790_v1 = vadd.f32 %v15827_v35, %v6789_v26  ;;  %vm6886_vm13 = vweird.f32 %v15783_v34 }
0x107a   :  { %v6999_v61 = vmul.f32 %v6879_v16, %v15543_v56  ;;  %v6890_v31 = vand.u32 2147483647, %v15783_v34  ;;  %vm6888_vm7 = vmor %vm6886_vm13, %vm6887_vm8  ;;  %vm6791_vm15 = vweird.f32 %v15781_v50  ;;  %v6795_v57 = vand.u32 2147483647, %v15781_v50 }
0x107b   :  { %v6664_v45 = vpop.f32.mrf.mxu1  ;;  %v6784_v58 = vsel %vm6781_vm5, %v6783_v63, %v6779_v43  ;;  %v6893_v20 = vor.u32 1.1754944e-38, %v6892_v0  ;;  %vm6793_vm4 = vmor %vm6791_vm15, %vm6792_vm14 }
0x107c   :  { %v10465_v41 = vpop.eup %10464  ;;  %v6699_v39 = vadd.f32 %v6664_v45, %v17331_v6  ;;  %v6794_v56 = vsel %vm6793_vm4, %v15827_v35, %v6790_v1  ;;  %vm6891_vm12 = vcmp.eq.f32.partialorder %v6890_v31, 8.507059e+37  ;;  %vm6796_vm10 = vcmp.eq.f32.partialorder %v6795_v57, 8.507059e+37  ;;  %v17442_v35 = vld [vmem:[#allocation20_spill] sm:$0xff]  ;;  %v17444_v31 = vld [vmem:[#allocation23_spill] sm:$0xff] }
0x107d   :  { %v7003_v42 = vmul.f32 %v10465_v41, %v6769_v60  ;;  %v6797_v60 = vand.u32 2147483648, %v15781_v50  ;;  %v6889_v41 = vsel %vm6888_vm7, %v15831_v19, %v6885_v12  ;;  %v17440_v19 = vld [vmem:[#allocation19_spill] sm:$0xff]  ;;  %v17443_v12 = vld [vmem:[#allocation22_spill] sm:$0xff] }
0x107e   :  { %10466 = vtanh.f32 %v6699_v39  ;;  %v6894_v44 = vsel %vm6891_vm12, %v6893_v20, %v6889_v41 }
0x107f   :  { %v15873_v28 = vadd.f32 %v7003_v42, %v6998_v18  ;;  %v6798_v34 = vor.u32 1.1754944e-38, %v6797_v60  ;;  %v7000_v42 = vmul.f32 %v6894_v44, %v15545_v36 }
0x1081   :  { %v6799_v18 = vsel %vm6796_vm10, %v6798_v34, %v6794_v56 }
0x1083   :  { %v6667_v24 = vpop.f32.mrf.mxu1 }
0x1084   :  { %v10467_v11 = vpop.eup %10466  ;;  %v6700_v14 = vadd.f32 %v6667_v24, %v17408_v22 }
0x1085   :  { %v7004_v53 = vmul.f32 %v10467_v11, %v6784_v58 }
0x1086   :  { %10468 = vtanh.f32 %v6700_v14 }
0x1087   :  { %v15891_v45 = vadd.f32 %v7004_v53, %v6999_v61 }
0x108b   :  { %v6669_v39 = vpop.f32.mrf.mxu1 }
0x108c   :  { %v10469_v9 = vpop.eup %10468  ;;  %v6701_v49 = vadd.f32 %v6669_v39, %v17440_v19 }
0x108d   :  { %v7005_v51 = vmul.f32 %v10469_v9, %v6799_v18 }
0x108e   :  { %v9342_v26 = vmul.f32 -1.442695, %v6701_v49 }
0x108f   :  { %v15900_v17 = vadd.f32 %v7005_v51, %v7000_v42 }
0x1090   :  { %10470 = vpow2.f32 %v9342_v26 }
0x1093   :  { %v6672_v50 = vpop.f32.mrf.mxu1 }
0x1094   :  { %v6702_v43 = vadd.f32 %v6672_v50, %v17442_v35 }
0x1096   :  { %v9343_v16 = vmul.f32 -1.442695, %v6702_v43  ;;  %v10471_v0 = vpop.eup %10470 }
0x1097   :  { %v15906_v14 = vadd.f32 1.0, %v10471_v0 }
0x109b   :  { %v6674_v2 = vpop.f32.mrf.mxu1 }
0x109c   :  { %v6703_v29 = vadd.f32 %v6674_v2, %v17441_v59 }
0x109e   :  { %v9344_v63 = vmul.f32 -1.442695, %v6703_v29 }
0x10a0   :  { %10472 = vpow2.f32 %v9344_v63 }
0x10a1   :  { %10474 = vpow2.f32 %v9343_v16 }
0x10a3   :  { %v6677_v24 = vpop.f32.mrf.mxu1 }
0x10a4   :  { %v6704_v11 = vadd.f32 %v6677_v24, %v17443_v12 }
0x10a6   :  { %v9345_v36 = vmul.f32 -1.442695, %v6704_v11  ;;  %v10473_v58 = vpop.eup %10472 }
0x10a7   :  { %v10475_v1 = vpop.eup %10474  ;;  %v15908_v61 = vadd.f32 1.0, %v10473_v58 }
0x10a8   :  { %10476 = vpow2.f32 %v9345_v36  ;;  %v15912_v41 = vadd.f32 1.0, %v10475_v1 }
0x10a9   :  { %10478 = vrcp.f32 %v15906_v14  ;;  %vm6956_vm15 = vweird.f32 %v15908_v61 }
0x10aa   :  { %10480 = vrcp.f32 %v15908_v61  ;;  %vm6941_vm2 = vweird.f32 %v15912_v41  ;;  %v6945_v1 = vand.u32 2147483647, %v15912_v41  ;;  %v6947_v35 = vand.u32 2147483648, %v15912_v41 }
0x10ab   :  { %v6679_v53 = vpop.f32.mrf.mxu1 }
0x10ac   :  { %v6705_v60 = vadd.f32 %v6679_v53, %v17444_v31  ;;  %v6930_v31 = vand.u32 2147483647, %v15906_v14 }
0x10ae   :  { %v10477_v57 = vpop.eup %10476  ;;  %v9346_v20 = vmul.f32 -1.442695, %v6705_v60 }
0x10af   :  { %v15915_v56 = vadd.f32 1.0, %v10477_v57  ;;  %v15919_v34 = vpop.eup %10478 }
0x10b0   :  { %10482 = vpow2.f32 %v9346_v20  ;;  %v15921_v44 = vpop.eup %10480  ;;  %v6922_v49 = vmul.f32 %v15919_v34, %v15906_v14  ;;  %vm6927_vm3 = vweird.f32 %v15919_v34 }
0x10b1   :  { %10484 = vrcp.f32 %v15915_v56  ;;  %v6952_v50 = vmul.f32 %v15921_v44, %v15908_v61  ;;  %vm6957_vm14 = vweird.f32 %v15921_v44  ;;  %vm6971_vm13 = vweird.f32 %v15915_v56 }
0x10b2   :  { %10486 = vrcp.f32 %v15912_v41  ;;  %v6923_v43 = vsub.f32 1.0, %v6922_v49 }
0x10b3   :  { %v6953_v26 = vsub.f32 1.0, %v6952_v50  ;;  %v6977_v50 = vand.u32 2147483648, %v15915_v56 }
0x10b4   :  { %v6924_v58 = vmul.f32 %v15919_v34, %v6923_v43 }
0x10b5   :  { %v6954_v36 = vmul.f32 %v15921_v44, %v6953_v26  ;;  %v6978_v12 = vor.u32 1.1754944e-38, %v6977_v50 }
0x10b6   :  { %v10483_v39 = vpop.eup %10482 }
0x10b7   :  { %v15923_v9 = vpop.eup %10484  ;;  %v6920_v18 = vadd.f32 1.0, %v10483_v39 }
0x10b8   :  { %v15925_v42 = vpop.eup %10486  ;;  %v6967_v51 = vmul.f32 %v15923_v9, %v15915_v56  ;;  %vm6972_vm8 = vweird.f32 %v15923_v9 }
0x10b9   :  { %10488 = vrcp.f32 %v6920_v18  ;;  %v6937_v2 = vmul.f32 %v15925_v42, %v15912_v41  ;;  %vm6942_vm9 = vweird.f32 %v15925_v42  ;;  %v6992_v53 = vand.u32 2147483648, %v6920_v18  ;;  %vm15958_vm4 = vmor %vm6971_vm13, %vm6972_vm8 }
0x10ba   :  { %v6968_v29 = vsub.f32 1.0, %v6967_v51  ;;  %10490 = vtanh.f32 %v15850_v21  ;;  %v6990_v51 = vand.u32 2147483647, %v6920_v18  ;;  %vm6986_vm7 = vweird.f32 %v6920_v18  ;;  %vm15970_vm8 = vmor %vm6956_vm15, %vm6957_vm14 }
0x10bb   :  { %10492 = vtanh.f32 %v15873_v28  ;;  %v6938_v16 = vsub.f32 1.0, %v6937_v2  ;;  %v6955_v2 = vadd.f32 %v15921_v44, %v6954_v36  ;;  %v6993_v36 = vor.u32 1.1754944e-38, %v6992_v53  ;;  %vm15984_vm14 = vmor %vm6941_vm2, %vm6942_vm9 }
0x10bc   :  { %v6969_v24 = vmul.f32 %v15923_v9, %v6968_v29  ;;  %10494 = vtanh.f32 %v15891_v45  ;;  %v6975_v29 = vand.u32 2147483647, %v15915_v56  ;;  %vm6991_vm10 = vcmp.eq.f32.partialorder %v6990_v51, 8.507059e+37 }
0x10bd   :  { %10496 = vtanh.f32 %v15900_v17  ;;  %v6939_v57 = vmul.f32 %v15925_v42, %v6938_v16  ;;  %v6962_v16 = vand.u32 2147483648, %v15908_v61  ;;  %v6932_v51 = vand.u32 2147483648, %v15906_v14 }
0x10be   :  { %v6970_v60 = vadd.f32 %v15923_v9, %v6969_v24  ;;  %10498 = vtanh.f32 %v15810_v47  ;;  %v6948_v41 = vor.u32 1.1754944e-38, %v6947_v35  ;;  %vm6946_vm2 = vcmp.eq.f32.partialorder %v6945_v1, 8.507059e+37  ;;  %v5470_v35 = vpop.f32.mrf.mxu2  ;;  %v5874_v1 = vpop.f32.mrf.mxu0 }
0x10bf   :  { %v10489_v63 = vpop.eup %10488  ;;  %vm6931_vm9 = vcmp.eq.f32.partialorder %v6930_v31, 8.507059e+37 }
0x10c0   :  { %v6982_v11 = vmul.f32 %v10489_v63, %v6920_v18  ;;  %v10491_v20 = vpop.eup %10490  ;;  %vm6987_vm5 = vweird.f32 %v10489_v63  ;;  %v6974_v56 = vsel %vm15958_vm4, %v15923_v9, %v6970_v60  ;;  %v6940_v18 = vadd.f32 %v15925_v42, %v6939_v57 }
0x10c1   :  { %v10493_v49 = vpop.eup %10492  ;;  %vm6988_vm12 = vmor %vm6986_vm7, %vm6987_vm5  ;;  %vm6976_vm5 = vcmp.eq.f32.partialorder %v6975_v29, 8.507059e+37  ;;  %v6925_v9 = vadd.f32 %v15919_v34, %v6924_v58  ;;  %vm6926_vm7 = vweird.f32 %v15906_v14  ;;  %vm17452_vm4 = vcmask 1042432  }
0x10c2   :  { %v6983_v0 = vsub.f32 1.0, %v6982_v11  ;;  %v10495_v26 = vpop.eup %10494  ;;  %v6979_v57 = vsel %vm6976_vm5, %v6978_v12, %v6974_v56  ;;  %vm6928_vm15 = vmor %vm6926_vm7, %vm6927_vm3  ;;  %vm17451_vm3 = vcmask 1040384  }
0x10c3   :  { %v10497_v11 = vpop.eup %10496  ;;  %v6929_v29 = vsel %vm6928_vm15, %v15919_v34, %v6925_v9 }
0x10c4   :  { %v6984_v39 = vmul.f32 %v10489_v63, %v6983_v0  ;;  %v6960_v0 = vand.u32 2147483647, %v15908_v61  ;;  %v6959_v61 = vsel %vm15970_vm8, %v15921_v44, %v6955_v2  ;;  %v6944_v44 = vsel %vm15984_vm14, %v15925_v42, %v6940_v18 }
0x10c5   :  { %v7019_v2 = vmul.f32 %v10495_v26, %v6979_v57  ;;  %v6949_v14 = vsel %vm6946_vm2, %v6948_v41, %v6944_v44  ;;  %v6682_v26 = vpop.f32.mrf.mxu1 }
0x10c6   :  { %v6985_v43 = vadd.f32 %v10489_v63, %v6984_v39  ;;  %vm6961_vm13 = vcmp.eq.f32.partialorder %v6960_v0, 8.507059e+37  ;;  %v10499_v0 = vpop.eup %10498  ;;  %v5472_v34 = vpop.f32.mrf.mxu2 }
0x10c8   :  { %v6989_v39 = vsel %vm6988_vm12, %v10489_v63, %v6985_v43  ;;  %v6963_v63 = vor.u32 1.1754944e-38, %v6962_v16  ;;  %v6933_v16 = vor.u32 1.1754944e-38, %v6932_v51 }
0x10c9   :  { %v6994_v53 = vsel %vm6991_vm10, %v6993_v36, %v6989_v39  ;;  %v7017_v36 = vmul.f32 %v10491_v20, %v6949_v14  ;;  %v6278_v20 = vpop.f32.mrf.mxu3 }
0x10ca   :  { %v7020_v60 = vmul.f32 %v10497_v11, %v6994_v53  ;;  %v6964_v58 = vsel %vm6961_vm13, %v6963_v63, %v6959_v61  ;;  %v6934_v42 = vsel %vm6931_vm9, %v6933_v16, %v6929_v29  ;;  %v5876_v53 = vpop.f32.mrf.mxu0 }
0x10cb   :  { %v7018_v24 = vmul.f32 %v10493_v49, %v6964_v58  ;;  %v7016_v56 = vmul.f32 %v10499_v0, %v6934_v42  ;;  %v8260_v49 = vrot.slane %v6278_v20, 6 }
0x10cc   :  { %v7023_v12 = vpack.c.bf16 %v7020_v60, %v7020_v60 }
0x10cd   :  { %v7022_v11 = vpack.c.bf16 %v7019_v2, %v7018_v24  ;;  %v7021_v18 = vpack.c.bf16 %v7017_v36, %v7016_v56  ;;  %v6684_v61 = vpop.f32.mrf.mxu1 }
0x10ce   :  { %v7025_v43 = vsel %vm51_vm6, %v7023_v12, 0 }
0x10cf   :  { %7032 = vmatpush.bf16.msrb.mxu2 %v7025_v43 }
0x10d3   :  { %7033 = vmatpush.bf16.msrb.mxu2 %v7022_v11 }
0x10d7   :  { %7034 = vmatpush.bf16.msrb.mxu2 %v7021_v18 }
0x10da   :  { %9347 = vmatmul.msk.bf16.vlgmr.msrb.gmra.mxu2 %vm4808_vm0, %v15621_v54  ;;  %v8257_v54 = vrot.slane %v5874_v1, 7 }
0x10dc   :  { %v8277_v39 = vsel %vm17451_vm3, %v5470_v35, %v8257_v54 }
0x10ea   :  { %9348 = vmatmul.msk.bf16.gmra.mxu2 %vm4808_vm0, %v15628_v10  ;;  %v8263_v10 = vrot.slane %v6682_v26, 5 }
0x10fa   :  { %9349 = vmatmul.msk.bf16.gmra.mxu2 %vm4808_vm0, %v15635_v37  ;;  %v8278_v37 = vsel %vm273_vm1, %v8277_v39, %v8260_v49 }
0x110a   :  { %9350 = vmatmul.msk.bf16.gmra.mxu2 %vm4808_vm0, %v15642_v40  ;;  %v16013_v40 = vsel %vm17452_vm4, %v8278_v37, %v8263_v10 }
0x111a   :  { %9351 = vmatmul.msk.bf16.gmra.mxu2 %vm4808_vm0, %v15649_v32  ;;  %v6280_v32 = vpop.f32.mrf.mxu3 }
0x112a   :  { %9352 = vmatmul.msk.bf16.gmra.mxu2 %vm4808_vm0, %v15656_v52 }
0x113a   :  { %9353 = vmatmul.msk.bf16.gmra.mxu2 %vm4808_vm0, %v15663_v33 }
0x114a   :  { %9354 = vmatmul.msk.bf16.gmra.mxu2 %vm4808_vm0, %v15670_v4 }
0x115a   :  { %9355 = vmatmul.msk.bf16.gmra.mxu2 %vm4808_vm0, %v15677_v8 }
0x115d   :  { %v7036_v52 = vpop.f32.mrf.mxu2 }
0x115e   :  { %v7090_v51 = vadd.f32 %v7036_v52, %v14034_v30 }
0x1160   :  { %v9358_v50 = vmul.f32 -1.442695, %v7090_v51 }
0x1162   :  { %10500 = vpow2.f32 %v9358_v50 }
0x1165   :  { %v7038_v9 = vpop.f32.mrf.mxu2 }
0x1166   :  { %v7091_v8 = vadd.f32 %v7038_v9, %v14038_v25 }
0x1168   :  { %v9359_v12 = vmul.f32 -1.442695, %v7091_v8  ;;  %v10501_v58 = vpop.eup %10500 }
0x1169   :  { %v16030_v43 = vadd.f32 1.0, %v10501_v58 }
0x116a   :  { %9356 = vmatmul.msk.bf16.gmra.mxu2 %vm4808_vm0, %v15684_v15 }
0x116b   :  { %vm7135_vm10 = vweird.f32 %v16030_v43 }
0x116d   :  { %v7041_v60 = vpop.f32.mrf.mxu2 }
0x116e   :  { %v7092_v29 = vadd.f32 %v7041_v60, %v14051_v55 }
0x1170   :  { %v9360_v24 = vmul.f32 -1.442695, %v7092_v29 }
0x1175   :  { %v7043_v63 = vpop.f32.mrf.mxu2 }
0x1176   :  { %v7093_v18 = vadd.f32 %v7043_v63, %v17388_v62 }
0x1178   :  { %v9361_v10 = vmul.f32 -1.442695, %v7093_v18 }
0x117a   :  { %9357 = vmatmul.msk.bf16.gmra.mxu2 %vm4808_vm0, %v15372_v13 }
0x117d   :  { %v7046_v57 = vpop.f32.mrf.mxu2 }
0x117e   :  { %v7094_v53 = vadd.f32 %v7046_v57, %v17390_v48 }
0x1180   :  { %v9362_v63 = vmul.f32 -1.442695, %v7094_v53 }
0x1185   :  { %v7048_v33 = vpop.f32.mrf.mxu2 }
0x1186   :  { %v7095_v4 = vadd.f32 %v7048_v33, %v17392_v46 }
0x1188   :  { %v9363_v31 = vmul.f32 -1.442695, %v7095_v4 }
0x118a   :  { %10502 = vpow2.f32 %v9363_v31 }
0x118b   :  { %10504 = vpow2.f32 %v9359_v12 }
0x118d   :  { %v7051_v44 = vpop.f32.mrf.mxu2 }
0x118e   :  { %v7096_v15 = vadd.f32 %v7051_v44, %v17391_v23 }
0x1190   :  { %v9364_v41 = vmul.f32 -1.442695, %v7096_v15  ;;  %v10503_v2 = vpop.eup %10502 }
0x1191   :  { %v16032_v16 = vadd.f32 1.0, %v10503_v2  ;;  %v10505_v11 = vpop.eup %10504 }
0x1192   :  { %10506 = vpow2.f32 %v9364_v41  ;;  %v16037_v56 = vadd.f32 1.0, %v10505_v11 }
0x1193   :  { %10508 = vrcp.f32 %v16030_v43  ;;  %v7236_v18 = vand.u32 2147483648, %v16032_v16  ;;  %vm7230_vm8 = vweird.f32 %v16032_v16 }
0x1194   :  { %10510 = vrcp.f32 %v16032_v16  ;;  %vm7150_vm4 = vweird.f32 %v16037_v56 }
0x1195   :  { %v7053_v14 = vpop.f32.mrf.mxu2  ;;  %10512 = vpow2.f32 %v9360_v24 }
0x1196   :  { %v7097_v42 = vadd.f32 %v7053_v14, %v17393_v27 }
0x1198   :  { %v9365_v36 = vmul.f32 -1.442695, %v7097_v42  ;;  %v10507_v0 = vpop.eup %10506 }
0x1199   :  { %v16040_v35 = vadd.f32 1.0, %v10507_v0  ;;  %v16042_v34 = vpop.eup %10508 }
0x119a   :  { %10514 = vpow2.f32 %v9365_v36  ;;  %v16044_v20 = vpop.eup %10510  ;;  %v7131_v26 = vmul.f32 %v16042_v34, %v16030_v43  ;;  %vm7136_vm1 = vweird.f32 %v16042_v34 }
0x119b   :  { %10516 = vrcp.f32 %v16037_v56  ;;  %v10513_v49 = vpop.eup %10512  ;;  %v7226_v32 = vmul.f32 %v16044_v20, %v16032_v16  ;;  %vm7231_vm12 = vweird.f32 %v16044_v20  ;;  %vm16091_vm5 = vmor %vm7135_vm10, %vm7136_vm1  ;;  %vm7245_vm9 = vweird.f32 %v16040_v35 }
0x119c   :  { %10518 = vrcp.f32 %v16040_v35  ;;  %v16054_v61 = vadd.f32 1.0, %v10513_v49  ;;  %v7132_v52 = vsub.f32 1.0, %v7131_v26  ;;  %v7141_v49 = vand.u32 2147483648, %v16030_v43  ;;  %vm16101_vm14 = vmor %vm7230_vm8, %vm7231_vm12 }
0x119d   :  { %v7056_v1 = vpop.f32.mrf.mxu2  ;;  %v7227_v51 = vsub.f32 1.0, %v7226_v32 }
0x119e   :  { %v7098_v54 = vadd.f32 %v7056_v1, %v17394_v38  ;;  %v7133_v44 = vmul.f32 %v16042_v34, %v7132_v52  ;;  %v17453_v1 = vld [vmem:[#allocation15_spill] sm:$0xff] }
0x119f   :  { %v7228_v12 = vmul.f32 %v16044_v20, %v7227_v51 }
0x11a0   :  { %v9366_v39 = vmul.f32 -1.442695, %v7098_v54  ;;  %v10515_v37 = vpop.eup %10514  ;;  %v7134_v29 = vadd.f32 %v16042_v34, %v7133_v44 }
0x11a1   :  { %v16056_v9 = vadd.f32 1.0, %v10515_v37  ;;  %v16058_v60 = vpop.eup %10516  ;;  %v7229_v36 = vadd.f32 %v16044_v20, %v7228_v12  ;;  %v7234_v37 = vand.u32 2147483647, %v16032_v16 }
0x11a2   :  { %10520 = vpow2.f32 %v9366_v39  ;;  %v16060_v50 = vpop.eup %10518  ;;  %v7146_v31 = vmul.f32 %v16058_v60, %v16037_v56  ;;  %v7139_v39 = vand.u32 2147483647, %v16030_v43  ;;  %vm7151_vm15 = vweird.f32 %v16058_v60 }
0x11a3   :  { %10522 = vpow2.f32 %v9361_v10  ;;  %v7241_v15 = vmul.f32 %v16060_v50, %v16040_v35  ;;  %vm7235_vm7 = vcmp.eq.f32.partialorder %v7234_v37, 8.507059e+37  ;;  %vm7246_vm2 = vweird.f32 %v16060_v50  ;;  %vm16149_vm1 = vmor %vm7150_vm4, %vm7151_vm15 }
0x11a4   :  { %10524 = vrcp.f32 %v16054_v61  ;;  %v7147_v2 = vsub.f32 1.0, %v7146_v31  ;;  %v7142_v31 = vor.u32 1.1754944e-38, %v7141_v49  ;;  %vm7140_vm13 = vcmp.eq.f32.partialorder %v7139_v39, 8.507059e+37  ;;  %vm16136_vm3 = vmor %vm7245_vm9, %vm7246_vm2 }
0x11a5   :  { %v7058_v33 = vpop.f32.mrf.mxu2  ;;  %10526 = vrcp.f32 %v16056_v9  ;;  %v7242_v42 = vsub.f32 1.0, %v7241_v15  ;;  %v7249_v10 = vand.u32 2147483647, %v16040_v35  ;;  %v7154_v37 = vand.u32 2147483647, %v16037_v56 }
0x11a6   :  { %v7099_v4 = vadd.f32 %v7058_v33, %v17395_v7  ;;  %10528 = vpow2.f32 %v9362_v63  ;;  %v7138_v63 = vsel %vm16091_vm5, %v16042_v34, %v7134_v29  ;;  %v7148_v51 = vmul.f32 %v16058_v60, %v7147_v2 }
0x11a7   :  { %v7243_v43 = vmul.f32 %v16060_v50, %v7242_v42  ;;  %v7233_v33 = vsel %vm16101_vm14, %v16044_v20, %v7229_v36  ;;  %v7156_v34 = vand.u32 2147483648, %v16037_v56  ;;  %v7143_v44 = vsel %vm7140_vm13, %v7142_v31, %v7138_v63 }
0x11a8   :  { %v10521_v57 = vpop.eup %10520  ;;  %v9367_v8 = vmul.f32 -1.442695, %v7099_v4  ;;  %v7149_v15 = vadd.f32 %v16058_v60, %v7148_v51  ;;  %v7251_v36 = vand.u32 2147483648, %v16040_v35  ;;  %vm7250_vm12 = vcmp.eq.f32.partialorder %v7249_v10, 8.507059e+37 }
0x11a9   :  { %v10523_v58 = vpop.eup %10522  ;;  %v16071_v41 = vadd.f32 1.0, %v10521_v57  ;;  %v7237_v57 = vor.u32 1.1754944e-38, %v7236_v18  ;;  %v7244_v42 = vadd.f32 %v16060_v50, %v7243_v43  ;;  %vm7155_vm10 = vcmp.eq.f32.partialorder %v7154_v37, 8.507059e+37 }
0x11aa   :  { %10530 = vpow2.f32 %v9367_v8  ;;  %v16075_v14 = vpop.eup %10524  ;;  %v16077_v24 = vadd.f32 1.0, %v10523_v58  ;;  %v7252_v63 = vor.u32 1.1754944e-38, %v7251_v36  ;;  %v7153_v51 = vsel %vm16149_vm1, %v16058_v60, %v7149_v15 }
0x11ab   :  { %v16081_v0 = vpop.eup %10526  ;;  %10532 = vrcp.f32 %v16071_v41  ;;  %v7161_v32 = vmul.f32 %v16075_v14, %v16054_v61  ;;  %v7238_v12 = vsel %vm7235_vm7, %v7237_v57, %v7233_v33  ;;  %v7248_v35 = vsel %vm16136_vm3, %v16060_v50, %v7244_v42 }
0x11ac   :  { %v10529_v26 = vpop.eup %10528  ;;  %v7256_v16 = vmul.f32 %v16081_v0, %v16056_v9  ;;  %v7400_v49 = vmul.f32 %v7238_v12, %v15810_v47  ;;  %v7253_v57 = vsel %vm7250_vm12, %v7252_v63, %v7248_v35  ;;  %vm7166_vm8 = vweird.f32 %v16075_v14 }
0x11ad   :  { %v7061_v11 = vpop.f32.mrf.mxu2  ;;  %v16116_v4 = vadd.f32 1.0, %v10529_v26  ;;  %v7162_v2 = vsub.f32 1.0, %v7161_v32  ;;  %v7171_v50 = vand.u32 2147483648, %v16054_v61  ;;  %vm7261_vm5 = vweird.f32 %v16081_v0 }
0x11ae   :  { %v7100_v54 = vadd.f32 %v7061_v11, %v17453_v1  ;;  %v7257_v20 = vsub.f32 1.0, %v7256_v16  ;;  %v7157_v16 = vor.u32 1.1754944e-38, %v7156_v34  ;;  %vm7260_vm14 = vweird.f32 %v16056_v9 }
0x11af   :  { %v7163_v43 = vmul.f32 %v16075_v14, %v7162_v2  ;;  %v7266_v2 = vand.u32 2147483648, %v16056_v9  ;;  %vm16176_vm13 = vmor %vm7260_vm14, %vm7261_vm5  ;;  %vm7165_vm7 = vweird.f32 %v16054_v61  ;;  %v7172_v47 = vor.u32 1.1754944e-38, %v7171_v50 }
0x11b0   :  { %v10531_v53 = vpop.eup %10530  ;;  %10534 = vtanh.f32 %v7100_v54  ;;  %v7158_v12 = vsel %vm7155_vm10, %v7157_v16, %v7153_v51  ;;  %vm7167_vm15 = vmor %vm7165_vm7, %vm7166_vm8  ;;  %vm7275_vm1 = vweird.f32 %v16071_v41  ;;  %vm7180_vm10 = vweird.f32 %v16077_v24 }
0x11b1   :  { %10536 = vrcp.f32 %v16077_v24  ;;  %v16118_v8 = vadd.f32 1.0, %v10531_v53  ;;  %v16123_v58 = vpop.eup %10532  ;;  %v7258_v53 = vmul.f32 %v16081_v0, %v7257_v20  ;;  %v7164_v42 = vadd.f32 %v16075_v14, %v7163_v43 }
0x11b2   :  { %10538 = vrcp.f32 %v16116_v4  ;;  %v7271_v32 = vmul.f32 %v16123_v58, %v16071_v41  ;;  %vm7276_vm4 = vweird.f32 %v16123_v58 }
0x11b3   :  { %10540 = vrcp.f32 %v16118_v8  ;;  %v7259_v60 = vadd.f32 %v16081_v0, %v7258_v53  ;;  %v7267_v53 = vor.u32 1.1754944e-38, %v7266_v2  ;;  %vm7277_vm12 = vmor %vm7275_vm1, %vm7276_vm4  ;;  %v7184_v2 = vand.u32 2147483647, %v16077_v24 }
0x11b5   :  { %v7063_v29 = vpop.f32.mrf.mxu2 }
0x11b6   :  { %v10535_v11 = vpop.eup %10534  ;;  %v7101_v18 = vadd.f32 %v7063_v29, %v17330_v3 }
0x11b7   :  { %v16131_v54 = vpop.eup %10536  ;;  %v7405_v26 = vmul.f32 %v10535_v11, %v7143_v44  ;;  %v7272_v44 = vsub.f32 1.0, %v7271_v32  ;;  %v7401_v11 = vmul.f32 %v7253_v57, %v15850_v21  ;;  %v7263_v21 = vsel %vm16176_vm13, %v16081_v0, %v7259_v60 }
0x11b8   :  { %10542 = vtanh.f32 %v7101_v18  ;;  %v7176_v56 = vmul.f32 %v16131_v54, %v16077_v24  ;;  %v16162_v33 = vpop.eup %10538  ;;  %v7264_v18 = vand.u32 2147483647, %v16056_v9  ;;  %vm7181_vm3 = vweird.f32 %v16131_v54 }
0x11b9   :  { %v16145_v52 = vadd.f32 %v7405_v26, %v7400_v49  ;;  %v16166_v31 = vpop.eup %10540  ;;  %v7169_v26 = vand.u32 2147483647, %v16054_v61  ;;  %v7273_v10 = vmul.f32 %v16123_v58, %v7272_v44  ;;  %v7191_v9 = vmul.f32 %v16162_v33, %v16116_v4  ;;  %vm7182_vm8 = vmor %vm7180_vm10, %vm7181_vm3 }
0x11ba   :  { %v7177_v34 = vsub.f32 1.0, %v7176_v56  ;;  %v7286_v39 = vmul.f32 %v16166_v31, %v16118_v8  ;;  %v7168_v61 = vsel %vm7167_vm15, %v16075_v14, %v7164_v42  ;;  %vm7265_vm2 = vcmp.eq.f32.partialorder %v7264_v18, 8.507059e+37 }
0x11bb   :  { %vm7170_vm9 = vcmp.eq.f32.partialorder %v7169_v26, 8.507059e+37  ;;  %v7268_v35 = vsel %vm7265_vm2, %v7267_v53, %v7263_v21  ;;  %v7274_v0 = vadd.f32 %v16123_v58, %v7273_v10  ;;  %v7192_v16 = vsub.f32 1.0, %v7191_v9 }
0x11bc   :  { %v7178_v32 = vmul.f32 %v16131_v54, %v7177_v34  ;;  %v7287_v56 = vsub.f32 1.0, %v7286_v39  ;;  %v7173_v63 = vsel %vm7170_vm9, %v7172_v47, %v7168_v61  ;;  %v7281_v57 = vand.u32 2147483648, %v16071_v41 }
0x11bd   :  { %v7066_v20 = vpop.f32.mrf.mxu2  ;;  %v7402_v44 = vmul.f32 %v7268_v35, %v15873_v28  ;;  %v7186_v60 = vand.u32 2147483648, %v16077_v24  ;;  %v7193_v28 = vmul.f32 %v16162_v33, %v7192_v16  ;;  %vm7291_vm14 = vweird.f32 %v16166_v31 }
0x11be   :  { %v10543_v15 = vpop.eup %10542  ;;  %v7102_v29 = vadd.f32 %v7066_v20, %v17389_v5  ;;  %v7179_v50 = vadd.f32 %v16131_v54, %v7178_v32  ;;  %v7279_v20 = vand.u32 2147483647, %v16071_v41  ;;  %v7282_v42 = vor.u32 1.1754944e-38, %v7281_v57 }
0x11bf   :  { %v7406_v36 = vmul.f32 %v10543_v15, %v7158_v12  ;;  %v7288_v15 = vmul.f32 %v16166_v31, %v7287_v56  ;;  %vm7185_vm13 = vcmp.eq.f32.partialorder %v7184_v2, 8.507059e+37  ;;  %vm7196_vm7 = vweird.f32 %v16162_v33  ;;  %v17465_v2 = vld [vmem:[#allocation22_spill] sm:$0xff] }
0x11c0   :  { %10544 = vtanh.f32 %v7102_v29  ;;  %v7278_v29 = vsel %vm7277_vm12, %v16123_v58, %v7274_v0  ;;  %v7183_v41 = vsel %vm7182_vm8, %v16131_v54, %v7179_v50  ;;  %vm7280_vm5 = vcmp.eq.f32.partialorder %v7279_v20, 8.507059e+37 }
0x11c1   :  { %v16185_v37 = vadd.f32 %v7406_v36, %v7401_v11  ;;  %v7187_v11 = vor.u32 1.1754944e-38, %v7186_v60  ;;  %v7283_v36 = vsel %vm7280_vm5, %v7282_v42, %v7278_v29  ;;  %v7289_v24 = vadd.f32 %v16166_v31, %v7288_v15 }
0x11c2   :  { %v7296_v49 = vand.u32 2147483648, %v16118_v8  ;;  %v7194_v39 = vadd.f32 %v16162_v33, %v7193_v28  ;;  %vm7290_vm15 = vweird.f32 %v16118_v8  ;;  %v7403_v54 = vmul.f32 %v7283_v36, %v15891_v45 }
0x11c3   :  { %v7188_v26 = vsel %vm7185_vm13, %v7187_v11, %v7183_v41  ;;  %v7294_v9 = vand.u32 2147483647, %v16118_v8  ;;  %vm7292_vm2 = vmor %vm7290_vm15, %vm7291_vm14  ;;  %v7201_v53 = vand.u32 2147483648, %v16116_v4  ;;  %vm7195_vm9 = vweird.f32 %v16116_v4 }
0x11c4   :  { %v7199_v32 = vand.u32 2147483647, %v16116_v4  ;;  %v7293_v47 = vsel %vm7292_vm2, %v16166_v31, %v7289_v24  ;;  %v7297_v35 = vor.u32 1.1754944e-38, %v7296_v49  ;;  %vm7197_vm3 = vmor %vm7195_vm9, %vm7196_vm7  ;;  %v17466_v24 = vld [vmem:[#allocation23_spill] sm:$0xff] }
0x11c5   :  { %v7068_v51 = vpop.f32.mrf.mxu2  ;;  %v7198_v45 = vsel %vm7197_vm3, %v16162_v33, %v7194_v39  ;;  %vm7295_vm4 = vcmp.eq.f32.partialorder %v7294_v9, 8.507059e+37  ;;  %v7202_v8 = vor.u32 1.1754944e-38, %v7201_v53  ;;  %v17464_v33 = vld [vmem:[#allocation20_spill] sm:$0xff] }
0x11c6   :  { %v10545_v43 = vpop.eup %10544  ;;  %v7103_v14 = vadd.f32 %v7068_v51, %v17331_v6  ;;  %v7298_v56 = vsel %vm7295_vm4, %v7297_v35, %v7293_v47  ;;  %vm7200_vm1 = vcmp.eq.f32.partialorder %v7199_v32, 8.507059e+37 }
0x11c7   :  { %v7407_v12 = vmul.f32 %v10545_v43, %v7173_v63  ;;  %v7203_v0 = vsel %vm7200_vm1, %v7202_v8, %v7198_v45  ;;  %v7404_v43 = vmul.f32 %v7298_v56, %v15900_v17 }
0x11c8   :  { %10546 = vtanh.f32 %v7103_v14 }
0x11c9   :  { %v16208_v34 = vadd.f32 %v7407_v12, %v7402_v44 }
0x11cd   :  { %v7071_v18 = vpop.f32.mrf.mxu2 }
0x11ce   :  { %v10547_v58 = vpop.eup %10546  ;;  %v7104_v10 = vadd.f32 %v7071_v18, %v17408_v22 }
0x11cf   :  { %v7408_v21 = vmul.f32 %v10547_v58, %v7188_v26 }
0x11d0   :  { %10548 = vtanh.f32 %v7104_v10 }
0x11d1   :  { %v16226_v61 = vadd.f32 %v7408_v21, %v7403_v54 }
0x11d5   :  { %v7073_v63 = vpop.f32.mrf.mxu2 }
0x11d6   :  { %v10549_v51 = vpop.eup %10548  ;;  %v7105_v31 = vadd.f32 %v7073_v63, %v17440_v19 }
0x11d7   :  { %v7409_v16 = vmul.f32 %v10549_v51, %v7203_v0 }
0x11d8   :  { %v9368_v44 = vmul.f32 -1.442695, %v7105_v31 }
0x11d9   :  { %v16235_v57 = vadd.f32 %v7409_v16, %v7404_v43 }
0x11da   :  { %10550 = vpow2.f32 %v9368_v44 }
0x11dd   :  { %v7076_v4 = vpop.f32.mrf.mxu2 }
0x11de   :  { %v7106_v12 = vadd.f32 %v7076_v4, %v17464_v33 }
0x11e0   :  { %v9369_v60 = vmul.f32 -1.442695, %v7106_v12  ;;  %v10551_v42 = vpop.eup %10550 }
0x11e1   :  { %v16241_v41 = vadd.f32 1.0, %v10551_v42 }
0x11e5   :  { %v7078_v14 = vpop.f32.mrf.mxu2 }
0x11e6   :  { %v7107_v50 = vadd.f32 %v7078_v14, %v17441_v59 }
0x11e8   :  { %v9370_v20 = vmul.f32 -1.442695, %v7107_v50 }
0x11ea   :  { %10552 = vpow2.f32 %v9370_v20 }
0x11eb   :  { %10554 = vpow2.f32 %v9369_v60 }
0x11ed   :  { %v7081_v15 = vpop.f32.mrf.mxu2 }
0x11ee   :  { %v7108_v29 = vadd.f32 %v7081_v15, %v17465_v2 }
0x11f0   :  { %v9371_v17 = vmul.f32 -1.442695, %v7108_v29  ;;  %v10553_v28 = vpop.eup %10552 }
0x11f1   :  { %v10555_v11 = vpop.eup %10554  ;;  %v16243_v36 = vadd.f32 1.0, %v10553_v28 }
0x11f2   :  { %10556 = vpow2.f32 %v9371_v17  ;;  %v16247_v26 = vadd.f32 1.0, %v10555_v11 }
0x11f3   :  { %10558 = vrcp.f32 %v16241_v41  ;;  %vm7360_vm2 = vweird.f32 %v16243_v36 }
0x11f4   :  { %10560 = vrcp.f32 %v16243_v36  ;;  %vm7345_vm10 = vweird.f32 %v16247_v26  ;;  %v7349_v15 = vand.u32 2147483647, %v16247_v26 }
0x11f5   :  { %v7083_v18 = vpop.f32.mrf.mxu2 }
0x11f6   :  { %v7109_v58 = vadd.f32 %v7083_v18, %v17466_v24 }
0x11f8   :  { %v10557_v49 = vpop.eup %10556  ;;  %v9372_v10 = vmul.f32 -1.442695, %v7109_v58 }
0x11f9   :  { %v16250_v39 = vadd.f32 1.0, %v10557_v49  ;;  %v16254_v21 = vpop.eup %10558 }
0x11fa   :  { %10562 = vpow2.f32 %v9372_v10  ;;  %v16256_v53 = vpop.eup %10560  ;;  %v7326_v51 = vmul.f32 %v16254_v21, %v16241_v41  ;;  %vm7331_vm12 = vweird.f32 %v16254_v21 }
0x11fb   :  { %10564 = vrcp.f32 %v16250_v39  ;;  %v7356_v63 = vmul.f32 %v16256_v53, %v16243_v36  ;;  %v7381_v58 = vand.u32 2147483648, %v16250_v39  ;;  %vm7361_vm13 = vweird.f32 %v16256_v53 }
0x11fc   :  { %10566 = vrcp.f32 %v16247_v26  ;;  %v7327_v4 = vsub.f32 1.0, %v7326_v51  ;;  %vm7375_vm7 = vweird.f32 %v16250_v39  ;;  %vm16309_vm1 = vmor %vm7360_vm2, %vm7361_vm13 }
0x11fd   :  { %v7086_v54 = vpop.f32.mrf.mxu2  ;;  %v7357_v16 = vsub.f32 1.0, %v7356_v63 }
0x11fe   :  { %v8266_v9 = vrot.slane %v7086_v54, 4  ;;  %v7328_v60 = vmul.f32 %v16254_v21, %v7327_v4  ;;  %v7379_v54 = vand.u32 2147483647, %v16250_v39  ;;  %v7382_v4 = vor.u32 1.1754944e-38, %v7381_v58 }
0x11ff   :  { %v7358_v12 = vmul.f32 %v16256_v53, %v7357_v16  ;;  %v16396_v16 = vld [vmem:[%s17006_s8 + $0x40] sm:$0xff] }
0x1200   :  { %v10563_v32 = vpop.eup %10562  ;;  %v16260_v47 = vsel %vm51_vm6, %v16013_v40, %v8266_v9 }
0x1201   :  { %v16262_v35 = vpop.eup %10564  ;;  %v7324_v45 = vadd.f32 1.0, %v10563_v32  ;;  %v7359_v10 = vadd.f32 %v16256_v53, %v7358_v12 }
0x1202   :  { %v16264_v8 = vpop.eup %10566  ;;  %v7371_v56 = vmul.f32 %v16262_v35, %v16250_v39  ;;  %vm7376_vm5 = vweird.f32 %v16262_v35 }
0x1203   :  { %10568 = vrcp.f32 %v7324_v45  ;;  %v7341_v0 = vmul.f32 %v16264_v8, %v16247_v26  ;;  %vm7346_vm8 = vweird.f32 %v16264_v8  ;;  %v7396_v29 = vand.u32 2147483648, %v7324_v45  ;;  %vm16297_vm9 = vmor %vm7375_vm7, %vm7376_vm5 }
0x1204   :  { %v7372_v40 = vsub.f32 1.0, %v7371_v56  ;;  %10570 = vtanh.f32 %v16185_v37  ;;  %v7394_v18 = vand.u32 2147483647, %v7324_v45  ;;  %vm7390_vm15 = vweird.f32 %v7324_v45 }
0x1205   :  { %v7088_v43 = vpop.f32.mrf.mxu2  ;;  %10572 = vtanh.f32 %v16208_v34  ;;  %v7342_v14 = vsub.f32 1.0, %v7341_v0  ;;  %v7366_v56 = vand.u32 2147483648, %v16243_v36  ;;  %v7397_v0 = vor.u32 1.1754944e-38, %v7396_v29 }
0x1206   :  { %v7373_v50 = vmul.f32 %v16262_v35, %v7372_v40  ;;  %10574 = vtanh.f32 %v16226_v61  ;;  %v7364_v40 = vand.u32 2147483647, %v16243_v36  ;;  %vm7395_vm4 = vcmp.eq.f32.partialorder %v7394_v18, 8.507059e+37 }
0x1207   :  { %10576 = vtanh.f32 %v16235_v57  ;;  %v7343_v42 = vmul.f32 %v16264_v8, %v7342_v14  ;;  %v7351_v14 = vand.u32 2147483648, %v16247_v26  ;;  %v7363_v36 = vsel %vm16309_vm1, %v16256_v53, %v7359_v10 }
0x1208   :  { %v7374_v17 = vadd.f32 %v16262_v35, %v7373_v50  ;;  %vm7380_vm5 = vcmp.eq.f32.partialorder %v7379_v54, 8.507059e+37  ;;  %vm7365_vm13 = vcmp.eq.f32.partialorder %v7364_v40, 8.507059e+37  ;;  %vm7330_vm7 = vweird.f32 %v16241_v41  ;;  %v16375_v40 = vld [vmem:[%s17006_s8 + $0x28] sm:$0xff] }
0x1209   :  { %v10569_v31 = vpop.eup %10568  ;;  %v7334_v53 = vand.u32 2147483647, %v16241_v41  ;;  %10578 = vtanh.f32 %v16145_v52  ;;  %v7352_v26 = vor.u32 1.1754944e-38, %v7351_v14 }
0x120a   :  { %v7386_v44 = vmul.f32 %v10569_v31, %v7324_v45  ;;  %v10571_v28 = vpop.eup %10570  ;;  %vm7391_vm14 = vweird.f32 %v10569_v31  ;;  %v7378_v39 = vsel %vm16297_vm9, %v16262_v35, %v7374_v17  ;;  %v7344_v45 = vadd.f32 %v16264_v8, %v7343_v42 }
0x120b   :  { %v10573_v49 = vpop.eup %10572  ;;  %vm7392_vm3 = vmor %vm7390_vm15, %vm7391_vm14  ;;  %v7329_v35 = vadd.f32 %v16254_v21, %v7328_v60  ;;  %v7383_v12 = vsel %vm7380_vm5, %v7382_v4, %v7378_v39  ;;  %v16382_v39 = vld [vmem:[%s17006_s8 + $0x30] sm:$0xff] }
0x120c   :  { %v7387_v20 = vsub.f32 1.0, %v7386_v44  ;;  %v10575_v9 = vpop.eup %10574  ;;  %vm16323_vm14 = vmor %vm7345_vm10, %vm7346_vm8  ;;  %vm7350_vm10 = vcmp.eq.f32.partialorder %v7349_v15, 8.507059e+37  ;;  %vm7335_vm8 = vcmp.eq.f32.partialorder %v7334_v53, 8.507059e+37  ;;  %v16347_v15 = vld [vmem:[%s17006_s8 + $0x8] sm:$0xff] }
0x120d   :  { %v10577_v51 = vpop.eup %10576  ;;  %v7348_v60 = vsel %vm16323_vm14, %v16264_v8, %v7344_v45  ;;  %vm7332_vm15 = vmor %vm7330_vm7, %vm7331_vm12  ;;  %v16389_v45 = vld [vmem:[%s17006_s8 + $0x38] sm:$0xff] }
0x120e   :  { %v7388_v11 = vmul.f32 %v10569_v31, %v7387_v20  ;;  %v7336_v20 = vand.u32 2147483648, %v16241_v41  ;;  %v7333_v18 = vsel %vm7332_vm15, %v16254_v21, %v7329_v35  ;;  %v7353_v41 = vsel %vm7350_vm10, %v7352_v26, %v7348_v60  ;;  %v16340_v21 = vld [vmem:[%s17006_s8] sm:$0xff] }
0x120f   :  { %v10579_v63 = vpop.eup %10578 }
0x1210   :  { %v7389_v32 = vadd.f32 %v10569_v31, %v7388_v11  ;;  %v7423_v11 = vmul.f32 %v10575_v9, %v7383_v12  ;;  %v7337_v10 = vor.u32 1.1754944e-38, %v7336_v20  ;;  %v16368_v9 = vld [vmem:[%s17006_s8 + $0x20] sm:$0xff] }
0x1212   :  { %v7393_v43 = vsel %vm7392_vm3, %v10569_v31, %v7389_v32  ;;  %v7367_v31 = vor.u32 1.1754944e-38, %v7366_v56  ;;  %v7338_v8 = vsel %vm7335_vm8, %v7337_v10, %v7333_v18  ;;  %v7421_v56 = vmul.f32 %v10571_v28, %v7353_v41  ;;  %v16354_v28 = vld [vmem:[%s17006_s8 + $0x10] sm:$0xff] }
0x1213   :  { %v7398_v50 = vsel %vm7395_vm4, %v7397_v0, %v7393_v43 }
0x1214   :  { %v7424_v44 = vmul.f32 %v10577_v51, %v7398_v50  ;;  %v7368_v42 = vsel %vm7365_vm13, %v7367_v31, %v7363_v36  ;;  %v7420_v51 = vmul.f32 %v10579_v63, %v7338_v8  ;;  %v16403_v50 = vld [vmem:[%s17006_s8 + $0x48] sm:$0xff] }
0x1215   :  { %v7422_v54 = vmul.f32 %v10573_v49, %v7368_v42  ;;  %v16361_v49 = vld [vmem:[%s17006_s8 + $0x18] sm:$0xff] }
0x1216   :  { %v7427_v17 = vpack.c.bf16 %v7424_v44, %v7424_v44  ;;  %v7425_v0 = vpack.c.bf16 %v7421_v56, %v7420_v51 }
0x1217   :  { %v7426_v32 = vpack.c.bf16 %v7423_v11, %v7422_v54 }
0x1218   :  { %v7429_v58 = vsel %vm51_vm6, %v7427_v17, 0 }
0x1219   :  { %7436 = vmatpush.bf16.msrb.mxu0 %v7429_v58 }
0x121d   :  { %7437 = vmatpush.bf16.msrb.mxu0 %v7426_v32 }
0x1221   :  { %7438 = vmatpush.bf16.msrb.mxu0 %v7425_v0 }
0x1224   :  { %9373 = vmatmul.msk.bf16.vlgmr.msrb.gmra.mxu0 %vm4808_vm0, %v16340_v21 }
0x1234   :  { %9374 = vmatmul.msk.bf16.gmra.mxu0 %vm4808_vm0, %v16347_v15 }
0x1244   :  { %9375 = vmatmul.msk.bf16.gmra.mxu0 %vm4808_vm0, %v16354_v28 }
0x1254   :  { %9376 = vmatmul.msk.bf16.gmra.mxu0 %vm4808_vm0, %v16361_v49 }
0x1264   :  { %9377 = vmatmul.msk.bf16.gmra.mxu0 %vm4808_vm0, %v16368_v9 }
0x1274   :  { %9378 = vmatmul.msk.bf16.gmra.mxu0 %vm4808_vm0, %v16375_v40 }
0x1284   :  { %9379 = vmatmul.msk.bf16.gmra.mxu0 %vm4808_vm0, %v16382_v39 }
0x1294   :  { %9380 = vmatmul.msk.bf16.gmra.mxu0 %vm4808_vm0, %v16389_v45 }
0x12a1   :  { %v7440_v43 = vpop.f32.mrf.mxu0 }
0x12a2   :  { %v7494_v44 = vadd.f32 %v7440_v43, %v14034_v30 }
0x12a4   :  { %9381 = vmatmul.msk.bf16.gmra.mxu0 %vm4808_vm0, %v16396_v16  ;;  %v9384_v12 = vmul.f32 -1.442695, %v7494_v44 }
0x12a6   :  { %10580 = vpow2.f32 %v9384_v12 }
0x12a9   :  { %v7442_v4 = vpop.f32.mrf.mxu0 }
0x12aa   :  { %v7495_v53 = vadd.f32 %v7442_v4, %v14038_v25 }
0x12ac   :  { %v9385_v17 = vmul.f32 -1.442695, %v7495_v53  ;;  %v10581_v26 = vpop.eup %10580 }
0x12ad   :  { %v16414_v10 = vadd.f32 1.0, %v10581_v26 }
0x12af   :  { %vm7539_vm9 = vweird.f32 %v16414_v10 }
0x12b1   :  { %v7445_v14 = vpop.f32.mrf.mxu0 }
0x12b2   :  { %v7496_v58 = vadd.f32 %v7445_v14, %v14051_v55 }
0x12b4   :  { %9382 = vmatmul.msk.bf16.gmra.mxu0 %vm4808_vm0, %v16403_v50  ;;  %v9386_v8 = vmul.f32 -1.442695, %v7496_v58 }
0x12b9   :  { %v7447_v36 = vpop.f32.mrf.mxu0 }
0x12ba   :  { %v7497_v43 = vadd.f32 %v7447_v36, %v17388_v62 }
0x12bc   :  { %v9387_v53 = vmul.f32 -1.442695, %v7497_v43 }
0x12c1   :  { %v7450_v35 = vpop.f32.mrf.mxu0 }
0x12c4   :  { %9383 = vmatmul.msk.bf16.gmra.mxu0 %vm4808_vm0, %v15372_v13 }
0x12c9   :  { %v7452_v31 = vpop.f32.mrf.mxu0 }
0x12ca   :  { %v7499_v20 = vadd.f32 %v7452_v31, %v17392_v46 }
0x12cc   :  { %v9389_v29 = vmul.f32 -1.442695, %v7499_v20 }
0x12ce   :  { %10582 = vpow2.f32 %v9389_v29 }
0x12cf   :  { %10584 = vpow2.f32 %v9385_v17  ;;  %v7498_v17 = vadd.f32 %v7450_v35, %v17390_v48 }
0x12d1   :  { %v7455_v60 = vpop.f32.mrf.mxu0 }
0x12d2   :  { %v7500_v42 = vadd.f32 %v7455_v60, %v17391_v23 }
0x12d4   :  { %v9390_v11 = vmul.f32 -1.442695, %v7500_v42  ;;  %v10583_v18 = vpop.eup %10582 }
0x12d5   :  { %v16416_v41 = vadd.f32 1.0, %v10583_v18  ;;  %v10585_v56 = vpop.eup %10584 }
0x12d6   :  { %10586 = vpow2.f32 %v9390_v11  ;;  %v16421_v0 = vadd.f32 1.0, %v10585_v56 }
0x12d7   :  { %10588 = vrcp.f32 %v16414_v10  ;;  %vm7634_vm3 = vweird.f32 %v16416_v41 }
0x12d8   :  { %10590 = vrcp.f32 %v16416_v41  ;;  %vm7554_vm8 = vweird.f32 %v16421_v0 }
0x12d9   :  { %v7457_v54 = vpop.f32.mrf.mxu0  ;;  %10592 = vpow2.f32 %v9386_v8 }
0x12da   :  { %v7501_v32 = vadd.f32 %v7457_v54, %v17393_v27  ;;  %v9388_v54 = vmul.f32 -1.442695, %v7498_v17 }
0x12dc   :  { %v9391_v63 = vmul.f32 -1.442695, %v7501_v32  ;;  %v10587_v51 = vpop.eup %10586 }
0x12dd   :  { %v16424_v4 = vadd.f32 1.0, %v10587_v51  ;;  %v16426_v14 = vpop.eup %10588 }
0x12de   :  { %10594 = vpow2.f32 %v9391_v63  ;;  %v16428_v31 = vpop.eup %10590  ;;  %v7535_v29 = vmul.f32 %v16426_v14, %v16414_v10  ;;  %vm7540_vm12 = vweird.f32 %v16426_v14 }
0x12df   :  { %10596 = vrcp.f32 %v16421_v0  ;;  %v10593_v20 = vpop.eup %10592  ;;  %v7630_v42 = vmul.f32 %v16428_v31, %v16416_v41  ;;  %vm7635_vm2 = vweird.f32 %v16428_v31  ;;  %vm16475_vm4 = vmor %vm7539_vm9, %vm7540_vm12  ;;  %vm7649_vm15 = vweird.f32 %v16424_v4 }
0x12e0   :  { %10598 = vrcp.f32 %v16424_v4  ;;  %v16438_v26 = vadd.f32 1.0, %v10593_v20  ;;  %v7536_v11 = vsub.f32 1.0, %v7535_v29  ;;  %vm16485_vm1 = vmor %vm7634_vm3, %vm7635_vm2 }
0x12e1   :  { %v7460_v44 = vpop.f32.mrf.mxu0  ;;  %v7631_v8 = vsub.f32 1.0, %v7630_v42 }
0x12e2   :  { %v7502_v12 = vadd.f32 %v7460_v44, %v17394_v38  ;;  %v7537_v44 = vmul.f32 %v16426_v14, %v7536_v11 }
0x12e4   :  { %v9392_v60 = vmul.f32 -1.442695, %v7502_v12  ;;  %v10595_v36 = vpop.eup %10594  ;;  %v7632_v12 = vmul.f32 %v16428_v31, %v7631_v8 }
0x12e5   :  { %v16440_v18 = vadd.f32 1.0, %v10595_v36  ;;  %v16442_v58 = vpop.eup %10596  ;;  %v7538_v36 = vadd.f32 %v16426_v14, %v7537_v44 }
0x12e6   :  { %10600 = vpow2.f32 %v9392_v60  ;;  %v16444_v56 = vpop.eup %10598  ;;  %v7550_v51 = vmul.f32 %v16442_v58, %v16421_v0  ;;  %v7633_v8 = vadd.f32 %v16428_v31, %v7632_v12  ;;  %v7543_v12 = vand.u32 2147483647, %v16414_v10 }
0x12e7   :  { %10602 = vpow2.f32 %v9387_v53  ;;  %v7645_v20 = vmul.f32 %v16444_v56, %v16424_v4  ;;  %vm7555_vm13 = vweird.f32 %v16442_v58  ;;  %vm7650_vm7 = vweird.f32 %v16444_v56 }
0x12e8   :  { %10604 = vrcp.f32 %v16438_v26  ;;  %v7551_v60 = vsub.f32 1.0, %v7550_v51  ;;  %v7545_v51 = vand.u32 2147483648, %v16414_v10  ;;  %v7637_v38 = vsel %vm16485_vm1, %v16428_v31, %v7633_v8  ;;  %vm16520_vm10 = vmor %vm7649_vm15, %vm7650_vm7 }
0x12e9   :  { %v7462_v32 = vpop.f32.mrf.mxu0  ;;  %10606 = vrcp.f32 %v16440_v18  ;;  %v7646_v11 = vsub.f32 1.0, %v7645_v20  ;;  %v7638_v20 = vand.u32 2147483647, %v16416_v41  ;;  %vm7544_vm5 = vcmp.eq.f32.partialorder %v7543_v12, 8.507059e+37  ;;  %vm16533_vm12 = vmor %vm7554_vm8, %vm7555_vm13 }
0x12ea   :  { %v7503_v63 = vadd.f32 %v7462_v32, %v17395_v7  ;;  %10608 = vpow2.f32 %v9388_v54  ;;  %v7542_v7 = vsel %vm16475_vm4, %v16426_v14, %v7538_v36  ;;  %v7552_v48 = vmul.f32 %v16442_v58, %v7551_v60 }
0x12eb   :  { %v7647_v10 = vmul.f32 %v16444_v56, %v7646_v11  ;;  %v7546_v55 = vor.u32 1.1754944e-38, %v7545_v51  ;;  %vm7639_vm14 = vcmp.eq.f32.partialorder %v7638_v20, 8.507059e+37  ;;  %v7560_v14 = vand.u32 2147483648, %v16421_v0 }
0x12ec   :  { %v10601_v35 = vpop.eup %10600  ;;  %v9393_v43 = vmul.f32 -1.442695, %v7503_v63  ;;  %v7640_v63 = vand.u32 2147483648, %v16416_v41  ;;  %v7553_v11 = vadd.f32 %v16442_v58, %v7552_v48  ;;  %v7558_v20 = vand.u32 2147483647, %v16421_v0 }
0x12ed   :  { %v10603_v29 = vpop.eup %10602  ;;  %v16455_v53 = vadd.f32 1.0, %v10601_v35  ;;  %v7547_v60 = vsel %vm7544_vm5, %v7546_v55, %v7542_v7  ;;  %v7655_v55 = vand.u32 2147483648, %v16424_v4  ;;  %vm7664_vm1 = vweird.f32 %v16440_v18 }
0x12ee   :  { %10610 = vpow2.f32 %v9393_v43  ;;  %v16459_v17 = vpop.eup %10604  ;;  %v16461_v42 = vadd.f32 1.0, %v10603_v29  ;;  %v7641_v27 = vor.u32 1.1754944e-38, %v7640_v63  ;;  %v7648_v63 = vadd.f32 %v16444_v56, %v7647_v10 }
0x12ef   :  { %v16465_v32 = vpop.eup %10606  ;;  %10612 = vrcp.f32 %v16455_v53  ;;  %vm7559_vm9 = vcmp.eq.f32.partialorder %v7558_v20, 8.507059e+37  ;;  %vm7570_vm3 = vweird.f32 %v16459_v17 }
0x12f0   :  { %v10609_v43 = vpop.eup %10608  ;;  %v7660_v41 = vmul.f32 %v16465_v32, %v16440_v18  ;;  %v7642_v36 = vsel %vm7639_vm14, %v7641_v27, %v7637_v38  ;;  %vm7665_vm4 = vweird.f32 %v16465_v32  ;;  %vm7569_vm14 = vweird.f32 %v16438_v26 }
0x12f1   :  { %v7465_v54 = vpop.f32.mrf.mxu0  ;;  %v16500_v62 = vadd.f32 1.0, %v10609_v43  ;;  %v7804_v38 = vmul.f32 %v7642_v36, %v16145_v52  ;;  %v7653_v43 = vand.u32 2147483647, %v16424_v4  ;;  %v7652_v4 = vsel %vm16520_vm10, %v16444_v56, %v7648_v63  ;;  %vm16560_vm5 = vmor %vm7664_vm1, %vm7665_vm4 }
0x12f2   :  { %v7504_v35 = vadd.f32 %v7465_v54, %v17453_v1  ;;  %v7565_v54 = vmul.f32 %v16459_v17, %v16438_v26  ;;  %v7661_v31 = vsub.f32 1.0, %v7660_v41  ;;  %v7656_v41 = vor.u32 1.1754944e-38, %v7655_v55  ;;  %vm7571_vm13 = vmor %vm7569_vm14, %vm7570_vm3 }
0x12f3   :  { %vm7654_vm2 = vcmp.eq.f32.partialorder %v7653_v43, 8.507059e+37  ;;  %v7575_v56 = vand.u32 2147483648, %v16438_v26  ;;  %v7668_v52 = vand.u32 2147483647, %v16440_v18 }
0x12f4   :  { %v10611_v29 = vpop.eup %10610  ;;  %10614 = vtanh.f32 %v7504_v35  ;;  %v7566_v1 = vsub.f32 1.0, %v7565_v54 }
0x12f5   :  { %10616 = vrcp.f32 %v16461_v42  ;;  %v16502_v44 = vadd.f32 1.0, %v10611_v29  ;;  %v16507_v35 = vpop.eup %10612  ;;  %v7662_v29 = vmul.f32 %v16465_v32, %v7661_v31  ;;  %v7561_v31 = vor.u32 1.1754944e-38, %v7560_v14 }
0x12f6   :  { %10618 = vrcp.f32 %v16500_v62  ;;  %v7675_v54 = vmul.f32 %v16507_v35, %v16455_v53  ;;  %v7567_v36 = vmul.f32 %v16459_v17, %v7566_v1  ;;  %v7670_v1 = vand.u32 2147483648, %v16440_v18 }
0x12f7   :  { %10620 = vrcp.f32 %v16502_v44  ;;  %vm7669_vm7 = vcmp.eq.f32.partialorder %v7668_v52, 8.507059e+37  ;;  %vm7680_vm8 = vweird.f32 %v16507_v35 }
0x12f8   :  { %v7676_v55 = vsub.f32 1.0, %v7675_v54  ;;  %v7568_v43 = vadd.f32 %v16459_v17, %v7567_v36  ;;  %v7588_v54 = vand.u32 2147483647, %v16461_v42 }
0x12f9   :  { %v7467_v8 = vpop.f32.mrf.mxu0 }
0x12fa   :  { %v10615_v51 = vpop.eup %10614  ;;  %v7505_v48 = vadd.f32 %v7467_v8, %v17330_v3 }
0x12fb   :  { %v16515_v27 = vpop.eup %10616  ;;  %v7809_v7 = vmul.f32 %v10615_v51, %v7547_v60  ;;  %v7557_v60 = vsel %vm16533_vm12, %v16442_v58, %v7553_v11  ;;  %v7657_v51 = vsel %vm7654_vm2, %v7656_v41, %v7652_v4  ;;  %v7663_v58 = vadd.f32 %v16465_v32, %v7662_v29 }
0x12fc   :  { %10622 = vtanh.f32 %v7505_v48  ;;  %v7580_v0 = vmul.f32 %v16515_v27, %v16461_v42  ;;  %v16546_v8 = vpop.eup %10618  ;;  %v7562_v48 = vsel %vm7559_vm9, %v7561_v31, %v7557_v60  ;;  %v7805_v12 = vmul.f32 %v7657_v51, %v16185_v37 }
0x12fd   :  { %v16529_v10 = vadd.f32 %v7809_v7, %v7804_v38  ;;  %v16550_v63 = vpop.eup %10620  ;;  %v7573_v29 = vand.u32 2147483647, %v16438_v26  ;;  %v7677_v4 = vmul.f32 %v16507_v35, %v7676_v55  ;;  %v7667_v37 = vsel %vm16560_vm5, %v16465_v32, %v7663_v58 }
0x12fe   :  { %v7581_v14 = vsub.f32 1.0, %v7580_v0  ;;  %v7690_v0 = vmul.f32 %v16550_v63, %v16502_v44  ;;  %v7595_v18 = vmul.f32 %v16546_v8, %v16500_v62  ;;  %v7671_v60 = vor.u32 1.1754944e-38, %v7670_v1 }
0x12ff   :  { %v7572_v26 = vsel %vm7571_vm13, %v16459_v17, %v7568_v43  ;;  %v7576_v31 = vor.u32 1.1754944e-38, %v7575_v56  ;;  %vm7574_vm15 = vcmp.eq.f32.partialorder %v7573_v29, 8.507059e+37  ;;  %vm7585_vm10 = vweird.f32 %v16515_v27 }
0x1300   :  { %v7582_v36 = vmul.f32 %v16515_v27, %v7581_v14  ;;  %v7672_v51 = vsel %vm7669_vm7, %v7671_v60, %v7667_v37  ;;  %v7691_v55 = vsub.f32 1.0, %v7690_v0  ;;  %v7678_v32 = vadd.f32 %v16507_v35, %v7677_v4 }
0x1301   :  { %v7470_v38 = vpop.f32.mrf.mxu0  ;;  %v7685_v1 = vand.u32 2147483648, %v16455_v53  ;;  %vm7679_vm12 = vweird.f32 %v16455_v53  ;;  %v7806_v14 = vmul.f32 %v7672_v51, %v16208_v34  ;;  %v7683_v43 = vand.u32 2147483647, %v16455_v53 }
0x1302   :  { %v10623_v11 = vpop.eup %10622  ;;  %v7506_v7 = vadd.f32 %v7470_v38, %v17389_v5  ;;  %v7583_v56 = vadd.f32 %v16515_v27, %v7582_v36  ;;  %vm7681_vm2 = vmor %vm7679_vm12, %vm7680_vm8  ;;  %vm7584_vm9 = vweird.f32 %v16461_v42  ;;  %vm7695_vm1 = vweird.f32 %v16550_v63 }
0x1303   :  { %v7810_v20 = vmul.f32 %v10623_v11, %v7562_v48  ;;  %v7577_v48 = vsel %vm7574_vm15, %v7576_v31, %v7572_v26  ;;  %v7596_v11 = vsub.f32 1.0, %v7595_v18  ;;  %v7682_v29 = vsel %vm7681_vm2, %v16507_v35, %v7678_v32  ;;  %vm7586_vm3 = vmor %vm7584_vm9, %vm7585_vm10 }
0x1304   :  { %10624 = vtanh.f32 %v7506_v7  ;;  %v7686_v4 = vor.u32 1.1754944e-38, %v7685_v1  ;;  %v7587_v53 = vsel %vm7586_vm3, %v16515_v27, %v7583_v56  ;;  %vm7684_vm4 = vcmp.eq.f32.partialorder %v7683_v43, 8.507059e+37 }
0x1305   :  { %v16569_v41 = vadd.f32 %v7810_v20, %v7805_v12  ;;  %v7590_v12 = vand.u32 2147483648, %v16461_v42  ;;  %v7692_v20 = vmul.f32 %v16550_v63, %v7691_v55  ;;  %v7597_v34 = vmul.f32 %v16546_v8, %v7596_v11 }
0x1306   :  { %v7687_v37 = vsel %vm7684_vm4, %v7686_v4, %v7682_v29  ;;  %vm7589_vm5 = vcmp.eq.f32.partialorder %v7588_v54, 8.507059e+37  ;;  %vm7600_vm14 = vweird.f32 %v16546_v8  ;;  %v7700_v60 = vand.u32 2147483648, %v16502_v44 }
0x1307   :  { %v7591_v0 = vor.u32 1.1754944e-38, %v7590_v12  ;;  %v7693_v42 = vadd.f32 %v16550_v63, %v7692_v20  ;;  %v7598_v31 = vadd.f32 %v16546_v8, %v7597_v34  ;;  %vm7694_vm13 = vweird.f32 %v16502_v44 }
0x1308   :  { %v7807_v27 = vmul.f32 %v7687_v37, %v16226_v61  ;;  %v7698_v55 = vand.u32 2147483647, %v16502_v44  ;;  %vm7696_vm7 = vmor %vm7694_vm13, %vm7695_vm1  ;;  %vm7599_vm15 = vweird.f32 %v16500_v62  ;;  %v7603_v32 = vand.u32 2147483647, %v16500_v62 }
0x1309   :  { %v7472_v38 = vpop.f32.mrf.mxu0  ;;  %v7592_v26 = vsel %vm7589_vm5, %v7591_v0, %v7587_v53  ;;  %v7701_v11 = vor.u32 1.1754944e-38, %v7700_v60  ;;  %vm7601_vm10 = vmor %vm7599_vm15, %vm7600_vm14  ;;  %vm17483_vm2 = vcmask 1044480  }
0x130a   :  { %v10625_v58 = vpop.eup %10624  ;;  %v7507_v17 = vadd.f32 %v7472_v38, %v17331_v6  ;;  %v7602_v61 = vsel %vm7601_vm10, %v16546_v8, %v7598_v31  ;;  %vm7699_vm8 = vcmp.eq.f32.partialorder %v7698_v55, 8.507059e+37  ;;  %vm7604_vm12 = vcmp.eq.f32.partialorder %v7603_v32, 8.507059e+37 }
0x130b   :  { %v7811_v7 = vmul.f32 %v10625_v58, %v7577_v48  ;;  %v7605_v48 = vand.u32 2147483648, %v16500_v62  ;;  %v7697_v58 = vsel %vm7696_vm7, %v16550_v63, %v7693_v42 }
0x130c   :  { %10626 = vtanh.f32 %v7507_v17  ;;  %v7702_v1 = vsel %vm7699_vm8, %v7701_v11, %v7697_v58 }
0x130d   :  { %v16592_v52 = vadd.f32 %v7811_v7, %v7806_v14  ;;  %v7606_v44 = vor.u32 1.1754944e-38, %v7605_v48  ;;  %v7808_v7 = vmul.f32 %v7702_v1, %v16235_v57 }
0x130f   :  { %v7607_v14 = vsel %vm7604_vm12, %v7606_v44, %v7602_v61 }
0x1311   :  { %v7475_v18 = vpop.f32.mrf.mxu0 }
0x1312   :  { %v10627_v35 = vpop.eup %10626  ;;  %v7508_v36 = vadd.f32 %v7475_v18, %v17408_v22 }
0x1313   :  { %v7812_v51 = vmul.f32 %v10627_v35, %v7592_v26 }
0x1314   :  { %10628 = vtanh.f32 %v7508_v36 }
0x1315   :  { %v16610_v38 = vadd.f32 %v7812_v51, %v7807_v27 }
0x1319   :  { %v7477_v17 = vpop.f32.mrf.mxu0 }
0x131a   :  { %v10629_v56 = vpop.eup %10628  ;;  %v7509_v63 = vadd.f32 %v7477_v17, %v17440_v19 }
0x131b   :  { %v7813_v43 = vmul.f32 %v10629_v56, %v7607_v14 }
0x131c   :  { %v9394_v29 = vmul.f32 -1.442695, %v7509_v63 }
0x131d   :  { %v16619_v12 = vadd.f32 %v7813_v43, %v7808_v7 }
0x131e   :  { %10630 = vpow2.f32 %v9394_v29 }
0x1321   :  { %v7480_v62 = vpop.f32.mrf.mxu0 }
0x1322   :  { %v7510_v8 = vadd.f32 %v7480_v62, %v17464_v33 }
0x1324   :  { %v9395_v34 = vmul.f32 -1.442695, %v7510_v8  ;;  %v10631_v37 = vpop.eup %10630 }
0x1325   :  { %v16625_v42 = vadd.f32 1.0, %v10631_v37 }
0x1329   :  { %v7482_v20 = vpop.f32.mrf.mxu0 }
0x132a   :  { %v7511_v54 = vadd.f32 %v7482_v20, %v17441_v59 }
0x132c   :  { %v9396_v4 = vmul.f32 -1.442695, %v7511_v54 }
0x132e   :  { %10632 = vpow2.f32 %v9396_v4 }
0x132f   :  { %10634 = vpow2.f32 %v9395_v34 }
0x1331   :  { %v7485_v53 = vpop.f32.mrf.mxu0 }
0x1332   :  { %v7512_v0 = vadd.f32 %v7485_v53, %v17465_v2 }
0x1334   :  { %v9397_v57 = vmul.f32 -1.442695, %v7512_v0  ;;  %v10633_v18 = vpop.eup %10632 }
0x1335   :  { %v10635_v35 = vpop.eup %10634  ;;  %v16627_v60 = vadd.f32 1.0, %v10633_v18 }
0x1336   :  { %10636 = vpow2.f32 %v9397_v57  ;;  %v16631_v27 = vadd.f32 1.0, %v10635_v35 }
0x1337   :  { %10638 = vrcp.f32 %v16625_v42  ;;  %vm7764_vm15 = vweird.f32 %v16627_v60 }
0x1338   :  { %10640 = vrcp.f32 %v16627_v60  ;;  %vm7749_vm3 = vweird.f32 %v16631_v27  ;;  %v7753_v37 = vand.u32 2147483647, %v16631_v27 }
0x1339   :  { %v7487_v26 = vpop.f32.mrf.mxu0 }
0x133a   :  { %v7513_v36 = vadd.f32 %v7487_v26, %v17466_v24 }
0x133c   :  { %v10637_v31 = vpop.eup %10636  ;;  %v9398_v51 = vmul.f32 -1.442695, %v7513_v36 }
0x133d   :  { %v16634_v55 = vadd.f32 1.0, %v10637_v31  ;;  %v16638_v32 = vpop.eup %10638 }
0x133e   :  { %10642 = vpow2.f32 %v9398_v51  ;;  %v16640_v11 = vpop.eup %10640  ;;  %v7730_v43 = vmul.f32 %v16638_v32, %v16625_v42  ;;  %vm7735_vm9 = vweird.f32 %v16638_v32 }
0x133f   :  { %10644 = vrcp.f32 %v16634_v55  ;;  %v7760_v7 = vmul.f32 %v16640_v11, %v16627_v60  ;;  %vm7765_vm14 = vweird.f32 %v16640_v11  ;;  %vm7779_vm13 = vweird.f32 %v16634_v55 }
0x1340   :  { %10646 = vrcp.f32 %v16631_v27  ;;  %v7731_v54 = vsub.f32 1.0, %v7730_v43 }
0x1341   :  { %v7490_v48 = vpop.f32.mrf.mxu0  ;;  %v7761_v20 = vsub.f32 1.0, %v7760_v7 }
0x1342   :  { %v8269_v58 = vrot.slane %v7490_v48, 3  ;;  %v7732_v57 = vmul.f32 %v16638_v32, %v7731_v54  ;;  %v7785_v48 = vand.u32 2147483648, %v16634_v55  ;;  %v7768_v54 = vand.u32 2147483647, %v16627_v60 }
0x1343   :  { %v7762_v53 = vmul.f32 %v16640_v11, %v7761_v20 }
0x1344   :  { %v10643_v61 = vpop.eup %10642  ;;  %v16644_v44 = vsel %vm17483_vm2, %v16260_v47, %v8269_v58  ;;  %vm16693_vm2 = vmor %vm7764_vm15, %vm7765_vm14  ;;  %vm7769_vm14 = vcmp.eq.f32.partialorder %v7768_v54, 8.507059e+37 }
0x1345   :  { %v16646_v1 = vpop.eup %10644  ;;  %v7728_v17 = vadd.f32 1.0, %v10643_v61  ;;  %v7763_v61 = vadd.f32 %v16640_v11, %v7762_v53  ;;  %v7755_v53 = vand.u32 2147483648, %v16631_v27 }
0x1346   :  { %v16648_v56 = vpop.eup %10646  ;;  %v7775_v14 = vmul.f32 %v16646_v1, %v16634_v55  ;;  %vm7780_vm1 = vweird.f32 %v16646_v1 }
0x1347   :  { %10648 = vrcp.f32 %v7728_v17  ;;  %v7745_v62 = vmul.f32 %v16648_v56, %v16631_v27  ;;  %vm7750_vm4 = vweird.f32 %v16648_v56  ;;  %v7800_v18 = vand.u32 2147483648, %v7728_v17  ;;  %vm16681_vm10 = vmor %vm7779_vm13, %vm7780_vm1 }
0x1348   :  { %v7776_v47 = vsub.f32 1.0, %v7775_v14  ;;  %10650 = vtanh.f32 %v16569_v41  ;;  %v7798_v51 = vand.u32 2147483647, %v7728_v17  ;;  %v7783_v14 = vand.u32 2147483647, %v16634_v55 }
0x1349   :  { %v7492_v63 = vpop.f32.mrf.mxu0  ;;  %10652 = vtanh.f32 %v16592_v52  ;;  %v7746_v8 = vsub.f32 1.0, %v7745_v62  ;;  %vm7794_vm7 = vweird.f32 %v7728_v17  ;;  %v7770_v62 = vand.u32 2147483648, %v16627_v60 }
0x134a   :  { %v7777_v4 = vmul.f32 %v16646_v1, %v7776_v47  ;;  %10654 = vtanh.f32 %v16610_v38  ;;  %v7801_v20 = vor.u32 1.1754944e-38, %v7800_v18  ;;  %vm7799_vm12 = vcmp.eq.f32.partialorder %v7798_v51, 8.507059e+37 }
0x134b   :  { %10656 = vtanh.f32 %v16619_v12  ;;  %v7747_v26 = vmul.f32 %v16648_v56, %v7746_v8  ;;  %v7767_v60 = vsel %vm16693_vm2, %v16640_v11, %v7763_v61  ;;  %vm7784_vm1 = vcmp.eq.f32.partialorder %v7783_v14, 8.507059e+37 }
0x134c   :  { %v7778_v35 = vadd.f32 %v16646_v1, %v7777_v4  ;;  %vm7734_vm13 = vweird.f32 %v16625_v42  ;;  %v7738_v11 = vand.u32 2147483647, %v16625_v42  ;;  %10658 = vtanh.f32 %v16529_v10 }
0x134d   :  { %v10649_v29 = vpop.eup %10648  ;;  %v7756_v27 = vor.u32 1.1754944e-38, %v7755_v53 }
0x134e   :  { %v7790_v34 = vmul.f32 %v10649_v29, %v7728_v17  ;;  %v10651_v36 = vpop.eup %10650  ;;  %vm7795_vm5 = vweird.f32 %v10649_v29  ;;  %v7782_v55 = vsel %vm16681_vm10, %v16646_v1, %v7778_v35  ;;  %v7748_v17 = vadd.f32 %v16648_v56, %v7747_v26 }
0x134f   :  { %v10653_v58 = vpop.eup %10652  ;;  %vm7796_vm8 = vmor %vm7794_vm7, %vm7795_vm5  ;;  %v7733_v1 = vadd.f32 %v16638_v32, %v7732_v57  ;;  %v7740_v26 = vand.u32 2147483648, %v16625_v42 }
0x1350   :  { %v7791_v0 = vsub.f32 1.0, %v7790_v34  ;;  %v10655_v7 = vpop.eup %10654  ;;  %v7786_v34 = vor.u32 1.1754944e-38, %v7785_v48  ;;  %vm16707_vm5 = vmor %vm7749_vm3, %vm7750_vm4  ;;  %vm7754_vm3 = vcmp.eq.f32.partialorder %v7753_v37, 8.507059e+37  ;;  %vm7739_vm4 = vcmp.eq.f32.partialorder %v7738_v11, 8.507059e+37 }
0x1351   :  { %v10657_v63 = vpop.eup %10656  ;;  %v7752_v57 = vsel %vm16707_vm5, %v16648_v56, %v7748_v17  ;;  %vm7736_vm7 = vmor %vm7734_vm13, %vm7735_vm9 }
0x1352   :  { %v7792_v31 = vmul.f32 %v10649_v29, %v7791_v0  ;;  %v7787_v35 = vsel %vm7784_vm1, %v7786_v34, %v7782_v55  ;;  %v7737_v14 = vsel %vm7736_vm7, %v16638_v32, %v7733_v1  ;;  %v7757_v42 = vsel %vm7754_vm3, %v7756_v27, %v7752_v57  ;;  %v10659_v54 = vpop.eup %10658 }
0x1353   :  { %v7827_v61 = vmul.f32 %v10655_v7, %v7787_v35  ;;  %v17492_v35 = vld [vmem:[#allocation7_spill] sm:$0xff] }
0x1354   :  { %v7793_v43 = vadd.f32 %v10649_v29, %v7792_v31 }
0x1356   :  { %v7797_v8 = vsel %vm7796_vm8, %v10649_v29, %v7793_v43  ;;  %v7771_v29 = vor.u32 1.1754944e-38, %v7770_v62  ;;  %v7741_v62 = vor.u32 1.1754944e-38, %v7740_v26 }
0x1357   :  { %v7802_v0 = vsel %vm7799_vm12, %v7801_v20, %v7797_v8  ;;  %v7825_v20 = vmul.f32 %v10651_v36, %v7757_v42 }
0x1358   :  { %v7828_v18 = vmul.f32 %v10657_v63, %v7802_v0  ;;  %v7772_v48 = vsel %vm7769_vm14, %v7771_v29, %v7767_v60  ;;  %v7742_v56 = vsel %vm7739_vm4, %v7741_v62, %v7737_v14  ;;  %v17491_v60 = vld [vmem:[#allocation8_spill] sm:$0xff] }
0x1359   :  { %v7826_v47 = vmul.f32 %v10653_v58, %v7772_v48  ;;  %v7824_v55 = vmul.f32 %v10659_v54, %v7742_v56  ;;  %v17493_v48 = vld [vmem:[#allocation12_spill] sm:$0xff] }
0x135a   :  { %v7831_v51 = vpack.c.bf16 %v7828_v18, %v7828_v18 }
0x135b   :  { %v7830_v63 = vpack.c.bf16 %v7827_v61, %v7826_v47  ;;  %v7829_v17 = vpack.c.bf16 %v7825_v20, %v7824_v55  ;;  %v17494_v47 = vld [vmem:[#allocation6_spill] sm:$0xff] }
0x135c   :  { %v7833_v43 = vsel %vm51_vm6, %v7831_v51, 0 }
0x135d   :  { %7840 = vmatpush.bf16.msrb.mxu3 %v7833_v43 }
0x1361   :  { %7841 = vmatpush.bf16.msrb.mxu3 %v7830_v63 }
0x1365   :  { %7842 = vmatpush.bf16.msrb.mxu3 %v7829_v17 }
0x1368   :  { %9399 = vmatmul.msk.bf16.vlgmr.msrb.gmra.mxu3 %vm4808_vm0, %v16340_v21 }
0x1378   :  { %9400 = vmatmul.msk.bf16.gmra.mxu3 %vm4808_vm0, %v16347_v15 }
0x1388   :  { %9401 = vmatmul.msk.bf16.gmra.mxu3 %vm4808_vm0, %v16354_v28 }
0x1398   :  { %9402 = vmatmul.msk.bf16.gmra.mxu3 %vm4808_vm0, %v16361_v49 }
0x13a8   :  { %9403 = vmatmul.msk.bf16.gmra.mxu3 %vm4808_vm0, %v16368_v9 }
0x13b8   :  { %9404 = vmatmul.msk.bf16.gmra.mxu3 %vm4808_vm0, %v16375_v40 }
0x13c8   :  { %9405 = vmatmul.msk.bf16.gmra.mxu3 %vm4808_vm0, %v16382_v39 }
0x13d8   :  { %9406 = vmatmul.msk.bf16.gmra.mxu3 %vm4808_vm0, %v16389_v45 }
0x13e8   :  { %9407 = vmatmul.msk.bf16.gmra.mxu3 %vm4808_vm0, %v16396_v16 }
0x13eb   :  { %v7844_v21 = vpop.f32.mrf.mxu3 }
0x13ec   :  { %v7898_v40 = vadd.f32 %v7844_v21, %v14034_v30 }
0x13ee   :  { %v9410_v32 = vmul.f32 -1.442695, %v7898_v40  ;;  %v17495_v40 = vld [vmem:[#allocation11_spill] sm:$0xff] }
0x13f0   :  { %10660 = vpow2.f32 %v9410_v32 }
0x13f3   :  { %v7846_v15 = vpop.f32.mrf.mxu3 }
0x13f4   :  { %v7899_v16 = vadd.f32 %v7846_v15, %v14038_v25 }
0x13f6   :  { %v9411_v58 = vmul.f32 -1.442695, %v7899_v16  ;;  %v10661_v7 = vpop.eup %10660 }
0x13f7   :  { %v16748_v30 = vadd.f32 1.0, %v10661_v7 }
0x13f8   :  { %9408 = vmatmul.msk.bf16.gmra.mxu3 %vm4808_vm0, %v16403_v50 }
0x13f9   :  { %vm7943_vm10 = vweird.f32 %v16748_v30 }
0x13fb   :  { %v7849_v28 = vpop.f32.mrf.mxu3 }
0x1403   :  { %v7851_v49 = vpop.f32.mrf.mxu3 }
0x1404   :  { %v7901_v26 = vadd.f32 %v7851_v49, %v17492_v35 }
0x1406   :  { %v9413_v43 = vmul.f32 -1.442695, %v7901_v26 }
0x1408   :  { %9409 = vmatmul.msk.bf16.gmra.mxu3 %vm4808_vm0, %v15372_v13  ;;  %v17490_v13 = vld [vmem:[#allocation10_spill] sm:$0xff] }
0x1409   :  { %v7900_v34 = vadd.f32 %v7849_v28, %v17490_v13 }
0x140b   :  { %v7854_v9 = vpop.f32.mrf.mxu3  ;;  %v9412_v0 = vmul.f32 -1.442695, %v7900_v34 }
0x140c   :  { %v7902_v56 = vadd.f32 %v7854_v9, %v17494_v47 }
0x140e   :  { %v9414_v21 = vmul.f32 -1.442695, %v7902_v56 }
0x1413   :  { %v7856_v39 = vpop.f32.mrf.mxu3 }
0x1414   :  { %v7903_v45 = vadd.f32 %v7856_v39, %v17392_v46 }
0x1416   :  { %v9415_v37 = vmul.f32 -1.442695, %v7903_v45 }
0x1418   :  { %10662 = vpow2.f32 %v9415_v37 }
0x1419   :  { %10664 = vpow2.f32 %v9411_v58 }
0x141b   :  { %v7859_v36 = vpop.f32.mrf.mxu3 }
0x141c   :  { %v7904_v50 = vadd.f32 %v7859_v36, %v17391_v23 }
0x141e   :  { %v9416_v8 = vmul.f32 -1.442695, %v7904_v50  ;;  %v10663_v4 = vpop.eup %10662 }
0x141f   :  { %v16750_v53 = vadd.f32 1.0, %v10663_v4  ;;  %v10665_v1 = vpop.eup %10664 }
0x1420   :  { %10666 = vpow2.f32 %v9416_v8  ;;  %v16755_v29 = vadd.f32 1.0, %v10665_v1  ;;  %v17496_v1 = vld [vmem:[#allocation15_spill] sm:$0xff] }
0x1421   :  { %10668 = vrcp.f32 %v16748_v30  ;;  %vm8038_vm8 = vweird.f32 %v16750_v53 }
0x1422   :  { %10670 = vrcp.f32 %v16750_v53  ;;  %vm7958_vm4 = vweird.f32 %v16755_v29 }
0x1423   :  { %v7861_v46 = vpop.f32.mrf.mxu3  ;;  %10672 = vpow2.f32 %v9412_v0 }
0x1424   :  { %v7905_v25 = vadd.f32 %v7861_v46, %v17491_v60 }
0x1426   :  { %v9417_v23 = vmul.f32 -1.442695, %v7905_v25  ;;  %v10667_v18 = vpop.eup %10666  ;;  %v8044_v25 = vand.u32 2147483648, %v16750_v53 }
0x1427   :  { %v16758_v31 = vadd.f32 1.0, %v10667_v18  ;;  %v16760_v11 = vpop.eup %10668  ;;  %v7949_v18 = vand.u32 2147483648, %v16748_v30 }
0x1428   :  { %10674 = vpow2.f32 %v9417_v23  ;;  %v16762_v51 = vpop.eup %10670  ;;  %v7939_v14 = vmul.f32 %v16760_v11, %v16748_v30  ;;  %vm7944_vm9 = vweird.f32 %v16760_v11  ;;  %v8045_v56 = vor.u32 1.1754944e-38, %v8044_v25 }
0x1429   :  { %10676 = vrcp.f32 %v16755_v29  ;;  %v10673_v61 = vpop.eup %10672  ;;  %v8034_v63 = vmul.f32 %v16762_v51, %v16750_v53  ;;  %vm8039_vm15 = vweird.f32 %v16762_v51  ;;  %vm16809_vm12 = vmor %vm7943_vm10, %vm7944_vm9  ;;  %vm8053_vm7 = vweird.f32 %v16758_v31 }
0x142a   :  { %10678 = vrcp.f32 %v16758_v31  ;;  %v16772_v20 = vadd.f32 1.0, %v10673_v61  ;;  %v7940_v54 = vsub.f32 1.0, %v7939_v14  ;;  %vm16819_vm2 = vmor %vm8038_vm8, %vm8039_vm15 }
0x142b   :  { %v7864_v57 = vpop.f32.mrf.mxu3  ;;  %v8035_v15 = vsub.f32 1.0, %v8034_v63  ;;  %v7950_v63 = vor.u32 1.1754944e-38, %v7949_v18 }
0x142c   :  { %v7906_v27 = vadd.f32 %v7864_v57, %v17493_v48  ;;  %v7941_v37 = vmul.f32 %v16760_v11, %v7940_v54  ;;  %v7947_v57 = vand.u32 2147483647, %v16748_v30  ;;  %v8042_v48 = vand.u32 2147483647, %v16750_v53 }
0x142d   :  { %v8036_v16 = vmul.f32 %v16762_v51, %v8035_v15 }
0x142e   :  { %v9418_v62 = vmul.f32 -1.442695, %v7906_v27  ;;  %v10675_v42 = vpop.eup %10674  ;;  %v7942_v8 = vadd.f32 %v16760_v11, %v7941_v37  ;;  %vm7948_vm1 = vcmp.eq.f32.partialorder %v7947_v57, 8.507059e+37  ;;  %vm8043_vm5 = vcmp.eq.f32.partialorder %v8042_v48, 8.507059e+37 }
0x142f   :  { %v16774_v55 = vadd.f32 1.0, %v10675_v42  ;;  %v16776_v17 = vpop.eup %10676  ;;  %v8037_v0 = vadd.f32 %v16762_v51, %v8036_v16  ;;  %v8059_v37 = vand.u32 2147483648, %v16758_v31 }
0x1430   :  { %10680 = vpow2.f32 %v9418_v62  ;;  %v16778_v49 = vpop.eup %10678  ;;  %v7954_v32 = vmul.f32 %v16776_v17, %v16755_v29  ;;  %vm7959_vm14 = vweird.f32 %v16776_v17 }
0x1431   :  { %10682 = vpow2.f32 %v9413_v43  ;;  %v8049_v36 = vmul.f32 %v16778_v49, %v16758_v31  ;;  %v7946_v43 = vsel %vm16809_vm12, %v16760_v11, %v7942_v8  ;;  %v8041_v42 = vsel %vm16819_vm2, %v16762_v51, %v8037_v0  ;;  %vm16867_vm9 = vmor %vm7958_vm4, %vm7959_vm14 }
0x1432   :  { %10684 = vrcp.f32 %v16772_v20  ;;  %v7955_v7 = vsub.f32 1.0, %v7954_v32  ;;  %v7964_v11 = vand.u32 2147483648, %v16755_v29  ;;  %v8046_v15 = vsel %vm8043_vm5, %v8045_v56, %v8041_v42 }
0x1433   :  { %v7866_v28 = vpop.f32.mrf.mxu3  ;;  %10686 = vrcp.f32 %v16774_v55  ;;  %v8050_v34 = vsub.f32 1.0, %v8049_v36  ;;  %vm8054_vm13 = vweird.f32 %v16778_v49  ;;  %v8057_v8 = vand.u32 2147483647, %v16758_v31 }
0x1434   :  { %v7907_v39 = vadd.f32 %v7866_v28, %v17495_v40  ;;  %10688 = vpow2.f32 %v9414_v21  ;;  %v7956_v62 = vmul.f32 %v16776_v17, %v7955_v7  ;;  %v7951_v21 = vsel %vm7948_vm1, %v7950_v63, %v7946_v43  ;;  %vm16854_vm3 = vmor %vm8053_vm7, %vm8054_vm13 }
0x1435   :  { %v8051_v30 = vmul.f32 %v16778_v49, %v8050_v34  ;;  %vm8058_vm15 = vcmp.eq.f32.partialorder %v8057_v8, 8.507059e+37  ;;  %vm8068_vm2 = vweird.f32 %v16774_v55  ;;  %vm7973_vm5 = vweird.f32 %v16772_v20 }
0x1436   :  { %v10681_v9 = vpop.eup %10680  ;;  %v9419_v45 = vmul.f32 -1.442695, %v7907_v39  ;;  %v7957_v28 = vadd.f32 %v16776_v17, %v7956_v62 }
0x1437   :  { %v10683_v58 = vpop.eup %10682  ;;  %v16789_v50 = vadd.f32 1.0, %v10681_v9  ;;  %v8052_v32 = vadd.f32 %v16778_v49, %v8051_v30  ;;  %v8074_v30 = vand.u32 2147483648, %v16774_v55 }
0x1438   :  { %10690 = vpow2.f32 %v9419_v45  ;;  %v16793_v4 = vpop.eup %10684  ;;  %v16795_v13 = vadd.f32 1.0, %v10683_v58  ;;  %v8208_v58 = vmul.f32 %v8046_v15, %v16529_v10  ;;  %v7977_v15 = vand.u32 2147483647, %v16772_v20 }
0x1439   :  { %v16799_v60 = vpop.eup %10686  ;;  %10692 = vrcp.f32 %v16789_v50  ;;  %v7969_v61 = vmul.f32 %v16793_v4, %v16772_v20  ;;  %v8056_v31 = vsel %vm16854_vm3, %v16778_v49, %v8052_v32  ;;  %vm7974_vm8 = vweird.f32 %v16793_v4 }
0x143a   :  { %v10689_v35 = vpop.eup %10688  ;;  %v8064_v53 = vmul.f32 %v16799_v60, %v16774_v55  ;;  %v7979_v49 = vand.u32 2147483648, %v16772_v20  ;;  %vm8069_vm12 = vweird.f32 %v16799_v60  ;;  %vm7975_vm14 = vmor %vm7973_vm5, %vm7974_vm8  ;;  %vm7978_vm7 = vcmp.eq.f32.partialorder %v7977_v15, 8.507059e+37 }
0x143b   :  { %v7869_v46 = vpop.f32.mrf.mxu3  ;;  %v16834_v47 = vadd.f32 1.0, %v10689_v35  ;;  %v7970_v39 = vsub.f32 1.0, %v7969_v61  ;;  %v7965_v35 = vor.u32 1.1754944e-38, %v7964_v11  ;;  %v8072_v11 = vand.u32 2147483647, %v16774_v55  ;;  %vm16894_vm1 = vmor %vm8068_vm2, %vm8069_vm12 }
0x143c   :  { %v7908_v23 = vadd.f32 %v7869_v46, %v17496_v1  ;;  %v8065_v51 = vsub.f32 1.0, %v8064_v53  ;;  %v7962_v46 = vand.u32 2147483647, %v16755_v29  ;;  %v8060_v1 = vor.u32 1.1754944e-38, %v8059_v37 }
0x143d   :  { %v7971_v18 = vmul.f32 %v16793_v4, %v7970_v39  ;;  %v7980_v32 = vor.u32 1.1754944e-38, %v7979_v49  ;;  %vm8073_vm13 = vcmp.eq.f32.partialorder %v8072_v11, 8.507059e+37  ;;  %v8089_v34 = vand.u32 2147483648, %v16789_v50 }
0x143e   :  { %v10691_v27 = vpop.eup %10690  ;;  %10694 = vtanh.f32 %v7908_v23  ;;  %v7961_v23 = vsel %vm16867_vm9, %v16776_v17, %v7957_v28  ;;  %vm7963_vm10 = vcmp.eq.f32.partialorder %v7962_v46, 8.507059e+37  ;;  %v8061_v57 = vsel %vm8058_vm15, %v8060_v1, %v8056_v31 }
0x143f   :  { %10696 = vrcp.f32 %v16795_v13  ;;  %v16836_v54 = vadd.f32 1.0, %v10691_v27  ;;  %v16841_v40 = vpop.eup %10692  ;;  %v7966_v61 = vsel %vm7963_vm10, %v7965_v35, %v7961_v23  ;;  %v7972_v42 = vadd.f32 %v16793_v4, %v7971_v18 }
0x1440   :  { %10698 = vrcp.f32 %v16834_v47  ;;  %v8079_v0 = vmul.f32 %v16841_v40, %v16789_v50  ;;  %v8209_v56 = vmul.f32 %v8061_v57, %v16569_v41  ;;  %vm8084_vm4 = vweird.f32 %v16841_v40 }
0x1441   :  { %10700 = vrcp.f32 %v16836_v54  ;;  %v7976_v20 = vsel %vm7975_vm14, %v16793_v4, %v7972_v42  ;;  %vm8083_vm9 = vweird.f32 %v16789_v50  ;;  %v8087_v10 = vand.u32 2147483647, %v16789_v50 }
0x1442   :  { %v8080_v27 = vsub.f32 1.0, %v8079_v0  ;;  %vm8085_vm15 = vmor %vm8083_vm9, %vm8084_vm4  ;;  %vm7988_vm10 = vweird.f32 %v16795_v13  ;;  %v7994_v31 = vand.u32 2147483648, %v16795_v13  ;;  %v8090_v18 = vor.u32 1.1754944e-38, %v8089_v34 }
0x1443   :  { %v7871_v9 = vpop.f32.mrf.mxu3  ;;  %vm8088_vm12 = vcmp.eq.f32.partialorder %v8087_v10, 8.507059e+37  ;;  %vm8098_vm14 = vweird.f32 %v16836_v54  ;;  %v8007_v42 = vand.u32 2147483647, %v16834_v47 }
0x1444   :  { %v10695_v45 = vpop.eup %10694  ;;  %v7909_v16 = vadd.f32 %v7871_v9, %v17330_v3  ;;  %v8066_v3 = vmul.f32 %v16799_v60, %v8065_v51  ;;  %v8075_v51 = vor.u32 1.1754944e-38, %v8074_v30  ;;  %v7995_v35 = vor.u32 1.1754944e-38, %v7994_v31 }
0x1445   :  { %v16849_v36 = vpop.eup %10696  ;;  %v8213_v7 = vmul.f32 %v10695_v45, %v7951_v21  ;;  %v8009_v30 = vand.u32 2147483648, %v16834_v47  ;;  %vm8008_vm9 = vcmp.eq.f32.partialorder %v8007_v42, 8.507059e+37 }
0x1446   :  { %10702 = vtanh.f32 %v7909_v16  ;;  %v7984_v29 = vmul.f32 %v16849_v36, %v16795_v13  ;;  %v16880_v26 = vpop.eup %10698  ;;  %v8067_v17 = vadd.f32 %v16799_v60, %v8066_v3  ;;  %vm7989_vm3 = vweird.f32 %v16849_v36 }
0x1447   :  { %v16863_v25 = vadd.f32 %v8213_v7, %v8208_v58  ;;  %v16884_v48 = vpop.eup %10700  ;;  %v7999_v55 = vmul.f32 %v16880_v26, %v16834_v47  ;;  %v7981_v16 = vsel %vm7978_vm7, %v7980_v32, %v7976_v20  ;;  %vm7990_vm8 = vmor %vm7988_vm10, %vm7989_vm3  ;;  %vm8004_vm5 = vweird.f32 %v16880_v26 }
0x1448   :  { %v7985_v62 = vsub.f32 1.0, %v7984_v29  ;;  %v8094_v28 = vmul.f32 %v16884_v48, %v16836_v54  ;;  %v8071_v41 = vsel %vm16894_vm1, %v16799_v60, %v8067_v17  ;;  %vm8099_vm2 = vweird.f32 %v16884_v48 }
0x1449   :  { %v8076_v45 = vsel %vm8073_vm13, %v8075_v51, %v8071_v41  ;;  %v8000_v8 = vsub.f32 1.0, %v7999_v55  ;;  %vm8100_vm13 = vmor %vm8098_vm14, %vm8099_vm2  ;;  %vm8003_vm7 = vweird.f32 %v16834_v47 }
0x144a   :  { %v7986_v9 = vmul.f32 %v16849_v36, %v7985_v62  ;;  %v8095_v37 = vsub.f32 1.0, %v8094_v28  ;;  %v8210_v3 = vmul.f32 %v8076_v45, %v16592_v52  ;;  %v8102_v62 = vand.u32 2147483647, %v16836_v54  ;;  %vm8005_vm3 = vmor %vm8003_vm7, %vm8004_vm5 }
0x144b   :  { %v7874_v14 = vpop.f32.mrf.mxu3  ;;  %v8001_v52 = vmul.f32 %v16880_v26, %v8000_v8 }
0x144c   :  { %v10703_v43 = vpop.eup %10702  ;;  %v7910_v53 = vadd.f32 %v7874_v14, %v17389_v5  ;;  %v8081_v5 = vmul.f32 %v16841_v40, %v8080_v27  ;;  %v7987_v46 = vadd.f32 %v16849_v36, %v7986_v9  ;;  %v8096_v29 = vmul.f32 %v16884_v48, %v8095_v37 }
0x144d   :  { %v8214_v63 = vmul.f32 %v10703_v43, %v7966_v61  ;;  %v8104_v27 = vand.u32 2147483648, %v16836_v54  ;;  %v8002_v17 = vadd.f32 %v16880_v26, %v8001_v52  ;;  %vm8103_vm4 = vcmp.eq.f32.partialorder %v8102_v62, 8.507059e+37 }
0x144e   :  { %10704 = vtanh.f32 %v7910_v53  ;;  %v8082_v60 = vadd.f32 %v16841_v40, %v8081_v5  ;;  %v7991_v50 = vsel %vm7990_vm8, %v16849_v36, %v7987_v46  ;;  %v8010_v54 = vor.u32 1.1754944e-38, %v8009_v30 }
0x144f   :  { %v16903_v39 = vadd.f32 %v8214_v63, %v8209_v56  ;;  %v8105_v56 = vor.u32 1.1754944e-38, %v8104_v27 }
0x1450   :  { %v8086_v23 = vsel %vm8085_vm15, %v16841_v40, %v8082_v60 }
0x1451   :  { %v8091_v57 = vsel %vm8088_vm12, %v8090_v18, %v8086_v23 }
0x1452   :  { %v8211_v36 = vmul.f32 %v8091_v57, %v16610_v38  ;;  %v8006_v38 = vsel %vm8005_vm3, %v16880_v26, %v8002_v17 }
0x1453   :  { %v7876_v58 = vpop.f32.mrf.mxu3  ;;  %v8011_v15 = vsel %vm8008_vm9, %v8010_v54, %v8006_v38 }
0x1454   :  { %v10705_v7 = vpop.eup %10704  ;;  %v7911_v4 = vadd.f32 %v7876_v58, %v17331_v6  ;;  %v7992_v6 = vand.u32 2147483647, %v16795_v13  ;;  %v8097_v13 = vadd.f32 %v16884_v48, %v8096_v29 }
0x1455   :  { %v8215_v0 = vmul.f32 %v10705_v7, %v7981_v16 }
0x1456   :  { %10706 = vtanh.f32 %v7911_v4  ;;  %vm7993_vm1 = vcmp.eq.f32.partialorder %v7992_v6, 8.507059e+37 }
0x1457   :  { %v16926_v1 = vadd.f32 %v8215_v0, %v8210_v3  ;;  %v7996_v61 = vsel %vm7993_vm1, %v7995_v35, %v7991_v50 }
0x145b   :  { %v7879_v49 = vpop.f32.mrf.mxu3 }
0x145c   :  { %v10707_v40 = vpop.eup %10706  ;;  %v7912_v14 = vadd.f32 %v7879_v49, %v17408_v22  ;;  %v8101_v22 = vsel %vm8100_vm13, %v16884_v48, %v8097_v13 }
0x145d   :  { %v8216_v43 = vmul.f32 %v10707_v40, %v7996_v61  ;;  %v8106_v63 = vsel %vm8103_vm4, %v8105_v56, %v8101_v22 }
0x145e   :  { %10708 = vtanh.f32 %v7912_v14  ;;  %v8212_v28 = vmul.f32 %v8106_v63, %v16619_v12 }
0x145f   :  { %v16944_v53 = vadd.f32 %v8216_v43, %v8211_v36 }
0x1463   :  { %v7881_v11 = vpop.f32.mrf.mxu3 }
0x1464   :  { %v10709_v21 = vpop.eup %10708  ;;  %v7913_v5 = vadd.f32 %v7881_v11, %v17440_v19 }
0x1465   :  { %v8217_v47 = vmul.f32 %v10709_v21, %v8011_v15 }
0x1466   :  { %v9420_v41 = vmul.f32 -1.442695, %v7913_v5 }
0x1467   :  { %v16954_v48 = vadd.f32 %v8217_v47, %v8212_v28 }
0x1468   :  { %10710 = vpow2.f32 %v9420_v41 }
0x146b   :  { %v7884_v55 = vpop.f32.mrf.mxu3 }
0x146c   :  { %v7914_v51 = vadd.f32 %v7884_v55, %v17464_v33 }
0x146e   :  { %v10711_v26 = vpop.eup %10710  ;;  %v9421_v20 = vmul.f32 -1.442695, %v7914_v51 }
0x146f   :  { %v8128_v9 = vadd.f32 1.0, %v10711_v26 }
0x1470   :  { %10712 = vpow2.f32 %v9421_v20 }
0x1471   :  { %10714 = vrcp.f32 %v8128_v9  ;;  %v8144_v31 = vand.u32 2147483648, %v8128_v9  ;;  %vm8138_vm10 = vweird.f32 %v8128_v9  ;;  %v8142_v6 = vand.u32 2147483647, %v8128_v9 }
0x1473   :  { %v7886_v32 = vpop.f32.mrf.mxu3  ;;  %v8145_v49 = vor.u32 1.1754944e-38, %v8144_v31  ;;  %vm8143_vm1 = vcmp.eq.f32.partialorder %v8142_v6, 8.507059e+37 }
0x1474   :  { %v7915_v45 = vadd.f32 %v7886_v32, %v17441_v59 }
0x1476   :  { %v10713_v37 = vpop.eup %10712  ;;  %v9422_v19 = vmul.f32 -1.442695, %v7915_v45 }
0x1477   :  { %v10715_v16 = vpop.eup %10714  ;;  %v8129_v12 = vadd.f32 1.0, %v10713_v37 }
0x1478   :  { %v8134_v58 = vmul.f32 %v10715_v16, %v8128_v9  ;;  %10716 = vpow2.f32 %v9422_v19  ;;  %vm8139_vm15 = vweird.f32 %v10715_v16 }
0x1479   :  { %10718 = vrcp.f32 %v8129_v12  ;;  %vm16965_vm8 = vmor %vm8138_vm10, %vm8139_vm15  ;;  %v8157_v35 = vand.u32 2147483647, %v8129_v12  ;;  %vm8153_vm2 = vweird.f32 %v8129_v12 }
0x147a   :  { %v8135_v60 = vsub.f32 1.0, %v8134_v58 }
0x147b   :  { %v7889_v7 = vpop.f32.mrf.mxu3  ;;  %vm8158_vm14 = vcmp.eq.f32.partialorder %v8157_v35, 8.507059e+37  ;;  %v17510_v35 = vld [vmem:[#allocation5_spill] sm:$0xff] }
0x147c   :  { %v7916_v8 = vadd.f32 %v7889_v7, %v17465_v2  ;;  %v8136_v33 = vmul.f32 %v10715_v16, %v8135_v60  ;;  %v8159_v2 = vand.u32 2147483648, %v8129_v12 }
0x147e   :  { %v10717_v34 = vpop.eup %10716  ;;  %v9423_v4 = vmul.f32 -1.442695, %v7916_v8  ;;  %v8137_v59 = vadd.f32 %v10715_v16, %v8136_v33 }
0x147f   :  { %v10719_v46 = vpop.eup %10718  ;;  %v16959_v3 = vadd.f32 1.0, %v10717_v34 }
0x1480   :  { %v8149_v0 = vmul.f32 %v10719_v46, %v8129_v12  ;;  %10720 = vpow2.f32 %v9423_v4  ;;  %vm8154_vm12 = vweird.f32 %v10719_v46  ;;  %v8141_v50 = vsel %vm16965_vm8, %v10715_v16, %v8137_v59 }
0x1481   :  { %10722 = vrcp.f32 %v16959_v3  ;;  %vm8155_vm5 = vmor %vm8153_vm2, %vm8154_vm12  ;;  %v8146_v61 = vsel %vm8143_vm1, %v8145_v49, %v8141_v50  ;;  %v8174_v47 = vand.u32 2147483648, %v16959_v3  ;;  %vm8168_vm7 = vweird.f32 %v16959_v3 }
0x1482   :  { %v8150_v10 = vsub.f32 1.0, %v8149_v0  ;;  %10724 = vtanh.f32 %v16863_v25  ;;  %v8172_v55 = vand.u32 2147483647, %v16959_v3 }
0x1483   :  { %v7891_v29 = vpop.f32.mrf.mxu3  ;;  %10726 = vtanh.f32 %v16903_v39  ;;  %v8175_v32 = vor.u32 1.1754944e-38, %v8174_v47 }
0x1484   :  { %v7917_v23 = vadd.f32 %v7891_v29, %v17466_v24  ;;  %v8151_v52 = vmul.f32 %v10719_v46, %v8150_v10  ;;  %v8160_v24 = vor.u32 1.1754944e-38, %v8159_v2  ;;  %vm8173_vm4 = vcmp.eq.f32.partialorder %v8172_v55, 8.507059e+37 }
0x1486   :  { %v10721_v57 = vpop.eup %10720  ;;  %v9424_v25 = vmul.f32 -1.442695, %v7917_v23  ;;  %v8152_v13 = vadd.f32 %v10719_v46, %v8151_v52 }
0x1487   :  { %v10723_v40 = vpop.eup %10722  ;;  %v8131_v27 = vadd.f32 1.0, %v10721_v57 }
0x1488   :  { %v8164_v39 = vmul.f32 %v10723_v40, %v16959_v3  ;;  %10728 = vpow2.f32 %v9424_v25  ;;  %v8156_v14 = vsel %vm8155_vm5, %v10719_v46, %v8152_v13  ;;  %v10725_v17 = vpop.eup %10724  ;;  %vm8169_vm13 = vweird.f32 %v10723_v40 }
0x1489   :  { %10730 = vrcp.f32 %v8131_v27  ;;  %v10727_v36 = vpop.eup %10726  ;;  %v8161_v62 = vsel %vm8158_vm14, %v8160_v24, %v8156_v14  ;;  %v16972_v42 = vmul.f32 %v10725_v17, %v8146_v61  ;;  %vm8170_vm3 = vmor %vm8168_vm7, %vm8169_vm13  ;;  %v8187_v9 = vand.u32 2147483647, %v8131_v27 }
0x148a   :  { %v8165_v43 = vsub.f32 1.0, %v8164_v39  ;;  %v8229_v22 = vmul.f32 %v10727_v36, %v8161_v62  ;;  %vm8183_vm9 = vweird.f32 %v8131_v27  ;;  %vm17509_vm5 = vcmask 1046528  }
0x148b   :  { %v7894_v30 = vpop.f32.mrf.mxu3  ;;  %vm8188_vm10 = vcmp.eq.f32.partialorder %v8187_v9, 8.507059e+37 }
0x148c   :  { %v8272_v56 = vrot.slane %v7894_v30, 2  ;;  %v8166_v38 = vmul.f32 %v10723_v40, %v8165_v43  ;;  %v8234_v54 = vpack.c.bf16 %v8229_v22, %v16972_v42 }
0x148e   :  { %v10729_v63 = vpop.eup %10728  ;;  %v16977_v11 = vsel %vm4584_vm11, %v16644_v44, %v8272_v56  ;;  %v8167_v28 = vadd.f32 %v10723_v40, %v8166_v38  ;;  %v8189_v44 = vand.u32 2147483648, %v8131_v27 }
0x148f   :  { %v10731_v21 = vpop.eup %10730  ;;  %v8132_v15 = vadd.f32 1.0, %v10729_v63 }
0x1490   :  { %v8179_v5 = vmul.f32 %v10731_v21, %v8131_v27  ;;  %v8171_v26 = vsel %vm8170_vm3, %v10723_v40, %v8167_v28  ;;  %vm8184_vm11 = vweird.f32 %v10731_v21  ;;  %v8190_v19 = vor.u32 1.1754944e-38, %v8189_v44 }
0x1491   :  { %10732 = vrcp.f32 %v8132_v15  ;;  %vm8185_vm15 = vmor %vm8183_vm9, %vm8184_vm11  ;;  %v8204_v34 = vand.u32 2147483648, %v8132_v15  ;;  %v8202_v46 = vand.u32 2147483647, %v8132_v15  ;;  %vm8198_vm12 = vweird.f32 %v8132_v15 }
0x1492   :  { %10734 = vtanh.f32 %v16926_v1  ;;  %v8180_v41 = vsub.f32 1.0, %v8179_v5  ;;  %v8176_v1 = vsel %vm8173_vm4, %v8175_v32, %v8171_v26 }
0x1493   :  { %10736 = vtanh.f32 %v16944_v53  ;;  %v7896_v51 = vpop.f32.mrf.mxu3  ;;  %v8205_v59 = vor.u32 1.1754944e-38, %v8204_v34  ;;  %vm8203_vm1 = vcmp.eq.f32.partialorder %v8202_v46, 8.507059e+37 }
0x1494   :  { %v8181_v20 = vmul.f32 %v10731_v21, %v8180_v41  ;;  %10738 = vtanh.f32 %v16954_v48  ;;  %v8233_v48 = vld [vmem:[%s17007_s9] sm:$0x1] }
0x1496   :  { %v8182_v45 = vadd.f32 %v10731_v21, %v8181_v20 }
0x1497   :  { %v10733_v37 = vpop.eup %10732 }
0x1498   :  { %v10735_v16 = vpop.eup %10734  ;;  %v8194_v12 = vmul.f32 %v10733_v37, %v8132_v15  ;;  %v8186_v58 = vsel %vm8185_vm15, %v10731_v21, %v8182_v45  ;;  %vm8199_vm8 = vweird.f32 %v10733_v37 }
0x1499   :  { %v10737_v53 = vpop.eup %10736  ;;  %v8191_v60 = vsel %vm8188_vm10, %v8190_v19, %v8186_v58  ;;  %v8230_v8 = vmul.f32 %v10735_v16, %v8176_v1  ;;  %vm8200_vm2 = vmor %vm8198_vm12, %vm8199_vm8 }
0x149a   :  { %v8195_v7 = vsub.f32 1.0, %v8194_v12  ;;  %v8231_v33 = vmul.f32 %v10737_v53, %v8191_v60  ;;  %v10739_v31 = vpop.eup %10738 }
0x149c   :  { %v8196_v4 = vmul.f32 %v10733_v37, %v8195_v7  ;;  %v8235_v3 = vpack.c.bf16 %v8231_v33, %v8230_v8 }
0x149e   :  { %v8197_v0 = vadd.f32 %v10733_v37, %v8196_v4 }
0x14a0   :  { %v8201_v10 = vsel %vm8200_vm2, %v10733_v37, %v8197_v0 }
0x14a1   :  { %v8206_v29 = vsel %vm8203_vm1, %v8205_v59, %v8201_v10 }
0x14a2   :  { %v8232_v6 = vmul.f32 %v10739_v31, %v8206_v29 }
0x14a4   :  { %v8236_v2 = vpack.c.bf16 %v8232_v6, %v8232_v6 }
0x14a6   :  { %v8241_v23 = vsel %vm51_vm6, %v8236_v2, 0 }
0x14a7   :  { %8248 = vmatpush.bf16.msra.mxu1 %v8241_v23 }
0x14ab   :  { %8249 = vmatpush.bf16.msra.mxu1 %v8235_v3 }
0x14af   :  { %8250 = vmatpush.bf16.msra.mxu1 %v8234_v54 }
0x14b2   :  { %9425 = vmatmul.msk.bf16.vlgmr.msra.gmra.mxu1 %vm4808_vm0, %v8233_v48 }
0x152f   :  { %v8252_v18 = vpop.f32.mrf.mxu1 }
0x1530   :  { %v8275_v52 = vrot.slane %v8252_v18, 1 }
0x1532   :  { %v8283_v50 = vsel %vm17509_vm5, %v16977_v11, %v8275_v52 }
0x1533   :  { %v8290_v57 = vadd.f32 %v17510_v35, %v8283_v50 }
0x1535   :  { %v9426_v25 = vmul.f32 -1.442695, %v8290_v57 }
0x1537   :  { %10740 = vpow2.f32 %v9426_v25  ;;  %v8254_v49 = vpop.f32.mrf.mxu1 }
0x153d   :  { %v10741_v13 = vpop.eup %10740 }
0x153e   :  { %v8294_v40 = vadd.f32 1.0, %v10741_v13 }
0x1540   :  { %10742 = vrcp.f32 %v8294_v40  ;;  %v8306_v61 = vand.u32 2147483648, %v8294_v40  ;;  %v8304_v17 = vand.u32 2147483647, %v8294_v40  ;;  %vm8300_vm0 = vweird.f32 %v8294_v40 }
0x1542   :  { %v8307_v43 = vor.u32 1.1754944e-38, %v8306_v61  ;;  %vm8305_vm13 = vcmp.eq.f32.partialorder %v8304_v17, 8.507059e+37 }
0x1546   :  { %v10743_v27 = vpop.eup %10742 }
0x1547   :  { %v8296_v24 = vmul.f32 %v10743_v27, %v8294_v40  ;;  %vm8301_vm6 = vweird.f32 %v10743_v27 }
0x1548   :  { %vm8302_vm14 = vmor %vm8300_vm0, %vm8301_vm6 }
0x1549   :  { %v8297_v39 = vsub.f32 1.0, %v8296_v24 }
0x154b   :  { %v8298_v14 = vmul.f32 %v10743_v27, %v8297_v39 }
0x154d   :  { %v8299_v36 = vadd.f32 %v10743_v27, %v8298_v14 }
0x154f   :  { %v8303_v62 = vsel %vm8302_vm14, %v10743_v27, %v8299_v36 }
0x1550   :  { %v8308_v30 = vsel %vm8305_vm13, %v8307_v43, %v8303_v62 }
0x1551   :  { %v8310_v42 = vrot.slane %v8308_v30, 4 }
0x1553   :  { %v8311_v22 = vmax.f32 %v8308_v30, %v8310_v42 }
0x1555   :  { %v8312_v56 = vrot.slane %v8311_v22, 2 }
0x1557   :  { %v8313_v38 = vmax.f32 %v8311_v22, %v8312_v56 }
0x1559   :  { %v8314_v54 = vrot.slane %v8313_v38, 1 }
0x155b   :  { %v8315_v63 = vmax.f32 %v8313_v38, %v8314_v54 }
0x155d   :  { %v8316_v11 = vsub.f32 %v8308_v30, %v8315_v63 }
0x155f   :  { %v8317_v21 = vmul.f32 1.442695, %v8316_v11 }
0x1561   :  { %10744 = vpow2.f32 %v8317_v21 }
0x1567   :  { %v10745_v15 = vpop.eup %10744 }
0x1568   :  { %v8319_v5 = vrot.slane %v10745_v15, 4 }
0x156a   :  { %v8320_v28 = vadd.f32 %v10745_v15, %v8319_v5 }
0x156c   :  { %v8321_v47 = vrot.slane %v8320_v28, 2 }
0x156e   :  { %v8322_v41 = vadd.f32 %v8321_v47, %v8320_v28 }
0x1570   :  { %v8323_v55 = vrot.slane %v8322_v41, 1 }
0x1572   :  { %v8324_v44 = vadd.f32 %v8323_v55, %v8322_v41 }
0x1574   :  { %10746 = vrcp.f32 %v8324_v44  ;;  %v8336_v9 = vand.u32 2147483648, %v8324_v44  ;;  %v8334_v45 = vand.u32 2147483647, %v8324_v44  ;;  %vm8330_vm3 = vweird.f32 %v8324_v44 }
0x1576   :  { %v8337_v1 = vor.u32 1.1754944e-38, %v8336_v9  ;;  %vm8335_vm4 = vcmp.eq.f32.partialorder %v8334_v45, 8.507059e+37 }
0x157a   :  { %v10747_v51 = vpop.eup %10746 }
0x157b   :  { %v8326_v26 = vmul.f32 %v10747_v51, %v8324_v44  ;;  %vm8331_vm7 = vweird.f32 %v10747_v51 }
0x157c   :  { %vm8332_vm11 = vmor %vm8330_vm3, %vm8331_vm7 }
0x157d   :  { %v8327_v20 = vsub.f32 1.0, %v8326_v26 }
0x157f   :  { %v8328_v32 = vmul.f32 %v10747_v51, %v8327_v20 }
0x1581   :  { %v8329_v37 = vadd.f32 %v10747_v51, %v8328_v32 }
0x1583   :  { %v8333_v19 = vsel %vm8332_vm11, %v10747_v51, %v8329_v37 }
0x1584   :  { %v8338_v16 = vsel %vm8335_vm4, %v8337_v1, %v8333_v19 }
0x1585   :  { %v8339_v12 = vmul.f32 %v10745_v15, %v8338_v16 }
0x1587   :  { %8340 = vst [vmem:[%s17008_s12] sm:$0xff] %v8339_v12 }

</bundles_post_ra>
